<compile_context>
chip_gen: v5e
topology: v5e:2x2
jax: 0.10.0
libtpu: 0.0.40
codegen_flags: <defaults>
</compile_context>

<pallas_src>
import functools

import jax
import jax.numpy as jnp
from jax.experimental import pallas as pl
from jax.experimental.pallas import tpu as pltpu

IN_DIM = 784
HID = 400
LATENT = 20


# ----------------------------- Pallas kernel --------------------------------

def vae_kernel(x_ref, eps_ref,
               w1_ref, b1_ref, w11_ref, b11_ref, w12_ref, b12_ref,
               wmlv_ref, bmlv_ref,
               w3_ref, b3_ref, w31_ref, b31_ref, w32_ref, b32_ref,
               w4_ref, b4_ref,
               recon_ref, mu_ref, logvar_ref):
    f32 = jnp.float32
    bf16 = jnp.bfloat16

    def linear(h, w_ref, b_ref):
        # bf16 x bf16 on the MXU, f32 accumulation; bias add in f32.
        return jnp.dot(h.astype(bf16), w_ref[...],
                       preferred_element_type=f32) + b_ref[...]

    def relu(v):
        return jnp.maximum(v, 0.0)

    x = x_ref[...]

    # ---- encode ----
    h1 = relu(linear(x, w1_ref, b1_ref))          # fc1  + relu
    h2 = relu(linear(h1, w11_ref, b11_ref))       # fc11 + relu
    h3 = relu(linear(h2, w12_ref, b12_ref))       # fc12 + relu
    mulv = linear(h3, wmlv_ref, bmlv_ref)         # fused fc21 || fc22
    mu = mulv[:, :LATENT]
    logvar = mulv[:, LATENT:]

    # ---- reparametrize ----
    z = eps_ref[...] * jnp.exp(0.5 * logvar) + mu

    # ---- decode ----
    d3 = relu(linear(z, w3_ref, b3_ref))          # fc3  + relu
    d4 = relu(linear(d3, w31_ref, b31_ref))       # fc31 + relu
    d5 = relu(linear(d4, w32_ref, b32_ref))       # fc32 + relu
    logits = linear(d5, w4_ref, b4_ref)           # fc4
    recon = jax.nn.sigmoid(logits)                # numerically safe sigmoid

    recon_ref[...] = recon
    mu_ref[...] = mu
    logvar_ref[...] = logvar


# ------------------------------- Wrapper -------------------------------------

def vae_forward(x, eps, params, *, tile_b=256):
    """Forward pass of the VAE.

    params: flat list [w1, b1, w11, b11, w12, b12, w21, b21, w22, b22,
                       w3, b3, w31, b31, w32, b32, w4, b4]
            with each W stored as (in_features, out_features) and b as (1, out).
    """
    (w1, b1, w11, b11, w12, b12, w21, b21, w22, b22,
     w3, b3, w31, b31, w32, b32, w4, b4) = params

    # Fuse the two latent heads into a single (400, 40) matmul.
    wmlv = jnp.concatenate([w21, w22], axis=1)
    bmlv = jnp.concatenate([b21, b22], axis=1)

    weight_mats = [w1, w11, w12, wmlv, w3, w31, w32, w4]
    biases = [b1, b11, b12, bmlv, b3, b31, b32, b4]
    # bf16 weights (halved DMA traffic, native bf16 MXU); biases stay f32.
    weight_mats = [w.astype(jnp.bfloat16) for w in weight_mats]

    # Interleave back into kernel argument order.
    w_args = []
    for w, b in zip(weight_mats, biases):
        w_args += [w, b.astype(jnp.float32)]

    B = x.shape[0]
    # Don't over-pad tiny batches; otherwise use a big MXU-filling tile.
    tile_b = int(min(tile_b, max(8, ((B + 7) // 8) * 8)))
    n_tiles = pl.cdiv(B, tile_b)
    Bp = n_tiles * tile_b
    if Bp != B:
        x = jnp.pad(x, ((0, Bp - B), (0, 0)))
        eps = jnp.pad(eps, ((0, Bp - B), (0, 0)))

    def act_spec(d):
        return pl.BlockSpec((tile_b, d), lambda i: (i, 0))

    def const_spec(a):
        # Full-array block, constant index -> stays resident in VMEM.
        return pl.BlockSpec(a.shape, lambda i: (0, 0))

    in_specs = [act_spec(IN_DIM), act_spec(LATENT)] + [const_spec(a) for a in w_args]
    out_specs = (act_spec(IN_DIM), act_spec(LATENT), act_spec(LATENT))
    out_shape = (
        jax.ShapeDtypeStruct((Bp, IN_DIM), jnp.float32),   # recon
        jax.ShapeDtypeStruct((Bp, LATENT), jnp.float32),   # mu
        jax.ShapeDtypeStruct((Bp, LATENT), jnp.float32),   # logvar
    )

    recon, mu, logvar = pl.pallas_call(
        vae_kernel,
        out_shape=out_shape,
        grid=(n_tiles,),
        in_specs=in_specs,
        out_specs=out_specs,
        compiler_params=pltpu.CompilerParams(
            dimension_semantics=("parallel",),
            vmem_limit_bytes=32 << 20,
        ),
    )(x, eps, *w_args)

    if Bp != B:
        recon, mu, logvar = recon[:B], mu[:B], logvar[:B]
    return recon, mu, logvar


# ------------------------- Deterministic param init --------------------------

def init_params(key):
    layer_dims = [  # (in, out) per Linear, stored as (in, out) for x @ W
        (IN_DIM, HID),   # fc1
        (HID, HID),      # fc11
        (HID, HID),      # fc12
        (HID, LATENT),   # fc21
        (HID, LATENT),   # fc22
        (LATENT, HID),   # fc3
        (HID, HID),      # fc31
        (HID, HID),      # fc32
        (HID, IN_DIM),   # fc4
    ]
    params = []
    for i, (din, dout) in enumerate(layer_dims):
        kw, kb = jax.random.split(jax.random.fold_in(key, i))
        scale = 1.0 / jnp.sqrt(jnp.float32(din))
        w = jax.random.uniform(kw, (din, dout), jnp.float32, -scale, scale)
        b = jax.random.uniform(kb, (1, dout), jnp.float32, -scale, scale)
        params += [w, b]
    return params


# ----------------------------- Pure-JAX reference ----------------------------

def vae_reference(x, eps, params):
    (w1, b1, w11, b11, w12, b12, w21, b21, w22, b22,
     w3, b3, w31, b31, w32, b32, w4, b4) = params
    relu = lambda v: jnp.maximum(v, 0.0)
    h1 = relu(x @ w1 + b1)
    h2 = relu(h1 @ w11 + b11)
    h3 = relu(h2 @ w12 + b12)
    mu = h3 @ w21 + b21
    logvar = h3 @ w22 + b22
    z = eps * jnp.exp(0.5 * logvar) + mu
    d3 = relu(z @ w3 + b3)
    d4 = relu(d3 @ w31 + b31)
    d5 = relu(d4 @ w32 + b32)
    recon = jax.nn.sigmoid(d5 @ w4 + b4)
    return recon, mu, logvar


# ---------------------------------- Main --------------------------------------

if __name__ == "__main__":
    key = jax.random.PRNGKey(0)
    k_x, k_eps, k_p = jax.random.split(key, 3)
    params = init_params(k_p)

    def check(B, tile_b):
        x = jax.random.uniform(jax.random.fold_in(k_x, B), (B, IN_DIM), jnp.float32)
        eps = jax.random.normal(jax.random.fold_in(k_eps, B), (B, LATENT), jnp.float32)
        recon, mu, logvar = vae_forward(x, eps, params, tile_b=tile_b)
        jax.block_until_ready((recon, mu, logvar))
        r_ref, mu_ref, lv_ref = vae_reference(x, eps, params)
        assert recon.shape == (B, IN_DIM)
        assert mu.shape == (B, LATENT) and logvar.shape == (B, LATENT)
        # bf16 weights/matmul inputs vs f32 reference -> loose-but-tight-enough tol.
        assert jnp.allclose(recon, r_ref, atol=3e-2, rtol=3e-2)
        assert jnp.allclose(mu, mu_ref, atol=3e-2, rtol=3e-2)
        assert jnp.allclose(logvar, lv_ref, atol=3e-2, rtol=3e-2)

    # Small batch (single tile) and a larger batch exercising the grid + padding.
    check(B=8, tile_b=256)
    check(B=200, tile_b=64)

    print("KERNEL_OK")
</pallas_src>

<mosaic_0001>
module attributes {stable_mosaic.version = 11 : i64} {
  func.func @vae_kernel(%arg0: i32, %arg1: memref<8x784xf32, #tpu.memory_space<vmem>>, %arg2: memref<8x20xf32, #tpu.memory_space<vmem>>, %arg3: memref<784x400xbf16, #tpu.memory_space<vmem>>, %arg4: memref<1x400xf32, #tpu.memory_space<vmem>>, %arg5: memref<400x400xbf16, #tpu.memory_space<vmem>>, %arg6: memref<1x400xf32, #tpu.memory_space<vmem>>, %arg7: memref<400x400xbf16, #tpu.memory_space<vmem>>, %arg8: memref<1x400xf32, #tpu.memory_space<vmem>>, %arg9: memref<400x40xbf16, #tpu.memory_space<vmem>>, %arg10: memref<1x40xf32, #tpu.memory_space<vmem>>, %arg11: memref<20x400xbf16, #tpu.memory_space<vmem>>, %arg12: memref<1x400xf32, #tpu.memory_space<vmem>>, %arg13: memref<400x400xbf16, #tpu.memory_space<vmem>>, %arg14: memref<1x400xf32, #tpu.memory_space<vmem>>, %arg15: memref<400x400xbf16, #tpu.memory_space<vmem>>, %arg16: memref<1x400xf32, #tpu.memory_space<vmem>>, %arg17: memref<400x784xbf16, #tpu.memory_space<vmem>>, %arg18: memref<1x784xf32, #tpu.memory_space<vmem>>, %arg19: memref<8x784xf32, #tpu.memory_space<vmem>>, %arg20: memref<8x20xf32, #tpu.memory_space<vmem>>, %arg21: memref<8x20xf32, #tpu.memory_space<vmem>>) attributes {dimension_semantics = [#tpu.dimension_semantics<parallel>], iteration_bounds = array<i64: 1>, scalar_prefetch = 0 : i64, scratch_operands = 0 : i64, tpu.core_type = #tpu.core_type<tc>, window_params = [{transform_indices = @transform_0, window_bounds = array<i64: 8, 784>}, {transform_indices = @transform_1, window_bounds = array<i64: 8, 20>}, {pipeline_mode = #tpu.pipeline_mode<synchronous>, transform_indices = @transform_2, window_bounds = array<i64: 784, 400>}, {pipeline_mode = #tpu.pipeline_mode<synchronous>, transform_indices = @transform_3, window_bounds = array<i64: 1, 400>}, {pipeline_mode = #tpu.pipeline_mode<synchronous>, transform_indices = @transform_4, window_bounds = array<i64: 400, 400>}, {pipeline_mode = #tpu.pipeline_mode<synchronous>, transform_indices = @transform_5, window_bounds = array<i64: 1, 400>}, {pipeline_mode = #tpu.pipeline_mode<synchronous>, transform_indices = @transform_6, window_bounds = array<i64: 400, 400>}, {pipeline_mode = #tpu.pipeline_mode<synchronous>, transform_indices = @transform_7, window_bounds = array<i64: 1, 400>}, {pipeline_mode = #tpu.pipeline_mode<synchronous>, transform_indices = @transform_8, window_bounds = array<i64: 400, 40>}, {pipeline_mode = #tpu.pipeline_mode<synchronous>, transform_indices = @transform_9, window_bounds = array<i64: 1, 40>}, {pipeline_mode = #tpu.pipeline_mode<synchronous>, transform_indices = @transform_10, window_bounds = array<i64: 20, 400>}, {pipeline_mode = #tpu.pipeline_mode<synchronous>, transform_indices = @transform_11, window_bounds = array<i64: 1, 400>}, {pipeline_mode = #tpu.pipeline_mode<synchronous>, transform_indices = @transform_12, window_bounds = array<i64: 400, 400>}, {pipeline_mode = #tpu.pipeline_mode<synchronous>, transform_indices = @transform_13, window_bounds = array<i64: 1, 400>}, {pipeline_mode = #tpu.pipeline_mode<synchronous>, transform_indices = @transform_14, window_bounds = array<i64: 400, 400>}, {pipeline_mode = #tpu.pipeline_mode<synchronous>, transform_indices = @transform_15, window_bounds = array<i64: 1, 400>}, {pipeline_mode = #tpu.pipeline_mode<synchronous>, transform_indices = @transform_16, window_bounds = array<i64: 400, 784>}, {pipeline_mode = #tpu.pipeline_mode<synchronous>, transform_indices = @transform_17, window_bounds = array<i64: 1, 784>}, {transform_indices = @transform_18, window_bounds = array<i64: 8, 784>}, {transform_indices = @transform_19, window_bounds = array<i64: 8, 20>}, {transform_indices = @transform_20, window_bounds = array<i64: 8, 20>}]} {
    %c0 = arith.constant 0 : index
    %c0_0 = arith.constant 0 : index
    %0 = vector.load %arg1[%c0, %c0_0] : memref<8x784xf32, #tpu.memory_space<vmem>>, vector<8x784xf32>
    %1 = arith.truncf %0 : vector<8x784xf32> to vector<8x784xbf16>
    %c0_1 = arith.constant 0 : index
    %c0_2 = arith.constant 0 : index
    %2 = vector.load %arg3[%c0_1, %c0_2] : memref<784x400xbf16, #tpu.memory_space<vmem>>, vector<784x400xbf16>
    %cst = arith.constant dense<0.000000e+00> : vector<8x400xf32>
    %3 = tpu.matmul %1, %2, %cst {dimension_numbers = #tpu.dot_dimension_numbers<[1], [0], [0], [1], [0, 0, 1, 1], [], []>} : vector<8x784xbf16>, vector<784x400xbf16>, vector<8x400xf32> -> vector<8x400xf32>
    %c0_3 = arith.constant 0 : index
    %c0_4 = arith.constant 0 : index
    %4 = vector.load %arg4[%c0_3, %c0_4] : memref<1x400xf32, #tpu.memory_space<vmem>>, vector<1x400xf32>
    %5 = vector.broadcast %4 : vector<1x400xf32> to vector<8x400xf32>
    %6 = arith.addf %3, %5 : vector<8x400xf32>
    %cst_5 = arith.constant 0.000000e+00 : f32
    %7 = vector.broadcast %cst_5 : f32 to vector<8x400xf32>
    %8 = arith.maximumf %6, %7 : vector<8x400xf32>
    %9 = arith.truncf %8 : vector<8x400xf32> to vector<8x400xbf16>
    %c0_6 = arith.constant 0 : index
    %c0_7 = arith.constant 0 : index
    %10 = vector.load %arg5[%c0_6, %c0_7] : memref<400x400xbf16, #tpu.memory_space<vmem>>, vector<400x400xbf16>
    %cst_8 = arith.constant dense<0.000000e+00> : vector<8x400xf32>
    %11 = tpu.matmul %9, %10, %cst_8 {dimension_numbers = #tpu.dot_dimension_numbers<[1], [0], [0], [1], [0, 0, 1, 1], [], []>} : vector<8x400xbf16>, vector<400x400xbf16>, vector<8x400xf32> -> vector<8x400xf32>
    %c0_9 = arith.constant 0 : index
    %c0_10 = arith.constant 0 : index
    %12 = vector.load %arg6[%c0_9, %c0_10] : memref<1x400xf32, #tpu.memory_space<vmem>>, vector<1x400xf32>
    %13 = vector.broadcast %12 : vector<1x400xf32> to vector<8x400xf32>
    %14 = arith.addf %11, %13 : vector<8x400xf32>
    %cst_11 = arith.constant 0.000000e+00 : f32
    %15 = vector.broadcast %cst_11 : f32 to vector<8x400xf32>
    %16 = arith.maximumf %14, %15 : vector<8x400xf32>
    %17 = arith.truncf %16 : vector<8x400xf32> to vector<8x400xbf16>
    %c0_12 = arith.constant 0 : index
    %c0_13 = arith.constant 0 : index
    %18 = vector.load %arg7[%c0_12, %c0_13] : memref<400x400xbf16, #tpu.memory_space<vmem>>, vector<400x400xbf16>
    %cst_14 = arith.constant dense<0.000000e+00> : vector<8x400xf32>
    %19 = tpu.matmul %17, %18, %cst_14 {dimension_numbers = #tpu.dot_dimension_numbers<[1], [0], [0], [1], [0, 0, 1, 1], [], []>} : vector<8x400xbf16>, vector<400x400xbf16>, vector<8x400xf32> -> vector<8x400xf32>
    %c0_15 = arith.constant 0 : index
    %c0_16 = arith.constant 0 : index
    %20 = vector.load %arg8[%c0_15, %c0_16] : memref<1x400xf32, #tpu.memory_space<vmem>>, vector<1x400xf32>
    %21 = vector.broadcast %20 : vector<1x400xf32> to vector<8x400xf32>
    %22 = arith.addf %19, %21 : vector<8x400xf32>
    %cst_17 = arith.constant 0.000000e+00 : f32
    %23 = vector.broadcast %cst_17 : f32 to vector<8x400xf32>
    %24 = arith.maximumf %22, %23 : vector<8x400xf32>
    %25 = arith.truncf %24 : vector<8x400xf32> to vector<8x400xbf16>
    %c0_18 = arith.constant 0 : index
    %c0_19 = arith.constant 0 : index
    %26 = vector.load %arg9[%c0_18, %c0_19] : memref<400x40xbf16, #tpu.memory_space<vmem>>, vector<400x40xbf16>
    %cst_20 = arith.constant dense<0.000000e+00> : vector<8x40xf32>
    %27 = tpu.matmul %25, %26, %cst_20 {dimension_numbers = #tpu.dot_dimension_numbers<[1], [0], [0], [1], [0, 0, 1, 1], [], []>} : vector<8x400xbf16>, vector<400x40xbf16>, vector<8x40xf32> -> vector<8x40xf32>
    %c0_21 = arith.constant 0 : index
    %c0_22 = arith.constant 0 : index
    %28 = vector.load %arg10[%c0_21, %c0_22] : memref<1x40xf32, #tpu.memory_space<vmem>>, vector<1x40xf32>
    %29 = vector.broadcast %28 : vector<1x40xf32> to vector<8x40xf32>
    %30 = arith.addf %27, %29 : vector<8x40xf32>
    %31 = vector.extract_strided_slice %30 {offsets = [0, 0], sizes = [8, 20], strides = [1, 1]} : vector<8x40xf32> to vector<8x20xf32>
    %32 = vector.extract_strided_slice %30 {offsets = [0, 20], sizes = [8, 20], strides = [1, 1]} : vector<8x40xf32> to vector<8x20xf32>
    %c0_23 = arith.constant 0 : index
    %c0_24 = arith.constant 0 : index
    %33 = vector.load %arg2[%c0_23, %c0_24] : memref<8x20xf32, #tpu.memory_space<vmem>>, vector<8x20xf32>
    %cst_25 = arith.constant 5.000000e-01 : f32
    %34 = vector.broadcast %cst_25 : f32 to vector<8x20xf32>
    %35 = arith.mulf %34, %32 : vector<8x20xf32>
    %36 = math.exp %35 : vector<8x20xf32>
    %37 = arith.mulf %33, %36 : vector<8x20xf32>
    %38 = arith.addf %37, %31 : vector<8x20xf32>
    %39 = arith.truncf %38 : vector<8x20xf32> to vector<8x20xbf16>
    %c0_26 = arith.constant 0 : index
    %c0_27 = arith.constant 0 : index
    %40 = vector.load %arg11[%c0_26, %c0_27] : memref<20x400xbf16, #tpu.memory_space<vmem>>, vector<20x400xbf16>
    %cst_28 = arith.constant dense<0.000000e+00> : vector<8x400xf32>
    %41 = tpu.matmul %39, %40, %cst_28 {dimension_numbers = #tpu.dot_dimension_numbers<[1], [0], [0], [1], [0, 0, 1, 1], [], []>} : vector<8x20xbf16>, vector<20x400xbf16>, vector<8x400xf32> -> vector<8x400xf32>
    %c0_29 = arith.constant 0 : index
    %c0_30 = arith.constant 0 : index
    %42 = vector.load %arg12[%c0_29, %c0_30] : memref<1x400xf32, #tpu.memory_space<vmem>>, vector<1x400xf32>
    %43 = vector.broadcast %42 : vector<1x400xf32> to vector<8x400xf32>
    %44 = arith.addf %41, %43 : vector<8x400xf32>
    %cst_31 = arith.constant 0.000000e+00 : f32
    %45 = vector.broadcast %cst_31 : f32 to vector<8x400xf32>
    %46 = arith.maximumf %44, %45 : vector<8x400xf32>
    %47 = arith.truncf %46 : vector<8x400xf32> to vector<8x400xbf16>
    %c0_32 = arith.constant 0 : index
    %c0_33 = arith.constant 0 : index
    %48 = vector.load %arg13[%c0_32, %c0_33] : memref<400x400xbf16, #tpu.memory_space<vmem>>, vector<400x400xbf16>
    %cst_34 = arith.constant dense<0.000000e+00> : vector<8x400xf32>
    %49 = tpu.matmul %47, %48, %cst_34 {dimension_numbers = #tpu.dot_dimension_numbers<[1], [0], [0], [1], [0, 0, 1, 1], [], []>} : vector<8x400xbf16>, vector<400x400xbf16>, vector<8x400xf32> -> vector<8x400xf32>
    %c0_35 = arith.constant 0 : index
    %c0_36 = arith.constant 0 : index
    %50 = vector.load %arg14[%c0_35, %c0_36] : memref<1x400xf32, #tpu.memory_space<vmem>>, vector<1x400xf32>
    %51 = vector.broadcast %50 : vector<1x400xf32> to vector<8x400xf32>
    %52 = arith.addf %49, %51 : vector<8x400xf32>
    %cst_37 = arith.constant 0.000000e+00 : f32
    %53 = vector.broadcast %cst_37 : f32 to vector<8x400xf32>
    %54 = arith.maximumf %52, %53 : vector<8x400xf32>
    %55 = arith.truncf %54 : vector<8x400xf32> to vector<8x400xbf16>
    %c0_38 = arith.constant 0 : index
    %c0_39 = arith.constant 0 : index
    %56 = vector.load %arg15[%c0_38, %c0_39] : memref<400x400xbf16, #tpu.memory_space<vmem>>, vector<400x400xbf16>
    %cst_40 = arith.constant dense<0.000000e+00> : vector<8x400xf32>
    %57 = tpu.matmul %55, %56, %cst_40 {dimension_numbers = #tpu.dot_dimension_numbers<[1], [0], [0], [1], [0, 0, 1, 1], [], []>} : vector<8x400xbf16>, vector<400x400xbf16>, vector<8x400xf32> -> vector<8x400xf32>
    %c0_41 = arith.constant 0 : index
    %c0_42 = arith.constant 0 : index
    %58 = vector.load %arg16[%c0_41, %c0_42] : memref<1x400xf32, #tpu.memory_space<vmem>>, vector<1x400xf32>
    %59 = vector.broadcast %58 : vector<1x400xf32> to vector<8x400xf32>
    %60 = arith.addf %57, %59 : vector<8x400xf32>
    %cst_43 = arith.constant 0.000000e+00 : f32
    %61 = vector.broadcast %cst_43 : f32 to vector<8x400xf32>
    %62 = arith.maximumf %60, %61 : vector<8x400xf32>
    %63 = arith.truncf %62 : vector<8x400xf32> to vector<8x400xbf16>
    %c0_44 = arith.constant 0 : index
    %c0_45 = arith.constant 0 : index
    %64 = vector.load %arg17[%c0_44, %c0_45] : memref<400x784xbf16, #tpu.memory_space<vmem>>, vector<400x784xbf16>
    %cst_46 = arith.constant dense<0.000000e+00> : vector<8x784xf32>
    %65 = tpu.matmul %63, %64, %cst_46 {dimension_numbers = #tpu.dot_dimension_numbers<[1], [0], [0], [1], [0, 0, 1, 1], [], []>} : vector<8x400xbf16>, vector<400x784xbf16>, vector<8x784xf32> -> vector<8x784xf32>
    %c0_47 = arith.constant 0 : index
    %c0_48 = arith.constant 0 : index
    %66 = vector.load %arg18[%c0_47, %c0_48] : memref<1x784xf32, #tpu.memory_space<vmem>>, vector<1x784xf32>
    %67 = vector.broadcast %66 : vector<1x784xf32> to vector<8x784xf32>
    %68 = arith.addf %65, %67 : vector<8x784xf32>
    %69 = arith.negf %68 : vector<8x784xf32>
    %70 = math.exp %69 : vector<8x784xf32>
    %cst_49 = arith.constant 1.000000e+00 : f32
    %71 = vector.broadcast %cst_49 : f32 to vector<8x784xf32>
    %72 = arith.addf %71, %70 : vector<8x784xf32>
    %73 = arith.divf %71, %72 : vector<8x784xf32>
    %c0_50 = arith.constant 0 : index
    %c0_51 = arith.constant 0 : index
    %74 = vector.load %arg19[%c0_50, %c0_51] : memref<8x784xf32, #tpu.memory_space<vmem>>, vector<8x784xf32>
    tpu.vector_store %arg19[%c0_50, %c0_51], %73 {strides = array<i32>} : memref<8x784xf32, #tpu.memory_space<vmem>>, vector<8x784xf32>,
    %c0_52 = arith.constant 0 : index
    %c0_53 = arith.constant 0 : index
    %75 = vector.load %arg20[%c0_52, %c0_53] : memref<8x20xf32, #tpu.memory_space<vmem>>, vector<8x20xf32>
    tpu.vector_store %arg20[%c0_52, %c0_53], %31 {strides = array<i32>} : memref<8x20xf32, #tpu.memory_space<vmem>>, vector<8x20xf32>,
    %c0_54 = arith.constant 0 : index
    %c0_55 = arith.constant 0 : index
    %76 = vector.load %arg21[%c0_54, %c0_55] : memref<8x20xf32, #tpu.memory_space<vmem>>, vector<8x20xf32>
    tpu.vector_store %arg21[%c0_54, %c0_55], %32 {strides = array<i32>} : memref<8x20xf32, #tpu.memory_space<vmem>>, vector<8x20xf32>,
    return
  }
  func.func @transform_0(%arg0: i32) -> (i32, i32) {
    %c0_i32 = arith.constant 0 : i32
    %c0_i32_0 = arith.constant 0 : i32
    return %arg0, %c0_i32 : i32, i32
  }
  func.func @transform_1(%arg0: i32) -> (i32, i32) {
    %c0_i32 = arith.constant 0 : i32
    %c0_i32_0 = arith.constant 0 : i32
    return %arg0, %c0_i32 : i32, i32
  }
  func.func @transform_2(%arg0: i32) -> (i32, i32) {
    %c0_i32 = arith.constant 0 : i32
    %c0_i32_0 = arith.constant 0 : i32
    %c0_i32_1 = arith.constant 0 : i32
    return %c0_i32, %c0_i32_0 : i32, i32
  }
  func.func @transform_3(%arg0: i32) -> (i32, i32) {
    %c0_i32 = arith.constant 0 : i32
    %c0_i32_0 = arith.constant 0 : i32
    %c0_i32_1 = arith.constant 0 : i32
    return %c0_i32, %c0_i32_0 : i32, i32
  }
  func.func @transform_4(%arg0: i32) -> (i32, i32) {
    %c0_i32 = arith.constant 0 : i32
    %c0_i32_0 = arith.constant 0 : i32
    %c0_i32_1 = arith.constant 0 : i32
    return %c0_i32, %c0_i32_0 : i32, i32
  }
  func.func @transform_5(%arg0: i32) -> (i32, i32) {
    %c0_i32 = arith.constant 0 : i32
    %c0_i32_0 = arith.constant 0 : i32
    %c0_i32_1 = arith.constant 0 : i32
    return %c0_i32, %c0_i32_0 : i32, i32
  }
  func.func @transform_6(%arg0: i32) -> (i32, i32) {
    %c0_i32 = arith.constant 0 : i32
    %c0_i32_0 = arith.constant 0 : i32
    %c0_i32_1 = arith.constant 0 : i32
    return %c0_i32, %c0_i32_0 : i32, i32
  }
  func.func @transform_7(%arg0: i32) -> (i32, i32) {
    %c0_i32 = arith.constant 0 : i32
    %c0_i32_0 = arith.constant 0 : i32
    %c0_i32_1 = arith.constant 0 : i32
    return %c0_i32, %c0_i32_0 : i32, i32
  }
  func.func @transform_8(%arg0: i32) -> (i32, i32) {
    %c0_i32 = arith.constant 0 : i32
    %c0_i32_0 = arith.constant 0 : i32
    %c0_i32_1 = arith.constant 0 : i32
    return %c0_i32, %c0_i32_0 : i32, i32
  }
  func.func @transform_9(%arg0: i32) -> (i32, i32) {
    %c0_i32 = arith.constant 0 : i32
    %c0_i32_0 = arith.constant 0 : i32
    %c0_i32_1 = arith.constant 0 : i32
    return %c0_i32, %c0_i32_0 : i32, i32
  }
  func.func @transform_10(%arg0: i32) -> (i32, i32) {
    %c0_i32 = arith.constant 0 : i32
    %c0_i32_0 = arith.constant 0 : i32
    %c0_i32_1 = arith.constant 0 : i32
    return %c0_i32, %c0_i32_0 : i32, i32
  }
  func.func @transform_11(%arg0: i32) -> (i32, i32) {
    %c0_i32 = arith.constant 0 : i32
    %c0_i32_0 = arith.constant 0 : i32
    %c0_i32_1 = arith.constant 0 : i32
    return %c0_i32, %c0_i32_0 : i32, i32
  }
  func.func @transform_12(%arg0: i32) -> (i32, i32) {
    %c0_i32 = arith.constant 0 : i32
    %c0_i32_0 = arith.constant 0 : i32
    %c0_i32_1 = arith.constant 0 : i32
    return %c0_i32, %c0_i32_0 : i32, i32
  }
  func.func @transform_13(%arg0: i32) -> (i32, i32) {
    %c0_i32 = arith.constant 0 : i32
    %c0_i32_0 = arith.constant 0 : i32
    %c0_i32_1 = arith.constant 0 : i32
    return %c0_i32, %c0_i32_0 : i32, i32
  }
  func.func @transform_14(%arg0: i32) -> (i32, i32) {
    %c0_i32 = arith.constant 0 : i32
    %c0_i32_0 = arith.constant 0 : i32
    %c0_i32_1 = arith.constant 0 : i32
    return %c0_i32, %c0_i32_0 : i32, i32
  }
  func.func @transform_15(%arg0: i32) -> (i32, i32) {
    %c0_i32 = arith.constant 0 : i32
    %c0_i32_0 = arith.constant 0 : i32
    %c0_i32_1 = arith.constant 0 : i32
    return %c0_i32, %c0_i32_0 : i32, i32
  }
  func.func @transform_16(%arg0: i32) -> (i32, i32) {
    %c0_i32 = arith.constant 0 : i32
    %c0_i32_0 = arith.constant 0 : i32
    %c0_i32_1 = arith.constant 0 : i32
    return %c0_i32, %c0_i32_0 : i32, i32
  }
  func.func @transform_17(%arg0: i32) -> (i32, i32) {
    %c0_i32 = arith.constant 0 : i32
    %c0_i32_0 = arith.constant 0 : i32
    %c0_i32_1 = arith.constant 0 : i32
    return %c0_i32, %c0_i32_0 : i32, i32
  }
  func.func @transform_18(%arg0: i32) -> (i32, i32) {
    %c0_i32 = arith.constant 0 : i32
    %c0_i32_0 = arith.constant 0 : i32
    return %arg0, %c0_i32 : i32, i32
  }
  func.func @transform_19(%arg0: i32) -> (i32, i32) {
    %c0_i32 = arith.constant 0 : i32
    %c0_i32_0 = arith.constant 0 : i32
    return %arg0, %c0_i32 : i32, i32
  }
  func.func @transform_20(%arg0: i32) -> (i32, i32) {
    %c0_i32 = arith.constant 0 : i32
    %c0_i32_0 = arith.constant 0 : i32
    return %arg0, %c0_i32 : i32, i32
  }
}

</mosaic_0001>

<bundles_post_ra>
// kernel: tpu_custom_call.1
= control target key start
LH: loop header
LB: loop body
LE: loop exit
PB: predicated region body
PF: predicated region fallthrough
CT: control target
= control target key end

     0   :  { %s15341_s0 = inlined_call_operand.vmem [shape: f32[8,784], index: 0, kind: input, shape index: {}]   ;;  %s15342_s1 = inlined_call_operand.vmem [shape: f32[8,20], index: 1, kind: input, shape index: {}]   ;;  %s15343_s2 = inlined_call_operand.vmem [shape: bf16[784,400], index: 2, kind: input, shape index: {}]   ;;  %s15344_s3 = inlined_call_operand.vmem [shape: f32[1,400], index: 3, kind: input, shape index: {}]   ;;  %s15345_s4 = inlined_call_operand.vmem [shape: bf16[400,400], index: 4, kind: input, shape index: {}]   ;;  %s15346_s5 = inlined_call_operand.vmem [shape: f32[1,400], index: 5, kind: input, shape index: {}]   ;;  %s15347_s6 = inlined_call_operand.vmem [shape: bf16[400,400], index: 6, kind: input, shape index: {}]   ;;  %s15348_s7 = inlined_call_operand.vmem [shape: f32[1,400], index: 7, kind: input, shape index: {}]   ;;  %s15349_s8 = inlined_call_operand.vmem [shape: bf16[400,40], index: 8, kind: input, shape index: {}]   ;;  %s15350_s9 = inlined_call_operand.vmem [shape: f32[1,40], index: 9, kind: input, shape index: {}]   ;;  %s15351_s10 = inlined_call_operand.vmem [shape: bf16[20,400], index: 10, kind: input, shape index: {}]   ;;  %s15352_s11 = inlined_call_operand.vmem [shape: f32[1,400], index: 11, kind: input, shape index: {}]   ;;  %s15353_s12 = inlined_call_operand.hbm [shape: bf16[400,400], index: 12, kind: input, shape index: {}]   ;;  %s15354_s13 = inlined_call_operand.vmem [shape: f32[1,400], index: 13, kind: input, shape index: {}]   ;;  %s15355_s14 = inlined_call_operand.hbm [shape: bf16[400,400], index: 14, kind: input, shape index: {}]   ;;  %s15356_s15 = inlined_call_operand.vmem [shape: f32[1,400], index: 15, kind: input, shape index: {}]   ;;  %s15357_s16 = inlined_call_operand.vmem [shape: bf16[400,784], index: 16, kind: input, shape index: {}]   ;;  %s15358_s17 = inlined_call_operand.vmem [shape: f32[1,784], index: 17, kind: input, shape index: {}]   ;;  %s15359_s18 = inlined_call_operand.hbm [shape: f32[8,784], index: 18, kind: output, shape index: {0}]   ;;  %s15360_s19 = inlined_call_operand.hbm [shape: f32[8,20], index: 19, kind: output, shape index: {1}]   ;;  %s15361_s20 = inlined_call_operand.hbm [shape: f32[8,20], index: 20, kind: output, shape index: {2}]  }
   0x1   :  { %15365 = sst [smem:[#allocation15_spill]] %s15341_s0 }
   0x2   :  { %15366 = sst [smem:[#allocation16_spill]] %s15342_s1 }
   0x3   :  { %15367 = sst [smem:[#allocation17_spill]] %s15343_s2 }
   0x4   :  { %15368 = sst [smem:[#allocation18_spill]] %s15344_s3 }
   0x5   :  { %15369 = sst [smem:[#allocation19_spill]] %s15345_s4 }
   0x6   :  { %26 = vsyncpa [#allocation3], 0 }
   0x7   :  { %27 = vsyncpa [#allocation6], 0 }
   0x8   :  { %28 = vsyncpa [#allocation4], 0 }
   0x9   :  { %29 = vsyncpa [#allocation9], 0  ;;  %s58_s23 = sshll.u32 %s15353_s12, 4  ;;  %s11266_s24 = smov [#allocation2]   ;;  %s59_s23 = int_to_ptr.hbm [resolvable:$true] %s58_s23 }
   0xa   :  { %s60_s2 = sshll.u32 %s11266_s24, 4  ;;  %s73_s26 = sshll.u32 %s15355_s14, 4  ;;  %s61_s2 = int_to_ptr.vmem [resolvable:$true] %s60_s2  ;;  %s74_s26 = int_to_ptr.hbm [resolvable:$true] %s73_s26 }
   0xb   :  { %s11267_s27 = smov 256   ;;  %s11268_s28 = smov 16  }
   0xc   :  { %66 = dma.hbm_to_vmem [thread:$0]  %s59_s23, 12800, %s61_s2, [#allocation3], %s11267_s27, %s11267_s27, %s11268_s28  }
   0xd   :  { %s11269_s4 = smov [#allocation5]  }
   0xe   :  { %s75_s29 = sshll.u32 %s11269_s4, 4  ;;  %s76_s29 = int_to_ptr.vmem [resolvable:$true] %s75_s29 }
   0xf   :  { %81 = dma.hbm_to_vmem [thread:$0]  %s74_s26, 12800, %s76_s29, [#allocation6], %s11267_s27, %s11267_s27, %s11268_s28  }
  0x10   :  { %11258 = dma.done.wait [#allocation3], 12800  }
  0x11   :  { %11259 = vsyncadd [#allocation3], 4294954496 }
  0x12   :  { %11260 = dma.done.wait [#allocation6], 12800  }
  0x13   :  { %11261 = vsyncadd [#allocation6], 4294954496  ;;  %s15370_s0 = sld [smem:[#allocation17_spill]]  ;;  %vm1297_vm0 = vcmask 130048   ;;  %vm3651_vm1 = vcmask 1041408   ;;  %vm3647_vm2 = vcmask 162816  }
  0x14   :  { %s15371_s4 = sld [smem:[#allocation15_spill]]  ;;  %s7029_s22 = sshll.u32 %s15360_s19, 4  ;;  %s7030_s22 = int_to_ptr.hbm [resolvable:$true] %s7029_s22 }
  0x15   :  { %s15372_s29 = sld [smem:[#allocation18_spill]]  ;;  %s11272_s23 = smov [#allocation10]  }
  0x16   :  { %s15373_s28 = sld [smem:[#allocation19_spill]]  ;;  %s7040_s25 = sshll.u32 %s15361_s20, 4  ;;  %s7041_s25 = int_to_ptr.hbm [resolvable:$true] %s7040_s25 }
  0x17   :  { %s11273_s19 = smov [#allocation7]   ;;  %s7018_s27 = sshll.u32 %s15359_s18, 4  ;;  %s7019_s27 = int_to_ptr.hbm [resolvable:$true] %s7018_s27 }
  0x18   :  { %s7016_s20 = sshll.u32 %s11273_s19, 4  ;;  %s7017_s20 = int_to_ptr.vmem [resolvable:$true] %s7016_s20 }
  0x19   :  { %v7174_v0 = vld [vmem:[%s15370_s0 + $0xe0] sm:$0xf]  ;;  %v10329_v1 = vld [vmem:[%s15370_s0 + $0xec] sm:$0xf0] }
  0x1a   :  { %v7302_v2 = vld [vmem:[%s15370_s0 + $0x1e0] sm:$0xf]  ;;  %v7175_v3 = vor.u32 %v10329_v1, %v7174_v0  ;;  %v10361_v4 = vld [vmem:[%s15370_s0 + $0x1ec] sm:$0xf0] }
  0x1b   :  { %v7430_v5 = vld [vmem:[%s15370_s0 + $0x2e0] sm:$0xf]  ;;  %v10393_v6 = vld [vmem:[%s15370_s0 + $0x2ec] sm:$0xf0]  ;;  %v7303_v7 = vor.u32 %v10361_v4, %v7302_v2 }
  0x1c   :  { %v7431_v8 = vor.u32 %v10393_v6, %v7430_v5  ;;  %v7558_v9 = vld [vmem:[%s15370_s0 + $0x3e0] sm:$0xf]  ;;  %v10425_v10 = vld [vmem:[%s15370_s0 + $0x3ec] sm:$0xf0]  ;;  %1301 = vmatpush.bf16.msra.mxu0 %v7175_v3 }
  0x1d   :  { %v7158_v11 = vld [vmem:[%s15370_s0 + $0xc0] sm:$0xf]  ;;  %v7559_v12 = vor.u32 %v10425_v10, %v7558_v9  ;;  %v10325_v13 = vld [vmem:[%s15370_s0 + $0xcc] sm:$0xf0]  ;;  %1314 = vmatpush.bf16.msra.mxu1 %v7303_v7 }
  0x1e   :  { %v7286_v14 = vld [vmem:[%s15370_s0 + $0x1c0] sm:$0xf]  ;;  %v10357_v15 = vld [vmem:[%s15370_s0 + $0x1cc] sm:$0xf0]  ;;  %1327 = vmatpush.bf16.msra.mxu2 %v7431_v8  ;;  %v7159_v16 = vor.u32 %v10325_v13, %v7158_v11 }
  0x1f   :  { %v7287_v17 = vor.u32 %v10357_v15, %v7286_v14  ;;  %v7414_v18 = vld [vmem:[%s15370_s0 + $0x2c0] sm:$0xf]  ;;  %v10389_v19 = vld [vmem:[%s15370_s0 + $0x2cc] sm:$0xf0]  ;;  %1340 = vmatpush.bf16.msra.mxu3 %v7559_v12 }
  0x20   :  { %v7542_v20 = vld [vmem:[%s15370_s0 + $0x3c0] sm:$0xf]  ;;  %v7415_v21 = vor.u32 %v10389_v19, %v7414_v18  ;;  %v10421_v22 = vld [vmem:[%s15370_s0 + $0x3cc] sm:$0xf0]  ;;  %1302 = vmatpush.bf16.msra.mxu0 %v7159_v16 }
  0x21   :  { %v7142_v23 = vld [vmem:[%s15370_s0 + $0xa0] sm:$0xf]  ;;  %v10321_v24 = vld [vmem:[%s15370_s0 + $0xac] sm:$0xf0]  ;;  %v7543_v25 = vor.u32 %v10421_v22, %v7542_v20  ;;  %1315 = vmatpush.bf16.msra.mxu1 %v7287_v17 }
  0x22   :  { %v7270_v26 = vld [vmem:[%s15370_s0 + $0x1a0] sm:$0xf]  ;;  %v10353_v27 = vld [vmem:[%s15370_s0 + $0x1ac] sm:$0xf0]  ;;  %v7143_v29 = vor.u32 %v10321_v24, %v7142_v23  ;;  %1328 = vmatpush.bf16.msra.mxu2 %v7415_v21 }
  0x23   :  { %v7398_v28 = vld [vmem:[%s15370_s0 + $0x2a0] sm:$0xf]  ;;  %v10385_v30 = vld [vmem:[%s15370_s0 + $0x2ac] sm:$0xf0]  ;;  %v7271_v33 = vor.u32 %v10353_v27, %v7270_v26  ;;  %1341 = vmatpush.bf16.msra.mxu3 %v7543_v25 }
  0x24   :  { %v7526_v31 = vld [vmem:[%s15370_s0 + $0x3a0] sm:$0xf]  ;;  %v10417_v32 = vld [vmem:[%s15370_s0 + $0x3ac] sm:$0xf0]  ;;  %v7399_v34 = vor.u32 %v10385_v30, %v7398_v28  ;;  %1303 = vmatpush.bf16.msra.mxu0 %v7143_v29 }
  0x25   :  { %v7126_v35 = vld [vmem:[%s15370_s0 + $0x80] sm:$0xf]  ;;  %v10317_v36 = vld [vmem:[%s15370_s0 + $0x8c] sm:$0xf0]  ;;  %v7527_v38 = vor.u32 %v10417_v32, %v7526_v31  ;;  %1316 = vmatpush.bf16.msra.mxu1 %v7271_v33  ;;  %v10327_v33 = vld [vmem:[%s15370_s0 + $0xe4] sm:$0xf] }
  0x26   :  { %v7254_v37 = vld [vmem:[%s15370_s0 + $0x180] sm:$0xf]  ;;  %v10349_v39 = vld [vmem:[%s15370_s0 + $0x18c] sm:$0xf0]  ;;  %v7127_v44 = vor.u32 %v10317_v36, %v7126_v35  ;;  %1329 = vmatpush.bf16.msra.mxu2 %v7399_v34  ;;  %v7176_v34 = vld [vmem:[%s15370_s0 + $0xf0] sm:$0xf0] }
  0x27   :  { %v7382_v40 = vld [vmem:[%s15370_s0 + $0x280] sm:$0xf]  ;;  %v10381_v41 = vld [vmem:[%s15370_s0 + $0x28c] sm:$0xf0]  ;;  %v7255_v45 = vor.u32 %v10349_v39, %v7254_v37  ;;  %1342 = vmatpush.bf16.msra.mxu3 %v7527_v38 }
  0x28   :  { %v7510_v42 = vld [vmem:[%s15370_s0 + $0x380] sm:$0xf]  ;;  %v10413_v43 = vld [vmem:[%s15370_s0 + $0x38c] sm:$0xf0]  ;;  %v7383_v46 = vor.u32 %v10381_v41, %v7382_v40  ;;  %1304 = vmatpush.bf16.msra.mxu0 %v7127_v44  ;;  %v7304_v44 = vld [vmem:[%s15370_s0 + $0x1f0] sm:$0xf0] }
  0x29   :  { %v7110_v47 = vld [vmem:[%s15370_s0 + $0x60] sm:$0xf]  ;;  %v10313_v48 = vld [vmem:[%s15370_s0 + $0x6c] sm:$0xf0]  ;;  %v7511_v50 = vor.u32 %v10413_v43, %v7510_v42  ;;  %1317 = vmatpush.bf16.msra.mxu1 %v7255_v45  ;;  %v10359_v43 = vld [vmem:[%s15370_s0 + $0x1e4] sm:$0xf] }
  0x2a   :  { %v7238_v49 = vld [vmem:[%s15370_s0 + $0x160] sm:$0xf]  ;;  %v10345_v51 = vld [vmem:[%s15370_s0 + $0x16c] sm:$0xf0]  ;;  %v7111_v56 = vor.u32 %v10313_v48, %v7110_v47  ;;  %1330 = vmatpush.bf16.msra.mxu2 %v7383_v46  ;;  %v100_v45 = vld [vmem:[%s15371_s4 + $0x18] sm:$0xff]  ;;  %v7179_v47 = vor.u32 %v10327_v33, %v7176_v34 }
  0x2b   :  { %v7366_v52 = vld [vmem:[%s15370_s0 + $0x260] sm:$0xf]  ;;  %v10377_v53 = vld [vmem:[%s15370_s0 + $0x26c] sm:$0xf0]  ;;  %v7239_v57 = vor.u32 %v10345_v51, %v7238_v49  ;;  %1343 = vmatpush.bf16.msra.mxu3 %v7511_v50 }
  0x2c   :  { %v7494_v54 = vld [vmem:[%s15370_s0 + $0x360] sm:$0xf]  ;;  %v10409_v55 = vld [vmem:[%s15370_s0 + $0x36c] sm:$0xf0]  ;;  %v7367_v58 = vor.u32 %v10377_v53, %v7366_v52  ;;  %1305 = vmatpush.bf16.msra.mxu0 %v7111_v56  ;;  %v10323_v53 = vld [vmem:[%s15370_s0 + $0xc4] sm:$0xf] }
  0x2d   :  { %v7094_v59 = vld [vmem:[%s15370_s0 + $0x40] sm:$0xf]  ;;  %v10309_v60 = vld [vmem:[%s15370_s0 + $0x4c] sm:$0xf0]  ;;  %v7495_v62 = vor.u32 %v10409_v55, %v7494_v54  ;;  %1318 = vmatpush.bf16.msra.mxu1 %v7239_v57  ;;  %v7160_v54 = vld [vmem:[%s15370_s0 + $0xd0] sm:$0xf0]  ;;  %v11638_v57 = vpack.c.bf16 %v100_v45, %v100_v45 }
  0x2e   :  { %v7222_v61 = vld [vmem:[%s15370_s0 + $0x140] sm:$0xf]  ;;  %v10341_v63 = vld [vmem:[%s15370_s0 + $0x14c] sm:$0xf0]  ;;  %v7095_v4 = vor.u32 %v10309_v60, %v7094_v59  ;;  %1331 = vmatpush.bf16.msra.mxu2 %v7367_v58  ;;  %v98_v58 = vld [vmem:[%s15371_s4 + $0x8] sm:$0xff]  ;;  %v7307_v59 = vor.u32 %v10359_v43, %v7304_v44 }
  0x2f   :  { %v7350_v0 = vld [vmem:[%s15370_s0 + $0x240] sm:$0xf]  ;;  %v10373_v1 = vld [vmem:[%s15370_s0 + $0x24c] sm:$0xf0]  ;;  %v7223_v5 = vor.u32 %v10341_v63, %v7222_v61  ;;  %1344 = vmatpush.bf16.msra.mxu3 %v7495_v62  ;;  %v10355_v61 = vld [vmem:[%s15370_s0 + $0x1c4] sm:$0xf] }
  0x30   :  { %v7478_v2 = vld [vmem:[%s15370_s0 + $0x340] sm:$0xf]  ;;  %v10405_v3 = vld [vmem:[%s15370_s0 + $0x34c] sm:$0xf0]  ;;  %v7351_v6 = vor.u32 %v10373_v1, %v7350_v0  ;;  %1306 = vmatpush.bf16.msra.mxu0 %v7095_v4  ;;  %v7288_v62 = vld [vmem:[%s15370_s0 + $0x1d0] sm:$0xf0]  ;;  %v7163_v0 = vor.u32 %v10323_v53, %v7160_v54 }
  0x31   :  { %v7078_v7 = vld [vmem:[%s15370_s0 + $0x20] sm:$0xf]  ;;  %v10305_v8 = vld [vmem:[%s15370_s0 + $0x2c] sm:$0xf0]  ;;  %v7479_v10 = vor.u32 %v10405_v3, %v7478_v2  ;;  %1319 = vmatpush.bf16.msra.mxu1 %v7223_v5  ;;  %v10319_v5 = vld [vmem:[%s15370_s0 + $0xa4] sm:$0xf] }
  0x32   :  { %v7206_v9 = vld [vmem:[%s15370_s0 + $0x120] sm:$0xf]  ;;  %v10337_v11 = vld [vmem:[%s15370_s0 + $0x12c] sm:$0xf0]  ;;  %v7079_v16 = vor.u32 %v10305_v8, %v7078_v7  ;;  %1332 = vmatpush.bf16.msra.mxu2 %v7351_v6  ;;  %v7144_v6 = vld [vmem:[%s15370_s0 + $0xb0] sm:$0xf0]  ;;  %v11669_v7 = vpack.c.bf16 %v98_v58, %v98_v58  ;;  %v7291_v8 = vor.u32 %v10355_v61, %v7288_v62 }
  0x33   :  { %v7334_v12 = vld [vmem:[%s15370_s0 + $0x220] sm:$0xf]  ;;  %v10369_v13 = vld [vmem:[%s15370_s0 + $0x22c] sm:$0xf0]  ;;  %v7207_v20 = vor.u32 %v10337_v11, %v7206_v9  ;;  %1345 = vmatpush.bf16.msra.mxu3 %v7479_v10  ;;  %v10351_v10 = vld [vmem:[%s15370_s0 + $0x1a4] sm:$0xf] }
  0x34   :  { %v7462_v14 = vld [vmem:[%s15370_s0 + $0x320] sm:$0xf]  ;;  %v10401_v15 = vld [vmem:[%s15370_s0 + $0x32c] sm:$0xf0]  ;;  %v7335_v21 = vor.u32 %v10369_v13, %v7334_v12  ;;  %1307 = vmatpush.bf16.msra.mxu0 %v7079_v16  ;;  %v7272_v11 = vld [vmem:[%s15370_s0 + $0x1b0] sm:$0xf0]  ;;  %v7147_v13 = vor.u32 %v10319_v5, %v7144_v6 }
  0x35   :  { %v7062_v17 = vld [vmem:[%s15370_s0] sm:$0xf]  ;;  %v10301_v18 = vld [vmem:[%s15370_s0 + $0xc] sm:$0xf0]  ;;  %v7463_v25 = vor.u32 %v10401_v15, %v7462_v14  ;;  %1320 = vmatpush.bf16.msra.mxu1 %v7207_v20  ;;  %v7275_v20 = vor.u32 %v10351_v10, %v7272_v11  ;;  %v10307_v43 = vld [vmem:[%s15370_s0 + $0x44] sm:$0xf] }
  0x36   :  { %v7190_v19 = vld [vmem:[%s15370_s0 + $0x100] sm:$0xf]  ;;  %v10333_v22 = vld [vmem:[%s15370_s0 + $0x10c] sm:$0xf0]  ;;  %v7063_v32 = vor.u32 %v10301_v18, %v7062_v17  ;;  %1333 = vmatpush.bf16.msra.mxu2 %v7335_v21  ;;  %v10315_v18 = vld [vmem:[%s15370_s0 + $0x84] sm:$0xf] }
  0x37   :  { %v7318_v23 = vld [vmem:[%s15370_s0 + $0x200] sm:$0xf]  ;;  %v10365_v24 = vld [vmem:[%s15370_s0 + $0x20c] sm:$0xf0]  ;;  %v7191_v36 = vor.u32 %v10333_v22, %v7190_v19  ;;  %1346 = vmatpush.bf16.msra.mxu3 %v7463_v25  ;;  %v7128_v19 = vld [vmem:[%s15370_s0 + $0x90] sm:$0xf0] }
  0x38   :  { %v7446_v26 = vld [vmem:[%s15370_s0 + $0x300] sm:$0xf]  ;;  %v10397_v27 = vld [vmem:[%s15370_s0 + $0x30c] sm:$0xf0]  ;;  %v7319_v37 = vor.u32 %v10365_v24, %v7318_v23  ;;  %1308 = vmatpush.bf16.msra.mxu0 %v7063_v32  ;;  %v10347_v22 = vld [vmem:[%s15370_s0 + $0x184] sm:$0xf]  ;;  %v7131_v25 = vor.u32 %v10315_v18, %v7128_v19 }
  0x39   :  { %v7686_v28 = vld [vmem:[%s15370_s0 + $0x4e0] sm:$0xf]  ;;  %v10457_v29 = vld [vmem:[%s15370_s0 + $0x4ec] sm:$0xf0]  ;;  %v7447_v41 = vor.u32 %v10397_v27, %v7446_v26  ;;  %1321 = vmatpush.bf16.msra.mxu1 %v7191_v36  ;;  %v7256_v23 = vld [vmem:[%s15370_s0 + $0x190] sm:$0xf0] }
  0x3a   :  { %v7814_v30 = vld [vmem:[%s15370_s0 + $0x5e0] sm:$0xf]  ;;  %v10489_v31 = vld [vmem:[%s15370_s0 + $0x5ec] sm:$0xf0]  ;;  %v7687_v42 = vor.u32 %v10457_v29, %v7686_v28  ;;  %1334 = vmatpush.bf16.msra.mxu2 %v7319_v37  ;;  %v7259_v33 = vor.u32 %v10347_v22, %v7256_v23  ;;  %v7240_v36 = vld [vmem:[%s15370_s0 + $0x170] sm:$0xf0] }
  0x3b   :  { %v99_v35 = vld [vmem:[%s15371_s4 + $0x10] sm:$0xff]  ;;  %v7830_v38 = vld [vmem:[%s15370_s0 + $0x600] sm:$0xf]  ;;  %v7815_v46 = vor.u32 %v10489_v31, %v7814_v30  ;;  %1347 = vmatpush.bf16.msra.mxu3 %v7447_v41  ;;  %v10311_v30 = vld [vmem:[%s15370_s0 + $0x64] sm:$0xf] }
  0x3c   :  { %v10493_v39 = vld [vmem:[%s15370_s0 + $0x60c] sm:$0xf0]  ;;  %v97_v40 = vld [vmem:[%s15371_s4] sm:$0xff]  ;;  %v11625_v51 = vpack.c.bf16 %v99_v35, %v99_v35  ;;  %1353 = vmatpush.bf16.msrb.mxu0 %v7687_v42  ;;  %1322 = vmatmul.bf16.vlgmr.msra.gmra.mxu1 %v11669_v7  ;;  %v7112_v31 = vld [vmem:[%s15370_s0 + $0x70] sm:$0xf0] }
  0x3d   :  { %v7670_v48 = vld [vmem:[%s15370_s0 + $0x4c0] sm:$0xf]  ;;  %v10453_v49 = vld [vmem:[%s15370_s0 + $0x4cc] sm:$0xf0]  ;;  %v11636_v55 = vpack.c.bf16 %v97_v40, %v97_v40  ;;  %v7831_v56 = vor.u32 %v10493_v39, %v7830_v38  ;;  %1366 = vmatpush.bf16.msrb.mxu1 %v7815_v46  ;;  %v10343_v35 = vld [vmem:[%s15370_s0 + $0x164] sm:$0xf]  ;;  %v7115_v38 = vor.u32 %v10311_v30, %v7112_v31 }
  0x3e   :  { %v7798_v50 = vld [vmem:[%s15370_s0 + $0x5c0] sm:$0xf]  ;;  %v10485_v52 = vld [vmem:[%s15370_s0 + $0x5cc] sm:$0xf0]  ;;  %v7671_v60 = vor.u32 %v10453_v49, %v7670_v48  ;;  %1335 = vmatmul.bf16.vlgmr.msra.gmra.mxu2 %v11625_v51  ;;  %1348 = vmatmul.bf16.vlgmr.msra.gmra.mxu3 %v11638_v57  ;;  %v7096_v44 = vld [vmem:[%s15370_s0 + $0x50] sm:$0xf0]  ;;  %v7243_v46 = vor.u32 %v10343_v35, %v7240_v36 }
  0x3f   :  { %1392 = vmatpush.bf16.msrb.mxu3 %v7179_v47  ;;  %v7799_v63 = vor.u32 %v10485_v52, %v7798_v50  ;;  %v7654_v1 = vld [vmem:[%s15370_s0 + $0x4a0] sm:$0xf]  ;;  %v10449_v2 = vld [vmem:[%s15370_s0 + $0x4ac] sm:$0xf0]  ;;  %1309 = vmatmul.bf16.vlgmr.msra.gmra.mxu0 %v11636_v55  ;;  %v10339_v48 = vld [vmem:[%s15370_s0 + $0x144] sm:$0xf]  ;;  %v7099_v52 = vor.u32 %v10307_v43, %v7096_v44 }
  0x40   :  { %v7782_v3 = vld [vmem:[%s15370_s0 + $0x5a0] sm:$0xf]  ;;  %v10481_v4 = vld [vmem:[%s15370_s0 + $0x5ac] sm:$0xf0]  ;;  %1386 = vmatpush.bf16.msrb.mxu2 %v7831_v56  ;;  %1354 = vmatpush.bf16.msrb.mxu0 %v7671_v60  ;;  %v7655_v9 = vor.u32 %v10449_v2, %v7654_v1  ;;  %v7224_v49 = vld [vmem:[%s15370_s0 + $0x150] sm:$0xf0] }
  0x41   :  { %1367 = vmatpush.bf16.msrb.mxu1 %v7799_v63  ;;  %v7783_v12 = vor.u32 %v10481_v4, %v7782_v3  ;;  %v7638_v14 = vld [vmem:[%s15370_s0 + $0x480] sm:$0xf]  ;;  %v10445_v15 = vld [vmem:[%s15370_s0 + $0x48c] sm:$0xf0]  ;;  %v7080_v60 = vld [vmem:[%s15370_s0 + $0x30] sm:$0xf0]  ;;  %v7227_v61 = vor.u32 %v10339_v48, %v7224_v49 }
  0x42   :  { %v7766_v16 = vld [vmem:[%s15370_s0 + $0x580] sm:$0xf]  ;;  %v10477_v17 = vld [vmem:[%s15370_s0 + $0x58c] sm:$0xf0]  ;;  %v7639_v21 = vor.u32 %v10445_v15, %v7638_v14  ;;  %v10335_v63 = vld [vmem:[%s15370_s0 + $0x124] sm:$0xf] }
  0x43   :  { %1393 = vmatpush.bf16.msrb.mxu3 %v7163_v0  ;;  %v7767_v24 = vor.u32 %v10477_v17, %v7766_v16  ;;  %v7622_v26 = vld [vmem:[%s15370_s0 + $0x460] sm:$0xf]  ;;  %v10441_v27 = vld [vmem:[%s15370_s0 + $0x46c] sm:$0xf0]  ;;  %v7208_v0 = vld [vmem:[%s15370_s0 + $0x130] sm:$0xf0] }
  0x44   :  { %1405 = vmatpush.bf16.msra.mxu2 %v7307_v59  ;;  %1355 = vmatpush.bf16.msrb.mxu0 %v7655_v9  ;;  %v7750_v28 = vld [vmem:[%s15370_s0 + $0x560] sm:$0xf]  ;;  %v10473_v29 = vld [vmem:[%s15370_s0 + $0x56c] sm:$0xf0]  ;;  %v7623_v34 = vor.u32 %v10441_v27, %v7622_v26  ;;  %v10303_v59 = vld [vmem:[%s15370_s0 + $0x24] sm:$0xf]  ;;  %v7211_v14 = vor.u32 %v10335_v63, %v7208_v0 }
  0x45   :  { %1368 = vmatpush.bf16.msrb.mxu1 %v7783_v12  ;;  %v103_v32 = vld [vmem:[%s15371_s4 + $0x30] sm:$0xff]  ;;  %v7751_v37 = vor.u32 %v10473_v29, %v7750_v28  ;;  %v7606_v39 = vld [vmem:[%s15370_s0 + $0x440] sm:$0xf]  ;;  %v7083_v3 = vor.u32 %v10303_v59, %v7080_v60  ;;  %v10391_v10 = vld [vmem:[%s15370_s0 + $0x2e4] sm:$0xf] }
  0x46   :  { %v10437_v40 = vld [vmem:[%s15370_s0 + $0x44c] sm:$0xf0]  ;;  %v7734_v41 = vld [vmem:[%s15370_s0 + $0x540] sm:$0xf]  ;;  %v11748_v45 = vpack.c.bf16 %v103_v32, %v103_v32  ;;  %v7064_v9 = vld [vmem:[%s15370_s0 + $0x10] sm:$0xf0] }
  0x47   :  { %1394 = vmatpush.bf16.msrb.mxu3 %v7147_v13  ;;  %v10469_v42 = vld [vmem:[%s15370_s0 + $0x54c] sm:$0xf0]  ;;  %v7607_v47 = vor.u32 %v10437_v40, %v7606_v39  ;;  %v7590_v53 = vld [vmem:[%s15370_s0 + $0x420] sm:$0xf]  ;;  %v7432_v11 = vld [vmem:[%s15370_s0 + $0x2f0] sm:$0xf0] }
  0x48   :  { %1406 = vmatpush.bf16.msra.mxu2 %v7291_v8  ;;  %1356 = vmatpush.bf16.msrb.mxu0 %v7639_v21  ;;  %v7735_v50 = vor.u32 %v10469_v42, %v7734_v41  ;;  %v10433_v54 = vld [vmem:[%s15370_s0 + $0x42c] sm:$0xf0]  ;;  %v7718_v56 = vld [vmem:[%s15370_s0 + $0x520] sm:$0xf]  ;;  %v10299_v8 = vld [vmem:[%s15370_s0 + $0x4] sm:$0xf] }
  0x49   :  { %1369 = vmatpush.bf16.msrb.mxu1 %v7767_v24  ;;  %v10465_v58 = vld [vmem:[%s15370_s0 + $0x52c] sm:$0xf0]  ;;  %v7591_v62 = vor.u32 %v10433_v54, %v7590_v53  ;;  %v7574_v1 = vld [vmem:[%s15370_s0 + $0x400] sm:$0xf]  ;;  %v10423_v12 = vld [vmem:[%s15370_s0 + $0x3e4] sm:$0xf]  ;;  %v7435_v24 = vor.u32 %v10391_v10, %v7432_v11 }
  0x4a   :  { %v7719_v2 = vor.u32 %v10465_v58, %v7718_v56  ;;  %v10429_v4 = vld [vmem:[%s15370_s0 + $0x40c] sm:$0xf0]  ;;  %v7702_v5 = vld [vmem:[%s15370_s0 + $0x500] sm:$0xf]  ;;  %v7560_v13 = vld [vmem:[%s15370_s0 + $0x3f0] sm:$0xf0] }
  0x4b   :  { %1395 = vmatpush.bf16.msrb.mxu3 %v7131_v25  ;;  %v10461_v6 = vld [vmem:[%s15370_s0 + $0x50c] sm:$0xf0]  ;;  %v7575_v15 = vor.u32 %v10429_v4, %v7574_v1  ;;  %v10455_v16 = vld [vmem:[%s15370_s0 + $0x4e4] sm:$0xf]  ;;  %v7688_v17 = vld [vmem:[%s15370_s0 + $0x4f0] sm:$0xf0]  ;;  %v7563_v25 = vor.u32 %v10423_v12, %v7560_v13 }
  0x4c   :  { %1407 = vmatpush.bf16.msra.mxu2 %v7275_v20  ;;  %1357 = vmatpush.bf16.msrb.mxu0 %v7623_v34  ;;  %v101_v18 = vld [vmem:[%s15371_s4 + $0x20] sm:$0xff]  ;;  %v7703_v19 = vor.u32 %v10461_v6, %v7702_v5  ;;  %v7067_v20 = vor.u32 %v10299_v8, %v7064_v9  ;;  %v7192_v22 = vld [vmem:[%s15370_s0 + $0x110] sm:$0xf0]  ;;  %v102_v23 = vld [vmem:[%s15371_s4 + $0x28] sm:$0xff]  ;;  %v7691_v29 = vor.u32 %v10455_v16, %v7688_v17 }
  0x4d   :  { %1370 = vmatpush.bf16.msrb.mxu1 %v7751_v37  ;;  %v10331_v21 = vld [vmem:[%s15370_s0 + $0x104] sm:$0xf]  ;;  %v7816_v27 = vld [vmem:[%s15370_s0 + $0x5f0] sm:$0xf0]  ;;  %v11839_v30 = vpack.c.bf16 %v101_v18, %v101_v18  ;;  %v11850_v35 = vpack.c.bf16 %v102_v23, %v102_v23 }
  0x4e   :  { %7844 = vmatmul.msk.bf16.vlgmr.msrb.gmra.mxu2 %vm1297_vm0, %v11748_v45  ;;  %v10487_v26 = vld [vmem:[%s15370_s0 + $0x5e4] sm:$0xf]  ;;  %v7416_v31 = vld [vmem:[%s15370_s0 + $0x2d0] sm:$0xf0]  ;;  %v7195_v34 = vor.u32 %v10331_v21, %v7192_v22 }
  0x4f   :  { %1396 = vmatpush.bf16.msrb.mxu3 %v7115_v38  ;;  %v10387_v28 = vld [vmem:[%s15370_s0 + $0x2c4] sm:$0xf]  ;;  %v7672_v37 = vld [vmem:[%s15370_s0 + $0x4d0] sm:$0xf0]  ;;  %v7819_v38 = vor.u32 %v10487_v26, %v7816_v27 }
  0x50   :  { %1408 = vmatpush.bf16.msra.mxu2 %v7259_v33  ;;  %1358 = vmatpush.bf16.msrb.mxu0 %v7607_v47  ;;  %v10419_v32 = vld [vmem:[%s15370_s0 + $0x3c4] sm:$0xf]  ;;  %v7544_v33 = vld [vmem:[%s15370_s0 + $0x3d0] sm:$0xf0]  ;;  %v7419_v39 = vor.u32 %v10387_v28, %v7416_v31 }
  0x51   :  { %1371 = vmatpush.bf16.msrb.mxu1 %v7735_v50  ;;  %v10451_v36 = vld [vmem:[%s15370_s0 + $0x4c4] sm:$0xf]  ;;  %v7547_v40 = vor.u32 %v10419_v32, %v7544_v33  ;;  %v7800_v42 = vld [vmem:[%s15370_s0 + $0x5d0] sm:$0xf0] }
  0x52   :  { %v10483_v41 = vld [vmem:[%s15370_s0 + $0x5c4] sm:$0xf]  ;;  %v7675_v44 = vor.u32 %v10451_v36, %v7672_v37  ;;  %v7528_v48 = vld [vmem:[%s15370_s0 + $0x3b0] sm:$0xf0] }
  0x53   :  { %1397 = vmatpush.bf16.msrb.mxu3 %v7099_v52  ;;  %v10383_v43 = vld [vmem:[%s15370_s0 + $0x2a4] sm:$0xf]  ;;  %v7656_v50 = vld [vmem:[%s15370_s0 + $0x4b0] sm:$0xf0]  ;;  %v7803_v52 = vor.u32 %v10483_v41, %v7800_v42 }
  0x54   :  { %1409 = vmatpush.bf16.msra.mxu2 %v7243_v46  ;;  %1359 = vmatpush.bf16.msrb.mxu0 %v7591_v62  ;;  %v7400_v46 = vld [vmem:[%s15370_s0 + $0x2b0] sm:$0xf0]  ;;  %v10415_v47 = vld [vmem:[%s15370_s0 + $0x3a4] sm:$0xf] }
  0x55   :  { %1372 = vmatpush.bf16.msrb.mxu1 %v7719_v2  ;;  %v10447_v49 = vld [vmem:[%s15370_s0 + $0x4a4] sm:$0xf]  ;;  %v7403_v53 = vor.u32 %v10383_v43, %v7400_v46  ;;  %v7531_v54 = vor.u32 %v10415_v47, %v7528_v48  ;;  %v7784_v58 = vld [vmem:[%s15370_s0 + $0x5b0] sm:$0xf0] }
  0x56   :  { %v10479_v56 = vld [vmem:[%s15370_s0 + $0x5a4] sm:$0xf]  ;;  %v7659_v60 = vor.u32 %v10447_v49, %v7656_v50  ;;  %v7512_v63 = vld [vmem:[%s15370_s0 + $0x390] sm:$0xf0] }
  0x57   :  { %1398 = vmatpush.bf16.msrb.mxu3 %v7083_v3  ;;  %v10379_v59 = vld [vmem:[%s15370_s0 + $0x284] sm:$0xf]  ;;  %v7640_v1 = vld [vmem:[%s15370_s0 + $0x490] sm:$0xf0]  ;;  %v7787_v2 = vor.u32 %v10479_v56, %v7784_v58  ;;  %v7182_v56 = vld [vmem:[%s15370_s0 + $0xe8] sm:$0xf] }
  0x58   :  { %1410 = vmatpush.bf16.msra.mxu2 %v7227_v61  ;;  %1360 = vmatpush.bf16.msrb.mxu0 %v7575_v15  ;;  %v7384_v61 = vld [vmem:[%s15370_s0 + $0x290] sm:$0xf0]  ;;  %v10411_v62 = vld [vmem:[%s15370_s0 + $0x384] sm:$0xf]  ;;  %v10330_v58 = vld [vmem:[%s15370_s0 + $0xf4] sm:$0xf0] }
  0x59   :  { %1373 = vmatpush.bf16.msrb.mxu1 %v7703_v19  ;;  %v10443_v0 = vld [vmem:[%s15370_s0 + $0x484] sm:$0xf]  ;;  %v7387_v3 = vor.u32 %v10379_v59, %v7384_v61  ;;  %v7515_v4 = vor.u32 %v10411_v62, %v7512_v63  ;;  %v7768_v6 = vld [vmem:[%s15370_s0 + $0x590] sm:$0xf0]  ;;  %v7310_v59 = vld [vmem:[%s15370_s0 + $0x1e8] sm:$0xf] }
  0x5a   :  { %v10475_v5 = vld [vmem:[%s15370_s0 + $0x584] sm:$0xf]  ;;  %v7643_v9 = vor.u32 %v10443_v0, %v7640_v1  ;;  %v7368_v10 = vld [vmem:[%s15370_s0 + $0x270] sm:$0xf0]  ;;  %v10362_v61 = vld [vmem:[%s15370_s0 + $0x1f4] sm:$0xf0] }
  0x5b   :  { %1399 = vmatpush.bf16.msrb.mxu3 %v7067_v20  ;;  %1361 = vmatmul.bf16.vlgmr.msrb.gmra.mxu0 %v11839_v30  ;;  %v10375_v8 = vld [vmem:[%s15370_s0 + $0x264] sm:$0xf]  ;;  %v7496_v12 = vld [vmem:[%s15370_s0 + $0x370] sm:$0xf0]  ;;  %v7771_v15 = vor.u32 %v10475_v5, %v7768_v6  ;;  %v7183_v6 = vor.u32 %v10330_v58, %v7182_v56  ;;  %v10314_v56 = vld [vmem:[%s15370_s0 + $0x74] sm:$0xf0] }
  0x5c   :  { %1411 = vmatpush.bf16.msra.mxu2 %v7211_v14  ;;  %1418 = vmatpush.bf16.msra.mxu0 %v7435_v24  ;;  %v10407_v11 = vld [vmem:[%s15370_s0 + $0x364] sm:$0xf]  ;;  %v7624_v14 = vld [vmem:[%s15370_s0 + $0x470] sm:$0xf0]  ;;  %v7371_v16 = vor.u32 %v10375_v8, %v7368_v10  ;;  %v10394_v8 = vld [vmem:[%s15370_s0 + $0x2f4] sm:$0xf0] }
  0x5d   :  { %1431 = vmatpush.bf16.msra.mxu1 %v7563_v25  ;;  %v10439_v13 = vld [vmem:[%s15370_s0 + $0x464] sm:$0xf]  ;;  %v7499_v17 = vor.u32 %v10407_v11, %v7496_v12  ;;  %v7752_v19 = vld [vmem:[%s15370_s0 + $0x570] sm:$0xf0]  ;;  %v10426_v10 = vld [vmem:[%s15370_s0 + $0x3f4] sm:$0xf0]  ;;  %v7311_v11 = vor.u32 %v10362_v61, %v7310_v59 }
  0x5e   :  { %1374 = vmatmul.bf16.vlgmr.msrb.gmra.mxu1 %v11850_v35  ;;  %1400 = vmatmul.bf16.vlgmr.msrb.gmra.mxu3 %v11636_v55  ;;  %v10471_v18 = vld [vmem:[%s15370_s0 + $0x564] sm:$0xf]  ;;  %v7627_v21 = vor.u32 %v10439_v13, %v7624_v14  ;;  %v7352_v22 = vld [vmem:[%s15370_s0 + $0x250] sm:$0xf0]  ;;  %v7166_v13 = vld [vmem:[%s15370_s0 + $0xc8] sm:$0xf] }
  0x5f   :  { %1444 = vmatpush.bf16.msra.mxu3 %v7691_v29  ;;  %v10371_v20 = vld [vmem:[%s15370_s0 + $0x244] sm:$0xf]  ;;  %v7480_v24 = vld [vmem:[%s15370_s0 + $0x350] sm:$0xf0]  ;;  %v7755_v27 = vor.u32 %v10471_v18, %v7752_v19  ;;  %v10326_v14 = vld [vmem:[%s15370_s0 + $0xd4] sm:$0xf0] }
  0x60   :  { %1412 = vmatpush.bf16.msra.mxu2 %v7195_v34  ;;  %1419 = vmatpush.bf16.msra.mxu0 %v7419_v39  ;;  %v10403_v23 = vld [vmem:[%s15370_s0 + $0x344] sm:$0xf]  ;;  %v7608_v26 = vld [vmem:[%s15370_s0 + $0x450] sm:$0xf0]  ;;  %v7355_v28 = vor.u32 %v10371_v20, %v7352_v22  ;;  %v7422_v20 = vld [vmem:[%s15370_s0 + $0x2c8] sm:$0xf] }
  0x61   :  { %1432 = vmatpush.bf16.msra.mxu1 %v7547_v40  ;;  %v10435_v25 = vld [vmem:[%s15370_s0 + $0x444] sm:$0xf]  ;;  %v7483_v29 = vor.u32 %v10403_v23, %v7480_v24  ;;  %v7736_v32 = vld [vmem:[%s15370_s0 + $0x550] sm:$0xf0]  ;;  %v10390_v22 = vld [vmem:[%s15370_s0 + $0x2d4] sm:$0xf0] }
  0x62   :  { %v10467_v31 = vld [vmem:[%s15370_s0 + $0x544] sm:$0xf]  ;;  %v7611_v34 = vor.u32 %v10435_v25, %v7608_v26  ;;  %v7336_v36 = vld [vmem:[%s15370_s0 + $0x230] sm:$0xf0]  ;;  %v7550_v23 = vld [vmem:[%s15370_s0 + $0x3c8] sm:$0xf] }
  0x63   :  { %1445 = vmatpush.bf16.msra.mxu3 %v7675_v44  ;;  %1413 = vmatmul.bf16.vlgmr.msra.gmra.mxu2 %v11669_v7  ;;  %v10367_v33 = vld [vmem:[%s15370_s0 + $0x224] sm:$0xf]  ;;  %v7592_v40 = vld [vmem:[%s15370_s0 + $0x430] sm:$0xf0]  ;;  %v7739_v41 = vor.u32 %v10467_v31, %v7736_v32  ;;  %v10422_v24 = vld [vmem:[%s15370_s0 + $0x3d4] sm:$0xf0]  ;;  %v7423_v31 = vor.u32 %v10390_v22, %v7422_v20 }
  0x64   :  { %1457 = vmatpush.bf16.msrb.mxu2 %v7819_v38  ;;  %1420 = vmatpush.bf16.msra.mxu0 %v7403_v53  ;;  %v10399_v37 = vld [vmem:[%s15370_s0 + $0x324] sm:$0xf]  ;;  %v7464_v38 = vld [vmem:[%s15370_s0 + $0x330] sm:$0xf0]  ;;  %v7339_v44 = vor.u32 %v10367_v33, %v7336_v36  ;;  %v7150_v26 = vld [vmem:[%s15370_s0 + $0xa8] sm:$0xf]  ;;  %v7551_v32 = vor.u32 %v10422_v24, %v7550_v23 }
  0x65   :  { %1433 = vmatpush.bf16.msra.mxu1 %v7531_v54  ;;  %v10431_v39 = vld [vmem:[%s15370_s0 + $0x424] sm:$0xf]  ;;  %v7720_v43 = vld [vmem:[%s15370_s0 + $0x530] sm:$0xf0]  ;;  %v7467_v46 = vor.u32 %v10399_v37, %v7464_v38  ;;  %v7406_v33 = vld [vmem:[%s15370_s0 + $0x2a8] sm:$0xf] }
  0x66   :  { %v10463_v42 = vld [vmem:[%s15370_s0 + $0x524] sm:$0xf]  ;;  %v7320_v48 = vld [vmem:[%s15370_s0 + $0x210] sm:$0xf0]  ;;  %v7595_v50 = vor.u32 %v10431_v39, %v7592_v40  ;;  %v10386_v36 = vld [vmem:[%s15370_s0 + $0x2b4] sm:$0xf0] }
  0x67   :  { %1446 = vmatpush.bf16.msra.mxu3 %v7659_v60  ;;  %v10363_v47 = vld [vmem:[%s15370_s0 + $0x204] sm:$0xf]  ;;  %v7576_v54 = vld [vmem:[%s15370_s0 + $0x410] sm:$0xf0]  ;;  %v7723_v60 = vor.u32 %v10463_v42, %v7720_v43  ;;  %v7534_v37 = vld [vmem:[%s15370_s0 + $0x3a8] sm:$0xf] }
  0x68   :  { %1458 = vmatpush.bf16.msrb.mxu2 %v7803_v52  ;;  %1421 = vmatpush.bf16.msra.mxu0 %v7387_v3  ;;  %v10395_v49 = vld [vmem:[%s15370_s0 + $0x304] sm:$0xf]  ;;  %v7448_v52 = vld [vmem:[%s15370_s0 + $0x310] sm:$0xf0]  ;;  %v7323_v0 = vor.u32 %v10363_v47, %v7320_v48  ;;  %v10418_v38 = vld [vmem:[%s15370_s0 + $0x3b4] sm:$0xf0] }
  0x69   :  { %1434 = vmatpush.bf16.msra.mxu1 %v7515_v4  ;;  %v10427_v53 = vld [vmem:[%s15370_s0 + $0x404] sm:$0xf]  ;;  %v7832_v63 = vld [vmem:[%s15370_s0 + $0x610] sm:$0xf0]  ;;  %v7451_v1 = vor.u32 %v10395_v49, %v7448_v52  ;;  %v7438_v4 = vld [vmem:[%s15370_s0 + $0x2e8] sm:$0xf] }
  0x6a   :  { %v10491_v62 = vld [vmem:[%s15370_s0 + $0x604] sm:$0xf]  ;;  %v7704_v3 = vld [vmem:[%s15370_s0 + $0x510] sm:$0xf0]  ;;  %v7579_v5 = vor.u32 %v10427_v53, %v7576_v54  ;;  %v7439_v18 = vor.u32 %v10394_v8, %v7438_v4  ;;  %v7134_v40 = vld [vmem:[%s15370_s0 + $0x88] sm:$0xf] }
  0x6b   :  { %1447 = vmatpush.bf16.msra.mxu3 %v7643_v9  ;;  %v7566_v9 = vld [vmem:[%s15370_s0 + $0x3e8] sm:$0xf]  ;;  %v7835_v12 = vor.u32 %v10491_v62, %v7832_v63  ;;  %v10350_v43 = vld [vmem:[%s15370_s0 + $0x194] sm:$0xf0] }
  0x6c   :  { %1459 = vmatpush.bf16.msrb.mxu2 %v7787_v2  ;;  %1422 = vmatpush.bf16.msra.mxu0 %v7371_v16  ;;  %v10459_v2 = vld [vmem:[%s15370_s0 + $0x504] sm:$0xf]  ;;  %v7294_v16 = vld [vmem:[%s15370_s0 + $0x1c8] sm:$0xf]  ;;  %v7567_v19 = vor.u32 %v10426_v10, %v7566_v9  ;;  %v10382_v49 = vld [vmem:[%s15370_s0 + $0x294] sm:$0xf0] }
  0x6d   :  { %1435 = vmatpush.bf16.msra.mxu1 %v7499_v17  ;;  %v10358_v17 = vld [vmem:[%s15370_s0 + $0x1d4] sm:$0xf0]  ;;  %v7262_v42 = vld [vmem:[%s15370_s0 + $0x188] sm:$0xf] }
  0x6e   :  { %v7295_v25 = vor.u32 %v10358_v17, %v7294_v16  ;;  %v7390_v47 = vld [vmem:[%s15370_s0 + $0x288] sm:$0xf]  ;;  %v10414_v52 = vld [vmem:[%s15370_s0 + $0x394] sm:$0xf0]  ;;  %v7263_v53 = vor.u32 %v10350_v43, %v7262_v42 }
  0x6f   :  { %1448 = vmatpush.bf16.msra.mxu3 %v7627_v21  ;;  %v7167_v21 = vor.u32 %v10326_v14, %v7166_v13  ;;  %v7118_v54 = vld [vmem:[%s15370_s0 + $0x68] sm:$0xf]  ;;  %v10346_v59 = vld [vmem:[%s15370_s0 + $0x174] sm:$0xf0] }
  0x70   :  { %1460 = vmatpush.bf16.msrb.mxu2 %v7771_v15  ;;  %1423 = vmatpush.bf16.msra.mxu0 %v7355_v28  ;;  %v7707_v15 = vor.u32 %v10459_v2, %v7704_v3  ;;  %v7278_v28 = vld [vmem:[%s15370_s0 + $0x1a8] sm:$0xf]  ;;  %v7119_v63 = vor.u32 %v10314_v56, %v7118_v54  ;;  %v10410_v2 = vld [vmem:[%s15370_s0 + $0x374] sm:$0xf0] }
  0x71   :  { %1436 = vmatpush.bf16.msra.mxu1 %v7483_v29  ;;  %v10354_v29 = vld [vmem:[%s15370_s0 + $0x1b4] sm:$0xf0]  ;;  %v7246_v58 = vld [vmem:[%s15370_s0 + $0x168] sm:$0xf] }
  0x72   :  { %v7279_v39 = vor.u32 %v10354_v29, %v7278_v28  ;;  %v7374_v62 = vld [vmem:[%s15370_s0 + $0x268] sm:$0xf]  ;;  %v7247_v3 = vor.u32 %v10346_v59, %v7246_v58  ;;  %v10342_v8 = vld [vmem:[%s15370_s0 + $0x154] sm:$0xf0] }
  0x73   :  { %1449 = vmatpush.bf16.msra.mxu3 %v7611_v34  ;;  %v7102_v4 = vld [vmem:[%s15370_s0 + $0x48] sm:$0xf]  ;;  %v10374_v13 = vld [vmem:[%s15370_s0 + $0x254] sm:$0xf0] }
  0x74   :  { %1461 = vmatpush.bf16.msrb.mxu2 %v7755_v27  ;;  %1424 = vmatpush.bf16.msra.mxu0 %v7339_v44  ;;  %v10322_v27 = vld [vmem:[%s15370_s0 + $0xb4] sm:$0xf0]  ;;  %v7407_v44 = vor.u32 %v10386_v36, %v7406_v33  ;;  %v7486_v14 = vld [vmem:[%s15370_s0 + $0x348] sm:$0xf] }
  0x75   :  { %1437 = vmatpush.bf16.msra.mxu1 %v7467_v46  ;;  %v7151_v34 = vor.u32 %v10322_v27, %v7150_v26  ;;  %v7535_v46 = vor.u32 %v10418_v38, %v7534_v37  ;;  %v7086_v17 = vld [vmem:[%s15370_s0 + $0x28] sm:$0xf]  ;;  %v10338_v20 = vld [vmem:[%s15370_s0 + $0x134] sm:$0xf0] }
  0x76   :  { %v7342_v23 = vld [vmem:[%s15370_s0 + $0x228] sm:$0xf]  ;;  %v10370_v24 = vld [vmem:[%s15370_s0 + $0x234] sm:$0xf0] }
  0x77   :  { %1450 = vmatpush.bf16.msra.mxu3 %v7595_v50  ;;  %v7518_v50 = vld [vmem:[%s15370_s0 + $0x388] sm:$0xf]  ;;  %v10402_v27 = vld [vmem:[%s15370_s0 + $0x334] sm:$0xf0]  ;;  %v7343_v38 = vor.u32 %v10370_v24, %v7342_v23 }
  0x78   :  { %1462 = vmatpush.bf16.msrb.mxu2 %v7739_v41  ;;  %1425 = vmatpush.bf16.msra.mxu0 %v7323_v0  ;;  %v10318_v41 = vld [vmem:[%s15370_s0 + $0x94] sm:$0xf0]  ;;  %v7519_v61 = vor.u32 %v10414_v52, %v7518_v50  ;;  %v7470_v26 = vld [vmem:[%s15370_s0 + $0x328] sm:$0xf]  ;;  %v7184_v50 = vld [vmem:[%s15370_s0 + $0xf8] sm:$0xf0] }
  0x79   :  { %1438 = vmatpush.bf16.msra.mxu1 %v7451_v1  ;;  %v7135_v48 = vor.u32 %v10318_v41, %v7134_v40  ;;  %v10378_v0 = vld [vmem:[%s15370_s0 + $0x274] sm:$0xf0]  ;;  %v7502_v1 = vld [vmem:[%s15370_s0 + $0x368] sm:$0xf] }
  0x7a   :  { %v7375_v9 = vor.u32 %v10378_v0, %v7374_v62  ;;  %v7503_v10 = vor.u32 %v10410_v2, %v7502_v1  ;;  %v7070_v28 = vld [vmem:[%s15370_s0 + $0x8] sm:$0xf]  ;;  %v10334_v33 = vld [vmem:[%s15370_s0 + $0x114] sm:$0xf0]  ;;  %v10360_v1 = vld [vmem:[%s15370_s0 + $0x1ec] sm:$0xf] }
  0x7b   :  { %1451 = vmatpush.bf16.msra.mxu3 %v7579_v5  ;;  %1426 = vmatmul.bf16.vlgmr.msra.gmra.mxu0 %v11625_v51  ;;  %v10310_v5 = vld [vmem:[%s15370_s0 + $0x54] sm:$0xf0]  ;;  %v7822_v37 = vld [vmem:[%s15370_s0 + $0x5e8] sm:$0xf]  ;;  %v7312_v2 = vld [vmem:[%s15370_s0 + $0x1f8] sm:$0xf0] }
  0x7c   :  { %1463 = vmatpush.bf16.msrb.mxu2 %v7723_v60  ;;  %1477 = vmatpush.bf16.msrb.mxu0 %v7835_v12  ;;  %v7391_v60 = vor.u32 %v10382_v49, %v7390_v47  ;;  %v7103_v12 = vor.u32 %v10310_v5, %v7102_v4  ;;  %v10458_v36 = vld [vmem:[%s15370_s0 + $0x4f4] sm:$0xf0]  ;;  %v7326_v41 = vld [vmem:[%s15370_s0 + $0x208] sm:$0xf]  ;;  %v10328_v47 = vld [vmem:[%s15370_s0 + $0xec] sm:$0xf] }
  0x7d   :  { %1483 = vmatpush.bf16.msrb.mxu1 %v7183_v6  ;;  %v7230_v6 = vld [vmem:[%s15370_s0 + $0x148] sm:$0xf]  ;;  %v10490_v40 = vld [vmem:[%s15370_s0 + $0x5f4] sm:$0xf0]  ;;  %v10324_v4 = vld [vmem:[%s15370_s0 + $0xcc] sm:$0xf] }
  0x7e   :  { %1452 = vmatmul.bf16.vlgmr.msra.gmra.mxu3 %v11839_v30  ;;  %1439 = vmatmul.bf16.vlgmr.msra.gmra.mxu1 %v11638_v57  ;;  %v7231_v16 = vor.u32 %v10342_v8, %v7230_v6  ;;  %v10366_v42 = vld [vmem:[%s15370_s0 + $0x214] sm:$0xf0]  ;;  %v7838_v52 = vld [vmem:[%s15370_s0 + $0x608] sm:$0xf]  ;;  %v7823_v54 = vor.u32 %v10490_v40, %v7822_v37  ;;  %v7168_v5 = vld [vmem:[%s15370_s0 + $0xd8] sm:$0xf0] }
  0x7f   :  { %1496 = vmatpush.bf16.msrb.mxu3 %v7311_v11  ;;  %v7358_v11 = vld [vmem:[%s15370_s0 + $0x248] sm:$0xf]  ;;  %v10454_v58 = vld [vmem:[%s15370_s0 + $0x4d4] sm:$0xf0]  ;;  %v7327_v59 = vor.u32 %v10366_v42, %v7326_v41  ;;  %v10348_v40 = vld [vmem:[%s15370_s0 + $0x18c] sm:$0xf] }
  0x80   :  { %1464 = vmatpush.bf16.msrb.mxu2 %v7707_v15  ;;  %1509 = vmatpush.bf16.msra.mxu0 %v7439_v18  ;;  %v10406_v15 = vld [vmem:[%s15370_s0 + $0x354] sm:$0xf0]  ;;  %v7678_v56 = vld [vmem:[%s15370_s0 + $0x4c8] sm:$0xf]  ;;  %v7264_v41 = vld [vmem:[%s15370_s0 + $0x198] sm:$0xf0] }
  0x81   :  { %1484 = vmatpush.bf16.msrb.mxu1 %v7167_v21  ;;  %v10306_v18 = vld [vmem:[%s15370_s0 + $0x34] sm:$0xf0]  ;;  %v7359_v21 = vor.u32 %v10374_v13, %v7358_v11  ;;  %v7487_v22 = vor.u32 %v10406_v15, %v7486_v14  ;;  %v7662_v8 = vld [vmem:[%s15370_s0 + $0x4a8] sm:$0xf]  ;;  %v7171_v13 = vor.u32 %v10324_v4, %v7168_v5  ;;  %v10356_v14 = vld [vmem:[%s15370_s0 + $0x1cc] sm:$0xf] }
  0x82   :  { %v10486_v62 = vld [vmem:[%s15370_s0 + $0x5d4] sm:$0xf0]  ;;  %v7790_v11 = vld [vmem:[%s15370_s0 + $0x5a8] sm:$0xf]  ;;  %v7296_v15 = vld [vmem:[%s15370_s0 + $0x1d8] sm:$0xf0] }
  0x83   :  { %1497 = vmatpush.bf16.msrb.mxu3 %v7295_v25  ;;  %1465 = vmatmul.bf16.vlgmr.msrb.gmra.mxu2 %v11850_v35  ;;  %v7087_v25 = vor.u32 %v10306_v18, %v7086_v17  ;;  %v10320_v17 = vld [vmem:[%s15370_s0 + $0xac] sm:$0xf]  ;;  %v7152_v18 = vld [vmem:[%s15370_s0 + $0xb8] sm:$0xf0]  ;;  %v7774_v23 = vld [vmem:[%s15370_s0 + $0x588] sm:$0xf] }
  0x84   :  { %1522 = vmatpush.bf16.msra.mxu2 %v7567_v19  ;;  %1510 = vmatpush.bf16.msra.mxu0 %v7423_v31  ;;  %v7214_v19 = vld [vmem:[%s15370_s0 + $0x128] sm:$0xf]  ;;  %v10302_v31 = vld [vmem:[%s15370_s0 + $0x14] sm:$0xf0]  ;;  %v10340_v4 = vld [vmem:[%s15370_s0 + $0x14c] sm:$0xf] }
  0x85   :  { %1485 = vmatpush.bf16.msrb.mxu1 %v7151_v34  ;;  %v7215_v29 = vor.u32 %v10338_v20, %v7214_v19  ;;  %v7694_v34 = vld [vmem:[%s15370_s0 + $0x4e8] sm:$0xf]  ;;  %v7071_v43 = vor.u32 %v10302_v31, %v7070_v28  ;;  %v10478_v24 = vld [vmem:[%s15370_s0 + $0x594] sm:$0xf0]  ;;  %v7136_v31 = vld [vmem:[%s15370_s0 + $0x98] sm:$0xf0] }
  0x86   :  { %v7695_v49 = vor.u32 %v10458_v36, %v7694_v34  ;;  %v7646_v20 = vld [vmem:[%s15370_s0 + $0x488] sm:$0xf]  ;;  %v10442_v34 = vld [vmem:[%s15370_s0 + $0x474] sm:$0xf0]  ;;  %v7232_v5 = vld [vmem:[%s15370_s0 + $0x158] sm:$0xf0] }
  0x87   :  { %1498 = vmatpush.bf16.msrb.mxu3 %v7279_v39  ;;  %v7471_v39 = vor.u32 %v10402_v27, %v7470_v26  ;;  %v10352_v26 = vld [vmem:[%s15370_s0 + $0x1ac] sm:$0xf]  ;;  %v7280_v27 = vld [vmem:[%s15370_s0 + $0x1b8] sm:$0xf0]  ;;  %v7758_v37 = vld [vmem:[%s15370_s0 + $0x568] sm:$0xf] }
  0x88   :  { %1523 = vmatpush.bf16.msra.mxu2 %v7551_v32  ;;  %1511 = vmatpush.bf16.msra.mxu0 %v7407_v44  ;;  %v7198_v32 = vld [vmem:[%s15370_s0 + $0x108] sm:$0xf]  ;;  %v7283_v36 = vor.u32 %v10352_v26, %v7280_v27 }
  0x89   :  { %1486 = vmatpush.bf16.msrb.mxu1 %v7135_v48  ;;  %v7454_v44 = vld [vmem:[%s15370_s0 + $0x308] sm:$0xf]  ;;  %v7199_v48 = vor.u32 %v10334_v33, %v7198_v32  ;;  %v7775_v32 = vor.u32 %v10478_v24, %v7774_v23  ;;  %v10300_v24 = vld [vmem:[%s15370_s0 + $0xc] sm:$0xf] }
  0x8a   :  { %v7630_v33 = vld [vmem:[%s15370_s0 + $0x468] sm:$0xf] }
  0x8b   :  { %1499 = vmatpush.bf16.msrb.mxu3 %v7263_v53  ;;  %7845 = vmatmul.msk.bf16.vlgmr.msrb.gmra.mxu0 %vm1297_vm0, %v11748_v45  ;;  %v10494_v53 = vld [vmem:[%s15370_s0 + $0x614] sm:$0xf0]  ;;  %v7631_v42 = vor.u32 %v10442_v34, %v7630_v33  ;;  %v10388_v33 = vld [vmem:[%s15370_s0 + $0x2cc] sm:$0xf]  ;;  %v7424_v34 = vld [vmem:[%s15370_s0 + $0x2d8] sm:$0xf0] }
  0x8c   :  { %1524 = vmatpush.bf16.msra.mxu2 %v7535_v46  ;;  %1512 = vmatpush.bf16.msra.mxu0 %v7391_v60  ;;  %v10398_v46 = vld [vmem:[%s15370_s0 + $0x314] sm:$0xf0]  ;;  %v7839_v0 = vor.u32 %v10494_v53, %v7838_v52 }
  0x8d   :  { %1487 = vmatpush.bf16.msrb.mxu1 %v7119_v63  ;;  %v7455_v60 = vor.u32 %v10398_v46, %v7454_v44  ;;  %v7187_v63 = vor.u32 %v10328_v47, %v7184_v50  ;;  %v7120_v44 = vld [vmem:[%s15370_s0 + $0x78] sm:$0xf0]  ;;  %v7614_v47 = vld [vmem:[%s15370_s0 + $0x448] sm:$0xf]  ;;  %v10470_v52 = vld [vmem:[%s15370_s0 + $0x554] sm:$0xf0] }
  0x8e   :  { %v7742_v50 = vld [vmem:[%s15370_s0 + $0x548] sm:$0xf] }
  0x8f   :  { %1500 = vmatpush.bf16.msrb.mxu3 %v7247_v3  ;;  %v7679_v3 = vor.u32 %v10454_v58, %v7678_v56  ;;  %v7248_v56 = vld [vmem:[%s15370_s0 + $0x178] sm:$0xf0] }
  0x90   :  { %1525 = vmatpush.bf16.msra.mxu2 %v7519_v61  ;;  %1513 = vmatpush.bf16.msra.mxu0 %v7375_v9  ;;  %v7806_v61 = vld [vmem:[%s15370_s0 + $0x5c8] sm:$0xf]  ;;  %v10450_v9 = vld [vmem:[%s15370_s0 + $0x4b4] sm:$0xf0] }
  0x91   :  { %1488 = vmatpush.bf16.msrb.mxu1 %v7103_v12  ;;  %v7807_v6 = vor.u32 %v10486_v62, %v7806_v61  ;;  %v10482_v12 = vld [vmem:[%s15370_s0 + $0x5b4] sm:$0xf0]  ;;  %v7743_v61 = vor.u32 %v10470_v52, %v7742_v50  ;;  %v7598_v62 = vld [vmem:[%s15370_s0 + $0x428] sm:$0xf]  ;;  %v10384_v50 = vld [vmem:[%s15370_s0 + $0x2ac] sm:$0xf] }
  0x92   :  { %v7791_v19 = vor.u32 %v10482_v12, %v7790_v11  ;;  %v10430_v12 = vld [vmem:[%s15370_s0 + $0x414] sm:$0xf0]  ;;  %v7408_v52 = vld [vmem:[%s15370_s0 + $0x2b8] sm:$0xf0] }
  0x93   :  { %1501 = vmatpush.bf16.msrb.mxu3 %v7231_v16  ;;  %v7663_v16 = vor.u32 %v10450_v9, %v7662_v8  ;;  %v10304_v8 = vld [vmem:[%s15370_s0 + $0x2c] sm:$0xf]  ;;  %v7088_v9 = vld [vmem:[%s15370_s0 + $0x38] sm:$0xf0] }
  0x94   :  { %1526 = vmatpush.bf16.msra.mxu2 %v7503_v10  ;;  %1514 = vmatpush.bf16.msra.mxu0 %v7359_v21  ;;  %v7315_v10 = vor.u32 %v10360_v1, %v7312_v2  ;;  %v10446_v21 = vld [vmem:[%s15370_s0 + $0x494] sm:$0xf0]  ;;  %v7726_v1 = vld [vmem:[%s15370_s0 + $0x528] sm:$0xf] }
  0x95   :  { %1489 = vmatpush.bf16.msrb.mxu1 %v7087_v25  ;;  %v7155_v25 = vor.u32 %v10320_v17, %v7152_v18  ;;  %v7647_v28 = vor.u32 %v10446_v21, %v7646_v20  ;;  %v10466_v2 = vld [vmem:[%s15370_s0 + $0x534] sm:$0xf0]  ;;  %v7440_v17 = vld [vmem:[%s15370_s0 + $0x2f8] sm:$0xf0]  ;;  %v10424_v18 = vld [vmem:[%s15370_s0 + $0x3ec] sm:$0xf] }
  0x96   :  { %v7727_v11 = vor.u32 %v10466_v2, %v7726_v1  ;;  %v7568_v20 = vld [vmem:[%s15370_s0 + $0x3f8] sm:$0xf0]  ;;  %v10336_v21 = vld [vmem:[%s15370_s0 + $0x12c] sm:$0xf] }
  0x97   :  { %1502 = vmatpush.bf16.msrb.mxu3 %v7215_v29  ;;  %v10316_v29 = vld [vmem:[%s15370_s0 + $0x8c] sm:$0xf]  ;;  %v7392_v2 = vld [vmem:[%s15370_s0 + $0x298] sm:$0xf0] }
  0x98   :  { %1527 = vmatpush.bf16.msra.mxu2 %v7487_v22  ;;  %1515 = vmatpush.bf16.msra.mxu0 %v7343_v38  ;;  %v7299_v22 = vor.u32 %v10356_v14, %v7296_v15  ;;  %v10474_v38 = vld [vmem:[%s15370_s0 + $0x574] sm:$0xf0]  ;;  %v7235_v15 = vor.u32 %v10340_v4, %v7232_v5  ;;  %v10380_v1 = vld [vmem:[%s15370_s0 + $0x28c] sm:$0xf]  ;;  %v7520_v5 = vld [vmem:[%s15370_s0 + $0x398] sm:$0xf0] }
  0x99   :  { %1490 = vmatpush.bf16.msrb.mxu1 %v7071_v43  ;;  %v10312_v43 = vld [vmem:[%s15370_s0 + $0x6c] sm:$0xf]  ;;  %v7759_v46 = vor.u32 %v10474_v38, %v7758_v37  ;;  %v10462_v14 = vld [vmem:[%s15370_s0 + $0x514] sm:$0xf0]  ;;  %v7552_v38 = vld [vmem:[%s15370_s0 + $0x3d8] sm:$0xf0] }
  0x9a   :  { %v7123_v53 = vor.u32 %v10312_v43, %v7120_v44  ;;  %v7824_v43 = vld [vmem:[%s15370_s0 + $0x5f8] sm:$0xf0]  ;;  %v7427_v44 = vor.u32 %v10388_v33, %v7424_v34  ;;  %v10412_v4 = vld [vmem:[%s15370_s0 + $0x38c] sm:$0xf] }
  0x9b   :  { %1503 = vmatpush.bf16.msrb.mxu3 %v7199_v48  ;;  %v10438_v48 = vld [vmem:[%s15370_s0 + $0x454] sm:$0xf0]  ;;  %v10472_v33 = vld [vmem:[%s15370_s0 + $0x56c] sm:$0xf]  ;;  %v7760_v34 = vld [vmem:[%s15370_s0 + $0x578] sm:$0xf0] }
  0x9c   :  { %1528 = vmatpush.bf16.msra.mxu2 %v7471_v39  ;;  %1516 = vmatpush.bf16.msra.mxu0 %v7327_v59  ;;  %v7139_v39 = vor.u32 %v10316_v29, %v7136_v31  ;;  %v7615_v58 = vor.u32 %v10438_v48, %v7614_v47  ;;  %v10308_v59 = vld [vmem:[%s15370_s0 + $0x4c] sm:$0xf]  ;;  %v7696_v29 = vld [vmem:[%s15370_s0 + $0x4f8] sm:$0xf0]  ;;  %v7571_v31 = vor.u32 %v10424_v18, %v7568_v20 }
  0x9d   :  { %1535 = vmatpush.bf16.msra.mxu1 %v7695_v49  ;;  %v7267_v49 = vor.u32 %v10348_v40, %v7264_v41  ;;  %v7200_v40 = vld [vmem:[%s15370_s0 + $0x118] sm:$0xf0] }
  0x9e   :  { %1504 = vmatmul.bf16.vlgmr.msrb.gmra.mxu3 %v11669_v7  ;;  %1491 = vmatmul.bf16.vlgmr.msrb.gmra.mxu1 %v11636_v55  ;;  %v7680_v47 = vld [vmem:[%s15370_s0 + $0x4d8] sm:$0xf0] }
  0x9f   :  { %1548 = vmatpush.bf16.msra.mxu3 %v7823_v54  ;;  %1517 = vmatmul.bf16.vlgmr.msra.gmra.mxu0 %v11625_v51  ;;  %v10344_v54 = vld [vmem:[%s15370_s0 + $0x16c] sm:$0xf]  ;;  %v7776_v20 = vld [vmem:[%s15370_s0 + $0x598] sm:$0xf0] }
  0xa0   :  { %1529 = vmatpush.bf16.msra.mxu2 %v7455_v60  ;;  %1568 = vmatpush.bf16.msrb.mxu0 %v7839_v0  ;;  %v7104_v60 = vld [vmem:[%s15370_s0 + $0x58] sm:$0xf0]  ;;  %v7251_v0 = vor.u32 %v10344_v54, %v7248_v56  ;;  %v10416_v54 = vld [vmem:[%s15370_s0 + $0x3ac] sm:$0xf] }
  0xa1   :  { %1536 = vmatpush.bf16.msra.mxu1 %v7679_v3  ;;  %v7107_v3 = vor.u32 %v10308_v59, %v7104_v60  ;;  %v7536_v56 = vld [vmem:[%s15370_s0 + $0x3b8] sm:$0xf0]  ;;  %v10484_v59 = vld [vmem:[%s15370_s0 + $0x5cc] sm:$0xf] }
  0xa2   :  { %v7808_v60 = vld [vmem:[%s15370_s0 + $0x5d8] sm:$0xf0] }
  0xa3   :  { %1549 = vmatpush.bf16.msra.mxu3 %v7807_v6  ;;  %1530 = vmatmul.bf16.vlgmr.msra.gmra.mxu2 %v11638_v57 }
  0xa4   :  { %1574 = vmatpush.bf16.msrb.mxu2 %v7187_v63  ;;  %1587 = vmatpush.bf16.msra.mxu0 %v7315_v10  ;;  %v10434_v63 = vld [vmem:[%s15370_s0 + $0x434] sm:$0xf0]  ;;  %v7582_v10 = vld [vmem:[%s15370_s0 + $0x408] sm:$0xf] }
  0xa5   :  { %1537 = vmatpush.bf16.msra.mxu1 %v7663_v16  ;;  %v7599_v6 = vor.u32 %v10434_v63, %v7598_v62  ;;  %v10392_v16 = vld [vmem:[%s15370_s0 + $0x2ec] sm:$0xf]  ;;  %v7583_v23 = vor.u32 %v10430_v12, %v7582_v10  ;;  %v7664_v63 = vld [vmem:[%s15370_s0 + $0x4b8] sm:$0xf0]  ;;  %v7395_v10 = vor.u32 %v10380_v1, %v7392_v2  ;;  %v7523_v12 = vor.u32 %v10412_v4, %v7520_v5  ;;  %v7962_v1 = vld [vmem:[%s15373_s28 + $0xe0] sm:$0xf] }
  0xa6   :  { %v7443_v27 = vor.u32 %v10392_v16, %v7440_v17  ;;  %v10448_v62 = vld [vmem:[%s15370_s0 + $0x4ac] sm:$0xf]  ;;  %v7840_v4 = vld [vmem:[%s15370_s0 + $0x618] sm:$0xf0] }
  0xa7   :  { %1550 = vmatpush.bf16.msra.mxu3 %v7791_v19  ;;  %v7091_v19 = vor.u32 %v10304_v8, %v7088_v9  ;;  %v10480_v8 = vld [vmem:[%s15370_s0 + $0x5ac] sm:$0xf]  ;;  %v7792_v9 = vld [vmem:[%s15370_s0 + $0x5b8] sm:$0xf0] }
  0xa8   :  { %1575 = vmatpush.bf16.msrb.mxu2 %v7171_v13  ;;  %1588 = vmatpush.bf16.msra.mxu0 %v7299_v22  ;;  %v7710_v13 = vld [vmem:[%s15370_s0 + $0x508] sm:$0xf]  ;;  %v7216_v22 = vld [vmem:[%s15370_s0 + $0x138] sm:$0xf0]  ;;  %v10408_v16 = vld [vmem:[%s15370_s0 + $0x36c] sm:$0xf] }
  0xa9   :  { %1538 = vmatpush.bf16.msra.mxu1 %v7647_v28  ;;  %v7711_v26 = vor.u32 %v10462_v14, %v7710_v13  ;;  %v10456_v28 = vld [vmem:[%s15370_s0 + $0x4ec] sm:$0xf]  ;;  %v7376_v14 = vld [vmem:[%s15370_s0 + $0x278] sm:$0xf0] }
  0xaa   :  { %v7699_v41 = vor.u32 %v10456_v28, %v7696_v29  ;;  %v10376_v13 = vld [vmem:[%s15370_s0 + $0x26c] sm:$0xf] }
  0xab   :  { %1551 = vmatpush.bf16.msra.mxu3 %v7775_v32  ;;  %v7219_v32 = vor.u32 %v10336_v21, %v7216_v22  ;;  %v7379_v21 = vor.u32 %v10376_v13, %v7376_v14  ;;  %v10440_v22 = vld [vmem:[%s15370_s0 + $0x46c] sm:$0xf] }
  0xac   :  { %1576 = vmatpush.bf16.msrb.mxu2 %v7155_v25  ;;  %1589 = vmatpush.bf16.msra.mxu0 %v7283_v36  ;;  %v7072_v25 = vld [vmem:[%s15370_s0 + $0x18] sm:$0xf0]  ;;  %v10420_v36 = vld [vmem:[%s15370_s0 + $0x3cc] sm:$0xf] }
  0xad   :  { %1539 = vmatpush.bf16.msra.mxu1 %v7631_v42  ;;  %v7075_v37 = vor.u32 %v10300_v24, %v7072_v25  ;;  %v10488_v42 = vld [vmem:[%s15370_s0 + $0x5ec] sm:$0xf]  ;;  %v7555_v48 = vor.u32 %v10420_v36, %v7552_v38 }
  0xae   :  { %v10372_v25 = vld [vmem:[%s15370_s0 + $0x24c] sm:$0xf] }
  0xaf   :  { %1552 = vmatpush.bf16.msra.mxu3 %v7759_v46  ;;  %7846 = vmatmul.msk.bf16.vlgmr.msrb.gmra.mxu0 %vm1297_vm0, %v11748_v45  ;;  %v10452_v46 = vld [vmem:[%s15370_s0 + $0x4cc] sm:$0xf] }
  0xb0   :  { %1577 = vmatpush.bf16.msrb.mxu2 %v7139_v39  ;;  %1590 = vmatpush.bf16.msra.mxu0 %v7267_v49  ;;  %v10332_v39 = vld [vmem:[%s15370_s0 + $0x10c] sm:$0xf] }
  0xb1   :  { %1540 = vmatpush.bf16.msra.mxu1 %v7615_v58  ;;  %v7203_v49 = vor.u32 %v10332_v39, %v7200_v40  ;;  %v7683_v58 = vor.u32 %v10452_v46, %v7680_v47  ;;  %v10404_v29 = vld [vmem:[%s15370_s0 + $0x34c] sm:$0xf]  ;;  %v7616_v39 = vld [vmem:[%s15370_s0 + $0x458] sm:$0xf0] }
  0xb2   :  { %v10436_v38 = vld [vmem:[%s15370_s0 + $0x44c] sm:$0xf]  ;;  %v7472_v47 = vld [vmem:[%s15370_s0 + $0x338] sm:$0xf0] }
  0xb3   :  { %1553 = vmatpush.bf16.msra.mxu3 %v7743_v61  ;;  %v7411_v61 = vor.u32 %v10384_v50, %v7408_v52  ;;  %v10400_v46 = vld [vmem:[%s15370_s0 + $0x32c] sm:$0xf]  ;;  %v7744_v52 = vld [vmem:[%s15370_s0 + $0x558] sm:$0xf0] }
  0xb4   :  { %1578 = vmatpush.bf16.msrb.mxu2 %v7123_v53  ;;  %1591 = vmatpush.bf16.msra.mxu0 %v7251_v0  ;;  %v7827_v53 = vor.u32 %v10488_v42, %v7824_v43  ;;  %v7539_v0 = vor.u32 %v10416_v54, %v7536_v56  ;;  %v10368_v42 = vld [vmem:[%s15370_s0 + $0x22c] sm:$0xf]  ;;  %v7344_v43 = vld [vmem:[%s15370_s0 + $0x238] sm:$0xf0] }
  0xb5   :  { %1541 = vmatpush.bf16.msra.mxu1 %v7599_v6  ;;  %v7667_v6 = vor.u32 %v10448_v62, %v7664_v63  ;;  %v10468_v50 = vld [vmem:[%s15370_s0 + $0x54c] sm:$0xf]  ;;  %v7347_v54 = vor.u32 %v10368_v42, %v7344_v43  ;;  %v7456_v63 = vld [vmem:[%s15370_s0 + $0x318] sm:$0xf0]  ;;  %v10513_v42 = vld [vmem:[%s15373_s28 + $0x8c] sm:$0xf0] }
  0xb6   :  { %v10432_v56 = vld [vmem:[%s15370_s0 + $0x42c] sm:$0xf] }
  0xb7   :  { %1554 = vmatpush.bf16.msra.mxu3 %v7727_v11  ;;  %v10444_v11 = vld [vmem:[%s15370_s0 + $0x48c] sm:$0xf] }
  0xb8   :  { %1579 = vmatpush.bf16.msrb.mxu2 %v7107_v3  ;;  %1592 = vmatpush.bf16.msra.mxu0 %v7235_v15  ;;  %v7811_v3 = vor.u32 %v10484_v59, %v7808_v60  ;;  %v7795_v15 = vor.u32 %v10480_v8, %v7792_v9  ;;  %v10364_v59 = vld [vmem:[%s15370_s0 + $0x20c] sm:$0xf]  ;;  %v7475_v60 = vor.u32 %v10400_v46, %v7472_v47  ;;  %v7728_v9 = vld [vmem:[%s15370_s0 + $0x538] sm:$0xf0]  ;;  %v7898_v46 = vld [vmem:[%s15373_s28 + $0x60] sm:$0xf] }
  0xb9   :  { %1542 = vmatpush.bf16.msra.mxu1 %v7583_v23  ;;  %v7632_v23 = vld [vmem:[%s15370_s0 + $0x478] sm:$0xf0]  ;;  %v12546_v28 = vpop.f32.mrf.mxu1  ;;  %v10396_v62 = vld [vmem:[%s15370_s0 + $0x30c] sm:$0xf] }
  0xba   :  { %v10464_v8 = vld [vmem:[%s15370_s0 + $0x52c] sm:$0xf]  ;;  %v7459_v14 = vor.u32 %v10396_v62, %v7456_v63  ;;  %v10541_v62 = vld [vmem:[%s15373_s28 + $0x16c] sm:$0xf0] }
  0xbb   :  { %1555 = vmatpush.bf16.msra.mxu3 %v7711_v26  ;;  %v7360_v26 = vld [vmem:[%s15370_s0 + $0x258] sm:$0xf0] }
  0xbc   :  { %1580 = vmatpush.bf16.msrb.mxu2 %v7091_v19  ;;  %1593 = vmatpush.bf16.msra.mxu0 %v7219_v32  ;;  %v12526_v17 = vpop.f32.mrf.mxu0  ;;  %v10476_v19 = vld [vmem:[%s15370_s0 + $0x58c] sm:$0xf]  ;;  %v7635_v32 = vor.u32 %v10440_v22, %v7632_v23  ;;  %v8090_v22 = vld [vmem:[%s15373_s28 + $0x1e0] sm:$0xf]  ;;  %v10557_v23 = vld [vmem:[%s15373_s28 + $0x1ec] sm:$0xf0] }
  0xbd   :  { %1600 = vmatpush.bf16.msrb.mxu1 %v7443_v27  ;;  %v7779_v27 = vor.u32 %v10476_v19, %v7776_v20  ;;  %v7946_v19 = vld [vmem:[%s15373_s28 + $0xc0] sm:$0xf] }
  0xbe   :  { %1543 = vmatmul.bf16.vlgmr.msra.gmra.mxu1 %v11839_v30  ;;  %1556 = vmatmul.bf16.vlgmr.msra.gmra.mxu3 %v11850_v35 }
  0xbf   :  { %1613 = vmatpush.bf16.msrb.mxu3 %v7571_v31  ;;  %v7488_v31 = vld [vmem:[%s15370_s0 + $0x358] sm:$0xf0] }
  0xc0   :  { %1581 = vmatpush.bf16.msrb.mxu2 %v7075_v37  ;;  %1594 = vmatpush.bf16.msra.mxu0 %v7203_v49  ;;  %v7363_v37 = vor.u32 %v10372_v25, %v7360_v26  ;;  %v7491_v40 = vor.u32 %v10404_v29, %v7488_v31  ;;  %v7619_v49 = vor.u32 %v10436_v38, %v7616_v39  ;;  %v7712_v25 = vld [vmem:[%s15370_s0 + $0x518] sm:$0xf0]  ;;  %v7930_v31 = vld [vmem:[%s15373_s28 + $0xa0] sm:$0xf] }
  0xc1   :  { %1601 = vmatpush.bf16.msrb.mxu1 %v7427_v44  ;;  %v12560_v36 = vpop.f32.mrf.mxu2  ;;  %v7763_v44 = vor.u32 %v10472_v33, %v7760_v34  ;;  %v1325_v2 = vpop.f32.mrf.mxu1  ;;  %v8091_v26 = vor.u32 %v10557_v23, %v8090_v22  ;;  %v10517_v33 = vld [vmem:[%s15373_s28 + $0xac] sm:$0xf0]  ;;  %v7978_v22 = vld [vmem:[%s15373_s28 + $0x100] sm:$0xf] }
  0xc2   :  { %v10553_v34 = vld [vmem:[%s15373_s28 + $0x1cc] sm:$0xf0]  ;;  %v7931_v39 = vor.u32 %v10517_v33, %v7930_v31  ;;  %v10515_v33 = vld [vmem:[%s15373_s28 + $0xa4] sm:$0xf] }
  0xc3   :  { %1614 = vmatpush.bf16.msrb.mxu3 %v7555_v48  ;;  %1582 = vmatmul.bf16.vlgmr.msrb.gmra.mxu2 %v11636_v55  ;;  %v7648_v55 = vld [vmem:[%s15370_s0 + $0x498] sm:$0xf0]  ;;  %v10501_v2 = vld [vmem:[%s15373_s28 + $0x2c] sm:$0xf0] }
  0xc4   :  { %1626 = vmatpush.bf16.msra.mxu2 %v7699_v41  ;;  %1639 = vmatpush.bf16.msrb.mxu0 %v7827_v53  ;;  %v7651_v18 = vor.u32 %v10444_v11, %v7648_v55  ;;  %v12568_v41 = vpop.f32.mrf.mxu3  ;;  %v1312_v48 = vpop.f32.mrf.mxu0  ;;  %v12591_v53 = vld [vmem:[%s15372_s29] sm:$0xf]  ;;  %v10428_v55 = vld [vmem:[%s15370_s0 + $0x40c] sm:$0xf]  ;;  %v10529_v23 = vld [vmem:[%s15373_s28 + $0x10c] sm:$0xf0] }
  0xc5   :  { %1602 = vmatpush.bf16.msrb.mxu1 %v7411_v61  ;;  %1595 = vmatmul.bf16.vlgmr.msra.gmra.mxu0 %v11669_v7  ;;  %v7504_v7 = vld [vmem:[%s15370_s0 + $0x378] sm:$0xf0]  ;;  %v309_v13 = vperm.slane %v12591_v53, 0  ;;  %v10509_v48 = vld [vmem:[%s15373_s28 + $0x6c] sm:$0xf0]  ;;  %s15374_s29 = sld [smem:[#allocation16_spill]] }
  0xc6   :  { %v7507_v24 = vor.u32 %v10408_v16, %v7504_v7  ;;  %v7328_v61 = vld [vmem:[%s15370_s0 + $0x218] sm:$0xf0] }
  0xc7   :  { %1615 = vmatpush.bf16.msrb.mxu3 %v7539_v0  ;;  %v7747_v0 = vor.u32 %v10468_v50, %v7744_v52  ;;  %v7331_v11 = vor.u32 %v10364_v59, %v7328_v61  ;;  %v8026_v61 = vld [vmem:[%s15373_s28 + $0x160] sm:$0xf] }
  0xc8   :  { %1627 = vmatpush.bf16.msra.mxu2 %v7683_v58  ;;  %1640 = vmatpush.bf16.msrb.mxu0 %v7811_v3  ;;  %v7600_v58 = vld [vmem:[%s15370_s0 + $0x438] sm:$0xf0]  ;;  %v10492_v3 = vld [vmem:[%s15370_s0 + $0x60c] sm:$0xf] }
  0xc9   :  { %1603 = vmatpush.bf16.msrb.mxu1 %v7395_v10  ;;  %v7603_v5 = vor.u32 %v10432_v56, %v7600_v58  ;;  %v1338_v10 = vpop.f32.mrf.mxu2  ;;  %v7899_v56 = vor.u32 %v10509_v48, %v7898_v46  ;;  %v7882_v58 = vld [vmem:[%s15373_s28 + $0x40] sm:$0xf]  ;;  %v7884_v46 = vld [vmem:[%s15373_s28 + $0x50] sm:$0xf0] }
  0xcb   :  { %1616 = vmatpush.bf16.msrb.mxu3 %v7523_v12  ;;  %v7584_v12 = vld [vmem:[%s15370_s0 + $0x418] sm:$0xf0] }
  0xcc   :  { %1628 = vmatpush.bf16.msra.mxu2 %v7667_v6  ;;  %1641 = vmatpush.bf16.msrb.mxu0 %v7795_v15  ;;  %v10525_v6 = vld [vmem:[%s15373_s28 + $0xec] sm:$0xf0]  ;;  %v7843_v15 = vor.u32 %v10492_v3, %v7840_v4  ;;  %v1351_v16 = vpop.f32.mrf.mxu3  ;;  %v7587_v20 = vor.u32 %v10428_v55, %v7584_v12 }
  0xcd   :  { %1604 = vmatpush.bf16.msrb.mxu1 %v7379_v21  ;;  %v7963_v7 = vor.u32 %v10525_v6, %v7962_v1  ;;  %v10521_v21 = vld [vmem:[%s15373_s28 + $0xcc] sm:$0xf0]  ;;  %v7964_v16 = vld [vmem:[%s15373_s28 + $0xf0] sm:$0xf0] }
  0xce   :  { %v7947_v29 = vor.u32 %v10521_v21, %v7946_v19  ;;  %v10537_v6 = vld [vmem:[%s15373_s28 + $0x14c] sm:$0xf0] }
  0xcf   :  { %1617 = vmatpush.bf16.msrb.mxu3 %v7507_v24  ;;  %v10460_v24 = vld [vmem:[%s15370_s0 + $0x50c] sm:$0xf]  ;;  %v10497_v12 = vld [vmem:[%s15373_s28 + $0xc] sm:$0xf0] }
  0xd0   :  { %1629 = vmatpush.bf16.msra.mxu2 %v7651_v18  ;;  %1642 = vmatpush.bf16.msrb.mxu0 %v7779_v27  ;;  %v7731_v18 = vor.u32 %v10464_v8, %v7728_v9  ;;  %v1311_v27 = vadd.f32 %v12526_v17, %v309_v13  ;;  %v8074_v17 = vld [vmem:[%s15373_s28 + $0x1c0] sm:$0xf] }
  0xd1   :  { %1605 = vmatpush.bf16.msrb.mxu1 %v7363_v37  ;;  %v1388_v37 = vpop.f32.mrf.mxu2  ;;  %v8075_v38 = vor.u32 %v10553_v34, %v8074_v17  ;;  %v7994_v13 = vld [vmem:[%s15373_s28 + $0x120] sm:$0xf]  ;;  %v7932_v17 = vld [vmem:[%s15373_s28 + $0xb0] sm:$0xf0] }
  0xd3   :  { %1618 = vmatpush.bf16.msrb.mxu3 %v7491_v40  ;;  %v7914_v40 = vld [vmem:[%s15373_s28 + $0x80] sm:$0xf] }
  0xd4   :  { %1630 = vmatpush.bf16.msra.mxu2 %v7635_v32  ;;  %1643 = vmatpush.bf16.msrb.mxu0 %v7763_v44  ;;  %v7715_v32 = vor.u32 %v10460_v24, %v7712_v25  ;;  %v7915_v44 = vor.u32 %v10513_v42, %v7914_v40  ;;  %v10519_v24 = vld [vmem:[%s15373_s28 + $0xc4] sm:$0xf]  ;;  %v7948_v25 = vld [vmem:[%s15373_s28 + $0xd0] sm:$0xf0] }
  0xd5   :  { %1606 = vmatpush.bf16.msrb.mxu1 %v7347_v54  ;;  %v10507_v42 = vld [vmem:[%s15373_s28 + $0x64] sm:$0xf] }
  0xd7   :  { %1619 = vmatpush.bf16.msrb.mxu3 %v7475_v60  ;;  %v10505_v60 = vld [vmem:[%s15373_s28 + $0x4c] sm:$0xf0] }
  0xd8   :  { %1631 = vmatpush.bf16.msra.mxu2 %v7619_v49  ;;  %1644 = vmatpush.bf16.msrb.mxu0 %v7747_v0  ;;  %v1362_v47 = vpop.f32.mrf.mxu0  ;;  %v8042_v49 = vld [vmem:[%s15373_s28 + $0x180] sm:$0xf]  ;;  %v7883_v63 = vor.u32 %v10505_v60, %v7882_v58  ;;  %v10587_v58 = vld [vmem:[%s15373_s28 + $0x2e4] sm:$0xf] }
  0xd9   :  { %1607 = vmatpush.bf16.msrb.mxu1 %v7331_v11  ;;  %v1390_v50 = vpop.f32.mrf.mxu2  ;;  %v7866_v0 = vld [vmem:[%s15373_s28 + $0x20] sm:$0xf] }
  0xda   :  { %v7850_v11 = vld [vmem:[%s15373_s28] sm:$0xf] }
  0xdb   :  { %1620 = vmatpush.bf16.msrb.mxu3 %v7459_v14  ;;  %v10533_v14 = vld [vmem:[%s15373_s28 + $0x12c] sm:$0xf0] }
  0xdc   :  { %1632 = vmatpush.bf16.msra.mxu2 %v7603_v5  ;;  %1645 = vmatpush.bf16.msrb.mxu0 %v7731_v18  ;;  %v8010_v5 = vld [vmem:[%s15373_s28 + $0x140] sm:$0xf]  ;;  %v7851_v18 = vor.u32 %v10497_v12, %v7850_v11 }
  0xdd   :  { %1659 = vmatpush.bf16.msra.mxu1 %v7843_v15  ;;  %v8011_v9 = vor.u32 %v10537_v6, %v8010_v5  ;;  %v10523_v15 = vld [vmem:[%s15373_s28 + $0xe4] sm:$0xf]  ;;  %v8098_v5 = vld [vmem:[%s15373_s28 + $0x1e8] sm:$0xf]  ;;  %v10558_v6 = vld [vmem:[%s15373_s28 + $0x1f4] sm:$0xf0] }
  0xde   :  { %1608 = vmatmul.bf16.vlgmr.msrb.gmra.mxu1 %v11625_v51  ;;  %1621 = vmatmul.bf16.vlgmr.msrb.gmra.mxu3 %v11638_v57  ;;  %v1324_v51 = vadd.f32 %v12546_v28, %v1311_v27  ;;  %v8058_v57 = vld [vmem:[%s15373_s28 + $0x1a0] sm:$0xf]  ;;  %v10549_v28 = vld [vmem:[%s15373_s28 + $0x1ac] sm:$0xf0]  ;;  %v8099_v12 = vor.u32 %v10558_v6, %v8098_v5  ;;  %v8002_v6 = vld [vmem:[%s15373_s28 + $0x128] sm:$0xf] }
  0xdf   :  { %2286 = vmatpush.bf16.msra.mxu3 %v7963_v7  ;;  %v7995_v7 = vor.u32 %v10533_v14, %v7994_v13  ;;  %v8082_v13 = vld [vmem:[%s15373_s28 + $0x1c8] sm:$0xf]  ;;  %v10554_v14 = vld [vmem:[%s15373_s28 + $0x1d4] sm:$0xf0] }
  0xe0   :  { %1633 = vmatpush.bf16.msra.mxu2 %v7587_v20  ;;  %1646 = vmatpush.bf16.msrb.mxu0 %v7715_v32  ;;  %v1337_v43 = vadd.f32 %v12560_v36, %v1324_v51  ;;  %v10545_v36 = vld [vmem:[%s15373_s28 + $0x18c] sm:$0xf0]  ;;  %v1364_v3 = vpop.f32.mrf.mxu0  ;;  %v7967_v20 = vor.u32 %v10523_v15, %v7964_v16  ;;  %v7951_v32 = vor.u32 %v10519_v24, %v7948_v25  ;;  %v7916_v51 = vld [vmem:[%s15373_s28 + $0x90] sm:$0xf0] }
  0xe1   :  { %2299 = vmatpush.bf16.msrb.mxu1 %v8091_v26  ;;  %v8043_v52 = vor.u32 %v10545_v36, %v8042_v49  ;;  %v1401_v4 = vpop.f32.mrf.mxu3  ;;  %v7979_v26 = vor.u32 %v10529_v23, %v7978_v22  ;;  %v10499_v36 = vld [vmem:[%s15373_s28 + $0x24] sm:$0xf]  ;;  %v10585_v3 = vld [vmem:[%s15373_s28 + $0x2cc] sm:$0xf0]  ;;  %v8188_v23 = vld [vmem:[%s15373_s28 + $0x2b0] sm:$0xf0] }
  0xe2   :  { %v1350_v54 = vadd.f32 %v12568_v41, %v1337_v43  ;;  %v8027_v41 = vor.u32 %v10541_v62, %v8026_v61  ;;  %v8220_v62 = vld [vmem:[%s15373_s28 + $0x2f0] sm:$0xf0] }
  0xe3   :  { %2287 = vmatpush.bf16.msra.mxu3 %v7947_v29  ;;  %1634 = vmatmul.bf16.vlgmr.msra.gmra.mxu2 %v11839_v30  ;;  %v8059_v30 = vor.u32 %v10549_v28, %v8058_v57  ;;  %v310_v29 = vperm.slane %v12591_v53, 1  ;;  %v7900_v57 = vld [vmem:[%s15373_s28 + $0x70] sm:$0xf0] }
  0xe4   :  { %1647 = vmatmul.bf16.vlgmr.msrb.gmra.mxu0 %v11850_v35  ;;  %v1375_v35 = vpop.f32.mrf.mxu1  ;;  %v1363_v59 = vadd.f32 %v1362_v47, %v1350_v54  ;;  %v7903_v43 = vor.u32 %v10507_v42, %v7900_v57  ;;  %v8218_v54 = vld [vmem:[%s15373_s28 + $0x2e0] sm:$0xf]  ;;  %v10546_v42 = vld [vmem:[%s15373_s28 + $0x194] sm:$0xf0] }
  0xe5   :  { %2300 = vmatpush.bf16.msrb.mxu1 %v8075_v38  ;;  %v1402_v34 = vadd.f32 %v1401_v4, %v310_v29  ;;  %v10511_v38 = vld [vmem:[%s15373_s28 + $0x84] sm:$0xf]  ;;  %v10550_v29 = vld [vmem:[%s15373_s28 + $0x1b4] sm:$0xf0] }
  0xe6   :  { %v1376_v1 = vadd.f32 %v1375_v35, %v1363_v59  ;;  %v1414_v10 = vpop.f32.mrf.mxu2  ;;  %v7919_v40 = vor.u32 %v10511_v38, %v7916_v51  ;;  %v7868_v35 = vld [vmem:[%s15373_s28 + $0x30] sm:$0xf0]  ;;  %v10583_v4 = vld [vmem:[%s15373_s28 + $0x2c4] sm:$0xf] }
  0xe7   :  { %2288 = vmatpush.bf16.msra.mxu3 %v7931_v39  ;;  %v1415_v39 = vadd.f32 %v1414_v10, %v1402_v34  ;;  %v8204_v10 = vld [vmem:[%s15373_s28 + $0x2d0] sm:$0xf0] }
  0xe8   :  { %v1389_v55 = vadd.f32 %v1388_v37, %v1376_v1  ;;  %v7935_v37 = vor.u32 %v10515_v33, %v7932_v17  ;;  %v8223_v1 = vor.u32 %v10587_v58, %v8220_v62  ;;  %v8207_v11 = vor.u32 %v10583_v4, %v8204_v10  ;;  %v10577_v33 = vld [vmem:[%s15373_s28 + $0x28c] sm:$0xf0]  ;;  %v10575_v17 = vld [vmem:[%s15373_s28 + $0x284] sm:$0xf]  ;;  %v8172_v38 = vld [vmem:[%s15373_s28 + $0x290] sm:$0xf0] }
  0xe9   :  { %2301 = vmatpush.bf16.msrb.mxu1 %v8059_v30  ;;  %v1403_v21 = vpop.f32.mrf.mxu3  ;;  %v8175_v51 = vor.u32 %v10575_v17, %v8172_v38  ;;  %v10561_v10 = vld [vmem:[%s15373_s28 + $0x20c] sm:$0xf0] }
  0xea   :  { %v1665_v19 = vmax.f32 %v1389_v55, 0.0 }
  0xeb   :  { %2289 = vmatpush.bf16.msra.mxu3 %v7915_v44  ;;  %v10503_v44 = vld [vmem:[%s15373_s28 + $0x44] sm:$0xf] }
  0xec   :  { %v1377_v8 = vpop.f32.mrf.mxu1  ;;  %v12755_v31 = vpack.c.bf16 %v1665_v19, %v1665_v19  ;;  %v7887_v49 = vor.u32 %v10503_v44, %v7884_v46  ;;  %v10579_v19 = vld [vmem:[%s15373_s28 + $0x2a4] sm:$0xf]  ;;  %v8156_v46 = vld [vmem:[%s15373_s28 + $0x270] sm:$0xf0] }
  0xed   :  { %2302 = vmatpush.bf16.msrb.mxu1 %v8043_v52  ;;  %v8191_v24 = vor.u32 %v10579_v19, %v8188_v23  ;;  %v10588_v19 = vld [vmem:[%s15373_s28 + $0x2ec] sm:$0xf] }
  0xee   :  { %7847 = vmatmul.msk.bf16.vlgmr.msra.gmra.mxu1 %vm1297_vm0, %v11748_v45  ;;  %v7867_v45 = vor.u32 %v10501_v2, %v7866_v0  ;;  %v1416_v27 = vpop.f32.mrf.mxu2  ;;  %v7852_v0 = vld [vmem:[%s15373_s28 + $0x10] sm:$0xf0]  ;;  %v8202_v2 = vld [vmem:[%s15373_s28 + $0x2c0] sm:$0xf] }
  0xef   :  { %2290 = vmatpush.bf16.msra.mxu3 %v7899_v56  ;;  %v10589_v56 = vld [vmem:[%s15373_s28 + $0x2ec] sm:$0xf0]  ;;  %v8066_v27 = vld [vmem:[%s15373_s28 + $0x1a8] sm:$0xf] }
  0xf0   :  { %v8219_v61 = vor.u32 %v10589_v56, %v8218_v54  ;;  %v8140_v56 = vld [vmem:[%s15373_s28 + $0x250] sm:$0xf0] }
  0xf1   :  { %2303 = vmatpush.bf16.msrb.mxu1 %v8027_v41  ;;  %v7871_v41 = vor.u32 %v10499_v36, %v7868_v35  ;;  %v10542_v36 = vld [vmem:[%s15373_s28 + $0x174] sm:$0xf0]  ;;  %v8138_v35 = vld [vmem:[%s15373_s28 + $0x240] sm:$0xf] }
  0xf2   :  { %2312 = vmatpush.bf16.msrb.mxu2 %v8219_v61  ;;  %v10538_v61 = vld [vmem:[%s15373_s28 + $0x154] sm:$0xf0] }
  0xf3   :  { %2291 = vmatpush.bf16.msra.mxu3 %v7883_v63  ;;  %v10495_v63 = vld [vmem:[%s15373_s28 + $0x4] sm:$0xf] }
  0xf4   :  { %v7855_v55 = vor.u32 %v10495_v63, %v7852_v0  ;;  %v10565_v63 = vld [vmem:[%s15373_s28 + $0x22c] sm:$0xf0]  ;;  %v10563_v0 = vld [vmem:[%s15373_s28 + $0x224] sm:$0xf] }
  0xf5   :  { %2304 = vmatpush.bf16.msrb.mxu1 %v8011_v9  ;;  %v8203_v9 = vor.u32 %v10585_v3, %v8202_v2  ;;  %v8124_v3 = vld [vmem:[%s15373_s28 + $0x230] sm:$0xf0] }
  0xf6   :  { %v8127_v4 = vor.u32 %v10563_v0, %v8124_v3  ;;  %v8044_v3 = vld [vmem:[%s15373_s28 + $0x190] sm:$0xf0] }
  0xf7   :  { %2292 = vmatpush.bf16.msra.mxu3 %v7867_v45  ;;  %2313 = vmatpush.bf16.msrb.mxu2 %v8203_v9  ;;  %v8106_v9 = vld [vmem:[%s15373_s28 + $0x200] sm:$0xf] }
  0xf8   :  { %v1427_v28 = vpop.f32.mrf.mxu0 }
  0xf9   :  { %2305 = vmatpush.bf16.msrb.mxu1 %v7995_v7  ;;  %v1428_v30 = vadd.f32 %v1427_v28, %v1415_v39  ;;  %v8186_v7 = vld [vmem:[%s15373_s28 + $0x2a0] sm:$0xf]  ;;  %v8067_v39 = vor.u32 %v10550_v29, %v8066_v27  ;;  %v311_v27 = vperm.slane %v12591_v53, 2 }
  0xfa   :  { %v8154_v28 = vld [vmem:[%s15373_s28 + $0x260] sm:$0xf] }
  0xfb   :  { %2293 = vmatpush.bf16.msra.mxu3 %v7851_v18  ;;  %v1440_v47 = vpop.f32.mrf.mxu1  ;;  %v10581_v18 = vld [vmem:[%s15373_s28 + $0x2ac] sm:$0xf0]  ;;  %v8234_v29 = vld [vmem:[%s15373_s28 + $0x300] sm:$0xf] }
  0xfc   :  { %v1441_v48 = vadd.f32 %v1440_v47, %v1428_v30  ;;  %v8187_v22 = vor.u32 %v10581_v18, %v8186_v7  ;;  %v10573_v30 = vld [vmem:[%s15373_s28 + $0x26c] sm:$0xf0]  ;;  %v10530_v7 = vld [vmem:[%s15373_s28 + $0x114] sm:$0xf0] }
  0xfd   :  { %2306 = vmatpush.bf16.msrb.mxu1 %v7979_v26  ;;  %v8083_v26 = vor.u32 %v10554_v14, %v8082_v13  ;;  %v8155_v44 = vor.u32 %v10573_v30, %v8154_v28 }
  0xfe   :  { %2294 = vmatmul.bf16.vlgmr.msra.gmra.mxu3 %v12755_v31  ;;  %2314 = vmatpush.bf16.msrb.mxu2 %v8187_v22 }
  0xff   :  { %2338 = vmatpush.bf16.msrb.mxu3 %v7967_v20 }
 0x100   :  { %v1429_v50 = vpop.f32.mrf.mxu0 }
 0x101   :  { %v1453_v52 = vpop.f32.mrf.mxu3  ;;  %2364 = vmatpush.bf16.msra.mxu1 %v8223_v1  ;;  %v10569_v50 = vld [vmem:[%s15373_s28 + $0x24c] sm:$0xf0] }
 0x102   :  { %v1454_v59 = vadd.f32 %v1453_v52, %v1441_v48  ;;  %v10567_v52 = vld [vmem:[%s15373_s28 + $0x244] sm:$0xf]  ;;  %v8139_v54 = vor.u32 %v10569_v50, %v8138_v35  ;;  %v8180_v35 = vld [vmem:[%s15373_s28 + $0x298] sm:$0xf0] }
 0x103   :  { %2339 = vmatpush.bf16.msrb.mxu3 %v7951_v32  ;;  %v1442_v8 = vpop.f32.mrf.mxu1  ;;  %v8170_v32 = vld [vmem:[%s15373_s28 + $0x280] sm:$0xf]  ;;  %v8143_v58 = vor.u32 %v10567_v52, %v8140_v56  ;;  %v10547_v56 = vld [vmem:[%s15373_s28 + $0x1a4] sm:$0xf] }
 0x104   :  { %v10534_v8 = vld [vmem:[%s15373_s28 + $0x134] sm:$0xf0] }
 0x105   :  { %2365 = vmatpush.bf16.msra.mxu1 %v8207_v11  ;;  %v8003_v14 = vor.u32 %v10534_v8, %v8002_v6  ;;  %v10594_v6 = vld [vmem:[%s15373_s28 + $0x314] sm:$0xf0] }
 0x106   :  { %v1466_v60 = vpop.f32.mrf.mxu2 }
 0x107   :  { %2340 = vmatpush.bf16.msrb.mxu3 %v7935_v37  ;;  %v1467_v45 = vadd.f32 %v1466_v60, %v1454_v59  ;;  %v8171_v37 = vor.u32 %v10577_v33, %v8170_v32  ;;  %v8018_v60 = vld [vmem:[%s15373_s28 + $0x148] sm:$0xf]  ;;  %v10593_v32 = vld [vmem:[%s15373_s28 + $0x30c] sm:$0xf0]  ;;  %v10591_v33 = vld [vmem:[%s15373_s28 + $0x304] sm:$0xf] }
 0x108   :  { %v1479_v15 = vpop.f32.mrf.mxu0  ;;  %v8019_v5 = vor.u32 %v10538_v61, %v8018_v60  ;;  %v8235_v38 = vor.u32 %v10593_v32, %v8234_v29  ;;  %v8164_v60 = vld [vmem:[%s15373_s28 + $0x278] sm:$0xf0]  ;;  %v10560_v29 = vld [vmem:[%s15373_s28 + $0x20c] sm:$0xf] }
 0x109   :  { %v1455_v16 = vpop.f32.mrf.mxu3  ;;  %v1480_v20 = vadd.f32 %v1479_v15, %v1467_v45  ;;  %2366 = vmatpush.bf16.msra.mxu1 %v8191_v24  ;;  %2315 = vmatpush.bf16.msrb.mxu2 %v8171_v37  ;;  %v10559_v45 = vld [vmem:[%s15373_s28 + $0x204] sm:$0xf]  ;;  %v10584_v24 = vld [vmem:[%s15373_s28 + $0x2cc] sm:$0xf]  ;;  %v8116_v32 = vld [vmem:[%s15373_s28 + $0x218] sm:$0xf0] }
 0x10a   :  { %v7986_v16 = vld [vmem:[%s15373_s28 + $0x108] sm:$0xf]  ;;  %2332 = vmatpush.bf16.msra.mxu0 %v8235_v38 }
 0x10b   :  { %2341 = vmatpush.bf16.msrb.mxu3 %v7919_v40  ;;  %v1666_v25 = vmax.f32 %v1480_v20, 0.0  ;;  %v8050_v40 = vld [vmem:[%s15373_s28 + $0x188] sm:$0xf]  ;;  %v8228_v20 = vld [vmem:[%s15373_s28 + $0x2f8] sm:$0xf0]  ;;  %v7987_v22 = vor.u32 %v10530_v7, %v7986_v16 }
 0x10c   :  { %v8051_v48 = vor.u32 %v10546_v42, %v8050_v40  ;;  %v8231_v23 = vor.u32 %v10588_v19, %v8228_v20  ;;  %v8092_v40 = vld [vmem:[%s15373_s28 + $0x1f0] sm:$0xf0]  ;;  %v10580_v42 = vld [vmem:[%s15373_s28 + $0x2ac] sm:$0xf]  ;;  %v7970_v19 = vld [vmem:[%s15373_s28 + $0xe8] sm:$0xf] }
 0x10d   :  { %v12857_v34 = vpack.c.bf16 %v1666_v25, %v1666_v25  ;;  %2367 = vmatpush.bf16.msra.mxu1 %v8175_v51  ;;  %2316 = vmatpush.bf16.msrb.mxu2 %v8155_v44  ;;  %v8212_v25 = vld [vmem:[%s15373_s28 + $0x2d8] sm:$0xf0]  ;;  %v8236_v51 = vld [vmem:[%s15373_s28 + $0x310] sm:$0xf0]  ;;  %v10551_v44 = vld [vmem:[%s15373_s28 + $0x1c4] sm:$0xf] }
 0x10e   :  { %v1468_v21 = vpop.f32.mrf.mxu2  ;;  %v8215_v17 = vor.u32 %v10584_v24, %v8212_v25  ;;  %v8239_v30 = vor.u32 %v10591_v33, %v8236_v51  ;;  %v10526_v20 = vld [vmem:[%s15373_s28 + $0xf4] sm:$0xf0]  ;;  %v7972_v25 = vld [vmem:[%s15373_s28 + $0xf8] sm:$0xf0]  ;;  %v7954_v38 = vld [vmem:[%s15373_s28 + $0xc8] sm:$0xf] }
 0x10f   :  { %2342 = vmatpush.bf16.msrb.mxu3 %v7903_v43  ;;  %2307 = vmatmul.bf16.vlgmr.msrb.gmra.mxu1 %v12857_v34  ;;  %v10571_v43 = vld [vmem:[%s15373_s28 + $0x264] sm:$0xf] }
 0x110   :  { %v1481_v57 = vpop.f32.mrf.mxu0  ;;  %v8159_v47 = vor.u32 %v10571_v43, %v8156_v46 }
 0x111   :  { %2317 = vmatpush.bf16.msrb.mxu2 %v8139_v54  ;;  %v8196_v57 = vld [vmem:[%s15373_s28 + $0x2b8] sm:$0xf0] }
 0x112   :  { %2368 = vmatpush.bf16.msra.mxu1 %v8159_v47  ;;  %v8076_v47 = vld [vmem:[%s15373_s28 + $0x1d0] sm:$0xf0] }
 0x113   :  { %2343 = vmatpush.bf16.msrb.mxu3 %v7887_v49  ;;  %v8034_v49 = vld [vmem:[%s15373_s28 + $0x168] sm:$0xf] }
 0x114   :  { %v8035_v59 = vor.u32 %v10542_v36, %v8034_v49  ;;  %v8199_v49 = vor.u32 %v10580_v42, %v8196_v57  ;;  %v10576_v36 = vld [vmem:[%s15373_s28 + $0x28c] sm:$0xf]  ;;  %v10522_v57 = vld [vmem:[%s15373_s28 + $0xd4] sm:$0xf0] }
 0x115   :  { %v8183_v52 = vor.u32 %v10576_v36, %v8180_v35  ;;  %v10518_v35 = vld [vmem:[%s15373_s28 + $0xb4] sm:$0xf0] }
 0x116   :  { %2369 = vmatpush.bf16.msra.mxu1 %v8143_v58  ;;  %v8060_v58 = vld [vmem:[%s15373_s28 + $0x1b0] sm:$0xf0] }
 0x117   :  { %2344 = vmatpush.bf16.msrb.mxu3 %v7871_v41  ;;  %v8122_v41 = vld [vmem:[%s15373_s28 + $0x220] sm:$0xf]  ;;  %v8063_v61 = vor.u32 %v10547_v56, %v8060_v58  ;;  %v10516_v56 = vld [vmem:[%s15373_s28 + $0xac] sm:$0xf]  ;;  %v7940_v58 = vld [vmem:[%s15373_s28 + $0xb8] sm:$0xf0] }
 0x118   :  { %v8123_v2 = vor.u32 %v10565_v63, %v8122_v41 }
 0x11a   :  { %2318 = vmatpush.bf16.msrb.mxu2 %v8123_v2  ;;  %2370 = vmatpush.bf16.msra.mxu1 %v8127_v4  ;;  %v10543_v2 = vld [vmem:[%s15373_s28 + $0x184] sm:$0xf] }
 0x11b   :  { %2345 = vmatpush.bf16.msrb.mxu3 %v7855_v55  ;;  %v1492_v1 = vpop.f32.mrf.mxu1  ;;  %v8107_v55 = vor.u32 %v10561_v10, %v8106_v9  ;;  %v8047_v4 = vor.u32 %v10543_v2, %v8044_v3  ;;  %v7924_v2 = vld [vmem:[%s15373_s28 + $0x98] sm:$0xf0] }
 0x11c   :  { %v12906_v62 = vpop.f32.mrf.mxu0  ;;  %v1493_v46 = vadd.f32 %v1492_v1, %v311_v27  ;;  %v10568_v1 = vld [vmem:[%s15373_s28 + $0x24c] sm:$0xf]  ;;  %v8012_v27 = vld [vmem:[%s15373_s28 + $0x150] sm:$0xf0] }
 0x11e   :  { %2346 = vmatmul.bf16.vlgmr.msrb.gmra.mxu3 %v12755_v31  ;;  %2319 = vmatpush.bf16.msrb.mxu2 %v8107_v55  ;;  %v10539_v55 = vld [vmem:[%s15373_s28 + $0x164] sm:$0xf] }
 0x11f   :  { %2403 = vmatpush.bf16.msra.mxu3 %v8099_v12  ;;  %v8108_v12 = vld [vmem:[%s15373_s28 + $0x210] sm:$0xf0] }
 0x120   :  { %v8111_v13 = vor.u32 %v10559_v45, %v8108_v12  ;;  %v8028_v12 = vld [vmem:[%s15373_s28 + $0x170] sm:$0xf0] }
 0x121   :  { %v1505_v11 = vpop.f32.mrf.mxu3  ;;  %v8031_v16 = vor.u32 %v10539_v55, %v8028_v12  ;;  %v10506_v55 = vld [vmem:[%s15373_s28 + $0x54] sm:$0xf0] }
 0x122   :  { %2371 = vmatpush.bf16.msra.mxu1 %v8111_v13  ;;  %2384 = vmatpush.bf16.msra.mxu2 %v8239_v30  ;;  %v1506_v50 = vadd.f32 %v1505_v11, %v1493_v46  ;;  %v7996_v30 = vld [vmem:[%s15373_s28 + $0x130] sm:$0xf0]  ;;  %v7956_v46 = vld [vmem:[%s15373_s28 + $0xd8] sm:$0xf0] }
 0x123   :  { %2404 = vmatpush.bf16.msra.mxu3 %v8083_v26  ;;  %v1494_v21 = vpop.f32.mrf.mxu1 }
 0x124   :  { %v1520_v15 = vpop.f32.mrf.mxu0  ;;  %v1519_v41 = vadd.f32 %v12906_v62, %v1506_v50  ;;  %v8148_v62 = vld [vmem:[%s15373_s28 + $0x258] sm:$0xf0]  ;;  %v10524_v21 = vld [vmem:[%s15373_s28 + $0xec] sm:$0xf] }
 0x125   :  { %v8151_v45 = vor.u32 %v10568_v1, %v8148_v62  ;;  %v8132_v15 = vld [vmem:[%s15373_s28 + $0x238] sm:$0xf0]  ;;  %v7975_v51 = vor.u32 %v10524_v21, %v7972_v25  ;;  %v10512_v1 = vld [vmem:[%s15373_s28 + $0x8c] sm:$0xf]  ;;  %v7906_v62 = vld [vmem:[%s15373_s28 + $0x68] sm:$0xf] }
 0x126   :  { %v1531_v18 = vpop.f32.mrf.mxu2  ;;  %v7876_v21 = vld [vmem:[%s15373_s28 + $0x38] sm:$0xf0] }
 0x127   :  { %2405 = vmatpush.bf16.msra.mxu3 %v8067_v39  ;;  %v10555_v39 = vld [vmem:[%s15373_s28 + $0x1e4] sm:$0xf]  ;;  %v1532_v8 = vadd.f32 %v1531_v18, %v1519_v41  ;;  %v10514_v41 = vld [vmem:[%s15373_s28 + $0x94] sm:$0xf0] }
 0x128   :  { %v8095_v43 = vor.u32 %v10555_v39, %v8092_v40  ;;  %v8119_v40 = vor.u32 %v10560_v29, %v8116_v32  ;;  %v7858_v29 = vld [vmem:[%s15373_s28 + $0x8] sm:$0xf]  ;;  %v10498_v32 = vld [vmem:[%s15373_s28 + $0x14] sm:$0xf0] }
 0x129   :  { %v1507_v26 = vpop.f32.mrf.mxu3 }
 0x12a   :  { %2351 = vmatpush.bf16.msrb.mxu0 %v8095_v43  ;;  %v10535_v26 = vld [vmem:[%s15373_s28 + $0x144] sm:$0xf] }
 0x12b   :  { %2406 = vmatpush.bf16.msra.mxu3 %v8051_v48  ;;  %v8079_v48 = vor.u32 %v10551_v44, %v8076_v47  ;;  %v8015_v33 = vor.u32 %v10535_v26, %v8012_v27  ;;  %v10520_v44 = vld [vmem:[%s15373_s28 + $0xcc] sm:$0xf] }
 0x12c   :  { %v12966_v37 = vpop.f32.mrf.mxu0  ;;  %v7959_v50 = vor.u32 %v10520_v44, %v7956_v46  ;;  %v8226_v46 = vld [vmem:[%s15373_s28 + $0x2e8] sm:$0xf] }
 0x12e   :  { %v1533_v28 = vpop.f32.mrf.mxu2  ;;  %2352 = vmatpush.bf16.msrb.mxu0 %v8079_v48  ;;  %v7955_v48 = vor.u32 %v10522_v57, %v7954_v38 }
 0x12f   :  { %2407 = vmatpush.bf16.msra.mxu3 %v8035_v59  ;;  %v10572_v59 = vld [vmem:[%s15373_s28 + $0x26c] sm:$0xf]  ;;  %v10531_v28 = vld [vmem:[%s15373_s28 + $0x124] sm:$0xf] }
 0x130   :  { %v8167_v0 = vor.u32 %v10572_v59, %v8164_v60  ;;  %v7999_v47 = vor.u32 %v10531_v28, %v7996_v30 }
 0x132   :  { %2353 = vmatpush.bf16.msrb.mxu0 %v8063_v61  ;;  %v7922_v61 = vld [vmem:[%s15373_s28 + $0x88] sm:$0xf] }
 0x133   :  { %2408 = vmatpush.bf16.msra.mxu3 %v8019_v5  ;;  %v8242_v5 = vld [vmem:[%s15373_s28 + $0x308] sm:$0xf]  ;;  %v7923_v3 = vor.u32 %v10514_v41, %v7922_v61 }
 0x134   :  { %v1572_v54 = vpop.f32.mrf.mxu0  ;;  %v8243_v9 = vor.u32 %v10594_v6, %v8242_v5  ;;  %v10508_v6 = vld [vmem:[%s15373_s28 + $0x6c] sm:$0xf] }
 0x135   :  { %v7980_v54 = vld [vmem:[%s15373_s28 + $0x110] sm:$0xf0] }
 0x136   :  { %2354 = vmatpush.bf16.msrb.mxu0 %v8047_v4  ;;  %2436 = vmatpush.bf16.msrb.mxu1 %v8243_v9  ;;  %v10510_v4 = vld [vmem:[%s15373_s28 + $0x74] sm:$0xf0] }
 0x137   :  { %2409 = vmatpush.bf16.msra.mxu3 %v8003_v14  ;;  %v10564_v14 = vld [vmem:[%s15373_s28 + $0x22c] sm:$0xf] }
 0x13a   :  { %2355 = vmatpush.bf16.msrb.mxu0 %v8031_v16 }
 0x13b   :  { %2410 = vmatpush.bf16.msra.mxu3 %v7987_v22  ;;  %v1544_v63 = vpop.f32.mrf.mxu1 }
 0x13c   :  { %v1545_v10 = vadd.f32 %v1544_v63, %v1532_v8  ;;  %v7943_v63 = vor.u32 %v10516_v56, %v7940_v58  ;;  %v7908_v8 = vld [vmem:[%s15373_s28 + $0x78] sm:$0xf0]  ;;  %v10586_v56 = vld [vmem:[%s15373_s28 + $0x2d4] sm:$0xf0]  ;;  %v10552_v58 = vld [vmem:[%s15373_s28 + $0x1cc] sm:$0xf] }
 0x13d   :  { %v7911_v12 = vor.u32 %v10508_v6, %v7908_v8  ;;  %v8052_v6 = vld [vmem:[%s15373_s28 + $0x198] sm:$0xf0] }
 0x13e   :  { %2411 = vmatmul.bf16.vlgmr.msra.gmra.mxu3 %v12857_v34  ;;  %2356 = vmatpush.bf16.msrb.mxu0 %v8015_v33 }
 0x13f   :  { %2468 = vmatpush.bf16.msrb.mxu3 %v8231_v23  ;;  %v8135_v23 = vor.u32 %v10564_v14, %v8132_v15  ;;  %v10504_v14 = vld [vmem:[%s15373_s28 + $0x4c] sm:$0xf]  ;;  %v7892_v15 = vld [vmem:[%s15373_s28 + $0x58] sm:$0xf0] }
 0x141   :  { %v1557_v13 = vpop.f32.mrf.mxu3 }
 0x142   :  { %v13027_v11 = vpop.f32.mrf.mxu0  ;;  %v1558_v7 = vadd.f32 %v1557_v13, %v1545_v10  ;;  %2357 = vmatpush.bf16.msrb.mxu0 %v7999_v47  ;;  %v7907_v10 = vor.u32 %v10510_v4, %v7906_v62  ;;  %v10590_v47 = vld [vmem:[%s15373_s28 + $0x2f4] sm:$0xf0]  ;;  %v8178_v4 = vld [vmem:[%s15373_s28 + $0x288] sm:$0xf] }
 0x143   :  { %2469 = vmatpush.bf16.msrb.mxu3 %v8215_v17  ;;  %v1546_v18 = vpop.f32.mrf.mxu1 }
 0x144   :  { %v1571_v22 = vadd.f32 %v12966_v37, %v1558_v7  ;;  %v7971_v37 = vor.u32 %v10526_v20, %v7970_v19  ;;  %v7874_v7 = vld [vmem:[%s15373_s28 + $0x28] sm:$0xf]  ;;  %v10502_v18 = vld [vmem:[%s15373_s28 + $0x34] sm:$0xf0]  ;;  %v10500_v20 = vld [vmem:[%s15373_s28 + $0x2c] sm:$0xf] }
 0x145   :  { %v7875_v26 = vor.u32 %v10502_v18, %v7874_v7  ;;  %v7879_v33 = vor.u32 %v10500_v20, %v7876_v21  ;;  %v10570_v7 = vld [vmem:[%s15373_s28 + $0x254] sm:$0xf0]  ;;  %v10536_v18 = vld [vmem:[%s15373_s28 + $0x14c] sm:$0xf]  ;;  %v8130_v21 = vld [vmem:[%s15373_s28 + $0x228] sm:$0xf] }
 0x146   :  { %v1583_v24 = vpop.f32.mrf.mxu2  ;;  %v1667_v17 = vmax.f32 %v1571_v22, 0.0 }
 0x147   :  { %2470 = vmatpush.bf16.msrb.mxu3 %v8199_v49  ;;  %v7938_v49 = vld [vmem:[%s15373_s28 + $0xa8] sm:$0xf] }
 0x148   :  { %v13069_v39 = vpack.c.bf16 %v1667_v17, %v1667_v17  ;;  %v7939_v60 = vor.u32 %v10518_v35, %v7938_v49  ;;  %v10496_v17 = vld [vmem:[%s15373_s28 + $0xc] sm:$0xf]  ;;  %v8100_v49 = vld [vmem:[%s15373_s28 + $0x1f8] sm:$0xf0]  ;;  %v8227_v35 = vor.u32 %v10590_v47, %v8226_v46  ;;  %v8366_v46 = vld [vmem:[%s15347_s6 + $0xe0] sm:$0xf] }
 0x149   :  { %v1559_v43 = vpop.f32.mrf.mxu3  ;;  %v10625_v47 = vld [vmem:[%s15347_s6 + $0xec] sm:$0xf0] }
 0x14a   :  { %v1598_v42 = vpop.f32.mrf.mxu0  ;;  %2320 = vmatmul.bf16.vlgmr.msrb.gmra.mxu2 %v13069_v39  ;;  %2372 = vmatmul.bf16.vlgmr.msra.gmra.mxu1 %v13069_v39 }
 0x14b   :  { %2471 = vmatpush.bf16.msrb.mxu3 %v8183_v52  ;;  %2390 = vmatpush.bf16.msrb.mxu2 %v7971_v37  ;;  %v10527_v52 = vld [vmem:[%s15373_s28 + $0x104] sm:$0xf]  ;;  %v7860_v37 = vld [vmem:[%s15373_s28 + $0x18] sm:$0xf0] }
 0x14c   :  { %2442 = vmatpush.bf16.msra.mxu1 %v7975_v51  ;;  %v7983_v59 = vor.u32 %v10527_v52, %v7980_v54  ;;  %v7859_v51 = vor.u32 %v10498_v32, %v7858_v29  ;;  %v8210_v54 = vld [vmem:[%s15373_s28 + $0x2c8] sm:$0xf]  ;;  %v10562_v29 = vld [vmem:[%s15373_s28 + $0x214] sm:$0xf0]  ;;  %v10528_v32 = vld [vmem:[%s15373_s28 + $0x10c] sm:$0xf] }
 0x14d   :  { %v8211_v61 = vor.u32 %v10586_v56, %v8210_v54  ;;  %v10617_v54 = vld [vmem:[%s15347_s6 + $0xac] sm:$0xf0] }
 0x14e   :  { %v1585_v36 = vpop.f32.mrf.mxu2  ;;  %2358 = vmatpush.bf16.msrb.mxu0 %v7983_v59  ;;  %v8084_v59 = vld [vmem:[%s15373_s28 + $0x1d8] sm:$0xf0] }
 0x14f   :  { %2472 = vmatpush.bf16.msrb.mxu3 %v8167_v0  ;;  %2391 = vmatpush.bf16.msrb.mxu2 %v7955_v48  ;;  %v312_v0 = vperm.slane %v12591_v53, 3  ;;  %v7927_v53 = vor.u32 %v10512_v1, %v7924_v2  ;;  %v10556_v48 = vld [vmem:[%s15373_s28 + $0x1ec] sm:$0xf]  ;;  %v8087_v41 = vor.u32 %v10552_v58, %v8084_v59  ;;  %v8068_v2 = vld [vmem:[%s15373_s28 + $0x1b8] sm:$0xf0] }
 0x150   :  { %2443 = vmatpush.bf16.msra.mxu1 %v7959_v50  ;;  %v8103_v52 = vor.u32 %v10556_v48, %v8100_v49  ;;  %v10548_v1 = vld [vmem:[%s15373_s28 + $0x1ac] sm:$0xf]  ;;  %v10621_v49 = vld [vmem:[%s15347_s6 + $0xcc] sm:$0xf0]  ;;  %v8318_v58 = vld [vmem:[%s15347_s6 + $0x80] sm:$0xf] }
 0x151   :  { %v1584_v5 = vadd.f32 %v1583_v24, %v312_v0  ;;  %v10582_v0 = vld [vmem:[%s15373_s28 + $0x2b4] sm:$0xf0]  ;;  %v8071_v62 = vor.u32 %v10548_v1, %v8068_v2  ;;  %v8270_v2 = vld [vmem:[%s15347_s6 + $0x20] sm:$0xf] }
 0x153   :  { %2473 = vmatpush.bf16.msrb.mxu3 %v8151_v45  ;;  %2392 = vmatpush.bf16.msrb.mxu2 %v7939_v60  ;;  %v7890_v45 = vld [vmem:[%s15373_s28 + $0x48] sm:$0xf]  ;;  %v1597_v13 = vadd.f32 %v13027_v11, %v1584_v5  ;;  %v7895_v11 = vor.u32 %v10504_v14, %v7892_v15  ;;  %v10544_v5 = vld [vmem:[%s15373_s28 + $0x18c] sm:$0xf] }
 0x154   :  { %2444 = vmatpush.bf16.msra.mxu1 %v7943_v63  ;;  %v7891_v16 = vor.u32 %v10506_v55, %v7890_v45  ;;  %v8194_v63 = vld [vmem:[%s15373_s28 + $0x2a8] sm:$0xf]  ;;  %v10574_v45 = vld [vmem:[%s15373_s28 + $0x274] sm:$0xf0]  ;;  %v10540_v55 = vld [vmem:[%s15373_s28 + $0x16c] sm:$0xf] }
 0x157   :  { %2474 = vmatpush.bf16.msrb.mxu3 %v8135_v23  ;;  %2393 = vmatpush.bf16.msrb.mxu2 %v7923_v3  ;;  %v8195_v3 = vor.u32 %v10582_v0, %v8194_v63  ;;  %v8286_v63 = vld [vmem:[%s15347_s6 + $0x40] sm:$0xf]  ;;  %v10605_v0 = vld [vmem:[%s15347_s6 + $0x4c] sm:$0xf0] }
 0x158   :  { %2445 = vmatpush.bf16.msra.mxu1 %v7927_v53  ;;  %v10578_v53 = vld [vmem:[%s15373_s28 + $0x294] sm:$0xf0]  ;;  %v8287_v1 = vor.u32 %v10605_v0, %v8286_v63  ;;  %v10629_v63 = vld [vmem:[%s15347_s6 + $0x10c] sm:$0xf0]  ;;  %v10627_v0 = vld [vmem:[%s15347_s6 + $0x104] sm:$0xf] }
 0x159   :  { %v8179_v8 = vor.u32 %v10578_v53, %v8178_v4  ;;  %v8254_v53 = vld [vmem:[%s15347_s6] sm:$0xf] }
 0x15b   :  { %2475 = vmatpush.bf16.msrb.mxu3 %v8119_v40  ;;  %v1609_v9 = vpop.f32.mrf.mxu1  ;;  %2394 = vmatpush.bf16.msrb.mxu2 %v7907_v10  ;;  %v7863_v40 = vor.u32 %v10496_v17, %v7860_v37  ;;  %v8162_v10 = vld [vmem:[%s15373_s28 + $0x268] sm:$0xf]  ;;  %v10592_v17 = vld [vmem:[%s15373_s28 + $0x30c] sm:$0xf]  ;;  %v8244_v37 = vld [vmem:[%s15373_s28 + $0x318] sm:$0xf0] }
 0x15c   :  { %2446 = vmatpush.bf16.msra.mxu1 %v7911_v12  ;;  %v1610_v19 = vadd.f32 %v1609_v9, %v1597_v13  ;;  %v8055_v9 = vor.u32 %v10544_v5, %v8052_v6  ;;  %v8036_v12 = vld [vmem:[%s15373_s28 + $0x178] sm:$0xf0]  ;;  %v8163_v14 = vor.u32 %v10574_v45, %v8162_v10  ;;  %v10597_v5 = vld [vmem:[%s15347_s6 + $0xc] sm:$0xf0]  ;;  %v10655_v10 = vld [vmem:[%s15347_s6 + $0x1e4] sm:$0xf] }
 0x15d   :  { %v8039_v15 = vor.u32 %v10540_v55, %v8036_v12  ;;  %v8255_v6 = vor.u32 %v10597_v5, %v8254_v53  ;;  %v8496_v55 = vld [vmem:[%s15347_s6 + $0x1f0] sm:$0xf0] }
 0x15e   :  { %2476 = vmatmul.bf16.vlgmr.msrb.gmra.mxu3 %v13069_v39  ;;  %v8499_v12 = vor.u32 %v10655_v10, %v8496_v55  ;;  %v8624_v53 = vld [vmem:[%s15347_s6 + $0x2f0] sm:$0xf0] }
 0x15f   :  { %2395 = vmatpush.bf16.msrb.mxu2 %v7891_v16  ;;  %v8146_v16 = vld [vmem:[%s15373_s28 + $0x248] sm:$0xf]  ;;  %v8608_v55 = vld [vmem:[%s15347_s6 + $0x2d0] sm:$0xf0] }
 0x160   :  { %2447 = vmatpush.bf16.msra.mxu1 %v7895_v11  ;;  %v8020_v11 = vld [vmem:[%s15373_s28 + $0x158] sm:$0xf0] }
 0x161   :  { %v1622_v22 = vpop.f32.mrf.mxu3  ;;  %v1648_v23 = vpop.f32.mrf.mxu0  ;;  %v8023_v20 = vor.u32 %v10536_v18, %v8020_v11  ;;  %v8462_v11 = vld [vmem:[%s15347_s6 + $0x1a0] sm:$0xf] }
 0x162   :  { %v1623_v24 = vadd.f32 %v1622_v22, %v1610_v19  ;;  %v8147_v19 = vor.u32 %v10570_v7, %v8146_v16  ;;  %v10566_v22 = vld [vmem:[%s15373_s28 + $0x234] sm:$0xf0]  ;;  %v8480_v7 = vld [vmem:[%s15347_s6 + $0x1d0] sm:$0xf0] }
 0x163   :  { %v1611_v25 = vpop.f32.mrf.mxu1  ;;  %2396 = vmatpush.bf16.msrb.mxu2 %v7875_v26 }
 0x164   :  { %2448 = vmatpush.bf16.msra.mxu1 %v7879_v33  ;;  %v8131_v25 = vor.u32 %v10566_v22, %v8130_v21  ;;  %v7988_v33 = vld [vmem:[%s15373_s28 + $0x118] sm:$0xf0]  ;;  %v10647_v21 = vld [vmem:[%s15347_s6 + $0x1a4] sm:$0xf]  ;;  %v8464_v22 = vld [vmem:[%s15347_s6 + $0x1b0] sm:$0xf0] }
 0x166   :  { %v1635_v27 = vpop.f32.mrf.mxu2 }
 0x167   :  { %v1636_v38 = vadd.f32 %v1635_v27, %v1623_v24  ;;  %2397 = vmatpush.bf16.msrb.mxu2 %v7859_v51  ;;  %v8114_v27 = vld [vmem:[%s15373_s28 + $0x208] sm:$0xf]  ;;  %v7991_v51 = vor.u32 %v10528_v32, %v7988_v33  ;;  %v8430_v33 = vld [vmem:[%s15347_s6 + $0x160] sm:$0xf] }
 0x168   :  { %2449 = vmatpush.bf16.msra.mxu1 %v7863_v40  ;;  %v8247_v40 = vor.u32 %v10592_v17, %v8244_v37  ;;  %v10641_v17 = vld [vmem:[%s15347_s6 + $0x16c] sm:$0xf0]  ;;  %v10639_v37 = vld [vmem:[%s15347_s6 + $0x164] sm:$0xf] }
 0x169   :  { %v1624_v42 = vpop.f32.mrf.mxu3  ;;  %v1650_v57 = vpop.f32.mrf.mxu0  ;;  %v1649_v28 = vadd.f32 %v1648_v23, %v1636_v38  ;;  %v10532_v23 = vld [vmem:[%s15373_s28 + $0x12c] sm:$0xf]  ;;  %v8115_v38 = vor.u32 %v10562_v29, %v8114_v27  ;;  %v8448_v27 = vld [vmem:[%s15347_s6 + $0x190] sm:$0xf0] }
 0x16a   :  { %v13285_v42 = vld [vmem:[%s15346_s5] sm:$0xf] }
 0x16b   :  { %v1661_v30 = vpop.f32.mrf.mxu1  ;;  %v1775_v57 = vperm.slane %v13285_v42, 0 }
 0x16c   :  { %v1662_v43 = vadd.f32 %v1661_v30, %v1649_v28 }
 0x16e   :  { %v1637_v44 = vpop.f32.mrf.mxu2  ;;  %v1668_v36 = vmax.f32 %v1662_v43, 0.0 }
 0x170   :  { %v13181_v50 = vpack.c.bf16 %v1668_v36, %v1668_v36 }
 0x172   :  { %8248 = vmatmul.msk.bf16.vlgmr.msra.gmra.mxu0 %vm1297_vm0, %v13181_v50  ;;  %8249 = vmatmul.msk.bf16.vlgmr.msra.gmra.mxu2 %vm1297_vm0, %v13181_v50 }
 0x173   :  { %8250 = vmatmul.msk.bf16.vlgmr.msrb.gmra.mxu1 %vm1297_vm0, %v13181_v50  ;;  %v1663_v60 = vpop.f32.mrf.mxu1  ;;  %2416 = vmatpush.bf16.msra.mxu0 %v8227_v35 }
 0x174   :  { %2455 = vmatpush.bf16.msra.mxu2 %v8103_v52  ;;  %v8334_v52 = vld [vmem:[%s15347_s6 + $0xa0] sm:$0xf] }
 0x175   :  { %v8335_v56 = vor.u32 %v10617_v54, %v8334_v52  ;;  %v8302_v60 = vld [vmem:[%s15347_s6 + $0x60] sm:$0xf]  ;;  %v10631_v52 = vld [vmem:[%s15347_s6 + $0x124] sm:$0xf] }
 0x177   :  { %2417 = vmatpush.bf16.msra.mxu0 %v8211_v61  ;;  %v10609_v61 = vld [vmem:[%s15347_s6 + $0x6c] sm:$0xf0] }
 0x178   :  { %2456 = vmatpush.bf16.msra.mxu2 %v8087_v41  ;;  %v8303_v41 = vor.u32 %v10609_v61, %v8302_v60  ;;  %v10689_v60 = vld [vmem:[%s15347_s6 + $0x2ec] sm:$0xf0] }
 0x17b   :  { %2418 = vmatpush.bf16.msra.mxu0 %v8195_v3  ;;  %v10601_v3 = vld [vmem:[%s15347_s6 + $0x2c] sm:$0xf0] }
 0x17c   :  { %2457 = vmatpush.bf16.msra.mxu2 %v8071_v62  ;;  %v8271_v62 = vor.u32 %v10601_v3, %v8270_v2  ;;  %v8384_v3 = vld [vmem:[%s15347_s6 + $0x110] sm:$0xf0] }
 0x17d   :  { %v8387_v5 = vor.u32 %v10627_v0, %v8384_v3 }
 0x17f   :  { %2419 = vmatpush.bf16.msra.mxu0 %v8179_v8  ;;  %v8494_v8 = vld [vmem:[%s15347_s6 + $0x1e0] sm:$0xf] }
 0x180   :  { %2458 = vmatpush.bf16.msra.mxu2 %v8055_v9  ;;  %v10657_v9 = vld [vmem:[%s15347_s6 + $0x1ec] sm:$0xf0] }
 0x181   :  { %v2295_v13 = vpop.f32.mrf.mxu3  ;;  %v8495_v45 = vor.u32 %v10657_v9, %v8494_v8  ;;  %v8606_v8 = vld [vmem:[%s15347_s6 + $0x2c0] sm:$0xf]  ;;  %v10685_v9 = vld [vmem:[%s15347_s6 + $0x2cc] sm:$0xf0] }
 0x182   :  { %2359 = vmatmul.bf16.vlgmr.msrb.gmra.mxu0 %v12857_v34  ;;  %2398 = vmatmul.bf16.vlgmr.msrb.gmra.mxu2 %v12755_v31  ;;  %v2296_v28 = vadd.f32 %v2295_v13, %v1775_v57  ;;  %v8478_v13 = vld [vmem:[%s15347_s6 + $0x1c0] sm:$0xf]  ;;  %v8607_v10 = vor.u32 %v10685_v9, %v8606_v8  ;;  %v10611_v8 = vld [vmem:[%s15347_s6 + $0x84] sm:$0xf]  ;;  %v8320_v9 = vld [vmem:[%s15347_s6 + $0x90] sm:$0xf0] }
 0x183   :  { %2450 = vmatmul.bf16.vlgmr.msra.gmra.mxu1 %v12755_v31  ;;  %2420 = vmatpush.bf16.msra.mxu0 %v8163_v14  ;;  %v8004_v31 = vld [vmem:[%s15373_s28 + $0x138] sm:$0xf0]  ;;  %v10653_v14 = vld [vmem:[%s15347_s6 + $0x1cc] sm:$0xf0] }
 0x184   :  { %2459 = vmatpush.bf16.msra.mxu2 %v8039_v15  ;;  %v8007_v26 = vor.u32 %v10532_v23, %v8004_v31  ;;  %v10651_v15 = vld [vmem:[%s15347_s6 + $0x1c4] sm:$0xf]  ;;  %3128 = vmatpush.bf16.msrb.mxu1 %v8495_v45  ;;  %v8479_v16 = vor.u32 %v10653_v14, %v8478_v13  ;;  %v8467_v31 = vor.u32 %v10647_v21, %v8464_v22  ;;  %v8590_v14 = vld [vmem:[%s15347_s6 + $0x2a0] sm:$0xf] }
 0x185   :  { %v8483_v18 = vor.u32 %v10651_v15, %v8480_v7  ;;  %v10683_v45 = vld [vmem:[%s15347_s6 + $0x2c4] sm:$0xf]  ;;  %v10681_v15 = vld [vmem:[%s15347_s6 + $0x2ac] sm:$0xf0] }
 0x186   :  { %v8611_v13 = vor.u32 %v10683_v45, %v8608_v55  ;;  %v10679_v7 = vld [vmem:[%s15347_s6 + $0x2a4] sm:$0xf]  ;;  %v8614_v45 = vld [vmem:[%s15347_s6 + $0x2c8] sm:$0xf]  ;;  %v10686_v55 = vld [vmem:[%s15347_s6 + $0x2d4] sm:$0xf0] }
 0x187   :  { %2421 = vmatpush.bf16.msra.mxu0 %v8147_v19  ;;  %v10649_v19 = vld [vmem:[%s15347_s6 + $0x1ac] sm:$0xf0]  ;;  %v10675_v22 = vld [vmem:[%s15347_s6 + $0x284] sm:$0xf] }
 0x188   :  { %2460 = vmatpush.bf16.msra.mxu2 %v8023_v20  ;;  %3129 = vmatpush.bf16.msrb.mxu1 %v8479_v16  ;;  %v8463_v23 = vor.u32 %v10649_v19, %v8462_v11  ;;  %v8591_v16 = vor.u32 %v10681_v15, %v8590_v14  ;;  %v8574_v19 = vld [vmem:[%s15347_s6 + $0x280] sm:$0xf]  ;;  %v10659_v15 = vld [vmem:[%s15347_s6 + $0x204] sm:$0xf] }
 0x189   :  { %v2297_v24 = vpop.f32.mrf.mxu3 }
 0x18a   :  { %v8446_v24 = vld [vmem:[%s15347_s6 + $0x180] sm:$0xf] }
 0x18b   :  { %2422 = vmatpush.bf16.msra.mxu0 %v8131_v25  ;;  %v10645_v25 = vld [vmem:[%s15347_s6 + $0x18c] sm:$0xf0] }
 0x18c   :  { %2461 = vmatpush.bf16.msra.mxu2 %v8007_v26  ;;  %v2308_v30 = vpop.f32.mrf.mxu1  ;;  %v10643_v26 = vld [vmem:[%s15347_s6 + $0x184] sm:$0xf]  ;;  %3130 = vmatpush.bf16.msrb.mxu1 %v8463_v23  ;;  %v8447_v29 = vor.u32 %v10645_v25, %v8446_v24  ;;  %v8576_v23 = vld [vmem:[%s15347_s6 + $0x290] sm:$0xf0]  ;;  %v8558_v24 = vld [vmem:[%s15347_s6 + $0x260] sm:$0xf] }
 0x18d   :  { %v13290_v43 = vadd.f32 %v2308_v30, %v2296_v28  ;;  %v8451_v32 = vor.u32 %v10643_v26, %v8448_v27  ;;  %v8414_v28 = vld [vmem:[%s15347_s6 + $0x140] sm:$0xf]  ;;  %v10637_v30 = vld [vmem:[%s15347_s6 + $0x14c] sm:$0xf0] }
 0x18e   :  { %v10673_v25 = vld [vmem:[%s15347_s6 + $0x26c] sm:$0xf0]  ;;  %v8638_v26 = vld [vmem:[%s15347_s6 + $0x300] sm:$0xf] }
 0x18f   :  { %2423 = vmatpush.bf16.msra.mxu0 %v8115_v38  ;;  %v8432_v38 = vld [vmem:[%s15347_s6 + $0x170] sm:$0xf0]  ;;  %v10693_v27 = vld [vmem:[%s15347_s6 + $0x30c] sm:$0xf0] }
 0x190   :  { %2462 = vmatpush.bf16.msra.mxu2 %v7991_v51  ;;  %3131 = vmatpush.bf16.msrb.mxu1 %v8447_v29  ;;  %v8435_v57 = vor.u32 %v10639_v37, %v8432_v38  ;;  %v8559_v29 = vor.u32 %v10673_v25, %v8558_v24  ;;  %v10671_v38 = vld [vmem:[%s15347_s6 + $0x264] sm:$0xf]  ;;  %v10682_v24 = vld [vmem:[%s15347_s6 + $0x2b4] sm:$0xf0]  ;;  %v8304_v25 = vld [vmem:[%s15347_s6 + $0x70] sm:$0xf0] }
 0x192   :  { %2424 = vmatmul.bf16.vlgmr.msra.gmra.mxu0 %v13069_v39  ;;  %v8367_v39 = vor.u32 %v10625_v47, %v8366_v46  ;;  %v10635_v46 = vld [vmem:[%s15347_s6 + $0x144] sm:$0xf] }
 0x193   :  { %2488 = vmatpush.bf16.msrb.mxu0 %v8247_v40  ;;  %2463 = vmatmul.bf16.vlgmr.msra.gmra.mxu2 %v12857_v34  ;;  %v8350_v34 = vld [vmem:[%s15347_s6 + $0xc0] sm:$0xf]  ;;  %v8431_v40 = vor.u32 %v10641_v17, %v8430_v33  ;;  %v10623_v33 = vld [vmem:[%s15347_s6 + $0xe4] sm:$0xf]  ;;  %v8368_v17 = vld [vmem:[%s15347_s6 + $0xf0] sm:$0xf0] }
 0x194   :  { %v2310_v48 = vpop.f32.mrf.mxu1  ;;  %v8351_v36 = vor.u32 %v10621_v49, %v8350_v34  ;;  %v8371_v37 = vor.u32 %v10623_v33, %v8368_v17  ;;  %v8288_v33 = vld [vmem:[%s15347_s6 + $0x50] sm:$0xf0]  ;;  %v8582_v17 = vld [vmem:[%s15347_s6 + $0x288] sm:$0xf] }
 0x195   :  { %3132 = vmatpush.bf16.msrb.mxu1 %v8431_v40  ;;  %v8415_v48 = vor.u32 %v10637_v30, %v8414_v28  ;;  %v8560_v40 = vld [vmem:[%s15347_s6 + $0x270] sm:$0xf0]  ;;  %v8542_v28 = vld [vmem:[%s15347_s6 + $0x240] sm:$0xf]  ;;  %v10669_v30 = vld [vmem:[%s15347_s6 + $0x24c] sm:$0xf0] }
 0x197   :  { %3115 = vmatpush.bf16.msra.mxu0 %v8367_v39  ;;  %v8416_v39 = vld [vmem:[%s15347_s6 + $0x150] sm:$0xf0] }
 0x198   :  { %v8419_v34 = vor.u32 %v10635_v46, %v8416_v39  ;;  %v8543_v46 = vor.u32 %v10669_v30, %v8542_v28  ;;  %v8352_v39 = vld [vmem:[%s15347_s6 + $0xd0] sm:$0xf0] }
 0x199   :  { %3133 = vmatpush.bf16.msrb.mxu1 %v8415_v48  ;;  %v10619_v48 = vld [vmem:[%s15347_s6 + $0xc4] sm:$0xf] }
 0x19b   :  { %3116 = vmatpush.bf16.msra.mxu0 %v8351_v36  ;;  %v8398_v36 = vld [vmem:[%s15347_s6 + $0x120] sm:$0xf] }
 0x19f   :  { %3117 = vmatpush.bf16.msra.mxu0 %v8335_v56  ;;  %v8400_v56 = vld [vmem:[%s15347_s6 + $0x130] sm:$0xf0] }
 0x1a1   :  { %v13292_v44 = vpop.f32.mrf.mxu3 }
 0x1a2   :  { %8251 = vmatmul.msk.bf16.vlgmr.msrb.gmra.mxu0 %vm1297_vm0, %v13181_v50  ;;  %v10613_v50 = vld [vmem:[%s15347_s6 + $0x8c] sm:$0xf0] }
 0x1a3   :  { %v8319_v59 = vor.u32 %v10613_v50, %v8318_v58  ;;  %v8403_v50 = vor.u32 %v10631_v52, %v8400_v56  ;;  %v10665_v56 = vld [vmem:[%s15347_s6 + $0x22c] sm:$0xf0] }
 0x1a5   :  { %3118 = vmatpush.bf16.msra.mxu0 %v8319_v59  ;;  %v8622_v59 = vld [vmem:[%s15347_s6 + $0x2e0] sm:$0xf] }
 0x1a6   :  { %v8623_v61 = vor.u32 %v10689_v60, %v8622_v59  ;;  %v10615_v60 = vld [vmem:[%s15347_s6 + $0xa4] sm:$0xf] }
 0x1a8   :  { %3141 = vmatpush.bf16.msrb.mxu2 %v8623_v61 }
 0x1a9   :  { %v2349_v35 = vpop.f32.mrf.mxu3  ;;  %3119 = vmatpush.bf16.msra.mxu0 %v8303_v41  ;;  %v8382_v41 = vld [vmem:[%s15347_s6 + $0x100] sm:$0xf] }
 0x1aa   :  { %v10633_v35 = vld [vmem:[%s15347_s6 + $0x12c] sm:$0xf0]  ;;  %v8383_v2 = vor.u32 %v10629_v63, %v8382_v41  ;;  %v8630_v41 = vld [vmem:[%s15347_s6 + $0x2e8] sm:$0xf]  ;;  %v10690_v63 = vld [vmem:[%s15347_s6 + $0x2f4] sm:$0xf0] }
 0x1ab   :  { %v8399_v54 = vor.u32 %v10633_v35, %v8398_v36  ;;  %v8544_v36 = vld [vmem:[%s15347_s6 + $0x250] sm:$0xf0] }
 0x1ac   :  { %3142 = vmatpush.bf16.msrb.mxu2 %v8607_v10 }
 0x1ad   :  { %3120 = vmatpush.bf16.msra.mxu0 %v8287_v1  ;;  %3134 = vmatpush.bf16.msrb.mxu1 %v8399_v54  ;;  %v8526_v54 = vld [vmem:[%s15347_s6 + $0x220] sm:$0xf] }
 0x1ae   :  { %v8527_v59 = vor.u32 %v10665_v56, %v8526_v54  ;;  %v8550_v54 = vld [vmem:[%s15347_s6 + $0x248] sm:$0xf]  ;;  %v10595_v56 = vld [vmem:[%s15347_s6 + $0x4] sm:$0xf] }
 0x1b0   :  { %3143 = vmatpush.bf16.msrb.mxu2 %v8591_v16  ;;  %v8512_v16 = vld [vmem:[%s15347_s6 + $0x210] sm:$0xf0] }
 0x1b1   :  { %3121 = vmatpush.bf16.msra.mxu0 %v8271_v62  ;;  %v10687_v62 = vld [vmem:[%s15347_s6 + $0x2e4] sm:$0xf]  ;;  %3135 = vmatpush.bf16.msrb.mxu1 %v8383_v2  ;;  %v8528_v2 = vld [vmem:[%s15347_s6 + $0x230] sm:$0xf0] }
 0x1b5   :  { %3122 = vmatpush.bf16.msra.mxu0 %v8255_v6  ;;  %v8627_v6 = vor.u32 %v10687_v62, %v8624_v53  ;;  %v8510_v53 = vld [vmem:[%s15347_s6 + $0x200] sm:$0xf] }
 0x1b7   :  { %3193 = vmatpush.bf16.msra.mxu1 %v8627_v6  ;;  %v10661_v6 = vld [vmem:[%s15347_s6 + $0x20c] sm:$0xf0] }
 0x1b9   :  { %3180 = vmatpush.bf16.msrb.mxu0 %v8499_v12 }
 0x1bb   :  { %3194 = vmatpush.bf16.msra.mxu1 %v8611_v13  ;;  %v8323_v13 = vor.u32 %v10611_v8, %v8320_v9 }
 0x1bd   :  { %3181 = vmatpush.bf16.msrb.mxu0 %v8483_v18  ;;  %v8592_v18 = vld [vmem:[%s15347_s6 + $0x2b0] sm:$0xf0] }
 0x1be   :  { %v8595_v11 = vor.u32 %v10679_v7, %v8592_v18  ;;  %v10691_v7 = vld [vmem:[%s15347_s6 + $0x304] sm:$0xf]  ;;  %v8515_v18 = vor.u32 %v10659_v15, %v8512_v16 }
 0x1c0   :  { %3195 = vmatpush.bf16.msra.mxu1 %v8595_v11  ;;  %v8640_v11 = vld [vmem:[%s15347_s6 + $0x310] sm:$0xf0] }
 0x1c1   :  { %v13338_v4 = vpop.f32.mrf.mxu3  ;;  %3182 = vmatpush.bf16.msrb.mxu0 %v8467_v31  ;;  %v8579_v31 = vor.u32 %v10675_v22, %v8576_v23  ;;  %v10607_v22 = vld [vmem:[%s15347_s6 + $0x64] sm:$0xf] }
 0x1c4   :  { %3196 = vmatpush.bf16.msra.mxu1 %v8579_v31  ;;  %v8598_v31 = vld [vmem:[%s15347_s6 + $0x2a8] sm:$0xf] }
 0x1c5   :  { %3183 = vmatpush.bf16.msrb.mxu0 %v8451_v32  ;;  %v8639_v32 = vor.u32 %v10693_v27, %v8638_v26  ;;  %v8307_v26 = vor.u32 %v10607_v22, %v8304_v25  ;;  %v1776_v27 = vperm.slane %v13285_v42, 1  ;;  %v1778_v22 = vperm.slane %v13285_v42, 3 }
 0x1c7   :  { %v13406_v51 = vpop.f32.mrf.mxu1  ;;  %3161 = vmatpush.bf16.msra.mxu3 %v8639_v32  ;;  %v10603_v32 = vld [vmem:[%s15347_s6 + $0x44] sm:$0xf] }
 0x1c9   :  { %v2414_v20 = vpop.f32.mrf.mxu3  ;;  %3184 = vmatpush.bf16.msrb.mxu0 %v8435_v57  ;;  %v8563_v57 = vor.u32 %v10671_v38, %v8560_v40  ;;  %v8291_v38 = vor.u32 %v10603_v32, %v8288_v33  ;;  %v10620_v33 = vld [vmem:[%s15347_s6 + $0xcc] sm:$0xf] }
 0x1ca   :  { %v10677_v20 = vld [vmem:[%s15347_s6 + $0x28c] sm:$0xf0] }
 0x1cb   :  { %v8575_v21 = vor.u32 %v10677_v20, %v8574_v19  ;;  %3167 = vmatpush.bf16.msrb.mxu3 %v8371_v37  ;;  %3197 = vmatpush.bf16.msra.mxu1 %v8563_v57  ;;  %v8615_v20 = vor.u32 %v10686_v55, %v8614_v45  ;;  %v10678_v37 = vld [vmem:[%s15347_s6 + $0x294] sm:$0xf0]  ;;  %v2348_v57 = vadd.f32 %v13292_v44, %v1776_v27  ;;  %v8518_v45 = vld [vmem:[%s15347_s6 + $0x208] sm:$0xf] }
 0x1cc   :  { %v8583_v30 = vor.u32 %v10678_v37, %v8582_v17  ;;  %v10674_v44 = vld [vmem:[%s15347_s6 + $0x274] sm:$0xf0]  ;;  %v8360_v17 = vld [vmem:[%s15347_s6 + $0xd8] sm:$0xf0] }
 0x1cd   :  { %v13417_v47 = vpop.f32.mrf.mxu2  ;;  %3185 = vmatpush.bf16.msrb.mxu0 %v8419_v34  ;;  %3144 = vmatpush.bf16.msrb.mxu2 %v8575_v21  ;;  %v8355_v34 = vor.u32 %v10619_v48, %v8352_v39  ;;  %v8643_v21 = vor.u32 %v10691_v7, %v8640_v11  ;;  %v8272_v48 = vld [vmem:[%s15347_s6 + $0x30] sm:$0xf0]  ;;  %v10662_v55 = vld [vmem:[%s15347_s6 + $0x214] sm:$0xf0] }
 0x1ce   :  { %v2322_v35 = vadd.f32 %v13417_v47, %v13290_v43  ;;  %v8336_v43 = vld [vmem:[%s15347_s6 + $0xb0] sm:$0xf0]  ;;  %v8519_v7 = vor.u32 %v10662_v55, %v8518_v45  ;;  %v8470_v55 = vld [vmem:[%s15347_s6 + $0x1a8] sm:$0xf] }
 0x1cf   :  { %v2375_v49 = vpop.f32.mrf.mxu1  ;;  %3168 = vmatpush.bf16.msrb.mxu3 %v8355_v34  ;;  %v8339_v0 = vor.u32 %v10615_v60, %v8336_v43  ;;  %v8646_v60 = vld [vmem:[%s15347_s6 + $0x308] sm:$0xf]  ;;  %v10694_v43 = vld [vmem:[%s15347_s6 + $0x314] sm:$0xf0] }
 0x1d0   :  { %v10667_v49 = vld [vmem:[%s15347_s6 + $0x244] sm:$0xf] }
 0x1d1   :  { %3186 = vmatpush.bf16.msrb.mxu0 %v8403_v50  ;;  %3145 = vmatpush.bf16.msrb.mxu2 %v8559_v29  ;;  %v8547_v52 = vor.u32 %v10667_v49, %v8544_v36  ;;  %v8599_v29 = vor.u32 %v10682_v24, %v8598_v31  ;;  %v8566_v49 = vld [vmem:[%s15347_s6 + $0x268] sm:$0xf] }
 0x1d3   :  { %3198 = vmatpush.bf16.msra.mxu1 %v8547_v52  ;;  %3169 = vmatpush.bf16.msrb.mxu3 %v8339_v0  ;;  %v8567_v52 = vor.u32 %v10674_v44, %v8566_v49  ;;  %v1777_v0 = vperm.slane %v13285_v42, 2  ;;  %v10622_v42 = vld [vmem:[%s15347_s6 + $0xd4] sm:$0xf0]  ;;  %v8326_v49 = vld [vmem:[%s15347_s6 + $0x88] sm:$0xf] }
 0x1d4   :  { %v10614_v44 = vld [vmem:[%s15347_s6 + $0x94] sm:$0xf0] }
 0x1d5   :  { %v2323_v1 = vpop.f32.mrf.mxu2  ;;  %3187 = vmatpush.bf16.msrb.mxu0 %v8387_v5  ;;  %3146 = vmatpush.bf16.msrb.mxu2 %v8543_v46  ;;  %v8631_v5 = vor.u32 %v10690_v63, %v8630_v41  ;;  %v10599_v46 = vld [vmem:[%s15347_s6 + $0x24] sm:$0xf] }
 0x1d6   :  { %v10663_v1 = vld [vmem:[%s15347_s6 + $0x224] sm:$0xf]  ;;  %v8275_v36 = vor.u32 %v10599_v46, %v8272_v48  ;;  %v8344_v46 = vld [vmem:[%s15347_s6 + $0xb8] sm:$0xf0] }
 0x1d7   :  { %v8531_v62 = vor.u32 %v10663_v1, %v8528_v2  ;;  %3170 = vmatpush.bf16.msrb.mxu3 %v8323_v13  ;;  %v10692_v13 = vld [vmem:[%s15347_s6 + $0x30c] sm:$0xf] }
 0x1d9   :  { %3147 = vmatpush.bf16.msrb.mxu2 %v8527_v59  ;;  %3199 = vmatpush.bf16.msra.mxu1 %v8531_v62 }
 0x1db   :  { %3171 = vmatpush.bf16.msrb.mxu3 %v8307_v26  ;;  %v8358_v26 = vld [vmem:[%s15347_s6 + $0xc8] sm:$0xf] }
 0x1dc   :  { %v8359_v37 = vor.u32 %v10622_v42, %v8358_v26  ;;  %v10656_v26 = vld [vmem:[%s15347_s6 + $0x1ec] sm:$0xf]  ;;  %v8504_v42 = vld [vmem:[%s15347_s6 + $0x1f8] sm:$0xf0] }
 0x1dd   :  { %3200 = vmatpush.bf16.msra.mxu1 %v8515_v18 }
 0x1df   :  { %3172 = vmatpush.bf16.msrb.mxu3 %v8291_v38 }
 0x1e1   :  { %v13434_v58 = vpop.f32.mrf.mxu3 }
 0x1e3   :  { %3173 = vmatpush.bf16.msrb.mxu3 %v8275_v36 }
 0x1e9   :  { %v2479_v12 = vpop.f32.mrf.mxu3 }
 0x1ea   :  { %v8511_v12 = vor.u32 %v10661_v6, %v8510_v53  ;;  %v10666_v6 = vld [vmem:[%s15347_s6 + $0x234] sm:$0xf0] }
 0x1ec   :  { %3148 = vmatpush.bf16.msrb.mxu2 %v8511_v12 }
 0x1ef   :  { %v2334_v50 = vpop.f32.mrf.mxu0 }
 0x1f0   :  { %v2335_v47 = vadd.f32 %v2334_v50, %v2322_v35  ;;  %v13552_v61 = vpop.f32.mrf.mxu1  ;;  %3213 = vmatpush.bf16.msra.mxu2 %v8643_v21  ;;  %v8256_v50 = vld [vmem:[%s15347_s6 + $0x10] sm:$0xf0]  ;;  %v10626_v21 = vld [vmem:[%s15347_s6 + $0xf4] sm:$0xf0] }
 0x1f2   :  { %v2494_v3 = vmax.f32 %v2335_v47, 0.0  ;;  %v8259_v47 = vor.u32 %v10595_v56, %v8256_v50  ;;  %v10612_v56 = vld [vmem:[%s15347_s6 + $0x8c] sm:$0xf]  ;;  %v8328_v50 = vld [vmem:[%s15347_s6 + $0x98] sm:$0xf0] }
 0x1f4   :  { %v13578_v10 = vpack.c.bf16 %v2494_v3, %v2494_v3  ;;  %v8647_v3 = vor.u32 %v10694_v43, %v8646_v60  ;;  %3174 = vmatpush.bf16.msrb.mxu3 %v8259_v47  ;;  %v8310_v60 = vld [vmem:[%s15347_s6 + $0x68] sm:$0xf]  ;;  %v10610_v43 = vld [vmem:[%s15347_s6 + $0x74] sm:$0xf0] }
 0x1f5   :  { %v2386_v14 = vpop.f32.mrf.mxu2 }
 0x1f6   :  { %3123 = vmatmul.bf16.vlgmr.msra.gmra.mxu0 %v13578_v10 }
 0x1f7   :  { %v2336_v19 = vpop.f32.mrf.mxu0  ;;  %3245 = vmatpush.bf16.msra.mxu0 %v8631_v5  ;;  %v8534_v5 = vld [vmem:[%s15347_s6 + $0x228] sm:$0xf] }
 0x1f8   :  { %v2440_v23 = vpop.f32.mrf.mxu1  ;;  %v8535_v9 = vor.u32 %v10666_v6, %v8534_v5  ;;  %v8294_v5 = vld [vmem:[%s15347_s6 + $0x48] sm:$0xf]  ;;  %v10606_v6 = vld [vmem:[%s15347_s6 + $0x54] sm:$0xf0] }
 0x1fb   :  { %3246 = vmatpush.bf16.msra.mxu0 %v8615_v20  ;;  %v8374_v20 = vld [vmem:[%s15347_s6 + $0xe8] sm:$0xf] }
 0x1fc   :  { %v8375_v31 = vor.u32 %v10626_v21, %v8374_v20  ;;  %v10646_v20 = vld [vmem:[%s15347_s6 + $0x194] sm:$0xf0]  ;;  %v10600_v21 = vld [vmem:[%s15347_s6 + $0x2c] sm:$0xf] }
 0x1fd   :  { %v2388_v40 = vpop.f32.mrf.mxu2 }
 0x1fe   :  { %v8342_v40 = vld [vmem:[%s15347_s6 + $0xa8] sm:$0xf] }
 0x1ff   :  { %v2360_v28 = vpop.f32.mrf.mxu0  ;;  %3247 = vmatpush.bf16.msra.mxu0 %v8599_v29 }
 0x200   :  { %v2361_v39 = vadd.f32 %v2360_v28, %v2348_v57  ;;  %v2451_v34 = vpop.f32.mrf.mxu1  ;;  %v10618_v57 = vld [vmem:[%s15347_s6 + $0xb4] sm:$0xf0]  ;;  %v8363_v28 = vor.u32 %v10620_v33, %v8360_v17  ;;  %v8264_v33 = vld [vmem:[%s15347_s6 + $0x18] sm:$0xf0] }
 0x201   :  { %v2452_v32 = vadd.f32 %v2451_v34, %v1778_v22  ;;  %v8343_v48 = vor.u32 %v10618_v57, %v8342_v40  ;;  %v8280_v22 = vld [vmem:[%s15347_s6 + $0x38] sm:$0xf0]  ;;  %v10652_v57 = vld [vmem:[%s15347_s6 + $0x1cc] sm:$0xf] }
 0x202   :  { %v2374_v35 = vadd.f32 %v13406_v51, %v2361_v39  ;;  %v10670_v51 = vld [vmem:[%s15347_s6 + $0x254] sm:$0xf0] }
 0x203   :  { %3248 = vmatpush.bf16.msra.mxu0 %v8583_v30  ;;  %v8551_v2 = vor.u32 %v10670_v51, %v8550_v54  ;;  %v10616_v30 = vld [vmem:[%s15347_s6 + $0xac] sm:$0xf] }
 0x204   :  { %v2387_v59 = vadd.f32 %v2386_v14, %v2374_v35  ;;  %v8648_v14 = vld [vmem:[%s15347_s6 + $0x318] sm:$0xf0]  ;;  %v8347_v35 = vor.u32 %v10616_v30, %v8344_v46  ;;  %v8422_v30 = vld [vmem:[%s15347_s6 + $0x148] sm:$0xf]  ;;  %v10638_v46 = vld [vmem:[%s15347_s6 + $0x154] sm:$0xf0] }
 0x205   :  { %v2399_v41 = vpop.f32.mrf.mxu2  ;;  %v8651_v11 = vor.u32 %v10692_v13, %v8648_v14  ;;  %v10604_v13 = vld [vmem:[%s15347_s6 + $0x4c] sm:$0xf]  ;;  %v8296_v14 = vld [vmem:[%s15347_s6 + $0x58] sm:$0xf0] }
 0x206   :  { %v2495_v63 = vmax.f32 %v2387_v59, 0.0  ;;  %v2400_v8 = vadd.f32 %v2399_v41, %v1777_v0  ;;  %v8327_v59 = vor.u32 %v10614_v44, %v8326_v49  ;;  %v8331_v41 = vor.u32 %v10612_v56, %v8328_v50  ;;  %v8472_v49 = vld [vmem:[%s15347_s6 + $0x1b8] sm:$0xf0]  ;;  %v8406_v44 = vld [vmem:[%s15347_s6 + $0x128] sm:$0xf] }
 0x207   :  { %v2362_v1 = vpop.f32.mrf.mxu0  ;;  %3249 = vmatpush.bf16.msra.mxu0 %v8567_v52  ;;  %v8502_v52 = vld [vmem:[%s15347_s6 + $0x1e8] sm:$0xf]  ;;  %v10630_v50 = vld [vmem:[%s15347_s6 + $0x114] sm:$0xf0] }
 0x208   :  { %v13657_v62 = vpack.c.bf16 %v2495_v63, %v2495_v63  ;;  %v2453_v53 = vpop.f32.mrf.mxu1  ;;  %v2413_v15 = vadd.f32 %v13338_v4, %v2400_v8  ;;  %v10624_v4 = vld [vmem:[%s15347_s6 + $0xec] sm:$0xf]  ;;  %v8486_v63 = vld [vmem:[%s15347_s6 + $0x1c8] sm:$0xf]  ;;  %v10654_v1 = vld [vmem:[%s15347_s6 + $0x1d4] sm:$0xf0] }
 0x209   :  { %v8311_v53 = vor.u32 %v10610_v43, %v8310_v60  ;;  %v8390_v56 = vld [vmem:[%s15347_s6 + $0x108] sm:$0xf]  ;;  %v10640_v43 = vld [vmem:[%s15347_s6 + $0x16c] sm:$0xf] }
 0x20a   :  { %3136 = vmatmul.bf16.vlgmr.msrb.gmra.mxu1 %v13657_v62  ;;  %3188 = vmatmul.bf16.vlgmr.msrb.gmra.mxu0 %v13657_v62  ;;  %v8391_v60 = vor.u32 %v10630_v50, %v8390_v56  ;;  %v10716_v50 = vld [vmem:[%s15349_s8 + $0xa8] sm:$0xff] }
 0x20b   :  { %3250 = vmatpush.bf16.msra.mxu0 %v8551_v2  ;;  %3265 = vmatpush.bf16.msrb.mxu1 %v8647_v3  ;;  %v10608_v2 = vld [vmem:[%s15347_s6 + $0x6c] sm:$0xf]  ;;  %v8312_v3 = vld [vmem:[%s15347_s6 + $0x78] sm:$0xf0] }
 0x20c   :  { %v8315_v45 = vor.u32 %v10608_v2, %v8312_v3  ;;  %v10636_v2 = vld [vmem:[%s15347_s6 + $0x14c] sm:$0xf]  ;;  %v8424_v3 = vld [vmem:[%s15347_s6 + $0x158] sm:$0xf0] }
 0x20d   :  { %v2401_v12 = vpop.f32.mrf.mxu2 }
 0x20e   :  { %v10650_v12 = vld [vmem:[%s15347_s6 + $0x1b4] sm:$0xf0] }
 0x20f   :  { %v2425_v16 = vpop.f32.mrf.mxu0  ;;  %3251 = vmatpush.bf16.msra.mxu0 %v8535_v9  ;;  %v8487_v9 = vor.u32 %v10654_v1, %v8486_v63  ;;  %v10684_v63 = vld [vmem:[%s15347_s6 + $0x2cc] sm:$0xf] }
 0x210   :  { %v2426_v18 = vadd.f32 %v2425_v16, %v2413_v15  ;;  %v8295_v15 = vor.u32 %v10606_v6, %v8294_v5  ;;  %v8278_v16 = vld [vmem:[%s15347_s6 + $0x28] sm:$0xf]  ;;  %v10680_v5 = vld [vmem:[%s15347_s6 + $0x2ac] sm:$0xf]  ;;  %v8600_v6 = vld [vmem:[%s15347_s6 + $0x2b8] sm:$0xf0] }
 0x212   :  { %v2439_v19 = vadd.f32 %v13552_v61, %v2426_v18  ;;  %v8376_v61 = vld [vmem:[%s15347_s6 + $0xf8] sm:$0xf0]  ;;  %v8471_v18 = vor.u32 %v10650_v12, %v8470_v55  ;;  %v8603_v55 = vor.u32 %v10680_v5, %v8600_v6  ;;  %v10676_v12 = vld [vmem:[%s15347_s6 + $0x28c] sm:$0xf]  ;;  %v10713_v6 = vld [vmem:[%s15349_s8 + $0x90] sm:$0xff] }
 0x213   :  { %3252 = vmatpush.bf16.msra.mxu0 %v8519_v7  ;;  %v8379_v29 = vor.u32 %v10624_v4, %v8376_v61  ;;  %v10602_v7 = vld [vmem:[%s15347_s6 + $0x34] sm:$0xf0]  ;;  %v8262_v4 = vld [vmem:[%s15347_s6 + $0x8] sm:$0xf] }
 0x214   :  { %v2496_v23 = vmax.f32 %v2439_v19, 0.0  ;;  %v8454_v19 = vld [vmem:[%s15347_s6 + $0x188] sm:$0xf]  ;;  %v10598_v61 = vld [vmem:[%s15347_s6 + $0x14] sm:$0xf0] }
 0x215   :  { %v8263_v17 = vor.u32 %v10598_v61, %v8262_v4  ;;  %v10664_v4 = vld [vmem:[%s15347_s6 + $0x22c] sm:$0xf]  ;;  %v8536_v61 = vld [vmem:[%s15347_s6 + $0x238] sm:$0xf0] }
 0x216   :  { %v13694_v24 = vpack.c.bf16 %v2496_v23, %v2496_v23  ;;  %v2464_v25 = vpop.f32.mrf.mxu2  ;;  %v8279_v23 = vor.u32 %v10602_v7, %v8278_v16  ;;  %v8392_v16 = vld [vmem:[%s15347_s6 + $0x118] sm:$0xf0] }
 0x217   :  { %3317 = vmatpush.bf16.msrb.mxu0 %v8651_v11  ;;  %v2427_v27 = vpop.f32.mrf.mxu0  ;;  %v2465_v38 = vadd.f32 %v2464_v25, %v2452_v32  ;;  %v8299_v11 = vor.u32 %v10604_v13, %v8296_v14  ;;  %v8283_v25 = vor.u32 %v10600_v21, %v8280_v22  ;;  %v10596_v32 = vld [vmem:[%s15347_s6 + $0xc] sm:$0xf]  ;;  %v8584_v13 = vld [vmem:[%s15347_s6 + $0x298] sm:$0xf0] }
 0x218   :  { %3149 = vmatmul.bf16.vlgmr.msrb.gmra.mxu2 %v13694_v24  ;;  %v8438_v27 = vld [vmem:[%s15347_s6 + $0x168] sm:$0xf]  ;;  %v8267_v40 = vor.u32 %v10596_v32, %v8264_v33  ;;  %v8587_v7 = vor.u32 %v10676_v12, %v8584_v13  ;;  %v10668_v21 = vld [vmem:[%s15347_s6 + $0x24c] sm:$0xf]  ;;  %v8552_v22 = vld [vmem:[%s15347_s6 + $0x258] sm:$0xf0] }
 0x219   :  { %3219 = vmatpush.bf16.msrb.mxu2 %v8375_v31  ;;  %v2478_v34 = vadd.f32 %v13434_v58, %v2465_v38  ;;  %v10658_v58 = vld [vmem:[%s15347_s6 + $0x1f4] sm:$0xf0]  ;;  %v8455_v31 = vor.u32 %v10646_v20, %v8454_v19  ;;  %v10700_v32 = vld [vmem:[%s15349_s8 + $0x28] sm:$0xff] }
 0x21a   :  { %3201 = vmatmul.bf16.vlgmr.msra.gmra.mxu1 %v13694_v24  ;;  %3253 = vmatmul.bf16.vlgmr.msra.gmra.mxu0 %v13694_v24  ;;  %v8503_v47 = vor.u32 %v10658_v58, %v8502_v52  ;;  %v8456_v58 = vld [vmem:[%s15347_s6 + $0x198] sm:$0xf0]  ;;  %v10712_v12 = vld [vmem:[%s15349_s8 + $0x88] sm:$0xff] }
 0x21b   :  { %3271 = vmatpush.bf16.msra.mxu1 %v8379_v29  ;;  %v10642_v29 = vld [vmem:[%s15347_s6 + $0x174] sm:$0xf0] }
 0x21c   :  { %v8439_v38 = vor.u32 %v10642_v29, %v8438_v27  ;;  %v10701_v27 = vld [vmem:[%s15349_s8 + $0x30] sm:$0xff] }
 0x21d   :  { %3220 = vmatpush.bf16.msrb.mxu2 %v8359_v37  ;;  %v8507_v37 = vor.u32 %v10656_v26, %v8504_v42  ;;  %v8520_v26 = vld [vmem:[%s15347_s6 + $0x218] sm:$0xf0] }
 0x21e   :  { %v2466_v39 = vpop.f32.mrf.mxu2  ;;  %v10702_v42 = vld [vmem:[%s15349_s8 + $0x38] sm:$0xff] }
 0x21f   :  { %v2490_v36 = vpop.f32.mrf.mxu0  ;;  %3272 = vmatpush.bf16.msra.mxu1 %v8363_v28  ;;  %v8488_v28 = vld [vmem:[%s15347_s6 + $0x1d8] sm:$0xf0]  ;;  %v8423_v39 = vor.u32 %v10638_v46, %v8422_v30  ;;  %3538 = vmatpush.bf16.msra.mxu0 %v10702_v42  ;;  %v10709_v30 = vld [vmem:[%s15349_s8 + $0x70] sm:$0xff]  ;;  %v10695_v46 = vld [vmem:[%s15349_s8] sm:$0xff] }
 0x220   :  { %v2491_v54 = vadd.f32 %v2490_v36, %v2478_v34  ;;  %v10648_v34 = vld [vmem:[%s15347_s6 + $0x1ac] sm:$0xf]  ;;  %v10634_v36 = vld [vmem:[%s15347_s6 + $0x134] sm:$0xf0] }
 0x221   :  { %3221 = vmatpush.bf16.msrb.mxu2 %v8343_v48  ;;  %v8491_v48 = vor.u32 %v10652_v57, %v8488_v28  ;;  %v8407_v52 = vor.u32 %v10634_v36, %v8406_v44  ;;  %v10696_v28 = vld [vmem:[%s15349_s8 + $0x8] sm:$0xff]  ;;  %v10718_v44 = vld [vmem:[%s15349_s8 + $0xb8] sm:$0xff] }
 0x222   :  { %v2497_v51 = vmax.f32 %v2491_v54, 0.0  ;;  %v10644_v54 = vld [vmem:[%s15347_s6 + $0x18c] sm:$0xf]  ;;  %v10706_v36 = vld [vmem:[%s15349_s8 + $0x58] sm:$0xff] }
 0x223   :  { %3273 = vmatpush.bf16.msra.mxu1 %v8347_v35  ;;  %v8475_v35 = vor.u32 %v10648_v34, %v8472_v49  ;;  %3539 = vmatpush.bf16.msra.mxu0 %v10701_v27  ;;  %v10707_v49 = vld [vmem:[%s15349_s8 + $0x60] sm:$0xff] }
 0x224   :  { %v2501_v0 = vpack.c.bf16 %v2497_v51, %v2497_v51  ;;  %v8459_v51 = vor.u32 %v10644_v54, %v8456_v58  ;;  %v10717_v54 = vld [vmem:[%s15349_s8 + $0xb0] sm:$0xff] }
 0x225   :  { %3222 = vmatpush.bf16.msrb.mxu2 %v8327_v59  ;;  %v8632_v59 = vld [vmem:[%s15347_s6 + $0x2f8] sm:$0xf0]  ;;  %v10705_v58 = vld [vmem:[%s15349_s8 + $0x50] sm:$0xff] }
 0x226   :  { %8652 = vmatmul.msk.bf16.vlgmr.msra.gmra.mxu3 %vm1297_vm0, %v2501_v0 }
 0x227   :  { %3232 = vmatpush.bf16.msra.mxu3 %v8503_v47  ;;  %v2492_v8 = vpop.f32.mrf.mxu0  ;;  %3274 = vmatpush.bf16.msra.mxu1 %v8331_v41  ;;  %v8440_v47 = vld [vmem:[%s15347_s6 + $0x178] sm:$0xf0] }
 0x228   :  { %8653 = vmatmul.msk.bf16.vlgmr.msra.gmra.mxu2 %vm1297_vm0, %v2501_v0  ;;  %v8443_v1 = vor.u32 %v10640_v43, %v8440_v47  ;;  %v8427_v8 = vor.u32 %v10636_v2, %v8424_v3  ;;  %3540 = vmatpush.bf16.msra.mxu0 %v10700_v32  ;;  %v10715_v47 = vld [vmem:[%s15349_s8 + $0xa0] sm:$0xff] }
 0x229   :  { %3223 = vmatpush.bf16.msrb.mxu2 %v8311_v53 }
 0x22a   :  { %8654 = vmatmul.msk.bf16.vlgmr.msrb.gmra.mxu1 %vm1297_vm0, %v2501_v0  ;;  %8655 = vmatmul.msk.bf16.vlgmr.msrb.gmra.mxu0 %vm1297_vm0, %v2501_v0  ;;  %v8616_v0 = vld [vmem:[%s15347_s6 + $0x2d8] sm:$0xf0] }
 0x22b   :  { %3233 = vmatpush.bf16.msra.mxu3 %v8487_v9  ;;  %3275 = vmatpush.bf16.msra.mxu1 %v8315_v45  ;;  %v8619_v53 = vor.u32 %v10684_v63, %v8616_v0  ;;  %v10632_v9 = vld [vmem:[%s15347_s6 + $0x12c] sm:$0xf]  ;;  %v8408_v45 = vld [vmem:[%s15347_s6 + $0x138] sm:$0xf0] }
 0x22c   :  { %v8411_v14 = vor.u32 %v10632_v9, %v8408_v45 }
 0x22d   :  { %3224 = vmatpush.bf16.msrb.mxu2 %v8295_v15  ;;  %v10628_v15 = vld [vmem:[%s15347_s6 + $0x10c] sm:$0xf] }
 0x22e   :  { %v8395_v19 = vor.u32 %v10628_v15, %v8392_v16  ;;  %v10711_v16 = vld [vmem:[%s15349_s8 + $0x80] sm:$0xff] }
 0x22f   :  { %3234 = vmatpush.bf16.msra.mxu3 %v8471_v18  ;;  %3276 = vmatpush.bf16.msra.mxu1 %v8299_v11  ;;  %v10672_v18 = vld [vmem:[%s15347_s6 + $0x26c] sm:$0xf]  ;;  %v8568_v11 = vld [vmem:[%s15347_s6 + $0x278] sm:$0xf0] }
 0x230   :  { %v8571_v20 = vor.u32 %v10672_v18, %v8568_v11 }
 0x231   :  { %3225 = vmatpush.bf16.msrb.mxu2 %v8279_v23  ;;  %v8555_v23 = vor.u32 %v10668_v21, %v8552_v22 }
 0x233   :  { %3235 = vmatpush.bf16.msra.mxu3 %v8455_v31  ;;  %3277 = vmatpush.bf16.msra.mxu1 %v8283_v25  ;;  %v8539_v31 = vor.u32 %v10664_v4, %v8536_v61  ;;  %v10660_v25 = vld [vmem:[%s15347_s6 + $0x20c] sm:$0xf] }
 0x235   :  { %3226 = vmatpush.bf16.msrb.mxu2 %v8263_v17  ;;  %v10698_v17 = vld [vmem:[%s15349_s8 + $0x18] sm:$0xff] }
 0x236   :  { %3175 = vmatmul.bf16.vlgmr.msrb.gmra.mxu3 %v13578_v10 }
 0x237   :  { %3236 = vmatpush.bf16.msra.mxu3 %v8439_v38  ;;  %3278 = vmatpush.bf16.msra.mxu1 %v8267_v40  ;;  %v10710_v38 = vld [vmem:[%s15349_s8 + $0x78] sm:$0xff] }
 0x238   :  { %3227 = vmatmul.bf16.vlgmr.msrb.gmra.mxu2 %v13578_v10 }
 0x239   :  { %3284 = vmatpush.bf16.msra.mxu2 %v8507_v37  ;;  %v10697_v37 = vld [vmem:[%s15349_s8 + $0x10] sm:$0xff] }
 0x23a   :  { %3279 = vmatmul.bf16.vlgmr.msra.gmra.mxu1 %v13578_v10  ;;  %v10688_v10 = vld [vmem:[%s15347_s6 + $0x2ec] sm:$0xf]  ;;  %s7038_s6 = sshll.u32 %s11272_s23, 4  ;;  %s7039_s6 = int_to_ptr.vmem [resolvable:$true] %s7038_s6 }
 0x23b   :  { %3237 = vmatpush.bf16.msra.mxu3 %v8423_v39  ;;  %v8635_v41 = vor.u32 %v10688_v10, %v8632_v59  ;;  %3551 = vmatpush.bf16.msrb.mxu1 %v10710_v38  ;;  %v13994_v10 = vld [vmem:[%s15348_s7] sm:$0xf]  ;;  %v10704_v59 = vld [vmem:[%s15349_s8 + $0x48] sm:$0xff] }
 0x23c   :  { %v2604_v43 = vperm.slane %v13994_v10, 0  ;;  %v2605_v11 = vperm.slane %v13994_v10, 1  ;;  %v2606_v27 = vperm.slane %v13994_v10, 2 }
 0x23d   :  { %3285 = vmatpush.bf16.msra.mxu2 %v8491_v48  ;;  %v10708_v48 = vld [vmem:[%s15349_s8 + $0x68] sm:$0xff] }
 0x23f   :  { %3238 = vmatpush.bf16.msra.mxu3 %v8407_v52  ;;  %3552 = vmatpush.bf16.msrb.mxu1 %v10709_v30  ;;  %v2607_v30 = vperm.slane %v13994_v10, 3  ;;  %v11107_v10 = vld [vmem:[%s15350_s9] ss:$0 sm:$0xff]  ;;  %s11270_s9 = smov 108  }
 0x241   :  { %3286 = vmatpush.bf16.msra.mxu2 %v8475_v35 }
 0x243   :  { %3239 = vmatpush.bf16.msra.mxu3 %v8391_v60  ;;  %3553 = vmatpush.bf16.msrb.mxu1 %v10708_v48 }
 0x245   :  { %3287 = vmatpush.bf16.msra.mxu2 %v8459_v51 }
 0x246   :  { %3240 = vmatmul.bf16.vlgmr.msra.gmra.mxu3 %v13657_v62 }
 0x247   :  { %3297 = vmatpush.bf16.msrb.mxu3 %v8635_v41  ;;  %3554 = vmatpush.bf16.msrb.mxu1 %v10707_v49  ;;  %v10703_v41 = vld [vmem:[%s15349_s8 + $0x40] sm:$0xff] }
 0x249   :  { %3288 = vmatpush.bf16.msra.mxu2 %v8443_v1  ;;  %v10714_v1 = vld [vmem:[%s15349_s8 + $0x98] sm:$0xff] }
 0x24b   :  { %3298 = vmatpush.bf16.msrb.mxu3 %v8619_v53  ;;  %3555 = vmatpush.bf16.msrb.mxu1 %v10706_v36 }
 0x24d   :  { %3289 = vmatpush.bf16.msra.mxu2 %v8427_v8 }
 0x24f   :  { %3299 = vmatpush.bf16.msrb.mxu3 %v8603_v55  ;;  %3556 = vmatpush.bf16.msrb.mxu1 %v10705_v58 }
 0x251   :  { %3290 = vmatpush.bf16.msra.mxu2 %v8411_v14 }
 0x253   :  { %3300 = vmatpush.bf16.msrb.mxu3 %v8587_v7  ;;  %3557 = vmatpush.bf16.msrb.mxu1 %v10704_v59 }
 0x255   :  { %3291 = vmatpush.bf16.msra.mxu2 %v8395_v19 }
 0x257   :  { %3301 = vmatpush.bf16.msrb.mxu3 %v8571_v20  ;;  %3558 = vmatpush.bf16.msrb.mxu1 %v10703_v41 }
 0x258   :  { %3292 = vmatmul.bf16.vlgmr.msra.gmra.mxu2 %v13657_v62  ;;  %v8523_v62 = vor.u32 %v10660_v25, %v8520_v26 }
 0x259   :  { %3564 = vmatpush.bf16.msrb.mxu2 %v10718_v44 }
 0x25b   :  { %3302 = vmatpush.bf16.msrb.mxu3 %v8555_v23 }
 0x25d   :  { %3565 = vmatpush.bf16.msrb.mxu2 %v10717_v54 }
 0x25f   :  { %3303 = vmatpush.bf16.msrb.mxu3 %v8539_v31 }
 0x261   :  { %3566 = vmatpush.bf16.msrb.mxu2 %v10716_v50 }
 0x263   :  { %3304 = vmatpush.bf16.msrb.mxu3 %v8523_v62 }
 0x265   :  { %3567 = vmatpush.bf16.msrb.mxu2 %v10715_v47 }
 0x266   :  { %3305 = vmatmul.bf16.vlgmr.msrb.gmra.mxu3 %v13694_v24  ;;  %v10699_v24 = vld [vmem:[%s15349_s8 + $0x20] sm:$0xff] }
 0x267   :  { %3541 = vmatpush.bf16.msra.mxu0 %v10699_v24  ;;  %v10719_v24 = vld [vmem:[%s15349_s8 + $0xc0] sm:$0xff] }
 0x268   :  { %3584 = vmatpush.bf16.msra.mxu3 %v10719_v24  ;;  %v9019_v24 = vld [vmem:[#allocation2 + $0x1e0] sm:$0xf] }
 0x269   :  { %3568 = vmatpush.bf16.msrb.mxu2 %v10714_v1 }
 0x26b   :  { %3542 = vmatpush.bf16.msra.mxu0 %v10698_v17 }
 0x26d   :  { %3569 = vmatpush.bf16.msrb.mxu2 %v10713_v6 }
 0x26f   :  { %3543 = vmatpush.bf16.msra.mxu0 %v10697_v37 }
 0x271   :  { %3570 = vmatpush.bf16.msrb.mxu2 %v10712_v12 }
 0x273   :  { %v3124_v29 = vpop.f32.mrf.mxu0  ;;  %3544 = vmatpush.bf16.msra.mxu0 %v10696_v28 }
 0x274   :  { %v3125_v0 = vadd.f32 %v3124_v29, %v2604_v43  ;;  %v3606_v43 = vld [vmem:[%s15351_s10 + $0x28] sm:$0x33] }
 0x275   :  { %3571 = vmatpush.bf16.msrb.mxu2 %v10711_v16 }
 0x277   :  { %3545 = vmatpush.bf16.msra.mxu0 %v10695_v46 }
 0x27b   :  { %v3126_v33 = vpop.f32.mrf.mxu0 }
 0x287   :  { %v3137_v40 = vpop.f32.mrf.mxu1  ;;  %v13959_v57 = vpop.f32.mrf.mxu0 }
 0x288   :  { %v3138_v2 = vadd.f32 %v3137_v40, %v3125_v0  ;;  %v3634_v0 = vunpack.c.h.b16 %v3606_v43 }
 0x28f   :  { %v3139_v39 = vpop.f32.mrf.mxu1  ;;  %v3191_v34 = vpop.f32.mrf.mxu0 }
 0x297   :  { %v3202_v35 = vpop.f32.mrf.mxu1  ;;  %v3254_v52 = vpop.f32.mrf.mxu0 }
 0x29b   :  { %v3150_v56 = vpop.f32.mrf.mxu2 }
 0x29c   :  { %v3151_v5 = vadd.f32 %v3150_v56, %v3138_v2 }
 0x29f   :  { %v3204_v51 = vpop.f32.mrf.mxu1  ;;  %v3256_v60 = vpop.f32.mrf.mxu0 }
 0x2a0   :  { %v3605_v60 = vld [vmem:[%s15351_s10 + $0x20] sm:$0x33] }
 0x2a1   :  { %v3631_v47 = vunpack.c.l.b16 %v3605_v60  ;;  %v3632_v41 = vunpack.c.h.b16 %v3605_v60  ;;  %v10810_v60 = vld [vmem:[#allocation2 + $0x2ac] sm:$0xf0] }
 0x2a3   :  { %v3152_v63 = vpop.f32.mrf.mxu2  ;;  %v3639_v1 = vpack.c.b16 %v3631_v47, %v3631_v47  ;;  %v3640_v2 = vpack.c.b16 %v3632_v41, %v3632_v41  ;;  %v10822_v41 = vld [vmem:[#allocation2 + $0x30c] sm:$0xf0] }
 0x2a4   :  { %v3633_v63 = vunpack.c.l.b16 %v3606_v43  ;;  %v9163_v43 = vld [vmem:[#allocation2 + $0x300] sm:$0xf] }
 0x2a5   :  { %v3653_v6 = vsel %vm3651_vm1, %v3639_v1, 0 }
 0x2a6   :  { %3670 = vmatpush.bf16.msrb.mxu3 %v3653_v6  ;;  %v9099_v6 = vld [vmem:[#allocation2 + $0x280] sm:$0xf] }
 0x2a7   :  { %v3267_v3 = vpop.f32.mrf.mxu1  ;;  %v3319_v53 = vpop.f32.mrf.mxu0 }
 0x2a9   :  { %v3163_v8 = vpop.f32.mrf.mxu3 }
 0x2aa   :  { %v3164_v9 = vadd.f32 %v3163_v8, %v3151_v5  ;;  %v3656_v8 = vsel %vm3651_vm1, %v3640_v2, 0  ;;  %v9164_v2 = vor.u32 %v10822_v41, %v9163_v43  ;;  %v8861_v41 = vld [vmem:[#allocation2 + $0xb0] sm:$0xf0] }
 0x2ab   :  { %v3215_v45 = vpop.f32.mrf.mxu2  ;;  %3683 = vmatpush.bf16.msrb.mxu0 %v3656_v8  ;;  %v10806_v8 = vld [vmem:[#allocation2 + $0x28c] sm:$0xf0] }
 0x2ac   :  { %v3323_v55 = vmax.f32 %v3164_v9, 0.0 }
 0x2ae   :  { %v3327_v13 = vpack.c.bf16 %v3323_v55, %v3323_v55 }
 0x2af   :  { %v3269_v14 = vpop.f32.mrf.mxu1  ;;  %v3321_v15 = vpop.f32.mrf.mxu0 }
 0x2b0   :  { %3546 = vmatmul.bf16.vlgmr.msra.gmra.mxu0 %v3327_v13 }
 0x2b1   :  { %v3165_v7 = vpop.f32.mrf.mxu3 }
 0x2b3   :  { %v3217_v18 = vpop.f32.mrf.mxu2 }
 0x2b7   :  { %v3280_v19 = vpop.f32.mrf.mxu1 }
 0x2b8   :  { %v3281_v48 = vadd.f32 %v3280_v19, %v2607_v30  ;;  %v10722_v19 = vld [vmem:[%s15351_s10 + $0xc] sm:$0xf0] }
 0x2b9   :  { %v3176_v20 = vpop.f32.mrf.mxu3  ;;  %v10746_v30 = vld [vmem:[#allocation2 + $0xac] sm:$0xf0] }
 0x2ba   :  { %v3177_v21 = vadd.f32 %v3176_v20, %v2605_v11  ;;  %v8759_v11 = vld [vmem:[%s15351_s10] sm:$0xf]  ;;  %v10720_v20 = vld [vmem:[%s15351_s10 + $0x4] sm:$0xf] }
 0x2bb   :  { %v3228_v22 = vpop.f32.mrf.mxu2 }
 0x2bc   :  { %v3190_v23 = vadd.f32 %v13959_v57, %v3177_v21  ;;  %v3229_v29 = vadd.f32 %v3228_v22, %v2606_v27  ;;  %v8760_v21 = vor.u32 %v10722_v19, %v8759_v11  ;;  %v8761_v22 = vld [vmem:[%s15351_s10 + $0x10] sm:$0xf0]  ;;  %v10754_v27 = vld [vmem:[#allocation2 + $0xec] sm:$0xf0]  ;;  %v8795_v19 = vld [vmem:[#allocation2 + $0x20] sm:$0xf] }
 0x2be   :  { %v3203_v4 = vadd.f32 %v3202_v35, %v3190_v23  ;;  %v8767_v23 = vld [vmem:[%s15351_s10 + $0x8] sm:$0xf]  ;;  %3671 = vmatpush.bf16.msrb.mxu3 %v8760_v21 }
 0x2bf   :  { %v3282_v61 = vpop.f32.mrf.mxu1 }
 0x2c0   :  { %v3216_v31 = vadd.f32 %v3215_v45, %v3203_v4  ;;  %v10723_v4 = vld [vmem:[%s15351_s10 + $0x14] sm:$0xf0]  ;;  %v8764_v61 = vor.u32 %v10720_v20, %v8761_v22  ;;  %v10730_v20 = vld [vmem:[#allocation2 + $0x2c] sm:$0xf0]  ;;  %v3590_v22 = vld [vmem:[%s15374_s29] sm:$0xff] }
 0x2c1   :  { %v3178_v25 = vpop.f32.mrf.mxu3 }
 0x2c2   :  { %v3324_v26 = vmax.f32 %v3216_v31, 0.0  ;;  %v8768_v31 = vor.u32 %v10723_v4, %v8767_v23  ;;  %v10721_v25 = vld [vmem:[%s15351_s10 + $0xc] sm:$0xf]  ;;  %3684 = vmatpush.bf16.msrb.mxu0 %v8764_v61  ;;  %v8923_v23 = vld [vmem:[#allocation2 + $0x120] sm:$0xf] }
 0x2c3   :  { %v3230_v62 = vpop.f32.mrf.mxu2  ;;  %v10762_v4 = vld [vmem:[#allocation2 + $0x12c] sm:$0xf0] }
 0x2c4   :  { %v3328_v42 = vpack.c.bf16 %v3324_v26, %v3324_v26  ;;  %v8769_v26 = vld [vmem:[%s15351_s10 + $0x18] sm:$0xf0] }
 0x2c5   :  { %v8772_v62 = vor.u32 %v10721_v25, %v8769_v26  ;;  %v10798_v25 = vld [vmem:[#allocation2 + $0x24c] sm:$0xf0] }
 0x2c6   :  { %3559 = vmatmul.bf16.vlgmr.msrb.gmra.mxu1 %v3328_v42  ;;  %v8891_v42 = vld [vmem:[#allocation2 + $0xe0] sm:$0xf] }
 0x2c9   :  { %v3241_v32 = vpop.f32.mrf.mxu3 }
 0x2ca   :  { %v3242_v33 = vadd.f32 %v3241_v32, %v3229_v29  ;;  %v8875_v29 = vld [vmem:[#allocation2 + $0xc0] sm:$0xf]  ;;  %v8892_v32 = vor.u32 %v10754_v27, %v8891_v42 }
 0x2cb   :  { %v8779_v27 = vld [vmem:[#allocation2] sm:$0xf] }
 0x2cc   :  { %v3255_v17 = vadd.f32 %v3254_v52, %v3242_v33  ;;  %v10750_v33 = vld [vmem:[#allocation2 + $0xcc] sm:$0xf0] }
 0x2ce   :  { %v3268_v37 = vadd.f32 %v3267_v3, %v3255_v17  ;;  %v3641_v3 = vpack.c.b16 %v3633_v63, %v3633_v63  ;;  %v10786_v17 = vld [vmem:[#allocation2 + $0x1ec] sm:$0xf0]  ;;  %v8827_v63 = vld [vmem:[#allocation2 + $0x60] sm:$0xf] }
 0x2d0   :  { %v3325_v38 = vmax.f32 %v3268_v37, 0.0  ;;  %v3659_v9 = vsel %vm3651_vm1, %v3641_v3, 0  ;;  %v9020_v37 = vor.u32 %v10786_v17, %v9019_v24  ;;  %v8955_v3 = vld [vmem:[#allocation2 + $0x160] sm:$0xf]  ;;  %v8893_v24 = vld [vmem:[#allocation2 + $0xf0] sm:$0xf0] }
 0x2d1   :  { %v3243_v40 = vpop.f32.mrf.mxu3  ;;  %3696 = vmatpush.bf16.msra.mxu1 %v3659_v9  ;;  %v10784_v17 = vld [vmem:[#allocation2 + $0x1e4] sm:$0xf] }
 0x2d2   :  { %v3329_v57 = vpack.c.bf16 %v3325_v38, %v3325_v38  ;;  %v9003_v38 = vld [vmem:[#allocation2 + $0x1c0] sm:$0xf]  ;;  %v8876_v40 = vor.u32 %v10750_v33, %v8875_v29  ;;  %4350 = vmatpush.bf16.msra.mxu0 %v9020_v37  ;;  %v10726_v29 = vld [vmem:[#allocation2 + $0xc] sm:$0xf0]  ;;  %v8924_v33 = vor.u32 %v10762_v4, %v8923_v23  ;;  %v9021_v37 = vld [vmem:[#allocation2 + $0x1f0] sm:$0xf0] }
 0x2d3   :  { %v10732_v23 = vld [vmem:[#allocation2 + $0x44] sm:$0xf]  ;;  %v8813_v4 = vld [vmem:[#allocation2 + $0x50] sm:$0xf0] }
 0x2d4   :  { %3572 = vmatmul.bf16.vlgmr.msrb.gmra.mxu2 %v3329_v57  ;;  %v10782_v57 = vld [vmem:[#allocation2 + $0x1cc] sm:$0xf0] }
 0x2d5   :  { %3697 = vmatpush.bf16.msra.mxu1 %v8768_v31  ;;  %v9067_v31 = vld [vmem:[#allocation2 + $0x240] sm:$0xf] }
 0x2db   :  { %v3293_v28 = vpop.f32.mrf.mxu2 }
 0x2dc   :  { %v3294_v39 = vadd.f32 %v3293_v28, %v3281_v48  ;;  %v8859_v28 = vld [vmem:[#allocation2 + $0xa0] sm:$0xf] }
 0x2dd   :  { %v8987_v48 = vld [vmem:[#allocation2 + $0x1a0] sm:$0xf] }
 0x2e3   :  { %v3295_v46 = vpop.f32.mrf.mxu2 }
 0x2e4   :  { %v9004_v46 = vor.u32 %v10782_v57, %v9003_v38  ;;  %v9068_v38 = vor.u32 %v10798_v25, %v9067_v31  ;;  %v8907_v57 = vld [vmem:[#allocation2 + $0x100] sm:$0xf]  ;;  %v8816_v31 = vor.u32 %v10732_v23, %v8813_v4  ;;  %v9101_v25 = vld [vmem:[#allocation2 + $0x290] sm:$0xf0]  ;;  %v9027_v23 = vld [vmem:[#allocation2 + $0x1e8] sm:$0xf] }
 0x2e5   :  { %v10787_v4 = vld [vmem:[#allocation2 + $0x1f4] sm:$0xf0] }
 0x2e6   :  { %4351 = vmatpush.bf16.msra.mxu0 %v9004_v46  ;;  %v9149_v46 = vld [vmem:[#allocation2 + $0x2f0] sm:$0xf0] }
 0x2e9   :  { %v3306_v34 = vpop.f32.mrf.mxu3 }
 0x2ea   :  { %v3307_v49 = vadd.f32 %v3306_v34, %v3294_v39  ;;  %v10778_v39 = vld [vmem:[#allocation2 + $0x1ac] sm:$0xf0]  ;;  %v9147_v34 = vld [vmem:[#allocation2 + $0x2e0] sm:$0xf] }
 0x2ec   :  { %v3320_v44 = vadd.f32 %v3319_v53, %v3307_v49  ;;  %v3642_v53 = vpack.c.b16 %v3634_v0, %v3634_v0  ;;  %v10818_v49 = vld [vmem:[#allocation2 + $0x2ec] sm:$0xf0] }
 0x2ed   :  { %v10738_v0 = vld [vmem:[#allocation2 + $0x6c] sm:$0xf0] }
 0x2ee   :  { %v3326_v36 = vmax.f32 %v3320_v44, 0.0  ;;  %v3662_v45 = vsel %vm3651_vm1, %v3642_v53, 0  ;;  %v8860_v44 = vor.u32 %v10746_v30, %v8859_v28  ;;  %v10770_v53 = vld [vmem:[#allocation2 + $0x16c] sm:$0xf0]  ;;  %v8828_v9 = vor.u32 %v10738_v0, %v8827_v63  ;;  %v10816_v30 = vld [vmem:[#allocation2 + $0x2e4] sm:$0xf] }
 0x2ef   :  { %3709 = vmatpush.bf16.msra.mxu2 %v3662_v45  ;;  %v8811_v45 = vld [vmem:[#allocation2 + $0x40] sm:$0xf]  ;;  %v10758_v28 = vld [vmem:[#allocation2 + $0x10c] sm:$0xf0]  ;;  %v10776_v63 = vld [vmem:[#allocation2 + $0x1a4] sm:$0xf] }
 0x2f0   :  { %v3330_v35 = vpack.c.bf16 %v3326_v36, %v3326_v36  ;;  %v8843_v36 = vld [vmem:[#allocation2 + $0x80] sm:$0xf]  ;;  %v8989_v0 = vld [vmem:[#allocation2 + $0x1b0] sm:$0xf0] }
 0x2f1   :  { %v3308_v54 = vpop.f32.mrf.mxu3 }
 0x2f2   :  { %8756 = vmatmul.msk.bf16.vlgmr.msra.gmra.mxu3 %vm1297_vm0, %v3330_v35  ;;  %v9148_v35 = vor.u32 %v10818_v49, %v9147_v34  ;;  %v10742_v54 = vld [vmem:[#allocation2 + $0x8c] sm:$0xf0]  ;;  %v8780_v49 = vor.u32 %v10726_v29, %v8779_v27  ;;  %v10820_v29 = vld [vmem:[#allocation2 + $0x304] sm:$0xf] }
 0x2f3   :  { %3710 = vmatpush.bf16.msra.mxu2 %v8772_v62  ;;  %4337 = vmatpush.bf16.msra.mxu3 %v8892_v32  ;;  %v8844_v47 = vor.u32 %v10742_v54, %v8843_v36  ;;  %v8796_v62 = vor.u32 %v10730_v20, %v8795_v19  ;;  %v10752_v32 = vld [vmem:[#allocation2 + $0xe4] sm:$0xf]  ;;  %v9024_v36 = vor.u32 %v10784_v17, %v9021_v37  ;;  %v8877_v54 = vld [vmem:[#allocation2 + $0xd0] sm:$0xf0]  ;;  %v9035_v20 = vld [vmem:[#allocation2 + $0x200] sm:$0xf] }
 0x2f4   :  { %4363 = vmatpush.bf16.msrb.mxu1 %v9148_v35  ;;  %v10748_v35 = vld [vmem:[#allocation2 + $0xc4] sm:$0xf]  ;;  %v8797_v17 = vld [vmem:[#allocation2 + $0x30] sm:$0xf0] }
 0x2f5   :  { %v10800_v37 = vld [vmem:[#allocation2 + $0x264] sm:$0xf] }
 0x2f7   :  { %4338 = vmatpush.bf16.msra.mxu3 %v8876_v40  ;;  %4383 = vmatpush.bf16.msrb.mxu2 %v9164_v2 }
 0x2fb   :  { %4339 = vmatpush.bf16.msra.mxu3 %v8860_v44  ;;  %v8896_v44 = vor.u32 %v10752_v32, %v8893_v24  ;;  %v9165_v32 = vld [vmem:[#allocation2 + $0x310] sm:$0xf0]  ;;  %v10728_v24 = vld [vmem:[#allocation2 + $0x24] sm:$0xf] }
 0x2ff   :  { %4340 = vmatpush.bf16.msra.mxu3 %v8844_v47  ;;  %v10744_v47 = vld [vmem:[#allocation2 + $0xa4] sm:$0xf] }
 0x300   :  { %v8864_v2 = vor.u32 %v10744_v47, %v8861_v41 }
 0x303   :  { %4341 = vmatpush.bf16.msra.mxu3 %v8828_v9 }
 0x32d   :  { %v3547_v52 = vpop.f32.mrf.mxu0 }
 0x32e   :  { %v3548_v5 = vadd.f32 %v11107_v10, %v3547_v52  ;;  %v8988_v52 = vor.u32 %v10778_v39, %v8987_v48  ;;  %v9115_v10 = vld [vmem:[#allocation2 + $0x2a0] sm:$0xf]  ;;  %v10794_v39 = vld [vmem:[#allocation2 + $0x22c] sm:$0xf0] }
 0x32f   :  { %v9051_v48 = vld [vmem:[#allocation2 + $0x220] sm:$0xf] }
 0x330   :  { %4352 = vmatpush.bf16.msra.mxu0 %v8988_v52  ;;  %v8908_v52 = vor.u32 %v10758_v28, %v8907_v57  ;;  %v10760_v57 = vld [vmem:[#allocation2 + $0x124] sm:$0xf]  ;;  %v8925_v28 = vld [vmem:[#allocation2 + $0x130] sm:$0xf0] }
 0x335   :  { %v3549_v58 = vpop.f32.mrf.mxu0 }
 0x336   :  { %v9131_v58 = vld [vmem:[#allocation2 + $0x2c0] sm:$0xf] }
 0x343   :  { %v3560_v56 = vpop.f32.mrf.mxu1 }
 0x344   :  { %v3561_v55 = vadd.f32 %v3560_v56, %v3548_v5  ;;  %v10814_v56 = vld [vmem:[#allocation2 + $0x2cc] sm:$0xf0]  ;;  %v9116_v5 = vor.u32 %v10810_v60, %v9115_v10  ;;  %v9133_v10 = vld [vmem:[#allocation2 + $0x2d0] sm:$0xf0]  ;;  %v8880_v60 = vor.u32 %v10748_v35, %v8877_v54 }
 0x345   :  { %v8909_v35 = vld [vmem:[#allocation2 + $0x110] sm:$0xf0] }
 0x34b   :  { %v3562_v50 = vpop.f32.mrf.mxu1 }
 0x34c   :  { %v8971_v50 = vld [vmem:[#allocation2 + $0x180] sm:$0xf] }
 0x357   :  { %v3573_v59 = vpop.f32.mrf.mxu2 }
 0x358   :  { %v3574_v12 = vadd.f32 %v3573_v59, %v3561_v55  ;;  %v10774_v59 = vld [vmem:[#allocation2 + $0x18c] sm:$0xf0] }
 0x359   :  { %v8972_v1 = vor.u32 %v10774_v59, %v8971_v50  ;;  %v10734_v55 = vld [vmem:[#allocation2 + $0x4c] sm:$0xf0]  ;;  %v9052_v50 = vor.u32 %v10794_v39, %v9051_v48  ;;  %v10724_v48 = vld [vmem:[#allocation2 + $0x4] sm:$0xf]  ;;  %v8781_v39 = vld [vmem:[#allocation2 + $0x10] sm:$0xf0] }
 0x35a   :  { %v8812_v11 = vor.u32 %v10734_v55, %v8811_v45  ;;  %v10736_v55 = vld [vmem:[#allocation2 + $0x64] sm:$0xf] }
 0x35b   :  { %4353 = vmatpush.bf16.msra.mxu0 %v8972_v1 }
 0x35c   :  { %4342 = vmatpush.bf16.msra.mxu3 %v8812_v11 }
 0x35f   :  { %v3575_v51 = vpop.f32.mrf.mxu2 }
 0x360   :  { %v9132_v51 = vor.u32 %v10814_v56, %v9131_v58  ;;  %4343 = vmatpush.bf16.msra.mxu3 %v8796_v62  ;;  %v9005_v58 = vld [vmem:[#allocation2 + $0x1d0] sm:$0xf0]  ;;  %v9152_v56 = vor.u32 %v10816_v30, %v9149_v46  ;;  %v8928_v46 = vor.u32 %v10760_v57, %v8925_v28 }
 0x361   :  { %v8941_v62 = vld [vmem:[#allocation2 + $0x150] sm:$0xf0] }
 0x362   :  { %4364 = vmatpush.bf16.msrb.mxu1 %v9132_v51  ;;  %v10812_v51 = vld [vmem:[#allocation2 + $0x2c4] sm:$0xf] }
 0x363   :  { %v9136_v1 = vor.u32 %v10812_v51, %v9133_v10  ;;  %v3607_v10 = vld [vmem:[%s15352_s11] sm:$0xf] }
 0x364   :  { %4344 = vmatpush.bf16.msra.mxu3 %v8780_v49  ;;  %v8784_v49 = vor.u32 %v10724_v48, %v8781_v39 }
 0x366   :  { %4365 = vmatpush.bf16.msrb.mxu1 %v9116_v5  ;;  %v8845_v5 = vld [vmem:[#allocation2 + $0x90] sm:$0xf0] }
 0x375   :  { %v3586_v13 = vpop.f32.mrf.mxu3 }
 0x376   :  { %v14035_v14 = vadd.f32 %v3586_v13, %v3574_v12  ;;  %v8956_v12 = vor.u32 %v10770_v53, %v8955_v3  ;;  %v8939_v13 = vld [vmem:[#allocation2 + $0x140] sm:$0xf]  ;;  %v8992_v3 = vor.u32 %v10776_v63, %v8989_v0  ;;  %v10740_v53 = vld [vmem:[#allocation2 + $0x84] sm:$0xf]  ;;  %v9171_v0 = vld [vmem:[#allocation2 + $0x308] sm:$0xf] }
 0x377   :  { %v8848_v9 = vor.u32 %v10740_v53, %v8845_v5  ;;  %v10755_v53 = vld [vmem:[#allocation2 + $0xf4] sm:$0xf0] }
 0x378   :  { %v3591_v15 = vmul.f32 0.5, %v14035_v14  ;;  %7005 = vst.msk [vmem:[#allocation8] sm:$0xff] %vm3647_vm2, %v14035_v14  ;;  %4354 = vmatpush.bf16.msra.mxu0 %v8956_v12  ;;  %v8829_v12 = vld [vmem:[#allocation2 + $0x70] sm:$0xf0] }
 0x37a   :  { %v3592_v16 = vmul.f32 1.442695, %v3591_v15  ;;  %v10766_v15 = vld [vmem:[#allocation2 + $0x14c] sm:$0xf0] }
 0x37b   :  { %v8940_v21 = vor.u32 %v10766_v15, %v8939_v13  ;;  %v10808_v13 = vld [vmem:[#allocation2 + $0x2a4] sm:$0xf]  ;;  %v8832_v15 = vor.u32 %v10736_v55, %v8829_v12 }
 0x37c   :  { %11108 = vpow2.f32 %v3592_v16  ;;  %v9100_v16 = vor.u32 %v10806_v8, %v9099_v6  ;;  %v10772_v6 = vld [vmem:[#allocation2 + $0x184] sm:$0xf]  ;;  %v8973_v8 = vld [vmem:[#allocation2 + $0x190] sm:$0xf0] }
 0x37d   :  { %v3588_v7 = vpop.f32.mrf.mxu3  ;;  %4355 = vmatpush.bf16.msra.mxu0 %v8940_v21  ;;  %v8976_v45 = vor.u32 %v10772_v6, %v8973_v8  ;;  %v10790_v21 = vld [vmem:[#allocation2 + $0x20c] sm:$0xf0]  ;;  %v3609_v6 = vperm.slane %v3607_v10, 0 }
 0x37e   :  { %v9083_v7 = vld [vmem:[#allocation2 + $0x260] sm:$0xf]  ;;  %4366 = vmatpush.bf16.msrb.mxu1 %v9100_v16  ;;  %v9117_v16 = vld [vmem:[#allocation2 + $0x2b0] sm:$0xf0] }
 0x37f   :  { %v9120_v11 = vor.u32 %v10808_v13, %v9117_v16  ;;  %v8883_v16 = vld [vmem:[#allocation2 + $0xc8] sm:$0xf] }
 0x381   :  { %4356 = vmatpush.bf16.msra.mxu0 %v8924_v33  ;;  %v9168_v33 = vor.u32 %v10820_v29, %v9165_v32  ;;  %v9028_v32 = vor.u32 %v10787_v4, %v9027_v23  ;;  %v10767_v23 = vld [vmem:[#allocation2 + $0x154] sm:$0xf0] }
 0x382   :  { %v11109_v18 = vpop.eup %11108 }
 0x383   :  { %3595 = vrot.lane.b32.xlu0 %v11109_v18, %s11270_s9  ;;  %v10802_v18 = vld [vmem:[#allocation2 + $0x26c] sm:$0xf0] }
 0x384   :  { %v9084_v61 = vor.u32 %v10802_v18, %v9083_v7  ;;  %v10768_v7 = vld [vmem:[#allocation2 + $0x164] sm:$0xf]  ;;  %v8957_v18 = vld [vmem:[#allocation2 + $0x170] sm:$0xf0] }
 0x385   :  { %4357 = vmatpush.bf16.msra.mxu0 %v8908_v52  ;;  %v8960_v19 = vor.u32 %v10768_v7, %v8957_v18  ;;  %v10751_v7 = vld [vmem:[#allocation2 + $0xd4] sm:$0xf0] }
 0x386   :  { %4367 = vmatpush.bf16.msrb.mxu1 %v9084_v61  ;;  %v10804_v61 = vld [vmem:[#allocation2 + $0x284] sm:$0xf] }
 0x38a   :  { %4368 = vmatpush.bf16.msrb.mxu1 %v9068_v38  ;;  %v8800_v38 = vor.u32 %v10728_v24, %v8797_v17  ;;  %v10815_v24 = vld [vmem:[#allocation2 + $0x2d4] sm:$0xf0] }
 0x38b   :  { %7007 = vrot.lane.b32.xlu0 %v14035_v14, %s11270_s9 }
 0x38e   :  { %4369 = vmatpush.bf16.msrb.mxu1 %v9052_v50  ;;  %v10788_v50 = vld [vmem:[#allocation2 + $0x204] sm:$0xf] }
 0x3f5   :  { %v3596_v26 = vpop.permute.xlu0 %3595 }
 0x3f6   :  { %v3598_v42 = vmul.f32 %v3596_v26, %v3590_v22  ;;  %v9036_v22 = vor.u32 %v10790_v21, %v9035_v20  ;;  %v10764_v26 = vld [vmem:[#allocation2 + $0x144] sm:$0xf]  ;;  %v10819_v20 = vld [vmem:[#allocation2 + $0x2f4] sm:$0xf0] }
 0x3f7   :  { %v8944_v27 = vor.u32 %v10764_v26, %v8941_v62 }
 0x3f8   :  { %v3599_v40 = vadd.f32 %v3598_v42, %v14035_v14  ;;  %v10780_v14 = vld [vmem:[#allocation2 + $0x1c4] sm:$0xf]  ;;  %4370 = vmatpush.bf16.msrb.mxu1 %v9036_v22  ;;  %v9104_v42 = vor.u32 %v10804_v61, %v9101_v25  ;;  %v8884_v25 = vor.u32 %v10751_v7, %v8883_v16  ;;  %v8803_v7 = vld [vmem:[#allocation2 + $0x28] sm:$0xf] }
 0x3f9   :  { %v9008_v43 = vor.u32 %v10780_v14, %v9005_v58  ;;  %v10792_v14 = vld [vmem:[#allocation2 + $0x224] sm:$0xf]  ;;  %v9053_v58 = vld [vmem:[#allocation2 + $0x230] sm:$0xf0] }
 0x3fa   :  { %v3600_v34 = vpack.c.bf16 %v3599_v40, %v3599_v40  ;;  %v9085_v40 = vld [vmem:[#allocation2 + $0x270] sm:$0xf0] }
 0x3fb   :  { %v9088_v30 = vor.u32 %v10800_v37, %v9085_v40  ;;  %v9011_v37 = vld [vmem:[#allocation2 + $0x1c8] sm:$0xf] }
 0x3fc   :  { %8773 = vmatmul.msk.bf16.vlgmr.msrb.gmra.mxu3 %vm3647_vm2, %v3600_v34  ;;  %8774 = vmatmul.msk.bf16.vlgmr.msrb.gmra.mxu0 %vm3647_vm2, %v3600_v34 }
 0x3fd   :  { %8775 = vmatmul.msk.bf16.vlgmr.msra.gmra.mxu1 %vm3647_vm2, %v3600_v34  ;;  %8776 = vmatmul.msk.bf16.vlgmr.msra.gmra.mxu2 %vm3647_vm2, %v3600_v34  ;;  %v7008_v59 = vpop.permute.xlu0 %7007  ;;  %v10796_v34 = vld [vmem:[#allocation2 + $0x244] sm:$0xf] }
 0x3fe   :  { %7010 = vst.msk [vmem:[#allocation10] sm:$0xff] %vm3647_vm2, %v7008_v59  ;;  %4389 = vmatpush.bf16.msra.mxu2 %v8896_v44  ;;  %4402 = vmatpush.bf16.msrb.mxu3 %v9024_v36  ;;  %v9069_v44 = vld [vmem:[#allocation2 + $0x250] sm:$0xf0]  ;;  %v10756_v36 = vld [vmem:[#allocation2 + $0x104] sm:$0xf] }
 0x3ff   :  { %4415 = vmatpush.bf16.msrb.mxu0 %v9152_v56  ;;  %4435 = vmatpush.bf16.msra.mxu1 %v9168_v33  ;;  %v9072_v54 = vor.u32 %v10796_v34, %v9069_v44  ;;  %v8912_v52 = vor.u32 %v10756_v36, %v8909_v35  ;;  %v9056_v56 = vor.u32 %v10792_v14, %v9053_v58  ;;  %v9037_v59 = vld [vmem:[#allocation2 + $0x210] sm:$0xf0]  ;;  %v9139_v33 = vld [vmem:[#allocation2 + $0x2c8] sm:$0xf]  ;;  %v10779_v36 = vld [vmem:[#allocation2 + $0x1b4] sm:$0xf0] }
 0x400   :  { %v9040_v51 = vor.u32 %v10788_v50, %v9037_v59  ;;  %v9140_v28 = vor.u32 %v10815_v24, %v9139_v33  ;;  %v9123_v34 = vld [vmem:[#allocation2 + $0x2a8] sm:$0xf]  ;;  %v10795_v24 = vld [vmem:[#allocation2 + $0x234] sm:$0xf0] }
 0x401   :  { %v8995_v44 = vld [vmem:[#allocation2 + $0x1a8] sm:$0xf] }
 0x402   :  { %4390 = vmatpush.bf16.msra.mxu2 %v8880_v60  ;;  %4403 = vmatpush.bf16.msrb.mxu3 %v9008_v43  ;;  %v3610_v60 = vperm.slane %v3607_v10, 1  ;;  %v3611_v43 = vperm.slane %v3607_v10, 2  ;;  %v8835_v58 = vld [vmem:[#allocation2 + $0x68] sm:$0xf]  ;;  %v8996_v50 = vor.u32 %v10779_v36, %v8995_v44  ;;  %v10759_v36 = vld [vmem:[#allocation2 + $0x114] sm:$0xf0] }
 0x403   :  { %4416 = vmatpush.bf16.msrb.mxu0 %v9136_v1  ;;  %v10823_v1 = vld [vmem:[#allocation2 + $0x314] sm:$0xf0]  ;;  %v9107_v59 = vld [vmem:[#allocation2 + $0x288] sm:$0xf] }
 0x404   :  { %v9059_v33 = vld [vmem:[#allocation2 + $0x228] sm:$0xf] }
 0x406   :  { %4391 = vmatpush.bf16.msra.mxu2 %v8864_v2  ;;  %4404 = vmatpush.bf16.msrb.mxu3 %v8992_v3  ;;  %v8899_v3 = vld [vmem:[#allocation2 + $0xe8] sm:$0xf] }
 0x407   :  { %4417 = vmatpush.bf16.msrb.mxu0 %v9120_v11  ;;  %v8900_v12 = vor.u32 %v10755_v53, %v8899_v3  ;;  %v9091_v53 = vld [vmem:[#allocation2 + $0x268] sm:$0xf] }
 0x40a   :  { %4392 = vmatpush.bf16.msra.mxu2 %v8848_v9  ;;  %4405 = vmatpush.bf16.msrb.mxu3 %v8976_v45  ;;  %v3612_v9 = vperm.slane %v3607_v10, 3  ;;  %v9172_v45 = vor.u32 %v10823_v1, %v9171_v0  ;;  %v8819_v1 = vld [vmem:[#allocation2 + $0x48] sm:$0xf] }
 0x40b   :  { %4418 = vmatpush.bf16.msrb.mxu0 %v9104_v42  ;;  %v8867_v42 = vld [vmem:[#allocation2 + $0xa8] sm:$0xf] }
 0x40e   :  { %4393 = vmatpush.bf16.msra.mxu2 %v8832_v15  ;;  %4406 = vmatpush.bf16.msrb.mxu3 %v8960_v19  ;;  %v9155_v19 = vld [vmem:[#allocation2 + $0x2e8] sm:$0xf] }
 0x40f   :  { %4419 = vmatpush.bf16.msrb.mxu0 %v9088_v30  ;;  %v9156_v62 = vor.u32 %v10819_v20, %v9155_v19  ;;  %v8851_v30 = vld [vmem:[#allocation2 + $0x88] sm:$0xf]  ;;  %v10799_v20 = vld [vmem:[#allocation2 + $0x254] sm:$0xf0] }
 0x410   :  { %v9075_v19 = vld [vmem:[#allocation2 + $0x248] sm:$0xf] }
 0x412   :  { %4394 = vmatpush.bf16.msra.mxu2 %v8816_v31  ;;  %4407 = vmatpush.bf16.msrb.mxu3 %v8944_v27  ;;  %v10747_v27 = vld [vmem:[#allocation2 + $0xb4] sm:$0xf0] }
 0x413   :  { %4420 = vmatpush.bf16.msrb.mxu0 %v9072_v54  ;;  %v8868_v40 = vor.u32 %v10747_v27, %v8867_v42  ;;  %v10753_v54 = vld [vmem:[#allocation2 + $0xec] sm:$0xf] }
 0x414   :  { %v10785_v42 = vld [vmem:[#allocation2 + $0x1ec] sm:$0xf] }
 0x416   :  { %4395 = vmatpush.bf16.msra.mxu2 %v8800_v38  ;;  %4408 = vmatpush.bf16.msrb.mxu3 %v8928_v46  ;;  %v10783_v38 = vld [vmem:[#allocation2 + $0x1d4] sm:$0xf0] }
 0x417   :  { %4421 = vmatpush.bf16.msrb.mxu0 %v9056_v56  ;;  %v10743_v46 = vld [vmem:[#allocation2 + $0x94] sm:$0xf0]  ;;  %v9012_v39 = vor.u32 %v10783_v38, %v9011_v37  ;;  %v8931_v38 = vld [vmem:[#allocation2 + $0x128] sm:$0xf] }
 0x418   :  { %v8852_v35 = vor.u32 %v10743_v46, %v8851_v30  ;;  %v10739_v56 = vld [vmem:[#allocation2 + $0x74] sm:$0xf0]  ;;  %v8837_v30 = vld [vmem:[#allocation2 + $0x78] sm:$0xf0] }
 0x41a   :  { %4396 = vmatpush.bf16.msra.mxu2 %v8784_v49  ;;  %4409 = vmatpush.bf16.msrb.mxu3 %v8912_v52  ;;  %v10811_v49 = vld [vmem:[#allocation2 + $0x2b4] sm:$0xf0]  ;;  %v8901_v52 = vld [vmem:[#allocation2 + $0xf8] sm:$0xf0] }
 0x41b   :  { %4422 = vmatpush.bf16.msrb.mxu0 %v9040_v51  ;;  %v9124_v14 = vor.u32 %v10811_v49, %v9123_v34  ;;  %v10807_v51 = vld [vmem:[#allocation2 + $0x294] sm:$0xf0]  ;;  %v8904_v10 = vor.u32 %v10753_v54, %v8901_v52  ;;  %v9013_v34 = vld [vmem:[#allocation2 + $0x1d8] sm:$0xf0]  ;;  %v8915_v49 = vld [vmem:[#allocation2 + $0x108] sm:$0xf] }
 0x41c   :  { %v9108_v0 = vor.u32 %v10807_v51, %v9107_v59  ;;  %v10791_v54 = vld [vmem:[#allocation2 + $0x214] sm:$0xf0]  ;;  %v10733_v59 = vld [vmem:[#allocation2 + $0x4c] sm:$0xf]  ;;  %v8821_v51 = vld [vmem:[#allocation2 + $0x58] sm:$0xf0] }
 0x479   :  { %v3686_v47 = vpop.f32.mrf.mxu0 }
 0x47a   :  { %v3687_v41 = vadd.f32 %v3686_v47, %v3610_v60  ;;  %v3699_v63 = vpop.f32.mrf.mxu1  ;;  %v8979_v60 = vld [vmem:[#allocation2 + $0x188] sm:$0xf]  ;;  %v8836_v47 = vor.u32 %v10739_v56, %v8835_v58  ;;  %v10821_v58 = vld [vmem:[#allocation2 + $0x30c] sm:$0xf]  ;;  %v9173_v56 = vld [vmem:[#allocation2 + $0x318] sm:$0xf0] }
 0x47b   :  { %v3700_v2 = vadd.f32 %v3699_v63, %v3611_v43  ;;  %v10775_v43 = vld [vmem:[#allocation2 + $0x194] sm:$0xf0]  ;;  %v8885_v63 = vld [vmem:[#allocation2 + $0xd8] sm:$0xf0] }
 0x47c   :  { %v3717_v5 = vmax.f32 %v3687_v41, 0.0  ;;  %v10749_v41 = vld [vmem:[#allocation2 + $0xcc] sm:$0xf]  ;;  %v8980_v3 = vor.u32 %v10775_v43, %v8979_v60  ;;  %v8916_v43 = vor.u32 %v10759_v36, %v8915_v49  ;;  %v8933_v36 = vld [vmem:[#allocation2 + $0x138] sm:$0xf0] }
 0x47d   :  { %v3718_v8 = vmax.f32 %v3700_v2, 0.0  ;;  %v10735_v2 = vld [vmem:[#allocation2 + $0x54] sm:$0xf0] }
 0x47e   :  { %v14077_v55 = vpack.c.bf16 %v3717_v5, %v3717_v5  ;;  %v10803_v5 = vld [vmem:[#allocation2 + $0x274] sm:$0xf0] }
 0x47f   :  { %v14079_v13 = vpack.c.bf16 %v3718_v8, %v3718_v8  ;;  %v3673_v15 = vpop.f32.mrf.mxu3  ;;  %v8963_v8 = vld [vmem:[#allocation2 + $0x168] sm:$0xf]  ;;  %v9092_v16 = vor.u32 %v10803_v5, %v9091_v53  ;;  %v10729_v53 = vld [vmem:[#allocation2 + $0x2c] sm:$0xf]  ;;  %v8805_v5 = vld [vmem:[#allocation2 + $0x38] sm:$0xf0] }
 0x480   :  { %v3674_v18 = vadd.f32 %v3673_v15, %v3609_v6  ;;  %v3712_v11 = vpop.f32.mrf.mxu2  ;;  %4358 = vmatmul.bf16.vlgmr.msra.gmra.mxu0 %v14077_v55  ;;  %v8888_v6 = vor.u32 %v10749_v41, %v8885_v63  ;;  %v8869_v15 = vld [vmem:[#allocation2 + $0xb8] sm:$0xf0]  ;;  %v9176_v63 = vor.u32 %v10821_v58, %v9173_v56  ;;  %v10797_v58 = vld [vmem:[#allocation2 + $0x24c] sm:$0xf] }
 0x481   :  { %v3713_v21 = vadd.f32 %v3712_v11, %v3612_v9  ;;  %4371 = vmatmul.bf16.vlgmr.msrb.gmra.mxu1 %v14079_v13  ;;  %v3688_v22 = vpop.f32.mrf.mxu0  ;;  %4487 = vmatpush.bf16.msra.mxu0 %v9172_v45  ;;  %v10771_v9 = vld [vmem:[#allocation2 + $0x174] sm:$0xf0]  ;;  %v8820_v45 = vor.u32 %v10735_v2, %v8819_v1  ;;  %v8997_v41 = vld [vmem:[#allocation2 + $0x1b8] sm:$0xf0]  ;;  %v8824_v1 = vor.u32 %v10733_v59, %v8821_v51  ;;  %v10813_v2 = vld [vmem:[#allocation2 + $0x2cc] sm:$0xf] }
 0x482   :  { %v3716_v61 = vmax.f32 %v3674_v18, 0.0  ;;  %4441 = vmatpush.bf16.msrb.mxu1 %v8900_v12  ;;  %v3701_v31 = vpop.f32.mrf.mxu1  ;;  %v10745_v12 = vld [vmem:[#allocation2 + $0xac] sm:$0xf]  ;;  %v10731_v18 = vld [vmem:[#allocation2 + $0x34] sm:$0xf0]  ;;  %v8964_v11 = vor.u32 %v10771_v9, %v8963_v8 }
 0x483   :  { %v3719_v26 = vmax.f32 %v3713_v21, 0.0  ;;  %v8872_v21 = vor.u32 %v10745_v12, %v8869_v15  ;;  %v8947_v22 = vld [vmem:[#allocation2 + $0x148] sm:$0xf]  ;;  %v8804_v4 = vor.u32 %v10731_v18, %v8803_v7  ;;  %v8853_v31 = vld [vmem:[#allocation2 + $0x98] sm:$0xf0] }
 0x484   :  { %v14083_v29 = vpack.c.bf16 %v3716_v61, %v3716_v61  ;;  %v10741_v61 = vld [vmem:[#allocation2 + $0x8c] sm:$0xf]  ;;  %v8948_v27 = vor.u32 %v10767_v23, %v8947_v22  ;;  %v8981_v9 = vld [vmem:[#allocation2 + $0x198] sm:$0xf0]  ;;  %v10854_v12 = vld [vmem:[#allocation5 + $0xec] sm:$0xf0] }
 0x485   :  { %v14085_v17 = vpack.c.bf16 %v3719_v26, %v3719_v26  ;;  %v8787_v26 = vld [vmem:[#allocation2 + $0x8] sm:$0xf]  ;;  %v8856_v37 = vor.u32 %v10741_v61, %v8853_v31  ;;  %v10773_v8 = vld [vmem:[#allocation2 + $0x18c] sm:$0xf]  ;;  %v8789_v22 = vld [vmem:[#allocation2 + $0x18] sm:$0xf0] }
 0x486   :  { %4442 = vmatpush.bf16.msrb.mxu1 %v8884_v25  ;;  %4345 = vmatmul.bf16.vlgmr.msra.gmra.mxu3 %v14083_v29  ;;  %v9076_v25 = vor.u32 %v10799_v20, %v9075_v19  ;;  %v10809_v7 = vld [vmem:[#allocation2 + $0x2ac] sm:$0xf]  ;;  %v10850_v19 = vld [vmem:[#allocation5 + $0xcc] sm:$0xf0]  ;;  %v9125_v20 = vld [vmem:[#allocation2 + $0x2b8] sm:$0xf0]  ;;  %v8984_v23 = vor.u32 %v10773_v8, %v8981_v9 }
 0x487   :  { %9177 = vmatmul.msk.bf16.vlgmr.msrb.gmra.mxu2 %vm1297_vm0, %v14085_v17  ;;  %v3675_v57 = vpop.f32.mrf.mxu3  ;;  %4467 = vmatpush.bf16.msra.mxu3 %v9156_v62  ;;  %v10727_v62 = vld [vmem:[#allocation2 + $0x14] sm:$0xf0]  ;;  %v8965_v61 = vld [vmem:[#allocation2 + $0x178] sm:$0xf0]  ;;  %v10757_v59 = vld [vmem:[#allocation2 + $0x10c] sm:$0xf] }
 0x488   :  { %4454 = vmatpush.bf16.msrb.mxu2 %v9028_v32  ;;  %v3714_v48 = vpop.f32.mrf.mxu2  ;;  %v9029_v32 = vld [vmem:[#allocation2 + $0x1f8] sm:$0xf0]  ;;  %v8788_v57 = vor.u32 %v10727_v62, %v8787_v26  ;;  %v9128_v26 = vor.u32 %v10809_v7, %v9125_v20  ;;  %v9183_v9 = vld [vmem:[#allocation5] sm:$0xf]  ;;  %v9409_v20 = vld [vmem:[#allocation5 + $0x1d0] sm:$0xf0] }
 0x489   :  { %v9032_v46 = vor.u32 %v10785_v42, %v9029_v32  ;;  %v9060_v48 = vor.u32 %v10795_v24, %v9059_v33  ;;  %v10846_v42 = vld [vmem:[#allocation5 + $0xac] sm:$0xf0]  ;;  %v10805_v33 = vld [vmem:[#allocation2 + $0x28c] sm:$0xf]  ;;  %v9109_v24 = vld [vmem:[#allocation2 + $0x298] sm:$0xf0] }
 0x48a   :  { %4443 = vmatpush.bf16.msrb.mxu1 %v8868_v40  ;;  %v10763_v40 = vld [vmem:[#allocation2 + $0x134] sm:$0xf0]  ;;  %v10886_v32 = vld [vmem:[#allocation5 + $0x1ec] sm:$0xf0]  ;;  %v9077_v56 = vld [vmem:[#allocation2 + $0x258] sm:$0xf0] }
 0x48b   :  { %4468 = vmatpush.bf16.msra.mxu3 %v9140_v28  ;;  %v10737_v28 = vld [vmem:[#allocation2 + $0x6c] sm:$0xf]  ;;  %v8932_v44 = vor.u32 %v10763_v40, %v8931_v38  ;;  %v8917_v51 = vld [vmem:[#allocation2 + $0x118] sm:$0xf0]  ;;  %v9407_v7 = vld [vmem:[#allocation5 + $0x1c0] sm:$0xf] }
 0x48c   :  { %4455 = vmatpush.bf16.msrb.mxu2 %v9012_v39  ;;  %v10781_v39 = vld [vmem:[#allocation2 + $0x1cc] sm:$0xf]  ;;  %v8840_v52 = vor.u32 %v10737_v28, %v8837_v30  ;;  %v9112_v30 = vor.u32 %v10805_v33, %v9109_v24  ;;  %v10870_v33 = vld [vmem:[#allocation5 + $0x16c] sm:$0xf0]  ;;  %v10868_v24 = vld [vmem:[#allocation5 + $0x164] sm:$0xf] }
 0x48d   :  { %v10765_v40 = vld [vmem:[#allocation2 + $0x14c] sm:$0xf] }
 0x48e   :  { %4444 = vmatpush.bf16.msrb.mxu1 %v8852_v35  ;;  %v9043_v35 = vld [vmem:[#allocation2 + $0x208] sm:$0xf] }
 0x48f   :  { %4469 = vmatpush.bf16.msra.mxu3 %v9124_v14  ;;  %v10817_v14 = vld [vmem:[#allocation2 + $0x2ec] sm:$0xf]  ;;  %v9044_v60 = vor.u32 %v10791_v54, %v9043_v35 }
 0x490   :  { %4456 = vmatpush.bf16.msrb.mxu2 %v8996_v50  ;;  %4423 = vmatmul.bf16.vlgmr.msrb.gmra.mxu0 %v14079_v13  ;;  %v9157_v50 = vld [vmem:[#allocation2 + $0x2f8] sm:$0xf0] }
 0x491   :  { %9178 = vmatmul.msk.bf16.vlgmr.msra.gmra.mxu1 %vm1297_vm0, %v14085_v17  ;;  %4493 = vmatpush.bf16.msrb.mxu0 %v8904_v10  ;;  %v9016_v10 = vor.u32 %v10781_v39, %v9013_v34  ;;  %v10801_v39 = vld [vmem:[#allocation2 + $0x26c] sm:$0xf]  ;;  %v9093_v34 = vld [vmem:[#allocation2 + $0x278] sm:$0xf0] }
 0x492   :  { %4445 = vmatpush.bf16.msrb.mxu1 %v8836_v47  ;;  %v10777_v47 = vld [vmem:[#allocation2 + $0x1ac] sm:$0xf]  ;;  %v9096_v54 = vor.u32 %v10801_v39, %v9093_v34  ;;  %v9327_v34 = vld [vmem:[#allocation5 + $0x120] sm:$0xf] }
 0x493   :  { %4470 = vmatpush.bf16.msra.mxu3 %v9108_v0  ;;  %v9160_v0 = vor.u32 %v10817_v14, %v9157_v50  ;;  %v10838_v14 = vld [vmem:[#allocation5 + $0x6c] sm:$0xf0] }
 0x494   :  { %4457 = vmatpush.bf16.msrb.mxu2 %v8980_v3  ;;  %v9141_v3 = vld [vmem:[#allocation2 + $0x2d8] sm:$0xf0] }
 0x495   :  { %4494 = vmatpush.bf16.msrb.mxu0 %v8888_v6  ;;  %v9000_v6 = vor.u32 %v10777_v47, %v8997_v41  ;;  %v9144_v15 = vor.u32 %v10813_v2, %v9141_v3  ;;  %v10793_v47 = vld [vmem:[#allocation2 + $0x22c] sm:$0xf]  ;;  %v9061_v41 = vld [vmem:[#allocation2 + $0x238] sm:$0xf0]  ;;  %v9199_v2 = vld [vmem:[#allocation5 + $0x20] sm:$0xf] }
 0x496   :  { %4446 = vmatpush.bf16.msrb.mxu1 %v8820_v45  ;;  %4410 = vmatmul.bf16.vlgmr.msrb.gmra.mxu3 %v14077_v55  ;;  %v9295_v45 = vld [vmem:[#allocation5 + $0xe0] sm:$0xf]  ;;  %v10830_v3 = vld [vmem:[#allocation5 + $0x2c] sm:$0xf0] }
 0x497   :  { %4397 = vmatmul.bf16.vlgmr.msra.gmra.mxu2 %v14083_v29  ;;  %4471 = vmatpush.bf16.msra.mxu3 %v9092_v16  ;;  %v8808_v16 = vor.u32 %v10729_v53, %v8805_v5  ;;  %v9296_v18 = vor.u32 %v10854_v12, %v9295_v45  ;;  %v10789_v53 = vld [vmem:[#allocation2 + $0x20c] sm:$0xf]  ;;  %v9045_v5 = vld [vmem:[#allocation2 + $0x218] sm:$0xf0]  ;;  %v10826_v45 = vld [vmem:[#allocation5 + $0xc] sm:$0xf0] }
 0x498   :  { %4458 = vmatpush.bf16.msrb.mxu2 %v8964_v11  ;;  %v9279_v11 = vld [vmem:[#allocation5 + $0xc0] sm:$0xf]  ;;  %v9048_v8 = vor.u32 %v10789_v53, %v9045_v5  ;;  %v9425_v12 = vld [vmem:[#allocation5 + $0x1f0] sm:$0xf0]  ;;  %v10910_v5 = vld [vmem:[#allocation5 + $0x2ac] sm:$0xf0] }
 0x499   :  { %4495 = vmatpush.bf16.msrb.mxu0 %v8872_v21  ;;  %v10725_v21 = vld [vmem:[#allocation2 + $0xc] sm:$0xf]  ;;  %v9280_v31 = vor.u32 %v10850_v19, %v9279_v11  ;;  %v10880_v11 = vld [vmem:[#allocation5 + $0x1c4] sm:$0xf]  ;;  %v9519_v53 = vld [vmem:[#allocation5 + $0x2a0] sm:$0xf] }
 0x49a   :  { %4447 = vmatpush.bf16.msrb.mxu1 %v8804_v4  ;;  %v10769_v4 = vld [vmem:[#allocation2 + $0x16c] sm:$0xf]  ;;  %v8792_v62 = vor.u32 %v10725_v21, %v8789_v22  ;;  %v9391_v21 = vld [vmem:[#allocation5 + $0x1a0] sm:$0xf]  ;;  %v10878_v22 = vld [vmem:[#allocation5 + $0x1ac] sm:$0xf0] }
 0x49b   :  { %4472 = vmatpush.bf16.msra.mxu3 %v9076_v25  ;;  %v9263_v25 = vld [vmem:[#allocation5 + $0xa0] sm:$0xf]  ;;  %v8968_v38 = vor.u32 %v10769_v4, %v8965_v61  ;;  %v10876_v4 = vld [vmem:[#allocation5 + $0x1a4] sm:$0xf]  ;;  %v9392_v61 = vor.u32 %v10878_v22, %v9391_v21  ;;  %v10902_v22 = vld [vmem:[#allocation5 + $0x26c] sm:$0xf0] }
 0x49c   :  { %4459 = vmatpush.bf16.msrb.mxu2 %v8948_v27  ;;  %v9423_v27 = vld [vmem:[#allocation5 + $0x1e0] sm:$0xf]  ;;  %v9264_v28 = vor.u32 %v10846_v42, %v9263_v25  ;;  %v9377_v42 = vld [vmem:[#allocation5 + $0x190] sm:$0xf0] }
 0x49d   :  { %4496 = vmatpush.bf16.msrb.mxu0 %v8856_v37  ;;  %v9424_v37 = vor.u32 %v10886_v32, %v9423_v27  ;;  %v9375_v25 = vld [vmem:[#allocation5 + $0x180] sm:$0xf] }
 0x49e   :  { %4448 = vmatpush.bf16.msrb.mxu1 %v8788_v57  ;;  %v8949_v57 = vld [vmem:[#allocation2 + $0x158] sm:$0xf0]  ;;  %v9359_v32 = vld [vmem:[#allocation5 + $0x160] sm:$0xf] }
 0x49f   :  { %4473 = vmatpush.bf16.msra.mxu3 %v9060_v48  ;;  %v10842_v48 = vld [vmem:[#allocation5 + $0x8c] sm:$0xf0]  ;;  %v8952_v49 = vor.u32 %v10765_v40, %v8949_v57  ;;  %v9343_v57 = vld [vmem:[#allocation5 + $0x140] sm:$0xf] }
 0x4a0   :  { %4460 = vmatpush.bf16.msrb.mxu2 %v8932_v44  ;;  %9179 = vmatmul.msk.bf16.vlgmr.msra.gmra.mxu0 %vm1297_vm0, %v14085_v17  ;;  %v10761_v44 = vld [vmem:[#allocation2 + $0x12c] sm:$0xf]  ;;  %v9487_v21 = vld [vmem:[#allocation5 + $0x260] sm:$0xf] }
 0x4a1   :  { %4449 = vmatmul.bf16.vlgmr.msrb.gmra.mxu1 %v14083_v29  ;;  %4497 = vmatpush.bf16.msrb.mxu0 %v8840_v52  ;;  %v9231_v52 = vld [vmem:[#allocation5 + $0x60] sm:$0xf]  ;;  %v8936_v50 = vor.u32 %v10761_v44, %v8933_v36  ;;  %v10860_v44 = vld [vmem:[#allocation5 + $0x124] sm:$0xf] }
 0x4a2   :  { %4506 = vmatpush.bf16.msra.mxu1 %v9032_v46  ;;  %v9247_v46 = vld [vmem:[#allocation5 + $0x80] sm:$0xf] }
 0x4a3   :  { %4474 = vmatpush.bf16.msra.mxu3 %v9044_v60  ;;  %v9248_v35 = vor.u32 %v10842_v48, %v9247_v46  ;;  %v9080_v60 = vor.u32 %v10797_v58, %v9077_v56  ;;  %v9345_v48 = vld [vmem:[#allocation5 + $0x150] sm:$0xf0]  ;;  %v9311_v56 = vld [vmem:[#allocation5 + $0x100] sm:$0xf] }
 0x4a4   :  { %4461 = vmatpush.bf16.msrb.mxu2 %v8916_v43  ;;  %v9215_v43 = vld [vmem:[#allocation5 + $0x40] sm:$0xf] }
 0x4a5   :  { %4498 = vmatpush.bf16.msrb.mxu0 %v8824_v1  ;;  %v9064_v1 = vor.u32 %v10793_v47, %v9061_v41  ;;  %v9535_v41 = vld [vmem:[#allocation5 + $0x2c0] sm:$0xf] }
 0x4a6   :  { %4507 = vmatpush.bf16.msra.mxu1 %v9016_v10  ;;  %4475 = vmatmul.bf16.vlgmr.msra.gmra.mxu3 %v14079_v13  ;;  %v9232_v10 = vor.u32 %v10838_v14, %v9231_v52  ;;  %v9551_v52 = vld [vmem:[#allocation5 + $0x2e0] sm:$0xf]  ;;  %v10918_v14 = vld [vmem:[#allocation5 + $0x2ec] sm:$0xf0] }
 0x4a7   :  { %4539 = vmatpush.bf16.msrb.mxu3 %v9176_v63  ;;  %4462 = vmatmul.bf16.vlgmr.msrb.gmra.mxu2 %v14077_v55  ;;  %v8920_v63 = vor.u32 %v10757_v59, %v8917_v51  ;;  %v9552_v58 = vor.u32 %v10918_v14, %v9551_v52  ;;  %v10856_v59 = vld [vmem:[#allocation5 + $0x104] sm:$0xf]  ;;  %v10890_v14 = vld [vmem:[#allocation5 + $0x20c] sm:$0xf0] }
 0x4a8   :  { %4519 = vmatpush.bf16.msra.mxu2 %v9160_v0 }
 0x4a9   :  { %4499 = vmatpush.bf16.msrb.mxu0 %v8808_v16 }
 0x4aa   :  { %4508 = vmatpush.bf16.msra.mxu1 %v9000_v6  ;;  %v9200_v6 = vor.u32 %v10830_v3, %v9199_v2  ;;  %v9537_v2 = vld [vmem:[#allocation5 + $0x2d0] sm:$0xf0] }
 0x4ab   :  { %5166 = vmatpush.bf16.msra.mxu3 %v9296_v18  ;;  %v10882_v18 = vld [vmem:[#allocation5 + $0x1cc] sm:$0xf0] }
 0x4ac   :  { %4520 = vmatpush.bf16.msra.mxu2 %v9144_v15  ;;  %v9184_v15 = vor.u32 %v10826_v45, %v9183_v9  ;;  %v9408_v19 = vor.u32 %v10882_v18, %v9407_v7  ;;  %v10908_v45 = vld [vmem:[#allocation5 + $0x2a4] sm:$0xf] }
 0x4ad   :  { %4500 = vmatpush.bf16.msrb.mxu0 %v8792_v62  ;;  %v10904_v18 = vld [vmem:[#allocation5 + $0x284] sm:$0xf] }
 0x4ae   :  { %4509 = vmatpush.bf16.msra.mxu1 %v8984_v23  ;;  %v9412_v23 = vor.u32 %v10880_v11, %v9409_v20  ;;  %v9505_v11 = vld [vmem:[#allocation5 + $0x290] sm:$0xf0] }
 0x4af   :  { %5167 = vmatpush.bf16.msra.mxu3 %v9280_v31  ;;  %v9508_v20 = vor.u32 %v10904_v18, %v9505_v11  ;;  %v9527_v18 = vld [vmem:[#allocation5 + $0x2a8] sm:$0xf]  ;;  %v10911_v11 = vld [vmem:[#allocation5 + $0x2b4] sm:$0xf0] }
 0x4b0   :  { %4521 = vmatpush.bf16.msra.mxu2 %v9128_v26  ;;  %4501 = vmatmul.bf16.vlgmr.msrb.gmra.mxu0 %v14083_v29  ;;  %v10834_v29 = vld [vmem:[#allocation5 + $0x4c] sm:$0xf0]  ;;  %v10872_v26 = vld [vmem:[#allocation5 + $0x184] sm:$0xf] }
 0x4b1   :  { %5179 = vmatpush.bf16.msra.mxu0 %v9424_v37  ;;  %v9216_v0 = vor.u32 %v10834_v29, %v9215_v43  ;;  %v9380_v27 = vor.u32 %v10872_v26, %v9377_v42  ;;  %v9360_v37 = vor.u32 %v10870_v33, %v9359_v32  ;;  %v9553_v43 = vld [vmem:[#allocation5 + $0x2f0] sm:$0xf0]  ;;  %v9471_v26 = vld [vmem:[#allocation5 + $0x240] sm:$0xf] }
 0x4b2   :  { %4510 = vmatpush.bf16.msra.mxu1 %v8968_v38  ;;  %v9361_v38 = vld [vmem:[#allocation5 + $0x170] sm:$0xf0] }
 0x4b3   :  { %5168 = vmatpush.bf16.msra.mxu3 %v9264_v28  ;;  %v9364_v40 = vor.u32 %v10868_v24, %v9361_v38  ;;  %v10866_v28 = vld [vmem:[#allocation5 + $0x14c] sm:$0xf0]  ;;  %v10896_v24 = vld [vmem:[#allocation5 + $0x244] sm:$0xf] }
 0x4b4   :  { %4522 = vmatpush.bf16.msra.mxu2 %v9112_v30  ;;  %v10864_v30 = vld [vmem:[#allocation5 + $0x144] sm:$0xf]  ;;  %v9344_v46 = vor.u32 %v10866_v28, %v9343_v57  ;;  %v10894_v57 = vld [vmem:[#allocation5 + $0x22c] sm:$0xf0] }
 0x4b5   :  { %5180 = vmatpush.bf16.msra.mxu0 %v9408_v19  ;;  %v9348_v39 = vor.u32 %v10864_v30, %v9345_v48  ;;  %v14108_v19 = vld [vmem:[%s15354_s13] sm:$0xf] }
 0x4b6   :  { %4511 = vmatpush.bf16.msra.mxu1 %v8952_v49  ;;  %9180 = vmatmul.msk.bf16.vlgmr.msrb.gmra.mxu3 %vm1297_vm0, %v14085_v17  ;;  %v10884_v17 = vld [vmem:[#allocation5 + $0x1e4] sm:$0xf]  ;;  %v10862_v49 = vld [vmem:[#allocation5 + $0x12c] sm:$0xf0] }
 0x4b7   :  { %5169 = vmatpush.bf16.msra.mxu3 %v9248_v35  ;;  %v9428_v16 = vor.u32 %v10884_v17, %v9425_v12  ;;  %v9328_v36 = vor.u32 %v10862_v49, %v9327_v34  ;;  %v9329_v35 = vld [vmem:[#allocation5 + $0x130] sm:$0xf0]  ;;  %v10892_v34 = vld [vmem:[#allocation5 + $0x224] sm:$0xf] }
 0x4b8   :  { %4523 = vmatpush.bf16.msra.mxu2 %v9096_v54  ;;  %v9332_v54 = vor.u32 %v10860_v44, %v9329_v35  ;;  %v9521_v17 = vld [vmem:[#allocation5 + $0x2b0] sm:$0xf0]  ;;  %v9559_v44 = vld [vmem:[#allocation5 + $0x2e8] sm:$0xf] }
 0x4b9   :  { %5181 = vmatpush.bf16.msra.mxu0 %v9392_v61  ;;  %v9524_v12 = vor.u32 %v10908_v45, %v9521_v17  ;;  %v3826_v61 = vperm.slane %v14108_v19, 0  ;;  %v9457_v49 = vld [vmem:[#allocation5 + $0x230] sm:$0xf0]  ;;  %v10848_v45 = vld [vmem:[#allocation5 + $0xc4] sm:$0xf] }
 0x4ba   :  { %4512 = vmatpush.bf16.msra.mxu1 %v8936_v50  ;;  %v10858_v50 = vld [vmem:[#allocation5 + $0x10c] sm:$0xf0]  ;;  %v9460_v35 = vor.u32 %v10892_v34, %v9457_v49  ;;  %v9281_v17 = vld [vmem:[#allocation5 + $0xd0] sm:$0xf0]  ;;  %v10923_v34 = vld [vmem:[#allocation5 + $0x314] sm:$0xf0] }
 0x4bb   :  { %5170 = vmatpush.bf16.msra.mxu3 %v9232_v10  ;;  %v9312_v51 = vor.u32 %v10858_v50, %v9311_v56  ;;  %v9313_v10 = vld [vmem:[#allocation5 + $0x110] sm:$0xf0]  ;;  %v10922_v56 = vld [vmem:[#allocation5 + $0x30c] sm:$0xf0] }
 0x4bc   :  { %4524 = vmatpush.bf16.msra.mxu2 %v9080_v60  ;;  %v10916_v60 = vld [vmem:[#allocation5 + $0x2e4] sm:$0xf]  ;;  %v9316_v29 = vor.u32 %v10856_v59, %v9313_v10 }
 0x4bd   :  { %v9556_v47 = vor.u32 %v10916_v60, %v9553_v43  ;;  %v10852_v10 = vld [vmem:[#allocation5 + $0xe4] sm:$0xf]  ;;  %v9297_v60 = vld [vmem:[#allocation5 + $0xf0] sm:$0xf0] }
 0x4be   :  { %4513 = vmatpush.bf16.msra.mxu1 %v8920_v63  ;;  %v10914_v63 = vld [vmem:[#allocation5 + $0x2cc] sm:$0xf0] }
 0x4bf   :  { %5171 = vmatpush.bf16.msra.mxu3 %v9216_v0  ;;  %v9536_v0 = vor.u32 %v10914_v63, %v9535_v41  ;;  %v10888_v41 = vld [vmem:[#allocation5 + $0x204] sm:$0xf]  ;;  %v9441_v63 = vld [vmem:[#allocation5 + $0x210] sm:$0xf0] }
 0x4c0   :  { %4525 = vmatpush.bf16.msra.mxu2 %v9064_v1  ;;  %v10912_v1 = vld [vmem:[#allocation5 + $0x2c4] sm:$0xf] }
 0x4c1   :  { %4514 = vmatmul.bf16.vlgmr.msra.gmra.mxu1 %v14077_v55  ;;  %v9393_v55 = vld [vmem:[#allocation5 + $0x1b0] sm:$0xf0]  ;;  %v9540_v3 = vor.u32 %v10912_v1, %v9537_v2  ;;  %v9444_v1 = vor.u32 %v10888_v41, %v9441_v63  ;;  %v10920_v2 = vld [vmem:[#allocation5 + $0x304] sm:$0xf]  ;;  %v9463_v41 = vld [vmem:[#allocation5 + $0x228] sm:$0xf] }
 0x4c2   :  { %v9396_v31 = vor.u32 %v10876_v4, %v9393_v55  ;;  %5192 = vmatpush.bf16.msrb.mxu1 %v9552_v58  ;;  %v9567_v58 = vld [vmem:[#allocation5 + $0x300] sm:$0xf]  ;;  %v10895_v63 = vld [vmem:[#allocation5 + $0x234] sm:$0xf0] }
 0x4c3   :  { %5172 = vmatpush.bf16.msra.mxu3 %v9200_v6  ;;  %v9520_v6 = vor.u32 %v10910_v5, %v9519_v53  ;;  %v9543_v5 = vld [vmem:[#allocation5 + $0x2c8] sm:$0xf] }
 0x4c4   :  { %4526 = vmatpush.bf16.msra.mxu2 %v9048_v8 }
 0x4c6   :  { %5193 = vmatpush.bf16.msrb.mxu1 %v9536_v0 }
 0x4c7   :  { %4527 = vmatmul.bf16.vlgmr.msra.gmra.mxu2 %v14079_v13  ;;  %5173 = vmatpush.bf16.msra.mxu3 %v9184_v15  ;;  %v10874_v13 = vld [vmem:[#allocation5 + $0x18c] sm:$0xf0]  ;;  %v9503_v15 = vld [vmem:[#allocation5 + $0x280] sm:$0xf] }
 0x4c8   :  { %v9376_v62 = vor.u32 %v10874_v13, %v9375_v25  ;;  %v9489_v25 = vld [vmem:[#allocation5 + $0x270] sm:$0xf0] }
 0x4ca   :  { %5182 = vmatpush.bf16.msra.mxu0 %v9376_v62  ;;  %5194 = vmatpush.bf16.msrb.mxu1 %v9520_v6  ;;  %v10898_v62 = vld [vmem:[#allocation5 + $0x24c] sm:$0xf0]  ;;  %v10915_v6 = vld [vmem:[#allocation5 + $0x2d4] sm:$0xf0] }
 0x4cb   :  { %5231 = vmatpush.bf16.msrb.mxu3 %v9428_v16  ;;  %v10906_v16 = vld [vmem:[#allocation5 + $0x28c] sm:$0xf0]  ;;  %v9472_v42 = vor.u32 %v10898_v62, %v9471_v26  ;;  %v9249_v26 = vld [vmem:[#allocation5 + $0x90] sm:$0xf0] }
 0x4cc   :  { %v9504_v7 = vor.u32 %v10906_v16, %v9503_v15  ;;  %v9284_v15 = vor.u32 %v10848_v45, %v9281_v17  ;;  %v3827_v16 = vperm.slane %v14108_v19, 1  ;;  %v9447_v45 = vld [vmem:[#allocation5 + $0x208] sm:$0xf]  ;;  %v10891_v17 = vld [vmem:[#allocation5 + $0x214] sm:$0xf0] }
 0x4ce   :  { %5183 = vmatpush.bf16.msra.mxu0 %v9360_v37  ;;  %5195 = vmatpush.bf16.msrb.mxu1 %v9504_v7  ;;  %v9473_v37 = vld [vmem:[#allocation5 + $0x250] sm:$0xf0]  ;;  %v9544_v7 = vor.u32 %v10915_v6, %v9543_v5  ;;  %v10824_v5 = vld [vmem:[#allocation5 + $0x4] sm:$0xf] }
 0x4cf   :  { %5232 = vmatpush.bf16.msrb.mxu3 %v9412_v23  ;;  %v9488_v23 = vor.u32 %v10902_v22, %v9487_v21  ;;  %v9476_v38 = vor.u32 %v10896_v24, %v9473_v37  ;;  %v9265_v21 = vld [vmem:[#allocation5 + $0xb0] sm:$0xf0]  ;;  %v9495_v37 = vld [vmem:[#allocation5 + $0x268] sm:$0xf] }
 0x4d0   :  { %v9185_v6 = vld [vmem:[#allocation5 + $0x10] sm:$0xf0] }
 0x4d2   :  { %5184 = vmatpush.bf16.msra.mxu0 %v9344_v46  ;;  %5196 = vmatpush.bf16.msrb.mxu1 %v9488_v23 }
 0x4d3   :  { %5233 = vmatpush.bf16.msrb.mxu3 %v9396_v31  ;;  %v10900_v31 = vld [vmem:[#allocation5 + $0x264] sm:$0xf] }
 0x4d4   :  { %v9492_v13 = vor.u32 %v10900_v31, %v9489_v25  ;;  %v9511_v31 = vld [vmem:[#allocation5 + $0x288] sm:$0xf]  ;;  %v10907_v25 = vld [vmem:[#allocation5 + $0x294] sm:$0xf0] }
 0x4d5   :  { %v9512_v24 = vor.u32 %v10907_v25, %v9511_v31 }
 0x4d6   :  { %5185 = vmatpush.bf16.msra.mxu0 %v9328_v36  ;;  %5197 = vmatpush.bf16.msrb.mxu1 %v9472_v42  ;;  %v10919_v36 = vld [vmem:[#allocation5 + $0x2f4] sm:$0xf0] }
 0x4d7   :  { %5234 = vmatpush.bf16.msrb.mxu3 %v9380_v27  ;;  %v9560_v0 = vor.u32 %v10919_v36, %v9559_v44 }
 0x4da   :  { %5186 = vmatpush.bf16.msra.mxu0 %v9312_v51  ;;  %v9568_v51 = vor.u32 %v10922_v56, %v9567_v58  ;;  %v3828_v58 = vperm.slane %v14108_v19, 2 }
 0x4db   :  { %5235 = vmatpush.bf16.msrb.mxu3 %v9364_v40  ;;  %v9455_v40 = vld [vmem:[#allocation5 + $0x220] sm:$0xf] }
 0x4dc   :  { %v9456_v30 = vor.u32 %v10894_v57, %v9455_v40  ;;  %5212 = vmatpush.bf16.msrb.mxu2 %v9568_v51  ;;  %v9233_v40 = vld [vmem:[#allocation5 + $0x70] sm:$0xf0] }
 0x4de   :  { %5244 = vmatpush.bf16.msrb.mxu0 %v9556_v47  ;;  %5198 = vmatpush.bf16.msrb.mxu1 %v9456_v30  ;;  %v9300_v47 = vor.u32 %v10852_v10, %v9297_v60  ;;  %v10903_v30 = vld [vmem:[#allocation5 + $0x274] sm:$0xf0]  ;;  %v10828_v60 = vld [vmem:[#allocation5 + $0x24] sm:$0xf] }
 0x4df   :  { %5236 = vmatpush.bf16.msrb.mxu3 %v9348_v39 }
 0x4e0   :  { %5218 = vmatpush.bf16.msra.mxu2 %v9300_v47 }
 0x4e2   :  { %5245 = vmatpush.bf16.msrb.mxu0 %v9540_v3  ;;  %v9569_v3 = vld [vmem:[#allocation5 + $0x310] sm:$0xf0] }
 0x4e3   :  { %5237 = vmatpush.bf16.msrb.mxu3 %v9332_v54  ;;  %v9439_v54 = vld [vmem:[#allocation5 + $0x200] sm:$0xf] }
 0x4e4   :  { %v9440_v59 = vor.u32 %v10890_v14, %v9439_v54  ;;  %5219 = vmatpush.bf16.msra.mxu2 %v9284_v15  ;;  %v10921_v15 = vld [vmem:[#allocation5 + $0x30c] sm:$0xf] }
 0x4e6   :  { %5246 = vmatpush.bf16.msrb.mxu0 %v9524_v12  ;;  %5199 = vmatpush.bf16.msrb.mxu1 %v9440_v59 }
 0x4e7   :  { %5238 = vmatpush.bf16.msrb.mxu3 %v9316_v29 }
 0x4ea   :  { %5247 = vmatpush.bf16.msrb.mxu0 %v9508_v20  ;;  %v10844_v20 = vld [vmem:[#allocation5 + $0xa4] sm:$0xf] }
 0x4eb   :  { %v9268_v23 = vor.u32 %v10844_v20, %v9265_v21  ;;  %v9448_v20 = vor.u32 %v10891_v17, %v9447_v45  ;;  %v9431_v17 = vld [vmem:[#allocation5 + $0x1e8] sm:$0xf] }
 0x4ed   :  { %5220 = vmatpush.bf16.msra.mxu2 %v9268_v23  ;;  %v10853_v23 = vld [vmem:[#allocation5 + $0xec] sm:$0xf] }
 0x4ee   :  { %5248 = vmatpush.bf16.msrb.mxu0 %v9492_v13  ;;  %v10840_v13 = vld [vmem:[#allocation5 + $0x84] sm:$0xf] }
 0x4f2   :  { %5249 = vmatpush.bf16.msrb.mxu0 %v9476_v38  ;;  %v10836_v38 = vld [vmem:[#allocation5 + $0x64] sm:$0xf] }
 0x4f3   :  { %v9236_v49 = vor.u32 %v10836_v38, %v9233_v40 }
 0x4f6   :  { %5250 = vmatpush.bf16.msrb.mxu0 %v9460_v35  ;;  %v9496_v35 = vor.u32 %v10903_v30, %v9495_v37  ;;  %v10847_v37 = vld [vmem:[#allocation5 + $0xb4] sm:$0xf0] }
 0x4fa   :  { %5251 = vmatpush.bf16.msrb.mxu0 %v9444_v1 }
 0x4fd   :  { %v4359_v8 = vpop.f32.mrf.mxu0 }
 0x4fe   :  { %v4372_v9 = vpop.f32.mrf.mxu1 }
 0x505   :  { %v4361_v4 = vpop.f32.mrf.mxu0 }
 0x506   :  { %v4374_v55 = vpop.f32.mrf.mxu1 }
 0x509   :  { %v4346_v27 = vpop.f32.mrf.mxu3 }
 0x50a   :  { %v4347_v32 = vadd.f32 %v4346_v27, %v3826_v61  ;;  %v4385_v33 = vpop.f32.mrf.mxu2  ;;  %v9528_v61 = vor.u32 %v10911_v11, %v9527_v18  ;;  %v9252_v27 = vor.u32 %v10840_v13, %v9249_v26  ;;  %v9303_v18 = vld [vmem:[#allocation5 + $0xe8] sm:$0xf]  ;;  %v10855_v11 = vld [vmem:[#allocation5 + $0xf4] sm:$0xf0] }
 0x50b   :  { %v9304_v31 = vor.u32 %v10855_v11, %v9303_v18  ;;  %v9287_v13 = vld [vmem:[#allocation5 + $0xc8] sm:$0xf]  ;;  %v10851_v26 = vld [vmem:[#allocation5 + $0xd4] sm:$0xf0]  ;;  %v10829_v11 = vld [vmem:[#allocation5 + $0x2c] sm:$0xf] }
 0x50c   :  { %v4360_v28 = vadd.f32 %v4359_v8, %v4347_v32  ;;  %v9572_v8 = vor.u32 %v10920_v2, %v9569_v3  ;;  %5221 = vmatpush.bf16.msra.mxu2 %v9252_v27  ;;  %v9464_v3 = vor.u32 %v10895_v63, %v9463_v41  ;;  %v10849_v27 = vld [vmem:[#allocation5 + $0xcc] sm:$0xf]  ;;  %v9225_v63 = vld [vmem:[#allocation5 + $0x58] sm:$0xf0] }
 0x50d   :  { %v14111_v46 = vpop.f32.mrf.mxu0  ;;  %v10833_v41 = vld [vmem:[#allocation5 + $0x4c] sm:$0xf] }
 0x50e   :  { %v4373_v48 = vadd.f32 %v4372_v9, %v4360_v28  ;;  %v14113_v39 = vpop.f32.mrf.mxu1  ;;  %5264 = vmatpush.bf16.msra.mxu1 %v9572_v8 }
 0x510   :  { %v4386_v52 = vadd.f32 %v4385_v33, %v4373_v48  ;;  %v9575_v48 = vld [vmem:[#allocation5 + $0x308] sm:$0xf]  ;;  %5222 = vmatpush.bf16.msra.mxu2 %v9236_v49  ;;  %v10843_v49 = vld [vmem:[#allocation5 + $0x94] sm:$0xf0] }
 0x511   :  { %v4348_v50 = vpop.f32.mrf.mxu3  ;;  %v9576_v54 = vor.u32 %v10923_v34, %v9575_v48  ;;  %v9255_v34 = vld [vmem:[#allocation5 + $0x88] sm:$0xf] }
 0x512   :  { %v4545_v43 = vmax.f32 %v4386_v52, 0.0  ;;  %v4387_v29 = vpop.f32.mrf.mxu2  ;;  %v9217_v52 = vld [vmem:[#allocation5 + $0x50] sm:$0xf0]  ;;  %v9479_v50 = vld [vmem:[#allocation5 + $0x248] sm:$0xf] }
 0x514   :  { %v14115_v53 = vpack.c.bf16 %v4545_v43, %v4545_v43  ;;  %v9201_v43 = vld [vmem:[#allocation5 + $0x30] sm:$0xf0] }
 0x515   :  { %v4426_v9 = vpop.f32.mrf.mxu0 }
 0x516   :  { %v4439_v12 = vpop.f32.mrf.mxu1  ;;  %5174 = vmatmul.bf16.vlgmr.msra.gmra.mxu3 %v14115_v53 }
 0x517   :  { %5296 = vmatpush.bf16.msra.mxu3 %v9560_v0  ;;  %v9204_v0 = vor.u32 %v10828_v60, %v9201_v43  ;;  %v9188_v12 = vor.u32 %v10824_v5, %v9185_v6  ;;  %v9223_v60 = vld [vmem:[#allocation5 + $0x48] sm:$0xf]  ;;  %v10835_v43 = vld [vmem:[#allocation5 + $0x54] sm:$0xf0]  ;;  %v9228_v6 = vor.u32 %v10833_v41, %v9225_v63  ;;  %v10861_v41 = vld [vmem:[#allocation5 + $0x12c] sm:$0xf] }
 0x518   :  { %v9337_v63 = vld [vmem:[#allocation5 + $0x138] sm:$0xf0] }
 0x519   :  { %v4411_v22 = vpop.f32.mrf.mxu3 }
 0x51a   :  { %v4398_v4 = vpop.f32.mrf.mxu2 }
 0x51b   :  { %v4399_v55 = vadd.f32 %v4398_v4, %v3827_v16  ;;  %5297 = vmatpush.bf16.msra.mxu3 %v9544_v7  ;;  %v9577_v16 = vld [vmem:[#allocation5 + $0x318] sm:$0xf0] }
 0x51c   :  { %v9305_v4 = vld [vmem:[#allocation5 + $0xf8] sm:$0xf0] }
 0x51d   :  { %v4412_v62 = vadd.f32 %v4411_v22, %v4399_v55  ;;  %v4489_v42 = vpop.f32.mrf.mxu0  ;;  %v9580_v55 = vor.u32 %v10921_v15, %v9577_v16  ;;  %v9191_v15 = vld [vmem:[#allocation5 + $0x8] sm:$0xf]  ;;  %v10885_v16 = vld [vmem:[#allocation5 + $0x1ec] sm:$0xf] }
 0x51e   :  { %v4450_v32 = vpop.f32.mrf.mxu1 }
 0x51f   :  { %v4425_v33 = vadd.f32 %v14111_v46, %v4412_v62  ;;  %5298 = vmatpush.bf16.msra.mxu3 %v9528_v61  ;;  %v10832_v46 = vld [vmem:[#allocation5 + $0x44] sm:$0xf]  ;;  %v4451_v29 = vadd.f32 %v4450_v32, %v3828_v58  ;;  %v9308_v62 = vor.u32 %v10853_v23, %v9305_v4  ;;  %v9289_v32 = vld [vmem:[#allocation5 + $0xd8] sm:$0xf0]  ;;  %v3829_v58 = vperm.slane %v14108_v19, 3 }
 0x520   :  { %v9220_v59 = vor.u32 %v10832_v46, %v9217_v52  ;;  %v9292_v38 = vor.u32 %v10849_v27, %v9289_v32  ;;  %v9239_v46 = vld [vmem:[#allocation5 + $0x68] sm:$0xf]  ;;  %v10839_v52 = vld [vmem:[#allocation5 + $0x74] sm:$0xf0]  ;;  %v9193_v27 = vld [vmem:[#allocation5 + $0x18] sm:$0xf0] }
 0x521   :  { %v4438_v57 = vadd.f32 %v14113_v39, %v4425_v33  ;;  %v4413_v28 = vpop.f32.mrf.mxu3  ;;  %v10899_v39 = vld [vmem:[#allocation5 + $0x254] sm:$0xf0]  ;;  %v9288_v33 = vor.u32 %v10851_v26, %v9287_v13  ;;  %v9415_v4 = vld [vmem:[#allocation5 + $0x1c8] sm:$0xf]  ;;  %v10881_v13 = vld [vmem:[#allocation5 + $0x1cc] sm:$0xf] }
 0x522   :  { %v4400_v44 = vpop.f32.mrf.mxu2  ;;  %v9480_v10 = vor.u32 %v10899_v39, %v9479_v50  ;;  %5223 = vmatpush.bf16.msra.mxu2 %v9220_v59  ;;  %v9273_v28 = vld [vmem:[#allocation5 + $0xb8] sm:$0xf0]  ;;  %v10837_v39 = vld [vmem:[#allocation5 + $0x6c] sm:$0xf] }
 0x523   :  { %v4546_v36 = vmax.f32 %v4438_v57, 0.0  ;;  %5299 = vmatpush.bf16.msra.mxu3 %v9512_v24  ;;  %v9271_v24 = vld [vmem:[#allocation5 + $0xa8] sm:$0xf]  ;;  %v10845_v57 = vld [vmem:[#allocation5 + $0xac] sm:$0xf] }
 0x524   :  { %v9272_v30 = vor.u32 %v10847_v37, %v9271_v24  ;;  %v9276_v44 = vor.u32 %v10845_v57, %v9273_v28  ;;  %v9241_v59 = vld [vmem:[#allocation5 + $0x78] sm:$0xf0]  ;;  %v10879_v24 = vld [vmem:[#allocation5 + $0x1b4] sm:$0xf0] }
 0x525   :  { %v14121_v14 = vpack.c.bf16 %v4546_v36, %v4546_v36  ;;  %v4491_v56 = vpop.f32.mrf.mxu0  ;;  %v10841_v36 = vld [vmem:[#allocation5 + $0x8c] sm:$0xf]  ;;  %v9401_v57 = vld [vmem:[#allocation5 + $0x1b8] sm:$0xf0] }
 0x526   :  { %v4452_v51 = vpop.f32.mrf.mxu1  ;;  %5224 = vmatpush.bf16.msra.mxu2 %v9204_v0 }
 0x527   :  { %5187 = vmatmul.bf16.vlgmr.msra.gmra.mxu0 %v14121_v14  ;;  %5239 = vmatmul.bf16.vlgmr.msrb.gmra.mxu3 %v14121_v14  ;;  %v9240_v51 = vor.u32 %v10839_v52, %v9239_v46  ;;  %v10869_v52 = vld [vmem:[#allocation5 + $0x16c] sm:$0xf] }
 0x528   :  { %5300 = vmatpush.bf16.msra.mxu3 %v9496_v35  ;;  %5316 = vmatpush.bf16.msra.mxu0 %v9576_v54  ;;  %v9257_v35 = vld [vmem:[#allocation5 + $0x98] sm:$0xf0]  ;;  %v9256_v54 = vor.u32 %v10843_v49, %v9255_v34  ;;  %v10873_v49 = vld [vmem:[#allocation5 + $0x18c] sm:$0xf] }
 0x529   :  { %v4476_v47 = vpop.f32.mrf.mxu3  ;;  %v9260_v56 = vor.u32 %v10841_v36, %v9257_v35  ;;  %v9367_v35 = vld [vmem:[#allocation5 + $0x168] sm:$0xf] }
 0x52a   :  { %v4463_v1 = vpop.f32.mrf.mxu2  ;;  %5225 = vmatpush.bf16.msra.mxu2 %v9188_v12  ;;  %v10887_v12 = vld [vmem:[#allocation5 + $0x1f4] sm:$0xf0] }
 0x52b   :  { %v4464_v2 = vadd.f32 %v4463_v1, %v4451_v29  ;;  %v9224_v1 = vor.u32 %v10835_v43, %v9223_v60  ;;  %v9335_v43 = vld [vmem:[#allocation5 + $0x128] sm:$0xf] }
 0x52c   :  { %5301 = vmatpush.bf16.msra.mxu3 %v9480_v10 }
 0x52d   :  { %v4477_v8 = vadd.f32 %v4476_v47, %v4464_v2  ;;  %v14126_v9 = vpop.f32.mrf.mxu0  ;;  %v9244_v47 = vor.u32 %v10837_v39, %v9241_v59  ;;  %v9207_v2 = vld [vmem:[#allocation5 + $0x28] sm:$0xf]  ;;  %v10867_v39 = vld [vmem:[#allocation5 + $0x154] sm:$0xf0] }
 0x52e   :  { %v4503_v29 = vadd.f32 %v14126_v9, %v3829_v58  ;;  %v10827_v9 = vld [vmem:[#allocation5 + $0x14] sm:$0xf0]  ;;  %v9369_v58 = vld [vmem:[#allocation5 + $0x178] sm:$0xf0] }
 0x52f   :  { %v4490_v7 = vadd.f32 %v4489_v42, %v4477_v8  ;;  %v9192_v23 = vor.u32 %v10827_v9, %v9191_v15  ;;  %v9372_v59 = vor.u32 %v10869_v52, %v9369_v58  ;;  %v9545_v15 = vld [vmem:[#allocation5 + $0x2d8] sm:$0xf0]  ;;  %v9615_v58 = vld [vmem:[%s15357_s16 + $0x38] sm:$0xf] }
 0x530   :  { %5302 = vmatpush.bf16.msra.mxu3 %v9464_v3  ;;  %v10831_v3 = vld [vmem:[#allocation5 + $0x34] sm:$0xf0] }
 0x531   :  { %v4547_v21 = vmax.f32 %v4490_v7, 0.0  ;;  %v4478_v22 = vpop.f32.mrf.mxu3  ;;  %v9208_v45 = vor.u32 %v10831_v3, %v9207_v2  ;;  %v9433_v7 = vld [vmem:[#allocation5 + $0x1f8] sm:$0xf0]  ;;  %v9340_v2 = vor.u32 %v10861_v41, %v9337_v63  ;;  %v10917_v3 = vld [vmem:[#allocation5 + $0x2ec] sm:$0xf] }
 0x532   :  { %v4465_v61 = vpop.f32.mrf.mxu2  ;;  %v10009_v41 = vld [vmem:[%s15357_s16 + $0x364] sm:$0xf0]  ;;  %v9979_v63 = vld [vmem:[%s15357_s16 + $0x310] sm:$0xf] }
 0x533   :  { %v14128_v25 = vpack.c.bf16 %v4547_v21, %v4547_v21  ;;  %v9432_v21 = vor.u32 %v10887_v12, %v9431_v17  ;;  %v10913_v12 = vld [vmem:[#allocation5 + $0x2cc] sm:$0xf] }
 0x534   :  { %5303 = vmatpush.bf16.msra.mxu3 %v9448_v20  ;;  %v9209_v20 = vld [vmem:[#allocation5 + $0x38] sm:$0xf0]  ;;  %v9548_v9 = vor.u32 %v10913_v12, %v9545_v15 }
 0x535   :  { %5200 = vmatmul.bf16.vlgmr.msrb.gmra.mxu1 %v14128_v25  ;;  %v4504_v42 = vpop.f32.mrf.mxu0  ;;  %v9212_v26 = vor.u32 %v10829_v11, %v9209_v20  ;;  %v10905_v11 = vld [vmem:[#allocation5 + $0x28c] sm:$0xf]  ;;  %v9513_v20 = vld [vmem:[#allocation5 + $0x298] sm:$0xf0] }
 0x536   :  { %5270 = vmatpush.bf16.msrb.mxu1 %v9304_v31  ;;  %v9436_v31 = vor.u32 %v10885_v16, %v9433_v7  ;;  %v10825_v42 = vld [vmem:[#allocation5 + $0xc] sm:$0xf]  ;;  %v9529_v7 = vld [vmem:[#allocation5 + $0x2b8] sm:$0xf0] }
 0x537   :  { %5252 = vmatmul.bf16.vlgmr.msrb.gmra.mxu0 %v14128_v25  ;;  %5304 = vmatmul.bf16.vlgmr.msra.gmra.mxu3 %v14128_v25  ;;  %v10909_v16 = vld [vmem:[#allocation5 + $0x2ac] sm:$0xf] }
 0x538   :  { %5368 = vmatpush.bf16.msrb.mxu3 %v9580_v55  ;;  %5322 = vmatpush.bf16.msrb.mxu0 %v9308_v62  ;;  %v10883_v55 = vld [vmem:[#allocation5 + $0x1d4] sm:$0xf0]  ;;  %v9417_v62 = vld [vmem:[#allocation5 + $0x1d8] sm:$0xf0] }
 0x539   :  { %v4541_v40 = vpop.f32.mrf.mxu3  ;;  %v9416_v32 = vor.u32 %v10883_v55, %v9415_v4  ;;  %v9420_v37 = vor.u32 %v10881_v13, %v9417_v62  ;;  %v10897_v55 = vld [vmem:[#allocation5 + $0x24c] sm:$0xf] }
 0x53a   :  { %5271 = vmatpush.bf16.msrb.mxu1 %v9288_v33  ;;  %v9399_v33 = vld [vmem:[#allocation5 + $0x1a8] sm:$0xf]  ;;  %v10893_v13 = vld [vmem:[#allocation5 + $0x22c] sm:$0xf] }
 0x53b   :  { %v9400_v28 = vor.u32 %v10879_v24, %v9399_v33  ;;  %v9755_v33 = vld [vmem:[%s15357_s16 + $0x150] sm:$0xf] }
 0x53c   :  { %5323 = vmatpush.bf16.msrb.mxu0 %v9292_v38  ;;  %v9196_v38 = vor.u32 %v10825_v42, %v9193_v27  ;;  %v10889_v42 = vld [vmem:[#allocation5 + $0x20c] sm:$0xf]  ;;  %v9449_v27 = vld [vmem:[#allocation5 + $0x218] sm:$0xf0] }
 0x53d   :  { %v9452_v24 = vor.u32 %v10889_v42, %v9449_v27  ;;  %v9867_v27 = vld [vmem:[%s15357_s16 + $0x230] sm:$0xf] }
 0x53e   :  { %v4515_v48 = vpop.f32.mrf.mxu1  ;;  %5272 = vmatpush.bf16.msrb.mxu1 %v9272_v30  ;;  %v9383_v30 = vld [vmem:[#allocation5 + $0x188] sm:$0xf] }
 0x53f   :  { %v4516_v0 = vadd.f32 %v4515_v48, %v4503_v29  ;;  %v10875_v48 = vld [vmem:[#allocation5 + $0x194] sm:$0xf0] }
 0x540   :  { %5324 = vmatpush.bf16.msrb.mxu0 %v9276_v44  ;;  %v9385_v44 = vld [vmem:[#allocation5 + $0x198] sm:$0xf0]  ;;  %v9384_v36 = vor.u32 %v10875_v48, %v9383_v30  ;;  %v10863_v29 = vld [vmem:[#allocation5 + $0x134] sm:$0xf0]  ;;  %v9699_v48 = vld [vmem:[%s15357_s16 + $0xe0] sm:$0xf] }
 0x541   :  { %v4543_v50 = vpop.f32.mrf.mxu3  ;;  %v9388_v46 = vor.u32 %v10873_v49, %v9385_v44  ;;  %v9671_v44 = vld [vmem:[%s15357_s16 + $0xa8] sm:$0xf] }
 0x542   :  { %5273 = vmatpush.bf16.msrb.mxu1 %v9256_v54  ;;  %v10871_v54 = vld [vmem:[#allocation5 + $0x174] sm:$0xf0]  ;;  %v9351_v50 = vld [vmem:[#allocation5 + $0x148] sm:$0xf] }
 0x543   :  { %v9352_v60 = vor.u32 %v10867_v39, %v9351_v50  ;;  %v9587_v39 = vld [vmem:[%s15357_s16] sm:$0xf] }
 0x544   :  { %5325 = vmatpush.bf16.msrb.mxu0 %v9260_v56  ;;  %v9368_v56 = vor.u32 %v10871_v54, %v9367_v35  ;;  %v9643_v35 = vld [vmem:[%s15357_s16 + $0x70] sm:$0xf]  ;;  %v10941_v54 = vld [vmem:[%s15357_s16 + $0x88] sm:$0xf0] }
 0x546   :  { %v4517_v10 = vpop.f32.mrf.mxu1  ;;  %5274 = vmatpush.bf16.msrb.mxu1 %v9240_v51  ;;  %v10865_v51 = vld [vmem:[#allocation5 + $0x14c] sm:$0xf] }
 0x547   :  { %v9353_v10 = vld [vmem:[#allocation5 + $0x158] sm:$0xf0] }
 0x548   :  { %5326 = vmatpush.bf16.msrb.mxu0 %v9244_v47  ;;  %v9356_v47 = vor.u32 %v10865_v51, %v9353_v10 }
 0x54a   :  { %v4528_v19 = vpop.f32.mrf.mxu2  ;;  %5275 = vmatpush.bf16.msrb.mxu1 %v9224_v1  ;;  %v9319_v1 = vld [vmem:[#allocation5 + $0x108] sm:$0xf] }
 0x54b   :  { %v4529_v5 = vadd.f32 %v4528_v19, %v4516_v0  ;;  %v9336_v0 = vor.u32 %v10863_v29, %v9335_v43  ;;  %v10859_v19 = vld [vmem:[#allocation5 + $0x114] sm:$0xf0]  ;;  %v11032_v43 = vld [vmem:[%s15357_s16 + $0x360] sm:$0xf0]  ;;  %v11029_v29 = vld [vmem:[%s15357_s16 + $0x34c] sm:$0xf] }
 0x54c   :  { %5327 = vmatpush.bf16.msrb.mxu0 %v9228_v6  ;;  %v10857_v6 = vld [vmem:[#allocation5 + $0x10c] sm:$0xf] }
 0x54d   :  { %v4542_v8 = vadd.f32 %v4541_v40, %v4529_v5  ;;  %v10877_v40 = vld [vmem:[#allocation5 + $0x1ac] sm:$0xf]  ;;  %v9561_v5 = vld [vmem:[#allocation5 + $0x2f8] sm:$0xf0] }
 0x54e   :  { %5276 = vmatpush.bf16.msrb.mxu1 %v9208_v45  ;;  %v9404_v34 = vor.u32 %v10877_v40, %v9401_v57  ;;  %v9320_v45 = vor.u32 %v10859_v19, %v9319_v1  ;;  %v9727_v57 = vld [vmem:[%s15357_s16 + $0x118] sm:$0xf]  ;;  %v10012_v19 = vor.u32 %v11029_v29, %v10009_v41  ;;  %v11078_v41 = vld [vmem:[%s15357_s16 + $0x4d4] sm:$0xf] }
 0x54f   :  { %v4548_v18 = vmax.f32 %v4542_v8, 0.0  ;;  %v9321_v8 = vld [vmem:[#allocation5 + $0x118] sm:$0xf0] }
 0x550   :  { %5328 = vmatpush.bf16.msrb.mxu0 %v9212_v26  ;;  %v9324_v17 = vor.u32 %v10857_v6, %v9321_v8  ;;  %v9465_v26 = vld [vmem:[#allocation5 + $0x238] sm:$0xf0]  ;;  %v9951_v8 = vld [vmem:[%s15357_s16 + $0x2d8] sm:$0xf] }
 0x551   :  { %v4552_v22 = vpack.c.bf16 %v4548_v18, %v4548_v18  ;;  %v9532_v18 = vor.u32 %v10909_v16, %v9529_v7  ;;  %v9468_v62 = vor.u32 %v10893_v13, %v9465_v26  ;;  %v9923_v7 = vld [vmem:[%s15357_s16 + $0x2a0] sm:$0xf]  ;;  %v9897_v26 = vld [vmem:[%s15357_s16 + $0x284] sm:$0xf0] }
 0x552   :  { %v4530_v61 = vpop.f32.mrf.mxu2  ;;  %5277 = vmatpush.bf16.msrb.mxu1 %v9192_v23  ;;  %v9497_v23 = vld [vmem:[#allocation5 + $0x278] sm:$0xf0] }
 0x553   :  { %9581 = vmatmul.msk.bf16.vlgmr.msrb.gmra.mxu2 %vm1297_vm0, %v4552_v22  ;;  %9582 = vmatmul.msk.bf16.vlgmr.msra.gmra.mxu1 %vm1297_vm0, %v4552_v22  ;;  %v9481_v61 = vld [vmem:[#allocation5 + $0x258] sm:$0xf0] }
 0x554   :  { %5283 = vmatpush.bf16.msrb.mxu2 %v9432_v21  ;;  %9583 = vmatmul.msk.bf16.vlgmr.msra.gmra.mxu0 %vm1297_vm0, %v4552_v22  ;;  %v9516_v21 = vor.u32 %v10905_v11, %v9513_v20  ;;  %v11008_v11 = vld [vmem:[%s15357_s16 + $0x2a4] sm:$0xf] }
 0x555   :  { %9584 = vmatmul.msk.bf16.vlgmr.msrb.gmra.mxu3 %vm1297_vm0, %v4552_v22  ;;  %5329 = vmatpush.bf16.msrb.mxu0 %v9196_v38  ;;  %v10901_v22 = vld [vmem:[#allocation5 + $0x26c] sm:$0xf] }
 0x556   :  { %5335 = vmatpush.bf16.msra.mxu1 %v9436_v31  ;;  %v9500_v4 = vor.u32 %v10901_v22, %v9497_v23  ;;  %v9484_v31 = vor.u32 %v10897_v55, %v9481_v61  ;;  %v10969_v38 = vld [vmem:[%s15357_s16 + $0x168] sm:$0xf0]  ;;  %v9895_v55 = vld [vmem:[%s15357_s16 + $0x268] sm:$0xf]  ;;  %v11004_v61 = vld [vmem:[%s15357_s16 + $0x280] sm:$0xf0] }
 0x557   :  { %v9756_v40 = vor.u32 %v10969_v38, %v9755_v33  ;;  %v9896_v13 = vor.u32 %v11004_v61, %v9895_v55  ;;  %v11057_v61 = vld [vmem:[%s15357_s16 + $0x42c] sm:$0xf] }
 0x558   :  { %5284 = vmatpush.bf16.msrb.mxu2 %v9416_v32  ;;  %v10976_v32 = vld [vmem:[%s15357_s16 + $0x1a0] sm:$0xf0] }
 0x55a   :  { %5336 = vmatpush.bf16.msra.mxu1 %v9420_v37 }
 0x55c   :  { %5285 = vmatpush.bf16.msrb.mxu2 %v9400_v28  ;;  %v10962_v28 = vld [vmem:[%s15357_s16 + $0x130] sm:$0xf0] }
 0x55d   :  { %v9728_v30 = vor.u32 %v10962_v28, %v9727_v57  ;;  %v9839_v57 = vld [vmem:[%s15357_s16 + $0x1f8] sm:$0xf]  ;;  %v10990_v28 = vld [vmem:[%s15357_s16 + $0x210] sm:$0xf0] }
 0x55e   :  { %5337 = vmatpush.bf16.msra.mxu1 %v9404_v34  ;;  %v10955_v34 = vld [vmem:[%s15357_s16 + $0xf8] sm:$0xf0] }
 0x55f   :  { %v9700_v49 = vor.u32 %v10955_v34, %v9699_v48  ;;  %v9840_v48 = vor.u32 %v10990_v28, %v9839_v57  ;;  %v9841_v34 = vld [vmem:[%s15357_s16 + $0x214] sm:$0xf0] }
 0x560   :  { %5286 = vmatpush.bf16.msrb.mxu2 %v9384_v36 }
 0x562   :  { %5338 = vmatpush.bf16.msra.mxu1 %v9388_v46  ;;  %v9644_v46 = vor.u32 %v10941_v54, %v9643_v35  ;;  %v9811_v54 = vld [vmem:[%s15357_s16 + $0x1c0] sm:$0xf] }
 0x563   :  { %5226 = vmatmul.bf16.vlgmr.msra.gmra.mxu2 %v14115_v53  ;;  %5278 = vmatmul.bf16.vlgmr.msrb.gmra.mxu1 %v14115_v53 }
 0x564   :  { %5287 = vmatpush.bf16.msrb.mxu2 %v9368_v56  ;;  %5330 = vmatmul.bf16.vlgmr.msrb.gmra.mxu0 %v14115_v53  ;;  %v9564_v53 = vor.u32 %v10917_v3, %v9561_v5  ;;  %v10934_v56 = vld [vmem:[%s15357_s16 + $0x50] sm:$0xf0]  ;;  %v9981_v3 = vld [vmem:[%s15357_s16 + $0x32c] sm:$0xf0] }
 0x565   :  { %v9616_v50 = vor.u32 %v10934_v56, %v9615_v58  ;;  %v10980_v56 = vld [vmem:[%s15357_s16 + $0x1c4] sm:$0xf] }
 0x566   :  { %5339 = vmatpush.bf16.msra.mxu1 %v9372_v59  ;;  %v10927_v59 = vld [vmem:[%s15357_s16 + $0x18] sm:$0xf0] }
 0x567   :  { %v9588_v51 = vor.u32 %v10927_v59, %v9587_v39  ;;  %v11085_v39 = vld [vmem:[%s15357_s16 + $0x50c] sm:$0xf] }
 0x568   :  { %5288 = vmatpush.bf16.msrb.mxu2 %v9352_v60  ;;  %v10007_v60 = vld [vmem:[%s15357_s16 + $0x348] sm:$0xf] }
 0x56a   :  { %5340 = vmatpush.bf16.msra.mxu1 %v9356_v47  ;;  %v10008_v47 = vor.u32 %v11032_v43, %v10007_v60  ;;  %v10203_v60 = vld [vmem:[%s15357_s16 + $0x4d0] sm:$0xf]  ;;  %v11081_v43 = vld [vmem:[%s15357_s16 + $0x4e8] sm:$0xf0] }
 0x56c   :  { %5289 = vmatpush.bf16.msrb.mxu2 %v9336_v0  ;;  %v11025_v0 = vld [vmem:[%s15357_s16 + $0x328] sm:$0xf0]  ;;  %6514 = vmatpush.bf16.msra.mxu0 %v10008_v47  ;;  %v10204_v47 = vor.u32 %v11081_v43, %v10203_v60  ;;  %v9785_v43 = vld [vmem:[%s15357_s16 + $0x1a4] sm:$0xf0] }
 0x56d   :  { %v9980_v5 = vor.u32 %v11025_v0, %v9979_v63  ;;  %v10205_v63 = vld [vmem:[%s15357_s16 + $0x4ec] sm:$0xf0]  ;;  %v10973_v60 = vld [vmem:[%s15357_s16 + $0x18c] sm:$0xf] }
 0x56e   :  { %5341 = vmatpush.bf16.msra.mxu1 %v9340_v2  ;;  %v11022_v2 = vld [vmem:[%s15357_s16 + $0x314] sm:$0xf]  ;;  %v10208_v0 = vor.u32 %v11078_v41, %v10205_v63  ;;  %v10183_v41 = vld [vmem:[%s15357_s16 + $0x4a0] sm:$0xf] }
 0x56f   :  { %v9984_v6 = vor.u32 %v11022_v2, %v9981_v3  ;;  %v11074_v2 = vld [vmem:[%s15357_s16 + $0x4b0] sm:$0xf0] }
 0x570   :  { %5290 = vmatpush.bf16.msrb.mxu2 %v9320_v45  ;;  %v11018_v45 = vld [vmem:[%s15357_s16 + $0x2f0] sm:$0xf0]  ;;  %6515 = vmatpush.bf16.msra.mxu0 %v9980_v5  ;;  %v14334_v5 = vld [vmem:[%s15356_s15] sm:$0xf] }
 0x571   :  { %v9952_v12 = vor.u32 %v11018_v45, %v9951_v8  ;;  %v10177_v8 = vld [vmem:[%s15357_s16 + $0x4b4] sm:$0xf0] }
 0x572   :  { %5342 = vmatpush.bf16.msra.mxu1 %v9324_v17  ;;  %v9953_v17 = vld [vmem:[%s15357_s16 + $0x2f4] sm:$0xf0] }
 0x573   :  { %5291 = vmatmul.bf16.vlgmr.msrb.gmra.mxu2 %v14121_v14 }
 0x574   :  { %5348 = vmatpush.bf16.msra.mxu2 %v9564_v53  ;;  %v11015_v53 = vld [vmem:[%s15357_s16 + $0x2dc] sm:$0xf]  ;;  %6516 = vmatpush.bf16.msra.mxu0 %v9952_v12  ;;  %v4655_v12 = vperm.slane %v14334_v5, 0 }
 0x575   :  { %5343 = vmatmul.bf16.vlgmr.msra.gmra.mxu1 %v14121_v14  ;;  %v9783_v14 = vld [vmem:[%s15357_s16 + $0x188] sm:$0xf] }
 0x576   :  { %v9784_v37 = vor.u32 %v10976_v32, %v9783_v14  ;;  %v10997_v14 = vld [vmem:[%s15357_s16 + $0x248] sm:$0xf0]  ;;  %v10994_v32 = vld [vmem:[%s15357_s16 + $0x234] sm:$0xf] }
 0x577   :  { %v9868_v33 = vor.u32 %v10997_v14, %v9867_v27 }
 0x578   :  { %5349 = vmatpush.bf16.msra.mxu2 %v9548_v9  ;;  %6501 = vmatpush.bf16.msra.mxu3 %v9784_v37  ;;  %v9956_v9 = vor.u32 %v11015_v53, %v9953_v17  ;;  %v10147_v53 = vld [vmem:[%s15357_s16 + $0x460] sm:$0xf]  ;;  %v11067_v17 = vld [vmem:[%s15357_s16 + $0x478] sm:$0xf0] }
 0x57c   :  { %5350 = vmatpush.bf16.msra.mxu2 %v9532_v18  ;;  %6502 = vmatpush.bf16.msra.mxu3 %v9756_v40  ;;  %v11011_v18 = vld [vmem:[%s15357_s16 + $0x2b8] sm:$0xf0] }
 0x57d   :  { %v9924_v20 = vor.u32 %v11011_v18, %v9923_v7  ;;  %v10149_v7 = vld [vmem:[%s15357_s16 + $0x47c] sm:$0xf0] }
 0x57f   :  { %6517 = vmatpush.bf16.msra.mxu0 %v9924_v20  ;;  %v10119_v20 = vld [vmem:[%s15357_s16 + $0x428] sm:$0xf] }
 0x580   :  { %5351 = vmatpush.bf16.msra.mxu2 %v9516_v21  ;;  %6503 = vmatpush.bf16.msra.mxu3 %v9728_v30  ;;  %v9925_v21 = vld [vmem:[%s15357_s16 + $0x2bc] sm:$0xf0]  ;;  %v10987_v30 = vld [vmem:[%s15357_s16 + $0x1fc] sm:$0xf] }
 0x581   :  { %v9928_v22 = vor.u32 %v11008_v11, %v9925_v21  ;;  %v11060_v21 = vld [vmem:[%s15357_s16 + $0x440] sm:$0xf0] }
 0x582   :  { %v10120_v55 = vor.u32 %v11060_v21, %v10119_v20  ;;  %v4656_v21 = vperm.slane %v14334_v5, 1 }
 0x583   :  { %6518 = vmatpush.bf16.msra.mxu0 %v9896_v13 }
 0x584   :  { %5352 = vmatpush.bf16.msra.mxu2 %v9500_v4  ;;  %6504 = vmatpush.bf16.msra.mxu3 %v9700_v49 }
 0x587   :  { %6519 = vmatpush.bf16.msra.mxu0 %v9868_v33  ;;  %v11050_v33 = vld [vmem:[%s15357_s16 + $0x3f4] sm:$0xf] }
 0x588   :  { %5353 = vmatpush.bf16.msra.mxu2 %v9484_v31  ;;  %v11001_v31 = vld [vmem:[%s15357_s16 + $0x26c] sm:$0xf] }
 0x589   :  { %v9900_v42 = vor.u32 %v11001_v31, %v9897_v26  ;;  %v10121_v31 = vld [vmem:[%s15357_s16 + $0x444] sm:$0xf0] }
 0x58a   :  { %v10124_v26 = vor.u32 %v11057_v61, %v10121_v31  ;;  %v10959_v61 = vld [vmem:[%s15357_s16 + $0x11c] sm:$0xf]  ;;  %v9729_v31 = vld [vmem:[%s15357_s16 + $0x134] sm:$0xf0] }
 0x58b   :  { %6520 = vmatpush.bf16.msra.mxu0 %v9840_v48  ;;  %v11046_v48 = vld [vmem:[%s15357_s16 + $0x3d0] sm:$0xf0] }
 0x58c   :  { %5354 = vmatpush.bf16.msra.mxu2 %v9468_v62 }
 0x590   :  { %5355 = vmatpush.bf16.msra.mxu2 %v9452_v24  ;;  %v9869_v24 = vld [vmem:[%s15357_s16 + $0x24c] sm:$0xf0] }
 0x591   :  { %v9872_v37 = vor.u32 %v10994_v32, %v9869_v24 }
 0x593   :  { %5356 = vmatmul.bf16.vlgmr.msra.gmra.mxu2 %v14128_v25  ;;  %v10948_v25 = vld [vmem:[%s15357_s16 + $0xc0] sm:$0xf0] }
 0x594   :  { %v9672_v36 = vor.u32 %v10948_v25, %v9671_v44  ;;  %v9844_v44 = vor.u32 %v10987_v30, %v9841_v34  ;;  %v10231_v25 = vld [vmem:[%s15357_s16 + $0x508] sm:$0xf]  ;;  %v10063_v30 = vld [vmem:[%s15357_s16 + $0x3b8] sm:$0xf] }
 0x596   :  { %6505 = vmatpush.bf16.msra.mxu3 %v9672_v36  ;;  %v11088_v36 = vld [vmem:[%s15357_s16 + $0x520] sm:$0xf0] }
 0x597   :  { %v10232_v35 = vor.u32 %v11088_v36, %v10231_v25  ;;  %v11043_v36 = vld [vmem:[%s15357_s16 + $0x3bc] sm:$0xf] }
 0x599   :  { %v14181_v52 = vpop.f32.mrf.mxu3  ;;  %6527 = vmatpush.bf16.msrb.mxu1 %v10232_v35  ;;  %v10065_v35 = vld [vmem:[%s15357_s16 + $0x3d4] sm:$0xf0] }
 0x59a   :  { %6506 = vmatpush.bf16.msra.mxu3 %v9644_v46  ;;  %v10983_v46 = vld [vmem:[%s15357_s16 + $0x1d8] sm:$0xf0] }
 0x59b   :  { %v9812_v58 = vor.u32 %v10983_v46, %v9811_v54  ;;  %v10211_v46 = vld [vmem:[%s15357_s16 + $0x4d8] sm:$0xf] }
 0x59d   :  { %6521 = vmatpush.bf16.msra.mxu0 %v9812_v58  ;;  %6528 = vmatpush.bf16.msrb.mxu1 %v10204_v47  ;;  %v11082_v58 = vld [vmem:[%s15357_s16 + $0x4f0] sm:$0xf0] }
 0x59e   :  { %6507 = vmatpush.bf16.msra.mxu3 %v9616_v50  ;;  %v9813_v50 = vld [vmem:[%s15357_s16 + $0x1dc] sm:$0xf0]  ;;  %v10212_v47 = vor.u32 %v11082_v58, %v10211_v46  ;;  %v11047_v58 = vld [vmem:[%s15357_s16 + $0x3d8] sm:$0xf0] }
 0x59f   :  { %v9816_v59 = vor.u32 %v10980_v56, %v9813_v50  ;;  %v10068_v56 = vor.u32 %v11043_v36, %v10065_v35  ;;  %v10035_v50 = vld [vmem:[%s15357_s16 + $0x380] sm:$0xf] }
 0x5a1   :  { %v5177_v10 = vpop.f32.mrf.mxu3 }
 0x5a2   :  { %6508 = vmatpush.bf16.msra.mxu3 %v9588_v51  ;;  %v10233_v51 = vld [vmem:[%s15357_s16 + $0x524] sm:$0xf0] }
 0x5a3   :  { %v10236_v10 = vor.u32 %v11085_v39, %v10233_v51  ;;  %v11039_v39 = vld [vmem:[%s15357_s16 + $0x398] sm:$0xf0] }
 0x5a4   :  { %v14213_v1 = vpop.f32.mrf.mxu0  ;;  %v10036_v51 = vor.u32 %v11039_v39, %v10035_v50  ;;  %v4657_v50 = vperm.slane %v14334_v5, 2 }
 0x5a5   :  { %6579 = vmatpush.bf16.msrb.mxu0 %v10236_v10  ;;  %v11095_v10 = vld [vmem:[%s15357_s16 + $0x558] sm:$0xf0] }
 0x5a6   :  { %6566 = vmatpush.bf16.msrb.mxu3 %v10012_v19  ;;  %v10175_v19 = vld [vmem:[%s15357_s16 + $0x498] sm:$0xf] }
 0x5a7   :  { %v10176_v3 = vor.u32 %v11074_v2, %v10175_v19  ;;  %v11036_v19 = vld [vmem:[%s15357_s16 + $0x384] sm:$0xf]  ;;  %v10037_v2 = vld [vmem:[%s15357_s16 + $0x39c] sm:$0xf0] }
 0x5a9   :  { %6580 = vmatpush.bf16.msrb.mxu0 %v10208_v0  ;;  %6529 = vmatpush.bf16.msrb.mxu1 %v10176_v3  ;;  %v9788_v0 = vor.u32 %v10973_v60, %v9785_v43  ;;  %v11075_v3 = vld [vmem:[%s15357_s16 + $0x4b8] sm:$0xf0] }
 0x5aa   :  { %v14233_v15 = vpop.f32.mrf.mxu3  ;;  %6567 = vmatpush.bf16.msrb.mxu3 %v9984_v6  ;;  %v11071_v6 = vld [vmem:[%s15357_s16 + $0x49c] sm:$0xf] }
 0x5ab   :  { %v10180_v45 = vor.u32 %v11071_v6, %v10177_v8  ;;  %v10040_v6 = vor.u32 %v11036_v19, %v10037_v2  ;;  %v11092_v8 = vld [vmem:[%s15357_s16 + $0x544] sm:$0xf]  ;;  %v10931_v19 = vld [vmem:[%s15357_s16 + $0x3c] sm:$0xf]  ;;  %v9617_v2 = vld [vmem:[%s15357_s16 + $0x54] sm:$0xf0] }
 0x5ac   :  { %v5190_v16 = vpop.f32.mrf.mxu0 }
 0x5ad   :  { %6581 = vmatpush.bf16.msrb.mxu0 %v10180_v45  ;;  %v11064_v16 = vld [vmem:[%s15357_s16 + $0x464] sm:$0xf]  ;;  %v10261_v45 = vld [vmem:[%s15357_s16 + $0x55c] sm:$0xf0] }
 0x5ae   :  { %6568 = vmatpush.bf16.msrb.mxu3 %v9956_v9  ;;  %v10148_v9 = vor.u32 %v11067_v17, %v10147_v53  ;;  %v10152_v18 = vor.u32 %v11064_v16, %v10149_v7  ;;  %v10966_v16 = vld [vmem:[%s15357_s16 + $0x154] sm:$0xf]  ;;  %v9757_v7 = vld [vmem:[%s15357_s16 + $0x16c] sm:$0xf0] }
 0x5af   :  { %v9760_v20 = vor.u32 %v10966_v16, %v9757_v7  ;;  %v9589_v16 = vld [vmem:[%s15357_s16 + $0x1c] sm:$0xf0] }
 0x5b0   :  { %6530 = vmatpush.bf16.msrb.mxu1 %v10148_v9 }
 0x5b1   :  { %6582 = vmatpush.bf16.msrb.mxu0 %v10152_v18  ;;  %v10184_v18 = vor.u32 %v11075_v3, %v10183_v41  ;;  %v11093_v41 = vld [vmem:[%s15357_s16 + $0x54c] sm:$0xf] }
 0x5b2   :  { %v14247_v23 = vpop.f32.mrf.mxu1  ;;  %v5242_v4 = vpop.f32.mrf.mxu3  ;;  %6569 = vmatpush.bf16.msrb.mxu3 %v9928_v22  ;;  %v5176_v22 = vadd.f32 %v14181_v52, %v4655_v12  ;;  %v10091_v52 = vld [vmem:[%s15357_s16 + $0x3f0] sm:$0xf]  ;;  %v10264_v12 = vor.u32 %v11092_v8, %v10261_v45  ;;  %v9620_v8 = vor.u32 %v10931_v19, %v9617_v2  ;;  %v9651_v2 = vld [vmem:[%s15357_s16 + $0x78] sm:$0xf] }
 0x5b4   :  { %v14261_v62 = vpop.f32.mrf.mxu0  ;;  %v5189_v13 = vadd.f32 %v14213_v1, %v5176_v22  ;;  %6531 = vmatpush.bf16.msrb.mxu1 %v10120_v55  ;;  %v10093_v1 = vld [vmem:[%s15357_s16 + $0x40c] sm:$0xf0]  ;;  %v10155_v22 = vld [vmem:[%s15357_s16 + $0x468] sm:$0xf]  ;;  %v11068_v55 = vld [vmem:[%s15357_s16 + $0x480] sm:$0xf0] }
 0x5b5   :  { %6583 = vmatpush.bf16.msrb.mxu0 %v10124_v26  ;;  %v10156_v26 = vor.u32 %v11068_v55, %v10155_v22  ;;  %v10974_v22 = vld [vmem:[%s15357_s16 + $0x194] sm:$0xf]  ;;  %v9793_v55 = vld [vmem:[%s15357_s16 + $0x1ac] sm:$0xf0] }
 0x5b6   :  { %6570 = vmatpush.bf16.msrb.mxu3 %v9900_v42  ;;  %v11053_v42 = vld [vmem:[%s15357_s16 + $0x408] sm:$0xf0]  ;;  %v5202_v14 = vadd.f32 %v14247_v23, %v5189_v13  ;;  %v10096_v23 = vor.u32 %v11050_v33, %v10093_v1 }
 0x5b7   :  { %v10092_v27 = vor.u32 %v11053_v42, %v10091_v52  ;;  %v9732_v52 = vor.u32 %v10959_v61, %v9729_v31  ;;  %v10978_v31 = vld [vmem:[%s15357_s16 + $0x1b0] sm:$0xf0] }
 0x5b9   :  { %6532 = vmatpush.bf16.msrb.mxu1 %v10092_v27  ;;  %6584 = vmatpush.bf16.msrb.mxu0 %v10096_v23  ;;  %v10127_v27 = vld [vmem:[%s15357_s16 + $0x430] sm:$0xf] }
 0x5ba   :  { %v5203_v38 = vpop.f32.mrf.mxu1  ;;  %v14275_v40 = vpop.f32.mrf.mxu3  ;;  %6571 = vmatpush.bf16.msrb.mxu3 %v9872_v37  ;;  %v10239_v37 = vld [vmem:[%s15357_s16 + $0x510] sm:$0xf] }
 0x5bb   :  { %v11089_v38 = vld [vmem:[%s15357_s16 + $0x528] sm:$0xf0] }
 0x5bc   :  { %v5255_v49 = vpop.f32.mrf.mxu0  ;;  %v10240_v25 = vor.u32 %v11089_v38, %v10239_v37  ;;  %v9701_v37 = vld [vmem:[%s15357_s16 + $0xfc] sm:$0xf0] }
 0x5bd   :  { %6585 = vmatpush.bf16.msrb.mxu0 %v10068_v56 }
 0x5be   :  { %6572 = vmatpush.bf16.msrb.mxu3 %v9844_v44  ;;  %v10064_v44 = vor.u32 %v11046_v48, %v10063_v30  ;;  %v10099_v30 = vld [vmem:[%s15357_s16 + $0x3f8] sm:$0xf]  ;;  %v10267_v48 = vld [vmem:[%s15357_s16 + $0x548] sm:$0xf] }
 0x5c0   :  { %6533 = vmatpush.bf16.msrb.mxu1 %v10064_v44  ;;  %v9673_v44 = vld [vmem:[%s15357_s16 + $0xc4] sm:$0xf0] }
 0x5c1   :  { %6586 = vmatpush.bf16.msrb.mxu0 %v10040_v6 }
 0x5c2   :  { %v5307_v29 = vpop.f32.mrf.mxu3  ;;  %6573 = vmatpush.bf16.msrb.mxu3 %v9816_v59  ;;  %v10259_v59 = vld [vmem:[%s15357_s16 + $0x540] sm:$0xf] }
 0x5c3   :  { %v10260_v63 = vor.u32 %v11095_v10, %v10259_v59  ;;  %v10938_v59 = vld [vmem:[%s15357_s16 + $0x74] sm:$0xf] }
 0x5c4   :  { %6534 = vmatpush.bf16.msrb.mxu1 %v10036_v51  ;;  %v9645_v51 = vld [vmem:[%s15357_s16 + $0x8c] sm:$0xf0] }
 0x5c5   :  { %6547 = vmatpush.bf16.msrb.mxu2 %v10260_v63  ;;  %v9648_v43 = vor.u32 %v10938_v59, %v9645_v51  ;;  %v10269_v63 = vld [vmem:[%s15357_s16 + $0x564] sm:$0xf0]  ;;  %v9679_v51 = vld [vmem:[%s15357_s16 + $0xb0] sm:$0xf] }
 0x5c8   :  { %6599 = vmatpush.bf16.msra.mxu1 %v10264_v12 }
 0x5c9   :  { %6553 = vmatpush.bf16.msra.mxu2 %v9788_v0 }
 0x5cd   :  { %6554 = vmatpush.bf16.msra.mxu2 %v9760_v20 }
 0x5d0   :  { %v14355_v11 = vpop.f32.mrf.mxu1 }
 0x5d1   :  { %v14364_v4 = vpop.f32.mrf.mxu0  ;;  %6555 = vmatpush.bf16.msra.mxu2 %v9732_v52 }
 0x5d6   :  { %v5214_v32 = vpop.f32.mrf.mxu2 }
 0x5d7   :  { %v5215_v24 = vadd.f32 %v5214_v32, %v5202_v14  ;;  %v11061_v14 = vld [vmem:[%s15357_s16 + $0x448] sm:$0xf0] }
 0x5d8   :  { %v14392_v57 = vpop.f32.mrf.mxu3  ;;  %v5268_v28 = vpop.f32.mrf.mxu1  ;;  %v10128_v38 = vor.u32 %v11061_v14, %v10127_v27  ;;  %v10970_v27 = vld [vmem:[%s15357_s16 + $0x170] sm:$0xf0]  ;;  %v9796_v14 = vor.u32 %v10974_v22, %v9793_v55 }
 0x5d9   :  { %v5374_v34 = vmax.f32 %v5215_v24, 0.0  ;;  %v5320_v49 = vpop.f32.mrf.mxu0  ;;  %v10952_v24 = vld [vmem:[%s15357_s16 + $0xe4] sm:$0xf] }
 0x5da   :  { %v9704_v23 = vor.u32 %v10952_v24, %v9701_v37  ;;  %v11096_v49 = vld [vmem:[%s15357_s16 + $0x560] sm:$0xf0]  ;;  %v9771_v24 = vld [vmem:[%s15357_s16 + $0x160] sm:$0xf]  ;;  %v10971_v37 = vld [vmem:[%s15357_s16 + $0x178] sm:$0xf0] }
 0x5db   :  { %v14406_v54 = vpack.c.bf16 %v5374_v34, %v5374_v34  ;;  %v10268_v56 = vor.u32 %v11096_v49, %v10267_v48  ;;  %v10960_v48 = vld [vmem:[%s15357_s16 + $0x124] sm:$0xf]  ;;  %v9743_v49 = vld [vmem:[%s15357_s16 + $0x128] sm:$0xf] }
 0x5dc   :  { %6556 = vmatpush.bf16.msra.mxu2 %v9704_v23  ;;  %v9735_v23 = vld [vmem:[%s15357_s16 + $0x120] sm:$0xf] }
 0x5dd   :  { %6509 = vmatmul.bf16.vlgmr.msra.gmra.mxu3 %v14406_v54 }
 0x5de   :  { %v5216_v29 = vpop.f32.mrf.mxu2  ;;  %6631 = vmatpush.bf16.msra.mxu3 %v10240_v25 }
 0x5df   :  { %v10043_v29 = vld [vmem:[%s15357_s16 + $0x388] sm:$0xf] }
 0x5e0   :  { %v5372_v53 = vpop.f32.mrf.mxu3  ;;  %v14451_v17 = vpop.f32.mrf.mxu1 }
 0x5e1   :  { %v14453_v9 = vpop.f32.mrf.mxu0  ;;  %v5280_v0 = vadd.f32 %v14451_v17, %v4657_v50  ;;  %v10272_v53 = vor.u32 %v11093_v41, %v10269_v63  ;;  %v10924_v17 = vld [vmem:[%s15357_s16 + $0x4] sm:$0xf]  ;;  %v10957_v50 = vld [vmem:[%s15357_s16 + $0x108] sm:$0xf0]  ;;  %v10946_v41 = vld [vmem:[%s15357_s16 + $0xb4] sm:$0xf] }
 0x5e2   :  { %6632 = vmatpush.bf16.msra.mxu3 %v10212_v47  ;;  %v11040_v47 = vld [vmem:[%s15357_s16 + $0x3a0] sm:$0xf0]  ;;  %v9681_v63 = vld [vmem:[%s15357_s16 + $0xcc] sm:$0xf0] }
 0x5e3   :  { %v10044_v6 = vor.u32 %v11040_v47, %v10043_v29 }
 0x5e6   :  { %v5227_v13 = vpop.f32.mrf.mxu2  ;;  %6633 = vmatpush.bf16.msra.mxu3 %v10184_v18  ;;  %v9592_v18 = vor.u32 %v10924_v17, %v9589_v16  ;;  %v9659_v17 = vld [vmem:[%s15357_s16 + $0x80] sm:$0xf] }
 0x5e7   :  { %v5228_v42 = vadd.f32 %v5227_v13, %v4656_v21  ;;  %v9791_v21 = vld [vmem:[%s15357_s16 + $0x190] sm:$0xf] }
 0x5e8   :  { %v5281_v32 = vpop.f32.mrf.mxu1 }
 0x5e9   :  { %v5241_v33 = vadd.f32 %v14233_v15, %v5228_v42  ;;  %v5333_v1 = vpop.f32.mrf.mxu0  ;;  %v11054_v15 = vld [vmem:[%s15357_s16 + $0x410] sm:$0xf0]  ;;  %v9763_v42 = vld [vmem:[%s15357_s16 + $0x158] sm:$0xf] }
 0x5ea   :  { %6634 = vmatpush.bf16.msra.mxu3 %v10156_v26  ;;  %v10100_v36 = vor.u32 %v11054_v15, %v10099_v30  ;;  %v9765_v1 = vld [vmem:[%s15357_s16 + $0x174] sm:$0xf0]  ;;  %v9772_v15 = vor.u32 %v10971_v37, %v9771_v24  ;;  %v10017_v24 = vld [vmem:[%s15357_s16 + $0x36c] sm:$0xf0] }
 0x5eb   :  { %v5254_v28 = vadd.f32 %v14261_v62, %v5241_v33  ;;  %v10945_v62 = vld [vmem:[%s15357_s16 + $0xac] sm:$0xf]  ;;  %v10967_v33 = vld [vmem:[%s15357_s16 + $0x15c] sm:$0xf] }
 0x5ec   :  { %v9676_v35 = vor.u32 %v10945_v62, %v9673_v44  ;;  %v9768_v30 = vor.u32 %v10967_v33, %v9765_v1  ;;  %v10964_v62 = vld [vmem:[%s15357_s16 + $0x140] sm:$0xf0]  ;;  %v11030_v1 = vld [vmem:[%s15357_s16 + $0x354] sm:$0xf] }
 0x5ed   :  { %v5267_v34 = vadd.f32 %v14355_v11, %v5254_v28  ;;  %v10071_v11 = vld [vmem:[%s15357_s16 + $0x3c0] sm:$0xf]  ;;  %v10963_v28 = vld [vmem:[%s15357_s16 + $0x138] sm:$0xf0] }
 0x5ee   :  { %v5229_v25 = vpop.f32.mrf.mxu2  ;;  %6635 = vmatpush.bf16.msra.mxu3 %v10128_v38  ;;  %6557 = vmatpush.bf16.msra.mxu2 %v9676_v35  ;;  %v10072_v60 = vor.u32 %v11047_v58, %v10071_v11  ;;  %v9764_v38 = vor.u32 %v10970_v27, %v9763_v42  ;;  %v9736_v44 = vor.u32 %v10963_v28, %v9735_v23  ;;  %v10953_v11 = vld [vmem:[%s15357_s16 + $0xec] sm:$0xf]  ;;  %v9709_v58 = vld [vmem:[%s15357_s16 + $0x104] sm:$0xf0]  ;;  %v10936_v42 = vld [vmem:[%s15357_s16 + $0x60] sm:$0xf0] }
 0x5ef   :  { %v5375_v46 = vmax.f32 %v5267_v34, 0.0  ;;  %v9737_v34 = vld [vmem:[%s15357_s16 + $0x13c] sm:$0xf0]  ;;  %v9707_v25 = vld [vmem:[%s15357_s16 + $0xe8] sm:$0xf]  ;;  %v9712_v29 = vor.u32 %v10953_v11, %v9709_v58 }
 0x5f0   :  { %v9740_v35 = vor.u32 %v10960_v48, %v9737_v34  ;;  %v9987_v23 = vld [vmem:[%s15357_s16 + $0x318] sm:$0xf]  ;;  %v11026_v28 = vld [vmem:[%s15357_s16 + $0x330] sm:$0xf0] }
 0x5f1   :  { %v14514_v39 = vpack.c.bf16 %v5375_v46, %v5375_v46  ;;  %v9744_v46 = vor.u32 %v10964_v62, %v9743_v49  ;;  %v9597_v49 = vld [vmem:[%s15357_s16 + $0x24] sm:$0xf0]  ;;  %v9603_v62 = vld [vmem:[%s15357_s16 + $0x10] sm:$0xf]  ;;  %v9988_v11 = vor.u32 %v11026_v28, %v9987_v23  ;;  %v10025_v58 = vld [vmem:[%s15357_s16 + $0x374] sm:$0xf0] }
 0x5f2   :  { %v14522_v10 = vpop.f32.mrf.mxu1  ;;  %6636 = vmatpush.bf16.msra.mxu3 %v10100_v36  ;;  %6558 = vmatpush.bf16.msra.mxu2 %v9648_v43  ;;  %v10956_v36 = vld [vmem:[%s15357_s16 + $0x100] sm:$0xf0]  ;;  %v4658_v43 = vperm.slane %v14334_v5, 3  ;;  %v10950_v5 = vld [vmem:[%s15357_s16 + $0xd0] sm:$0xf0] }
 0x5f3   :  { %6522 = vmatmul.bf16.vlgmr.msra.gmra.mxu0 %v14514_v39  ;;  %6574 = vmatmul.bf16.vlgmr.msrb.gmra.mxu3 %v14514_v39  ;;  %v9708_v59 = vor.u32 %v10956_v36, %v9707_v25  ;;  %v10020_v25 = vor.u32 %v11030_v1, %v10017_v24  ;;  %v10023_v36 = vld [vmem:[%s15357_s16 + $0x358] sm:$0xf]  ;;  %v10998_v1 = vld [vmem:[%s15357_s16 + $0x250] sm:$0xf0] }
 0x5f4   :  { %6651 = vmatpush.bf16.msra.mxu0 %v10268_v56  ;;  %v9715_v56 = vld [vmem:[%s15357_s16 + $0xf0] sm:$0xf]  ;;  %v9911_v23 = vld [vmem:[%s15357_s16 + $0x278] sm:$0xf]  ;;  %v11006_v28 = vld [vmem:[%s15357_s16 + $0x290] sm:$0xf0] }
 0x5f5   :  { %v9716_v47 = vor.u32 %v10957_v50, %v9715_v56  ;;  %v11023_v56 = vld [vmem:[%s15357_s16 + $0x31c] sm:$0xf]  ;;  %v9989_v50 = vld [vmem:[%s15357_s16 + $0x334] sm:$0xf0] }
 0x5f6   :  { %v5292_v3 = vpop.f32.mrf.mxu2  ;;  %6637 = vmatpush.bf16.msra.mxu3 %v10072_v60  ;;  %6559 = vmatpush.bf16.msra.mxu2 %v9620_v8  ;;  %v10949_v60 = vld [vmem:[%s15357_s16 + $0xc8] sm:$0xf0]  ;;  %v9684_v8 = vor.u32 %v10946_v41, %v9681_v63  ;;  %v9992_v41 = vor.u32 %v11023_v56, %v9989_v50  ;;  %v9995_v63 = vld [vmem:[%s15357_s16 + $0x320] sm:$0xf]  ;;  %v10988_v50 = vld [vmem:[%s15357_s16 + $0x204] sm:$0xf] }
 0x5f7   :  { %v5293_v45 = vadd.f32 %v5292_v3, %v5280_v0  ;;  %v9687_v0 = vld [vmem:[%s15357_s16 + $0xb8] sm:$0xf]  ;;  %v9680_v19 = vor.u32 %v10949_v60, %v9679_v51  ;;  %v10942_v3 = vld [vmem:[%s15357_s16 + $0x90] sm:$0xf0]  ;;  %v9959_v51 = vld [vmem:[%s15357_s16 + $0x2e0] sm:$0xf] }
 0x5f8   :  { %v11019_v60 = vld [vmem:[%s15357_s16 + $0x2f8] sm:$0xf0]  ;;  %v9885_v56 = vld [vmem:[%s15357_s16 + $0x25c] sm:$0xf0] }
 0x5f9   :  { %v5306_v12 = vadd.f32 %v14275_v40, %v5293_v45  ;;  %v10977_v40 = vld [vmem:[%s15357_s16 + $0x1a8] sm:$0xf0]  ;;  %v9688_v45 = vor.u32 %v10950_v5, %v9687_v0  ;;  %v11027_v0 = vld [vmem:[%s15357_s16 + $0x338] sm:$0xf0]  ;;  %v11024_v5 = vld [vmem:[%s15357_s16 + $0x324] sm:$0xf] }
 0x5fa   :  { %v5346_v7 = vpop.f32.mrf.mxu1  ;;  %6638 = vmatpush.bf16.msra.mxu3 %v10044_v6  ;;  %6560 = vmatpush.bf16.msra.mxu2 %v9592_v18  ;;  %v9792_v26 = vor.u32 %v10977_v40, %v9791_v21  ;;  %v5332_v6 = vadd.f32 %v14453_v9, %v4658_v43  ;;  %v10943_v9 = vld [vmem:[%s15357_s16 + $0x98] sm:$0xf0] }
 0x5fb   :  { %v5319_v20 = vadd.f32 %v14364_v4, %v5306_v12  ;;  %v9799_v4 = vld [vmem:[%s15357_s16 + $0x198] sm:$0xf]  ;;  %v9652_v7 = vor.u32 %v10942_v3, %v9651_v2  ;;  %v10935_v21 = vld [vmem:[%s15357_s16 + $0x58] sm:$0xf0]  ;;  %v9660_v55 = vor.u32 %v10943_v9, %v9659_v17  ;;  %v9997_v2 = vld [vmem:[%s15357_s16 + $0x33c] sm:$0xf0] }
 0x5fc   :  { %v9800_v32 = vor.u32 %v10978_v31, %v9799_v4  ;;  %v9653_v12 = vld [vmem:[%s15357_s16 + $0x94] sm:$0xf0]  ;;  %v5345_v16 = vadd.f32 %v14522_v10, %v5332_v6  ;;  %v10015_v4 = vld [vmem:[%s15357_s16 + $0x350] sm:$0xf]  ;;  %v11033_v31 = vld [vmem:[%s15357_s16 + $0x368] sm:$0xf0] }
 0x5fd   :  { %v5376_v61 = vmax.f32 %v5319_v20, 0.0  ;;  %v9623_v20 = vld [vmem:[%s15357_s16 + $0x40] sm:$0xf]  ;;  %v10016_v33 = vor.u32 %v11033_v31, %v10015_v4  ;;  %v11016_v3 = vld [vmem:[%s15357_s16 + $0x2e4] sm:$0xf] }
 0x5fe   :  { %6703 = vmatpush.bf16.msrb.mxu3 %v10272_v53  ;;  %v5294_v13 = vpop.f32.mrf.mxu2  ;;  %v10939_v53 = vld [vmem:[%s15357_s16 + $0x7c] sm:$0xf]  ;;  %v9624_v10 = vor.u32 %v10935_v21, %v9623_v20  ;;  %v9961_v6 = vld [vmem:[%s15357_s16 + $0x2fc] sm:$0xf0]  ;;  %v9967_v9 = vld [vmem:[%s15357_s16 + $0x2e8] sm:$0xf] }
 0x5ff   :  { %v14571_v52 = vpack.c.bf16 %v5376_v61, %v5376_v61  ;;  %v9656_v22 = vor.u32 %v10939_v53, %v9653_v12  ;;  %v10932_v13 = vld [vmem:[%s15357_s16 + $0x44] sm:$0xf]  ;;  %v9996_v53 = vor.u32 %v11027_v0, %v9995_v63  ;;  %v10000_v12 = vor.u32 %v11024_v5, %v9997_v2  ;;  %v9969_v20 = vld [vmem:[%s15357_s16 + $0x304] sm:$0xf0]  ;;  %v11009_v21 = vld [vmem:[%s15357_s16 + $0x2ac] sm:$0xf] }
 0x600   :  { %v9964_v17 = vor.u32 %v11016_v3, %v9961_v6  ;;  %v9939_v31 = vld [vmem:[%s15357_s16 + $0x2b0] sm:$0xf]  ;;  %v9855_v5 = vld [vmem:[%s15357_s16 + $0x208] sm:$0xf]  ;;  %v10989_v2 = vld [vmem:[%s15357_s16 + $0x20c] sm:$0xf] }
 0x601   :  { %6535 = vmatmul.bf16.vlgmr.msrb.gmra.mxu1 %v14571_v52  ;;  %v9857_v3 = vld [vmem:[%s15357_s16 + $0x224] sm:$0xf0]  ;;  %v10981_v6 = vld [vmem:[%s15357_s16 + $0x1cc] sm:$0xf] }
 0x602   :  { %6605 = vmatpush.bf16.msrb.mxu1 %v9792_v26  ;;  %v9625_v26 = vld [vmem:[%s15357_s16 + $0x5c] sm:$0xf0] }
 0x603   :  { %6587 = vmatmul.bf16.vlgmr.msrb.gmra.mxu0 %v14571_v52  ;;  %6639 = vmatmul.bf16.vlgmr.msra.gmra.mxu3 %v14571_v52 }
 0x604   :  { %6657 = vmatpush.bf16.msrb.mxu0 %v9796_v14  ;;  %6709 = vmatpush.bf16.msra.mxu3 %v9800_v32  ;;  %v9595_v14 = vld [vmem:[%s15357_s16 + $0x8] sm:$0xf]  ;;  %v10928_v32 = vld [vmem:[%s15357_s16 + $0x20] sm:$0xf0] }
 0x605   :  { %v9596_v34 = vor.u32 %v10928_v32, %v9595_v14 }
 0x606   :  { %6606 = vmatpush.bf16.msrb.mxu1 %v9764_v38  ;;  %v9628_v38 = vor.u32 %v10932_v13, %v9625_v26  ;;  %v11013_v13 = vld [vmem:[%s15357_s16 + $0x2c8] sm:$0xf0]  ;;  %v11010_v26 = vld [vmem:[%s15357_s16 + $0x2b4] sm:$0xf] }
 0x607   :  { %v9940_v32 = vor.u32 %v11013_v13, %v9939_v31  ;;  %v10255_v31 = vld [vmem:[%s15357_s16 + $0x520] sm:$0xf]  ;;  %v11091_v13 = vld [vmem:[%s15357_s16 + $0x538] sm:$0xf0] }
 0x608   :  { %6658 = vmatpush.bf16.msrb.mxu0 %v9768_v30  ;;  %6710 = vmatpush.bf16.msra.mxu3 %v9772_v15  ;;  %v10925_v30 = vld [vmem:[%s15357_s16 + $0xc] sm:$0xf] }
 0x60a   :  { %6607 = vmatpush.bf16.msrb.mxu1 %v9736_v44  ;;  %v10929_v44 = vld [vmem:[%s15357_s16 + $0x28] sm:$0xf0] }
 0x60b   :  { %v9604_v43 = vor.u32 %v10929_v44, %v9603_v62  ;;  %v9912_v62 = vor.u32 %v11006_v28, %v9911_v23  ;;  %v9847_v44 = vld [vmem:[%s15357_s16 + $0x200] sm:$0xf] }
 0x60c   :  { %6659 = vmatpush.bf16.msrb.mxu0 %v9740_v35  ;;  %6711 = vmatpush.bf16.msra.mxu3 %v9744_v46  ;;  %v11034_v35 = vld [vmem:[%s15357_s16 + $0x370] sm:$0xf0]  ;;  %v11031_v46 = vld [vmem:[%s15357_s16 + $0x35c] sm:$0xf]  ;;  %v10221_v28 = vld [vmem:[%s15357_s16 + $0x4fc] sm:$0xf0] }
 0x60e   :  { %6608 = vmatpush.bf16.msrb.mxu1 %v9708_v59  ;;  %v9600_v59 = vor.u32 %v10925_v30, %v9597_v49  ;;  %v11003_v30 = vld [vmem:[%s15357_s16 + $0x27c] sm:$0xf] }
 0x610   :  { %6660 = vmatpush.bf16.msrb.mxu0 %v9712_v29  ;;  %6712 = vmatpush.bf16.msra.mxu3 %v9716_v47  ;;  %v10024_v29 = vor.u32 %v11034_v35, %v10023_v36  ;;  %v10028_v47 = vor.u32 %v11031_v46, %v10025_v58  ;;  %v9883_v46 = vld [vmem:[%s15357_s16 + $0x240] sm:$0xf]  ;;  %v10996_v58 = vld [vmem:[%s15357_s16 + $0x244] sm:$0xf] }
 0x611   :  { %v9888_v63 = vor.u32 %v10996_v58, %v9885_v56  ;;  %v10199_v58 = vld [vmem:[%s15357_s16 + $0x4b0] sm:$0xf]  ;;  %v11077_v56 = vld [vmem:[%s15357_s16 + $0x4c8] sm:$0xf0] }
 0x612   :  { %6609 = vmatpush.bf16.msrb.mxu1 %v9680_v19  ;;  %v9960_v19 = vor.u32 %v11019_v60, %v9959_v51  ;;  %v9819_v60 = vld [vmem:[%s15357_s16 + $0x1c8] sm:$0xf] }
 0x614   :  { %6661 = vmatpush.bf16.msrb.mxu0 %v9684_v8  ;;  %6713 = vmatpush.bf16.msra.mxu3 %v9688_v45  ;;  %v9931_v8 = vld [vmem:[%s15357_s16 + $0x2a8] sm:$0xf]  ;;  %v11012_v45 = vld [vmem:[%s15357_s16 + $0x2c0] sm:$0xf0] }
 0x616   :  { %v5357_v18 = vpop.f32.mrf.mxu2  ;;  %6610 = vmatpush.bf16.msrb.mxu1 %v9652_v7  ;;  %v11017_v7 = vld [vmem:[%s15357_s16 + $0x2ec] sm:$0xf] }
 0x617   :  { %v5358_v40 = vadd.f32 %v5357_v18, %v5345_v16  ;;  %v11020_v16 = vld [vmem:[%s15357_s16 + $0x300] sm:$0xf0]  ;;  %v9932_v18 = vor.u32 %v11012_v45, %v9931_v8  ;;  %v9821_v8 = vld [vmem:[%s15357_s16 + $0x1e4] sm:$0xf0] }
 0x618   :  { %6662 = vmatpush.bf16.msrb.mxu0 %v9656_v22  ;;  %6714 = vmatpush.bf16.msra.mxu3 %v9660_v55  ;;  %v9968_v22 = vor.u32 %v11020_v16, %v9967_v9  ;;  %v9903_v55 = vld [vmem:[%s15357_s16 + $0x270] sm:$0xf]  ;;  %v11079_v16 = vld [vmem:[%s15357_s16 + $0x4dc] sm:$0xf] }
 0x619   :  { %v5371_v61 = vadd.f32 %v14392_v57, %v5358_v40  ;;  %v9631_v57 = vld [vmem:[%s15357_s16 + $0x48] sm:$0xf] }
 0x61a   :  { %6611 = vmatpush.bf16.msrb.mxu1 %v9624_v10  ;;  %v9632_v48 = vor.u32 %v10936_v42, %v9631_v57  ;;  %v9933_v40 = vld [vmem:[%s15357_s16 + $0x2c4] sm:$0xf0]  ;;  %v9972_v10 = vor.u32 %v11017_v7, %v9969_v20  ;;  %v9941_v57 = vld [vmem:[%s15357_s16 + $0x2cc] sm:$0xf0]  ;;  %v11002_v42 = vld [vmem:[%s15357_s16 + $0x274] sm:$0xf]  ;;  %v9860_v7 = vor.u32 %v10989_v2, %v9857_v3 }
 0x61b   :  { %v5377_v27 = vmax.f32 %v5371_v61, 0.0  ;;  %v11005_v61 = vld [vmem:[%s15357_s16 + $0x288] sm:$0xf0]  ;;  %v9936_v4 = vor.u32 %v11009_v21, %v9933_v40  ;;  %v9944_v24 = vor.u32 %v11010_v26, %v9941_v57  ;;  %v10213_v20 = vld [vmem:[%s15357_s16 + $0x4f4] sm:$0xf0] }
 0x61c   :  { %6663 = vmatpush.bf16.msrb.mxu0 %v9628_v38  ;;  %6715 = vmatpush.bf16.msra.mxu3 %v9632_v48  ;;  %v9904_v14 = vor.u32 %v11005_v61, %v9903_v55  ;;  %v10995_v48 = vld [vmem:[%s15357_s16 + $0x23c] sm:$0xf]  ;;  %v9827_v21 = vld [vmem:[%s15357_s16 + $0x1d0] sm:$0xf]  ;;  %v10985_v40 = vld [vmem:[%s15357_s16 + $0x1e8] sm:$0xf0]  ;;  %v10216_v26 = vor.u32 %v11079_v16, %v10213_v20 }
 0x61d   :  { %v14706_v37 = vpack.c.bf16 %v5377_v27, %v5377_v27  ;;  %v9905_v27 = vld [vmem:[%s15357_s16 + $0x28c] sm:$0xf0]  ;;  %v10982_v55 = vld [vmem:[%s15357_s16 + $0x1d4] sm:$0xf]  ;;  %v9828_v57 = vor.u32 %v10985_v40, %v9827_v21  ;;  %v10135_v3 = vld [vmem:[%s15357_s16 + $0x438] sm:$0xf] }
 0x61e   :  { %v5359_v15 = vpop.f32.mrf.mxu2  ;;  %6612 = vmatpush.bf16.msrb.mxu1 %v9596_v34  ;;  %v9908_v38 = vor.u32 %v11002_v42, %v9905_v27  ;;  %v9877_v34 = vld [vmem:[%s15357_s16 + $0x254] sm:$0xf0]  ;;  %v9829_v61 = vld [vmem:[%s15357_s16 + $0x1ec] sm:$0xf0]  ;;  %v10219_v42 = vld [vmem:[%s15357_s16 + $0x4e0] sm:$0xf] }
 0x61f   :  { %10285 = vmatmul.msk.bf16.vlgmr.msrb.gmra.mxu2 %vm1297_vm0, %v14706_v37  ;;  %10286 = vmatmul.msk.bf16.vlgmr.msra.gmra.mxu1 %vm1297_vm0, %v14706_v37  ;;  %v9913_v15 = vld [vmem:[%s15357_s16 + $0x294] sm:$0xf0]  ;;  %v9880_v35 = vor.u32 %v10995_v48, %v9877_v34  ;;  %v11083_v27 = vld [vmem:[%s15357_s16 + $0x4f8] sm:$0xf0]  ;;  %v10191_v34 = vld [vmem:[%s15357_s16 + $0x4a8] sm:$0xf] }
 0x620   :  { %6618 = vmatpush.bf16.msrb.mxu2 %v10016_v33  ;;  %10287 = vmatmul.msk.bf16.vlgmr.msra.gmra.mxu0 %vm1297_vm0, %v14706_v37  ;;  %v9875_v33 = vld [vmem:[%s15357_s16 + $0x238] sm:$0xf]  ;;  %v9916_v36 = vor.u32 %v11003_v30, %v9913_v15  ;;  %v10220_v23 = vor.u32 %v11083_v27, %v10219_v42  ;;  %v10227_v30 = vld [vmem:[%s15357_s16 + $0x4e8] sm:$0xf]  ;;  %v11084_v15 = vld [vmem:[%s15357_s16 + $0x500] sm:$0xf0] }
 0x621   :  { %10288 = vmatmul.msk.bf16.vlgmr.msrb.gmra.mxu3 %vm1297_vm0, %v14706_v37  ;;  %6664 = vmatpush.bf16.msrb.mxu0 %v9600_v59  ;;  %v9876_v49 = vor.u32 %v10998_v1, %v9875_v33  ;;  %v9849_v59 = vld [vmem:[%s15357_s16 + $0x21c] sm:$0xf0]  ;;  %v10137_v16 = vld [vmem:[%s15357_s16 + $0x454] sm:$0xf0]  ;;  %v11055_v40 = vld [vmem:[%s15357_s16 + $0x418] sm:$0xf0] }
 0x622   :  { %6670 = vmatpush.bf16.msra.mxu1 %v10020_v25  ;;  %6716 = vmatpush.bf16.msra.mxu3 %v9604_v43  ;;  %v10991_v25 = vld [vmem:[%s15357_s16 + $0x218] sm:$0xf0]  ;;  %v9852_v0 = vor.u32 %v10988_v50, %v9849_v59  ;;  %v10185_v33 = vld [vmem:[%s15357_s16 + $0x4bc] sm:$0xf0]  ;;  %v10163_v59 = vld [vmem:[%s15357_s16 + $0x470] sm:$0xf] }
 0x623   :  { %v9848_v51 = vor.u32 %v10991_v25, %v9847_v44  ;;  %v10157_v44 = vld [vmem:[%s15357_s16 + $0x484] sm:$0xf0]  ;;  %v10107_v21 = vld [vmem:[%s15357_s16 + $0x400] sm:$0xf] }
 0x624   :  { %6619 = vmatpush.bf16.msrb.mxu2 %v9988_v11  ;;  %v10999_v11 = vld [vmem:[%s15357_s16 + $0x258] sm:$0xf0]  ;;  %v10079_v27 = vld [vmem:[%s15357_s16 + $0x3c8] sm:$0xf] }
 0x625   :  { %6722 = vmatpush.bf16.msra.mxu0 %v10024_v29  ;;  %v9884_v43 = vor.u32 %v10999_v11, %v9883_v46  ;;  %v10984_v29 = vld [vmem:[%s15357_s16 + $0x1e0] sm:$0xf0]  ;;  %v10193_v11 = vld [vmem:[%s15357_s16 + $0x4c4] sm:$0xf0] }
 0x626   :  { %6774 = vmatpush.bf16.msrb.mxu3 %v10028_v47  ;;  %6671 = vmatpush.bf16.msra.mxu1 %v9992_v41  ;;  %v11086_v47 = vld [vmem:[%s15357_s16 + $0x514] sm:$0xf]  ;;  %v10241_v41 = vld [vmem:[%s15357_s16 + $0x52c] sm:$0xf0]  ;;  %v9820_v45 = vor.u32 %v10984_v29, %v9819_v60 }
 0x627   :  { %v11058_v60 = vld [vmem:[%s15357_s16 + $0x434] sm:$0xf] }
 0x628   :  { %6620 = vmatpush.bf16.msrb.mxu2 %v9960_v19  ;;  %v10992_v19 = vld [vmem:[%s15357_s16 + $0x220] sm:$0xf0] }
 0x629   :  { %6723 = vmatpush.bf16.msra.mxu0 %v9996_v53  ;;  %v10247_v53 = vld [vmem:[%s15357_s16 + $0x518] sm:$0xf]  ;;  %v9856_v9 = vor.u32 %v10992_v19, %v9855_v5  ;;  %v11070_v19 = vld [vmem:[%s15357_s16 + $0x490] sm:$0xf0] }
 0x62a   :  { %6775 = vmatpush.bf16.msrb.mxu3 %v10000_v12  ;;  %6672 = vmatpush.bf16.msra.mxu1 %v9964_v17  ;;  %v11090_v12 = vld [vmem:[%s15357_s16 + $0x530] sm:$0xf0]  ;;  %v10244_v17 = vor.u32 %v11086_v47, %v10241_v41  ;;  %v10200_v47 = vor.u32 %v11077_v56, %v10199_v58  ;;  %v10171_v5 = vld [vmem:[%s15357_s16 + $0x478] sm:$0xf] }
 0x62b   :  { %v11066_v41 = vld [vmem:[%s15357_s16 + $0x474] sm:$0xf] }
 0x62c   :  { %6621 = vmatpush.bf16.msrb.mxu2 %v9932_v18  ;;  %v9824_v18 = vor.u32 %v10981_v6, %v9821_v8  ;;  %v11062_v6 = vld [vmem:[%s15357_s16 + $0x450] sm:$0xf0]  ;;  %v11051_v8 = vld [vmem:[%s15357_s16 + $0x3fc] sm:$0xf] }
 0x62d   :  { %6724 = vmatpush.bf16.msra.mxu0 %v9968_v22  ;;  %v10248_v22 = vor.u32 %v11090_v12, %v10247_v53  ;;  %v10172_v12 = vor.u32 %v11070_v19, %v10171_v5  ;;  %v10979_v5 = vld [vmem:[%s15357_s16 + $0x1b8] sm:$0xf0]  ;;  %v10968_v19 = vld [vmem:[%s15357_s16 + $0x164] sm:$0xf] }
 0x62e   :  { %6776 = vmatpush.bf16.msrb.mxu3 %v9972_v10  ;;  %6673 = vmatpush.bf16.msra.mxu1 %v9936_v4  ;;  %v11087_v10 = vld [vmem:[%s15357_s16 + $0x51c] sm:$0xf]  ;;  %v10249_v4 = vld [vmem:[%s15357_s16 + $0x534] sm:$0xf0] }
 0x62f   :  { %6561 = vmatmul.bf16.vlgmr.msra.gmra.mxu2 %v14406_v54  ;;  %6613 = vmatmul.bf16.vlgmr.msrb.gmra.mxu1 %v14406_v54  ;;  %v10252_v1 = vor.u32 %v11087_v10, %v10249_v4  ;;  %v11052_v4 = vld [vmem:[%s15357_s16 + $0x404] sm:$0xf] }
 0x630   :  { %6622 = vmatpush.bf16.msrb.mxu2 %v9904_v14  ;;  %6665 = vmatmul.bf16.vlgmr.msrb.gmra.mxu0 %v14406_v54  ;;  %v9832_v14 = vor.u32 %v10982_v55, %v9829_v61  ;;  %v10073_v55 = vld [vmem:[%s15357_s16 + $0x3dc] sm:$0xf0] }
 0x631   :  { %6717 = vmatmul.bf16.vlgmr.msra.gmra.mxu3 %v14406_v54  ;;  %6725 = vmatpush.bf16.msra.mxu0 %v9940_v32  ;;  %v11072_v32 = vld [vmem:[%s15357_s16 + $0x4a4] sm:$0xf] }
 0x632   :  { %6777 = vmatpush.bf16.msrb.mxu3 %v9944_v24  ;;  %6674 = vmatpush.bf16.msra.mxu1 %v9908_v38  ;;  %v10256_v24 = vor.u32 %v11091_v13, %v10255_v31  ;;  %v11080_v38 = vld [vmem:[%s15357_s16 + $0x4e4] sm:$0xf]  ;;  %v10188_v48 = vor.u32 %v11072_v32, %v10185_v33  ;;  %v10108_v31 = vor.u32 %v11055_v40, %v10107_v21  ;;  %v10109_v13 = vld [vmem:[%s15357_s16 + $0x41c] sm:$0xf0]  ;;  %v11037_v32 = vld [vmem:[%s15357_s16 + $0x38c] sm:$0xf] }
 0x633   :  { %v10224_v25 = vor.u32 %v11080_v38, %v10221_v28  ;;  %v10045_v33 = vld [vmem:[%s15357_s16 + $0x3a4] sm:$0xf0]  ;;  %v11045_v38 = vld [vmem:[%s15357_s16 + $0x3cc] sm:$0xf] }
 0x634   :  { %6623 = vmatpush.bf16.msrb.mxu2 %v9876_v49  ;;  %v11076_v49 = vld [vmem:[%s15357_s16 + $0x4c0] sm:$0xf0]  ;;  %v11097_v28 = vld [vmem:[%s15357_s16 + $0x568] sm:$0xf0] }
 0x635   :  { %6726 = vmatpush.bf16.msra.mxu0 %v9912_v62  ;;  %v11065_v62 = vld [vmem:[%s15357_s16 + $0x46c] sm:$0xf]  ;;  %v10192_v46 = vor.u32 %v11076_v49, %v10191_v34  ;;  %v10048_v49 = vor.u32 %v11037_v32, %v10045_v33  ;;  %v10940_v32 = vld [vmem:[%s15357_s16 + $0x84] sm:$0xf]  ;;  %v9661_v33 = vld [vmem:[%s15357_s16 + $0x9c] sm:$0xf0] }
 0x636   :  { %6778 = vmatpush.bf16.msrb.mxu3 %v9916_v36  ;;  %6675 = vmatpush.bf16.msra.mxu1 %v9880_v35  ;;  %v10228_v36 = vor.u32 %v11084_v15, %v10227_v30  ;;  %v11073_v35 = vld [vmem:[%s15357_s16 + $0x4ac] sm:$0xf]  ;;  %v10160_v50 = vor.u32 %v11065_v62, %v10157_v44  ;;  %v10081_v15 = vld [vmem:[%s15357_s16 + $0x3e4] sm:$0xf0]  ;;  %v10051_v62 = vld [vmem:[%s15357_s16 + $0x390] sm:$0xf] }
 0x637   :  { %v10196_v29 = vor.u32 %v11073_v35, %v10193_v11  ;;  %v11049_v34 = vld [vmem:[%s15357_s16 + $0x3e8] sm:$0xf0]  ;;  %v9801_v35 = vld [vmem:[%s15357_s16 + $0x1b4] sm:$0xf0]  ;;  %v10277_v11 = vld [vmem:[%s15357_s16 + $0x56c] sm:$0xf0]  ;;  %v10084_v58 = vor.u32 %v11045_v38, %v10081_v15 }
 0x638   :  { %6624 = vmatpush.bf16.msrb.mxu2 %v9848_v51  ;;  %v11069_v51 = vld [vmem:[%s15357_s16 + $0x488] sm:$0xf0]  ;;  %v9667_v38 = vld [vmem:[%s15357_s16 + $0x88] sm:$0xf] }
 0x639   :  { %6727 = vmatpush.bf16.msra.mxu0 %v9884_v43  ;;  %v10129_v43 = vld [vmem:[%s15357_s16 + $0x44c] sm:$0xf0]  ;;  %v11041_v44 = vld [vmem:[%s15357_s16 + $0x3a8] sm:$0xf0] }
 0x63a   :  { %6779 = vmatpush.bf16.msrb.mxu3 %v9888_v63  ;;  %6676 = vmatpush.bf16.msra.mxu1 %v9852_v0  ;;  %v10164_v63 = vor.u32 %v11069_v51, %v10163_v59  ;;  %v10165_v0 = vld [vmem:[%s15357_s16 + $0x48c] sm:$0xf0]  ;;  %v10132_v2 = vor.u32 %v11058_v60, %v10129_v43  ;;  %v10052_v59 = vor.u32 %v11041_v44, %v10051_v62  ;;  %v10059_v60 = vld [vmem:[%s15357_s16 + $0x398] sm:$0xf]  ;;  %v11042_v43 = vld [vmem:[%s15357_s16 + $0x3b0] sm:$0xf0] }
 0x63b   :  { %v10168_v53 = vor.u32 %v11066_v41, %v10165_v0  ;;  %v10053_v51 = vld [vmem:[%s15357_s16 + $0x3ac] sm:$0xf0]  ;;  %v9807_v41 = vld [vmem:[%s15357_s16 + $0x1a0] sm:$0xf]  ;;  %v11098_v0 = vld [vmem:[%s15357_s16 + $0x570] sm:$0xf0] }
 0x63c   :  { %6625 = vmatpush.bf16.msrb.mxu2 %v9820_v45  ;;  %v10101_v45 = vld [vmem:[%s15357_s16 + $0x414] sm:$0xf0]  ;;  %v10965_v40 = vld [vmem:[%s15357_s16 + $0x148] sm:$0xf0]  ;;  %v10926_v44 = vld [vmem:[%s15357_s16 + $0x14] sm:$0xf] }
 0x63d   :  { %6728 = vmatpush.bf16.msra.mxu0 %v9856_v9  ;;  %v10136_v9 = vor.u32 %v11062_v6, %v10135_v3  ;;  %v10104_v20 = vor.u32 %v11051_v8, %v10101_v45  ;;  %v10060_v6 = vor.u32 %v11042_v43, %v10059_v60  ;;  %v9808_v45 = vor.u32 %v10979_v5, %v9807_v41  ;;  %v10937_v62 = vld [vmem:[%s15357_s16 + $0x68] sm:$0xf0]  ;;  %v11014_v5 = vld [vmem:[%s15357_s16 + $0x2d0] sm:$0xf0] }
 0x63e   :  { %6780 = vmatpush.bf16.msrb.mxu3 %v9860_v7  ;;  %6677 = vmatpush.bf16.msra.mxu1 %v9824_v18  ;;  %v10143_v7 = vld [vmem:[%s15357_s16 + $0x440] sm:$0xf]  ;;  %v11063_v18 = vld [vmem:[%s15357_s16 + $0x458] sm:$0xf0]  ;;  %v11021_v41 = vld [vmem:[%s15357_s16 + $0x308] sm:$0xf0] }
 0x63f   :  { %6626 = vmatmul.bf16.vlgmr.msrb.gmra.mxu2 %v14514_v39  ;;  %v10144_v10 = vor.u32 %v11063_v18, %v10143_v7 }
 0x640   :  { %6683 = vmatpush.bf16.msra.mxu2 %v10244_v17  ;;  %v11059_v17 = vld [vmem:[%s15357_s16 + $0x43c] sm:$0xf] }
 0x641   :  { %6729 = vmatpush.bf16.msra.mxu0 %v9828_v57  ;;  %6678 = vmatmul.bf16.vlgmr.msra.gmra.mxu1 %v14514_v39  ;;  %v10140_v61 = vor.u32 %v11059_v17, %v10137_v16  ;;  %v11056_v57 = vld [vmem:[%s15357_s16 + $0x420] sm:$0xf0]  ;;  %v9745_v16 = vld [vmem:[%s15357_s16 + $0x144] sm:$0xf0] }
 0x642   :  { %6735 = vmatpush.bf16.msrb.mxu1 %v10248_v22  ;;  %6781 = vmatpush.bf16.msrb.mxu3 %v9832_v14  ;;  %v11044_v22 = vld [vmem:[%s15357_s16 + $0x3c4] sm:$0xf] }
 0x643   :  { %v10076_v42 = vor.u32 %v11044_v22, %v10073_v55  ;;  %v11048_v14 = vld [vmem:[%s15357_s16 + $0x3e0] sm:$0xf0]  ;;  %v10954_v22 = vld [vmem:[%s15357_s16 + $0xf4] sm:$0xf]  ;;  %v9717_v55 = vld [vmem:[%s15357_s16 + $0x10c] sm:$0xf0] }
 0x644   :  { %6684 = vmatpush.bf16.msra.mxu2 %v10216_v26  ;;  %6730 = vmatmul.bf16.vlgmr.msra.gmra.mxu0 %v14514_v39  ;;  %v10115_v26 = vld [vmem:[%s15357_s16 + $0x408] sm:$0xf]  ;;  %v10080_v30 = vor.u32 %v11048_v14, %v10079_v27  ;;  %v10972_v17 = vld [vmem:[%s15357_s16 + $0x180] sm:$0xf0]  ;;  %v10951_v14 = vld [vmem:[%s15357_s16 + $0xd8] sm:$0xf0] }
 0x645   :  { %6787 = vmatpush.bf16.msrb.mxu0 %v10252_v1  ;;  %6782 = vmatmul.bf16.vlgmr.msrb.gmra.mxu3 %v14514_v39  ;;  %v10112_v1 = vor.u32 %v11052_v4, %v10109_v13  ;;  %v10958_v4 = vld [vmem:[%s15357_s16 + $0x110] sm:$0xf0]  ;;  %v9689_v13 = vld [vmem:[%s15357_s16 + $0xd4] sm:$0xf0] }
 0x646   :  { %6839 = vmatpush.bf16.msra.mxu3 %v10256_v24  ;;  %6736 = vmatpush.bf16.msrb.mxu1 %v10220_v23  ;;  %v10116_v24 = vor.u32 %v11056_v57, %v10115_v26  ;;  %v10275_v23 = vld [vmem:[%s15357_s16 + $0x550] sm:$0xf] }
 0x648   :  { %6685 = vmatpush.bf16.msra.mxu2 %v10188_v48  ;;  %v10087_v48 = vld [vmem:[%s15357_s16 + $0x3d0] sm:$0xf] }
 0x649   :  { %6788 = vmatpush.bf16.msrb.mxu0 %v10224_v25  ;;  %v10975_v25 = vld [vmem:[%s15357_s16 + $0x19c] sm:$0xf]  ;;  %v10088_v56 = vor.u32 %v11049_v34, %v10087_v48  ;;  %v9639_v34 = vld [vmem:[%s15357_s16 + $0x50] sm:$0xf] }
 0x64a   :  { %6840 = vmatpush.bf16.msra.mxu3 %v10228_v36  ;;  %6737 = vmatpush.bf16.msrb.mxu1 %v10192_v46  ;;  %v10276_v36 = vor.u32 %v11097_v28, %v10275_v23  ;;  %v11094_v46 = vld [vmem:[%s15357_s16 + $0x554] sm:$0xf]  ;;  %v10944_v23 = vld [vmem:[%s15357_s16 + $0xa0] sm:$0xf0]  ;;  %v10933_v28 = vld [vmem:[%s15357_s16 + $0x4c] sm:$0xf] }
 0x64b   :  { %v9668_v15 = vor.u32 %v10944_v23, %v9667_v38 }
 0x64c   :  { %6686 = vmatpush.bf16.msra.mxu2 %v10160_v50  ;;  %v11038_v50 = vld [vmem:[%s15357_s16 + $0x394] sm:$0xf] }
 0x64d   :  { %6789 = vmatpush.bf16.msrb.mxu0 %v10196_v29  ;;  %v9804_v29 = vor.u32 %v10975_v25, %v9801_v35  ;;  %v10056_v3 = vor.u32 %v11038_v50, %v10053_v51  ;;  %v9605_v25 = vld [vmem:[%s15357_s16 + $0x2c] sm:$0xf0]  ;;  %v9640_v35 = vor.u32 %v10937_v62, %v9639_v34  ;;  %v10003_v50 = vld [vmem:[%s15357_s16 + $0x328] sm:$0xf] }
 0x64e   :  { %6841 = vmatpush.bf16.msra.mxu3 %v10200_v47  ;;  %6738 = vmatpush.bf16.msrb.mxu1 %v10164_v63  ;;  %v10280_v47 = vor.u32 %v11094_v46, %v10277_v11  ;;  %v10283_v63 = vld [vmem:[%s15357_s16 + $0x558] sm:$0xf]  ;;  %v9608_v46 = vor.u32 %v10926_v44, %v9605_v25 }
 0x64f   :  { %v10284_v8 = vor.u32 %v11098_v0, %v10283_v63  ;;  %v9947_v0 = vld [vmem:[%s15357_s16 + $0x2b8] sm:$0xf] }
 0x650   :  { %6687 = vmatpush.bf16.msra.mxu2 %v10132_v2  ;;  %v9773_v2 = vld [vmem:[%s15357_s16 + $0x17c] sm:$0xf0] }
 0x651   :  { %6790 = vmatpush.bf16.msrb.mxu0 %v10168_v53  ;;  %v9776_v53 = vor.u32 %v10968_v19, %v9773_v2 }
 0x652   :  { %6842 = vmatpush.bf16.msra.mxu3 %v10172_v12  ;;  %6739 = vmatpush.bf16.msrb.mxu1 %v10136_v9  ;;  %v9779_v12 = vld [vmem:[%s15357_s16 + $0x168] sm:$0xf]  ;;  %v10961_v9 = vld [vmem:[%s15357_s16 + $0x12c] sm:$0xf] }
 0x653   :  { %v9780_v7 = vor.u32 %v10972_v17, %v9779_v12  ;;  %v9748_v18 = vor.u32 %v10961_v9, %v9745_v16  ;;  %v9891_v12 = vld [vmem:[%s15357_s16 + $0x248] sm:$0xf] }
 0x654   :  { %6688 = vmatpush.bf16.msra.mxu2 %v10104_v20  ;;  %v9751_v20 = vld [vmem:[%s15357_s16 + $0x130] sm:$0xf] }
 0x655   :  { %6791 = vmatpush.bf16.msrb.mxu0 %v10140_v61  ;;  %v9752_v61 = vor.u32 %v10965_v40, %v9751_v20  ;;  %v10993_v20 = vld [vmem:[%s15357_s16 + $0x228] sm:$0xf0] }
 0x656   :  { %6843 = vmatpush.bf16.msra.mxu3 %v10144_v10  ;;  %6740 = vmatpush.bf16.msrb.mxu1 %v10108_v31  ;;  %v9720_v10 = vor.u32 %v10954_v22, %v9717_v55  ;;  %v10947_v31 = vld [vmem:[%s15357_s16 + $0xbc] sm:$0xf]  ;;  %v9835_v22 = vld [vmem:[%s15357_s16 + $0x1d8] sm:$0xf]  ;;  %v10986_v55 = vld [vmem:[%s15357_s16 + $0x1f0] sm:$0xf0] }
 0x657   :  { %v9692_v57 = vor.u32 %v10947_v31, %v9689_v13 }
 0x658   :  { %6689 = vmatpush.bf16.msra.mxu2 %v10076_v42  ;;  %v9695_v42 = vld [vmem:[%s15357_s16 + $0xc0] sm:$0xf] }
 0x659   :  { %6792 = vmatpush.bf16.msrb.mxu0 %v10112_v1  ;;  %v9696_v1 = vor.u32 %v10951_v14, %v9695_v42 }
 0x65a   :  { %6844 = vmatpush.bf16.msra.mxu3 %v10116_v24  ;;  %6741 = vmatpush.bf16.msrb.mxu1 %v10080_v30  ;;  %v9664_v24 = vor.u32 %v10940_v32, %v9661_v33  ;;  %v9633_v30 = vld [vmem:[%s15357_s16 + $0x64] sm:$0xf0] }
 0x65b   :  { %v9636_v48 = vor.u32 %v10933_v28, %v9633_v30 }
 0x65c   :  { %6690 = vmatpush.bf16.msra.mxu2 %v10048_v49 }
 0x65d   :  { %6793 = vmatpush.bf16.msrb.mxu0 %v10084_v58  ;;  %v9611_v58 = vld [vmem:[%s15357_s16 + $0x18] sm:$0xf] }
 0x65e   :  { %6845 = vmatpush.bf16.msra.mxu3 %v10088_v56  ;;  %6742 = vmatpush.bf16.msrb.mxu1 %v10052_v59  ;;  %v10930_v56 = vld [vmem:[%s15357_s16 + $0x30] sm:$0xf0]  ;;  %v11028_v59 = vld [vmem:[%s15357_s16 + $0x340] sm:$0xf0] }
 0x65f   :  { %6691 = vmatmul.bf16.vlgmr.msra.gmra.mxu2 %v14571_v52  ;;  %v9612_v60 = vor.u32 %v10930_v56, %v9611_v58 }
 0x660   :  { %6755 = vmatpush.bf16.msrb.mxu2 %v10276_v36  ;;  %v15163_v21 = vpop.f32.mrf.mxu3  ;;  %v10031_v36 = vld [vmem:[%s15357_s16 + $0x360] sm:$0xf] }
 0x661   :  { %6794 = vmatpush.bf16.msrb.mxu0 %v10056_v3  ;;  %6743 = vmatmul.bf16.vlgmr.msrb.gmra.mxu1 %v14571_v52 }
 0x662   :  { %6807 = vmatpush.bf16.msra.mxu1 %v10280_v47  ;;  %6846 = vmatpush.bf16.msra.mxu3 %v10060_v6  ;;  %v9975_v47 = vld [vmem:[%s15357_s16 + $0x2f0] sm:$0xf]  ;;  %v9948_v6 = vor.u32 %v11014_v5, %v9947_v0 }
 0x663   :  { %v9976_v63 = vor.u32 %v11021_v41, %v9975_v47 }
 0x664   :  { %6761 = vmatpush.bf16.msra.mxu2 %v9804_v29  ;;  %6795 = vmatmul.bf16.vlgmr.msrb.gmra.mxu0 %v14571_v52  ;;  %v10004_v29 = vor.u32 %v11028_v59, %v10003_v50 }
 0x665   :  { %6859 = vmatpush.bf16.msra.mxu0 %v10284_v8  ;;  %6847 = vmatmul.bf16.vlgmr.msra.gmra.mxu3 %v14571_v52  ;;  %v9723_v52 = vld [vmem:[%s15357_s16 + $0xf8] sm:$0xf]  ;;  %v9919_v8 = vld [vmem:[%s15357_s16 + $0x280] sm:$0xf] }
 0x666   :  { %6813 = vmatpush.bf16.msrb.mxu1 %v9808_v45  ;;  %v9724_v26 = vor.u32 %v10958_v4, %v9723_v52  ;;  %v11007_v45 = vld [vmem:[%s15357_s16 + $0x298] sm:$0xf0]  ;;  %v15293_v52 = vld [vmem:[%s15358_s17] sm:$0x7f] }
 0x667   :  { %v5584_v4 = vperm.slane %v15293_v52, 0  ;;  %v5586_v41 = vperm.slane %v15293_v52, 2 }
 0x668   :  { %6762 = vmatpush.bf16.msra.mxu2 %v9776_v53  ;;  %v6512_v27 = vpop.f32.mrf.mxu3  ;;  %v9920_v53 = vor.u32 %v11007_v45, %v9919_v8 }
 0x669   :  { %v6511_v13 = vadd.f32 %v15163_v21, %v5584_v4  ;;  %v5585_v21 = vperm.slane %v15293_v52, 1 }
 0x66a   :  { %6814 = vmatpush.bf16.msrb.mxu1 %v9780_v7 }
 0x66c   :  { %6763 = vmatpush.bf16.msra.mxu2 %v9748_v18  ;;  %v9863_v18 = vld [vmem:[%s15357_s16 + $0x210] sm:$0xf] }
 0x66d   :  { %v9864_v40 = vor.u32 %v10993_v20, %v9863_v18 }
 0x66e   :  { %6815 = vmatpush.bf16.msrb.mxu1 %v9752_v61 }
 0x66f   :  { %10289 = vmatmul.msk.bf16.vlgmr.msrb.gmra.mxu2 %vm1297_vm0, %v14706_v37 }
 0x670   :  { %6764 = vmatpush.bf16.msra.mxu2 %v9720_v10  ;;  %v15219_v49 = vpop.f32.mrf.mxu0  ;;  %v9836_v10 = vor.u32 %v10986_v55, %v9835_v22 }
 0x671   :  { %10290 = vmatmul.msk.bf16.vlgmr.msra.gmra.mxu1 %vm1297_vm0, %v14706_v37 }
 0x672   :  { %6816 = vmatpush.bf16.msrb.mxu1 %v9724_v26 }
 0x674   :  { %6765 = vmatpush.bf16.msra.mxu2 %v9692_v57  ;;  %10291 = vmatmul.msk.bf16.vlgmr.msra.gmra.mxu0 %vm1297_vm0, %v14706_v37  ;;  %v11035_v37 = vld [vmem:[%s15357_s16 + $0x378] sm:$0xf0]  ;;  %v6524_v57 = vadd.f32 %v15219_v49, %v6511_v13 }
 0x675   :  { %v10032_v11 = vor.u32 %v11035_v37, %v10031_v36 }
 0x676   :  { %6817 = vmatpush.bf16.msrb.mxu1 %v9696_v1  ;;  %v15248_v51 = vpop.f32.mrf.mxu3 }
 0x678   :  { %6766 = vmatpush.bf16.msra.mxu2 %v9664_v24  ;;  %v6525_v43 = vpop.f32.mrf.mxu0 }
 0x67a   :  { %6818 = vmatpush.bf16.msrb.mxu1 %v9668_v15 }
 0x67c   :  { %6767 = vmatpush.bf16.msra.mxu2 %v9636_v48 }
 0x67e   :  { %6819 = vmatpush.bf16.msrb.mxu1 %v9640_v35  ;;  %v6536_v19 = vpop.f32.mrf.mxu1  ;;  %v6577_v2 = vpop.f32.mrf.mxu3 }
 0x67f   :  { %v6537_v42 = vadd.f32 %v6536_v19, %v6524_v57 }
 0x680   :  { %6768 = vmatpush.bf16.msra.mxu2 %v9608_v46  ;;  %v6588_v3 = vpop.f32.mrf.mxu0 }
 0x682   :  { %6820 = vmatpush.bf16.msrb.mxu1 %v9612_v60 }
 0x683   :  { %6769 = vmatmul.bf16.vlgmr.msra.gmra.mxu2 %v14406_v54 }
 0x684   :  { %6826 = vmatpush.bf16.msrb.mxu2 %v10032_v11 }
 0x685   :  { %6821 = vmatmul.bf16.vlgmr.msrb.gmra.mxu1 %v14406_v54  ;;  %v11000_v54 = vld [vmem:[%s15357_s16 + $0x260] sm:$0xf0]  ;;  %s11271_s16 = smov [#allocation8]  }
 0x686   :  { %v6538_v17 = vpop.f32.mrf.mxu1  ;;  %v15276_v9 = vpop.f32.mrf.mxu3  ;;  %v9892_v7 = vor.u32 %v11000_v54, %v9891_v12  ;;  %s7027_s17 = sshll.u32 %s11271_s16, 4  ;;  %s7028_s17 = int_to_ptr.vmem [resolvable:$true] %s7027_s17 }
 0x687   :  { %7032 = dma.vmem_to_hbm [thread:$0]  %s7028_s17, 128, %s7030_s22, [#allocation9]  }
 0x688   :  { %6827 = vmatpush.bf16.msrb.mxu2 %v10004_v29  ;;  %v6590_v16 = vpop.f32.mrf.mxu0  ;;  %7043 = dma.vmem_to_hbm [thread:$0]  %s7039_s6, 128, %s7041_s25, [#allocation9]  }
 0x68c   :  { %6828 = vmatpush.bf16.msrb.mxu2 %v9976_v63 }
 0x68e   :  { %v6642_v61 = vpop.f32.mrf.mxu3 }
 0x690   :  { %6829 = vmatpush.bf16.msrb.mxu2 %v9948_v6 }
 0x694   :  { %6830 = vmatpush.bf16.msrb.mxu2 %v9920_v53 }
 0x698   :  { %6831 = vmatpush.bf16.msrb.mxu2 %v9892_v7 }
 0x69c   :  { %6832 = vmatpush.bf16.msrb.mxu2 %v9864_v40  ;;  %v6601_v31 = vpop.f32.mrf.mxu1 }
 0x69d   :  { %v15298_v26 = vpop.f32.mrf.mxu0 }
 0x6a0   :  { %6833 = vmatpush.bf16.msrb.mxu2 %v9836_v10 }
 0x6a2   :  { %v6549_v27 = vpop.f32.mrf.mxu2 }
 0x6a3   :  { %6834 = vmatmul.bf16.vlgmr.msrb.gmra.mxu2 %v14514_v39  ;;  %v6550_v14 = vadd.f32 %v6549_v27, %v6537_v42  ;;  %v5587_v42 = vperm.slane %v15293_v52, 3 }
 0x6a4   :  { %v15301_v32 = vpop.f32.mrf.mxu3  ;;  %v6603_v33 = vpop.f32.mrf.mxu1 }
 0x6a5   :  { %v10292_v1 = vmul.f32 -1.442695, %v6550_v14  ;;  %v6655_v24 = vpop.f32.mrf.mxu0 }
 0x6a7   :  { %11110 = vpow2.f32 %v10292_v1 }
 0x6aa   :  { %v6551_v38 = vpop.f32.mrf.mxu2 }
 0x6ac   :  { %v6707_v23 = vpop.f32.mrf.mxu3  ;;  %v6614_v39 = vpop.f32.mrf.mxu1 }
 0x6ad   :  { %v11111_v28 = vpop.eup %11110  ;;  %v15303_v15 = vpop.f32.mrf.mxu0  ;;  %v6615_v5 = vadd.f32 %v6614_v39, %v5586_v41 }
 0x6ae   :  { %v6886_v30 = vadd.f32 1.0, %v11111_v28  ;;  %v6667_v33 = vadd.f32 %v15303_v15, %v5587_v42 }
 0x6b0   :  { %11112 = vrcp.f32 %v6886_v30  ;;  %v6904_v11 = vand.u32 2147483648, %v6886_v30  ;;  %v6902_v50 = vand.u32 2147483647, %v6886_v30  ;;  %vm6898_vm4 = vweird.f32 %v6886_v30 }
 0x6b2   :  { %v6562_v48 = vpop.f32.mrf.mxu2  ;;  %v6905_v47 = vor.u32 1.1754944e-38, %v6904_v11  ;;  %vm6903_vm6 = vcmp.eq.f32.partialorder %v6902_v50, 8.507059e+37 }
 0x6b3   :  { %v6563_v34 = vadd.f32 %v6562_v48, %v5585_v21 }
 0x6b4   :  { %v15306_v49 = vpop.f32.mrf.mxu3  ;;  %v6616_v62 = vpop.f32.mrf.mxu1 }
 0x6b5   :  { %v6576_v25 = vadd.f32 %v15248_v51, %v6563_v34  ;;  %v6668_v36 = vpop.f32.mrf.mxu0 }
 0x6b6   :  { %v11113_v44 = vpop.eup %11112 }
 0x6b7   :  { %v6894_v37 = vmul.f32 %v11113_v44, %v6886_v30  ;;  %v6589_v35 = vadd.f32 %v6588_v3, %v6576_v25  ;;  %vm6899_vm3 = vweird.f32 %v11113_v44 }
 0x6b8   :  { %vm6900_vm5 = vmor %vm6898_vm4, %vm6899_vm3 }
 0x6b9   :  { %v6895_v46 = vsub.f32 1.0, %v6894_v37  ;;  %v6602_v58 = vadd.f32 %v6601_v31, %v6589_v35 }
 0x6ba   :  { %v6564_v59 = vpop.f32.mrf.mxu2 }
 0x6bb   :  { %v6896_v56 = vmul.f32 %v11113_v44, %v6895_v46  ;;  %v10293_v60 = vmul.f32 -1.442695, %v6602_v58  ;;  %v5588_v46 = vperm.slane %v15293_v52, 4 }
 0x6bc   :  { %v6720_v29 = vpop.f32.mrf.mxu3 }
 0x6bd   :  { %v6897_v43 = vadd.f32 %v11113_v44, %v6896_v56  ;;  %11114 = vpow2.f32 %v10293_v60  ;;  %v6719_v56 = vadd.f32 %v15306_v49, %v5588_v46 }
 0x6be   :  { %v6679_v0 = vpop.f32.mrf.mxu1 }
 0x6bf   :  { %v6901_v51 = vsel %vm6900_vm5, %v11113_v44, %v6897_v43  ;;  %v6680_v38 = vadd.f32 %v6679_v0, %v6667_v33 }
 0x6c0   :  { %v6906_v63 = vsel %vm6903_vm6, %v6905_v47, %v6901_v51 }
 0x6c1   :  { %6998 = vst [vmem:[#allocation7] sm:$0xff] %v6906_v63  ;;  %v15313_v19 = vpop.f32.mrf.mxu0 }
 0x6c2   :  { %v6627_v2 = vpop.f32.mrf.mxu2  ;;  %v6732_v59 = vadd.f32 %v15313_v19, %v6719_v56 }
 0x6c3   :  { %v11115_v3 = vpop.eup %11114  ;;  %v6628_v6 = vadd.f32 %v6627_v2, %v6615_v5 }
 0x6c4   :  { %v6887_v8 = vadd.f32 1.0, %v11115_v3 }
 0x6c5   :  { %v6641_v45 = vadd.f32 %v15276_v9, %v6628_v6 }
 0x6c6   :  { %11116 = vrcp.f32 %v6887_v8  ;;  %v6681_v12 = vpop.f32.mrf.mxu1  ;;  %v6919_v22 = vand.u32 2147483648, %v6887_v8  ;;  %v6917_v10 = vand.u32 2147483647, %v6887_v8  ;;  %vm6913_vm8 = vweird.f32 %v6887_v8 }
 0x6c7   :  { %v6654_v53 = vadd.f32 %v15298_v26, %v6641_v45 }
 0x6c8   :  { %v15320_v54 = vpop.f32.mrf.mxu3  ;;  %v6920_v13 = vor.u32 1.1754944e-38, %v6919_v22  ;;  %vm6918_vm10 = vcmp.eq.f32.partialorder %v6917_v10, 8.507059e+37 }
 0x6c9   :  { %v10294_v17 = vmul.f32 -1.442695, %v6654_v53  ;;  %v6733_v16 = vpop.f32.mrf.mxu0 }
 0x6ca   :  { %v6629_v7 = vpop.f32.mrf.mxu2  ;;  %v5589_v16 = vperm.slane %v15293_v52, 5 }
 0x6cb   :  { %11118 = vpow2.f32 %v10294_v17 }
 0x6cc   :  { %v11117_v18 = vpop.eup %11116 }
 0x6cd   :  { %v6909_v20 = vmul.f32 %v11117_v18, %v6887_v8  ;;  %vm6914_vm7 = vweird.f32 %v11117_v18 }
 0x6ce   :  { %vm6915_vm9 = vmor %vm6913_vm8, %vm6914_vm7 }
 0x6cf   :  { %v6910_v40 = vsub.f32 1.0, %v6909_v20 }
 0x6d0   :  { %v6785_v55 = vpop.f32.mrf.mxu3 }
 0x6d1   :  { %v11119_v61 = vpop.eup %11118  ;;  %v6911_v9 = vmul.f32 %v11117_v18, %v6910_v40 }
 0x6d2   :  { %v6888_v4 = vadd.f32 1.0, %v11119_v61 }
 0x6d3   :  { %v6912_v31 = vadd.f32 %v11117_v18, %v6911_v9 }
 0x6d4   :  { %11120 = vrcp.f32 %v6888_v4  ;;  %v6934_v23 = vand.u32 2147483648, %v6888_v4  ;;  %v6932_v39 = vand.u32 2147483647, %v6888_v4  ;;  %vm6928_vm12 = vweird.f32 %v6888_v4 }
 0x6d5   :  { %v6916_v26 = vsel %vm6915_vm9, %v11117_v18, %v6912_v31 }
 0x6d6   :  { %v6921_v57 = vsel %vm6918_vm10, %v6920_v13, %v6916_v26  ;;  %v6935_v62 = vor.u32 1.1754944e-38, %v6934_v23  ;;  %vm6933_vm14 = vcmp.eq.f32.partialorder %v6932_v39, 8.507059e+37  ;;  %v5590_v39 = vperm.slane %v15293_v52, 6 }
 0x6d7   :  { %6999 = vst [vmem:[#allocation7 + $0x8] sm:$0xff] %v6921_v57 }
 0x6da   :  { %v11121_v27 = vpop.eup %11120 }
 0x6db   :  { %v6924_v14 = vmul.f32 %v11121_v27, %v6888_v4  ;;  %vm6929_vm11 = vweird.f32 %v11121_v27 }
 0x6dc   :  { %vm6930_vm13 = vmor %vm6928_vm12, %vm6929_vm11 }
 0x6dd   :  { %v6925_v1 = vsub.f32 1.0, %v6924_v14 }
 0x6de   :  { %v6744_v24 = vpop.f32.mrf.mxu1 }
 0x6df   :  { %v6926_v28 = vmul.f32 %v11121_v27, %v6925_v1  ;;  %v6745_v29 = vadd.f32 %v6744_v24, %v6732_v59 }
 0x6e1   :  { %v6796_v30 = vpop.f32.mrf.mxu0  ;;  %v6927_v34 = vadd.f32 %v11121_v27, %v6926_v28 }
 0x6e2   :  { %v6692_v21 = vpop.f32.mrf.mxu2 }
 0x6e3   :  { %v6693_v48 = vadd.f32 %v6692_v21, %v6680_v38  ;;  %v6931_v25 = vsel %vm6930_vm13, %v11121_v27, %v6927_v34 }
 0x6e4   :  { %v6936_v36 = vsel %vm6933_vm14, %v6935_v62, %v6931_v25 }
 0x6e5   :  { %v6706_v44 = vadd.f32 %v15301_v32, %v6693_v48  ;;  %7000 = vst [vmem:[#allocation7 + $0x10] sm:$0xff] %v6936_v36 }
 0x6e6   :  { %v6746_v37 = vpop.f32.mrf.mxu1 }
 0x6e7   :  { %v10295_v15 = vmul.f32 -1.442695, %v6706_v44 }
 0x6e8   :  { %v15325_v35 = vpop.f32.mrf.mxu3 }
 0x6e9   :  { %11122 = vpow2.f32 %v10295_v15  ;;  %v6798_v11 = vpop.f32.mrf.mxu0 }
 0x6ea   :  { %v6694_v58 = vpop.f32.mrf.mxu2 }
 0x6ee   :  { %v6809_v32 = vpop.f32.mrf.mxu1 }
 0x6ef   :  { %v11123_v50 = vpop.eup %11122 }
 0x6f0   :  { %v6889_v60 = vadd.f32 1.0, %v11123_v50  ;;  %v6850_v43 = vpop.f32.mrf.mxu3 }
 0x6f1   :  { %v15330_v47 = vpop.f32.mrf.mxu0 }
 0x6f2   :  { %11124 = vrcp.f32 %v6889_v60  ;;  %v6757_v41 = vpop.f32.mrf.mxu2  ;;  %v6949_v8 = vand.u32 2147483648, %v6889_v60  ;;  %v6947_v53 = vand.u32 2147483647, %v6889_v60  ;;  %vm6943_vm1 = vweird.f32 %v6889_v60 }
 0x6f3   :  { %v6758_v51 = vadd.f32 %v6757_v41, %v6745_v29 }
 0x6f4   :  { %v6950_v7 = vor.u32 1.1754944e-38, %v6949_v8  ;;  %vm6948_vm3 = vcmp.eq.f32.partialorder %v6947_v53, 8.507059e+37 }
 0x6f5   :  { %v10296_v63 = vmul.f32 -1.442695, %v6758_v51 }
 0x6f6   :  { %v6811_v5 = vpop.f32.mrf.mxu1 }
 0x6f7   :  { %11126 = vpow2.f32 %v10296_v63 }
 0x6f8   :  { %v11125_v0 = vpop.eup %11124 }
 0x6f9   :  { %v6939_v2 = vmul.f32 %v11125_v0, %v6889_v60  ;;  %v6863_v3 = vpop.f32.mrf.mxu0  ;;  %vm6944_vm15 = vweird.f32 %v11125_v0 }
 0x6fa   :  { %v6759_v6 = vpop.f32.mrf.mxu2  ;;  %vm6945_vm2 = vmor %vm6943_vm1, %vm6944_vm15 }
 0x6fb   :  { %v6940_v49 = vsub.f32 1.0, %v6939_v2 }
 0x6fd   :  { %v11127_v45 = vpop.eup %11126  ;;  %v6941_v19 = vmul.f32 %v11125_v0, %v6940_v49 }
 0x6fe   :  { %v6890_v12 = vadd.f32 1.0, %v11127_v45 }
 0x6ff   :  { %v6942_v17 = vadd.f32 %v11125_v0, %v6941_v19 }
 0x700   :  { %11128 = vrcp.f32 %v6890_v12  ;;  %v6964_v57 = vand.u32 2147483648, %v6890_v12  ;;  %v6962_v14 = vand.u32 2147483647, %v6890_v12  ;;  %vm6958_vm5 = vweird.f32 %v6890_v12 }
 0x701   :  { %v6946_v20 = vsel %vm6945_vm2, %v11125_v0, %v6942_v17 }
 0x702   :  { %v6822_v18 = vpop.f32.mrf.mxu1  ;;  %v6951_v40 = vsel %vm6948_vm3, %v6950_v7, %v6946_v20  ;;  %v6965_v24 = vor.u32 1.1754944e-38, %v6964_v57  ;;  %vm6963_vm7 = vcmp.eq.f32.partialorder %v6962_v14, 8.507059e+37 }
 0x703   :  { %7001 = vst [vmem:[#allocation7 + $0x18] sm:$0xff] %v6951_v40  ;;  %v6823_v48 = vadd.f32 %v6822_v18, %v5590_v39 }
 0x706   :  { %v6770_v22 = vpop.f32.mrf.mxu2  ;;  %v11129_v9 = vpop.eup %11128 }
 0x707   :  { %v6771_v55 = vadd.f32 %v6770_v22, %v5589_v16  ;;  %v6954_v10 = vmul.f32 %v11129_v9, %v6890_v12  ;;  %vm6959_vm4 = vweird.f32 %v11129_v9 }
 0x708   :  { %vm6960_vm6 = vmor %vm6958_vm5, %vm6959_vm4 }
 0x709   :  { %v6784_v61 = vadd.f32 %v15320_v54, %v6771_v55  ;;  %v6955_v13 = vsub.f32 1.0, %v6954_v10 }
 0x70a   :  { %v6824_v31 = vpop.f32.mrf.mxu1 }
 0x70b   :  { %v6797_v4 = vadd.f32 %v6796_v30, %v6784_v61  ;;  %v6956_v27 = vmul.f32 %v11129_v9, %v6955_v13 }
 0x70d   :  { %v6810_v26 = vadd.f32 %v6809_v32, %v6797_v4  ;;  %v6957_v1 = vadd.f32 %v11129_v9, %v6956_v27 }
 0x70e   :  { %v6772_v42 = vpop.f32.mrf.mxu2 }
 0x70f   :  { %v10297_v33 = vmul.f32 -1.442695, %v6810_v26  ;;  %v6961_v38 = vsel %vm6960_vm6, %v11129_v9, %v6957_v1 }
 0x710   :  { %v6966_v54 = vsel %vm6963_vm7, %v6965_v24, %v6961_v38 }
 0x711   :  { %11130 = vpow2.f32 %v10297_v33  ;;  %7002 = vst [vmem:[#allocation7 + $0x20] sm:$0xff] %v6966_v54 }
 0x717   :  { %v11131_v23 = vpop.eup %11130 }
 0x718   :  { %v6891_v28 = vadd.f32 1.0, %v11131_v23 }
 0x71a   :  { %11132 = vrcp.f32 %v6891_v28  ;;  %v6979_v44 = vand.u32 2147483648, %v6891_v28  ;;  %v6977_v15 = vand.u32 2147483647, %v6891_v28  ;;  %vm6973_vm9 = vweird.f32 %v6891_v28 }
 0x71c   :  { %v6980_v11 = vor.u32 1.1754944e-38, %v6979_v44  ;;  %vm6978_vm11 = vcmp.eq.f32.partialorder %v6977_v15, 8.507059e+37 }
 0x720   :  { %v11133_v30 = vpop.eup %11132 }
 0x721   :  { %v6969_v21 = vmul.f32 %v11133_v30, %v6891_v28  ;;  %vm6974_vm8 = vweird.f32 %v11133_v30 }
 0x722   :  { %vm6975_vm10 = vmor %vm6973_vm9, %vm6974_vm8 }
 0x723   :  { %v6970_v34 = vsub.f32 1.0, %v6969_v21 }
 0x725   :  { %v6971_v36 = vmul.f32 %v11133_v30, %v6970_v34 }
 0x726   :  { %v6835_v62 = vpop.f32.mrf.mxu2 }
 0x727   :  { %v6836_v25 = vadd.f32 %v6835_v62, %v6823_v48  ;;  %v6972_v46 = vadd.f32 %v11133_v30, %v6971_v36 }
 0x729   :  { %v6849_v37 = vadd.f32 %v15325_v35, %v6836_v25  ;;  %v6976_v56 = vsel %vm6975_vm10, %v11133_v30, %v6972_v46 }
 0x72a   :  { %v6981_v52 = vsel %vm6978_vm11, %v6980_v11, %v6976_v56 }
 0x72b   :  { %v6862_v58 = vadd.f32 %v15330_v47, %v6849_v37  ;;  %7003 = vst [vmem:[#allocation7 + $0x28] sm:$0xff] %v6981_v52 }
 0x72d   :  { %v10298_v50 = vmul.f32 -1.442695, %v6862_v58 }
 0x72e   :  { %v6837_v59 = vpop.f32.mrf.mxu2 }
 0x72f   :  { %11134 = vpow2.f32 %v10298_v50 }
 0x735   :  { %v11135_v60 = vpop.eup %11134 }
 0x736   :  { %v6892_v32 = vadd.f32 1.0, %v11135_v60 }
 0x738   :  { %11136 = vrcp.f32 %v6892_v32  ;;  %v6994_v35 = vand.u32 2147483648, %v6892_v32  ;;  %v6992_v63 = vand.u32 2147483647, %v6892_v32  ;;  %vm6988_vm13 = vweird.f32 %v6892_v32 }
 0x73a   :  { %v6995_v0 = vor.u32 1.1754944e-38, %v6994_v35  ;;  %vm6993_vm15 = vcmp.eq.f32.partialorder %v6992_v63, 8.507059e+37 }
 0x73e   :  { %v11137_v43 = vpop.eup %11136 }
 0x73f   :  { %v6984_v29 = vmul.f32 %v11137_v43, %v6892_v32  ;;  %vm6989_vm12 = vweird.f32 %v11137_v43 }
 0x740   :  { %vm6990_vm14 = vmor %vm6988_vm13, %vm6989_vm12 }
 0x741   :  { %v6985_v41 = vsub.f32 1.0, %v6984_v29 }
 0x743   :  { %v6986_v51 = vmul.f32 %v11137_v43, %v6985_v41 }
 0x745   :  { %v6987_v47 = vadd.f32 %v11137_v43, %v6986_v51 }
 0x747   :  { %v6991_v5 = vsel %vm6990_vm14, %v11137_v43, %v6987_v47 }
 0x748   :  { %v6996_v2 = vsel %vm6993_vm15, %v6995_v0, %v6991_v5 }
 0x749   :  { %7004 = vst.msk [vmem:[#allocation7 + $0x30] sm:$0xff] %vm1297_vm0, %v6996_v2 }
 0x74a   :  { %7021 = dma.vmem_to_hbm [thread:$0]  %s7017_s20, 896, %s7019_s27, [#allocation4]  }
 0x74b   :  { %11262 = dma.done.wait [#allocation4], 896  }
 0x74c   :  { %11263 = vsyncadd [#allocation4], 4294966400 }
 0x74d   :  { %11264 = dma.done.wait [#allocation9], 256  }
 0x74e   :  { %11265 = vsyncadd [#allocation9], 4294967040 }
 0x74f   :  { %7056 = vsyncpa [#allocation3], 1 }
 0x750   :  { %7057 = vsyncpa [#allocation6], 1 }
 0x751   :  { %7058 = vsyncpa [#allocation4], 1 }
 0x752   :  { %7059 = vsyncpa [#allocation9], 1 }

</bundles_post_ra>
